<compile_context>
chip_gen: v5e
topology: v5e:2x2
jax: 0.10.0
libtpu: 0.0.40
codegen_flags: <defaults>
</compile_context>

<pallas_src>
import functools

import jax
import jax.numpy as jnp
from jax.experimental import pallas as pl
from jax.experimental.pallas import tpu as pltpu


def find_largest_divisor(n, cap=32):
    for d in range(min(n, cap), 0, -1):
        if n % d == 0:
            return d
    return 1


# ----------------------------------------------------------------------------
# Pallas kernels
# ----------------------------------------------------------------------------
def _convT_gn_relu_kernel(a_ref, w_ref, fold_ref, spread_ref, gamma_ref, beta_ref,
                          o_ref, *, eps):
    """Per-sample fused (conv-transpose as matmul) + GroupNorm + ReLU.

    a_ref:      (M, K)  bf16 patches / latent row for one sample
    w_ref:      (K, L)  bf16 sub-pixel (or head) weight, L = reps*C lanes
    fold_ref:   (L, C)  f32  sums the replicated lanes into per-channel sums
    spread_ref: (C, L)  f32  group membership * (1/N), broadcast back to lanes
    gamma/beta: (1, L)  f32  affine params pre-expanded to the lane layout
    """
    acc = jnp.dot(a_ref[...], w_ref[...], preferred_element_type=jnp.float32)   # (M, L)
    s = jnp.sum(acc, axis=0, keepdims=True)                                     # (1, L)
    sq = jnp.sum(acc * acc, axis=0, keepdims=True)                              # (1, L)
    ch_s = jnp.dot(s, fold_ref[...], preferred_element_type=jnp.float32)        # (1, C)
    ch_sq = jnp.dot(sq, fold_ref[...], preferred_element_type=jnp.float32)      # (1, C)
    mean = jnp.dot(ch_s, spread_ref[...], preferred_element_type=jnp.float32)   # (1, L)
    ex2 = jnp.dot(ch_sq, spread_ref[...], preferred_element_type=jnp.float32)   # (1, L)
    var = jnp.maximum(ex2 - mean * mean, 0.0)        # clamp: E[x^2]-m^2 cancellation
    y = (acc - mean) * jax.lax.rsqrt(var + eps)
    y = y * gamma_ref[...] + beta_ref[...]
    o_ref[...] = jnp.maximum(y, 0.0).astype(o_ref.dtype)


def _convT_tanh_kernel(a_ref, w_ref, o_ref):
    """Final ConvTranspose2d (sub-pixel matmul) + Tanh."""
    acc = jnp.dot(a_ref[...], w_ref[...], preferred_element_type=jnp.float32)
    o_ref[...] = jnp.tanh(acc).astype(o_ref.dtype)


# ----------------------------------------------------------------------------
# pallas_call wrappers
# ----------------------------------------------------------------------------
def _fused_layer_call(a_bmk, w_kl, fold, spread, gamma_l, beta_l, eps=1e-5):
    B, M, K = a_bmk.shape
    L = w_kl.shape[1]
    C = fold.shape[1]
    kernel = functools.partial(_convT_gn_relu_kernel, eps=eps)
    return pl.pallas_call(
        kernel,
        out_shape=jax.ShapeDtypeStruct((B, M, L), jnp.float32),
        grid_spec=pltpu.PrefetchScalarGridSpec(
            num_scalar_prefetch=0,
            grid=(B,),
            in_specs=[
                pl.BlockSpec((None, M, K), lambda b: (b, 0, 0)),
                pl.BlockSpec((K, L), lambda b: (0, 0)),
                pl.BlockSpec((L, C), lambda b: (0, 0)),
                pl.BlockSpec((C, L), lambda b: (0, 0)),
                pl.BlockSpec((1, L), lambda b: (0, 0)),
                pl.BlockSpec((1, L), lambda b: (0, 0)),
            ],
            out_specs=pl.BlockSpec((None, M, L), lambda b: (b, 0, 0)),
        ),
        compiler_params=pltpu.CompilerParams(dimension_semantics=("parallel",)),
    )(a_bmk, w_kl, fold, spread, gamma_l, beta_l)


def _final_layer_call(a_bmk, w_kl):
    B, M, K = a_bmk.shape
    L = w_kl.shape[1]
    return pl.pallas_call(
        _convT_tanh_kernel,
        out_shape=jax.ShapeDtypeStruct((B, M, L), jnp.float32),
        grid_spec=pltpu.PrefetchScalarGridSpec(
            num_scalar_prefetch=0,
            grid=(B,),
            in_specs=[pl.BlockSpec((None, M, K), lambda b: (b, 0, 0)),
                      pl.BlockSpec((K, L), lambda b: (0, 0))],
            out_specs=pl.BlockSpec((None, M, L), lambda b: (b, 0, 0)),
        ),
        compiler_params=pltpu.CompilerParams(dimension_semantics=("parallel",)),
    )(a_bmk, w_kl)


# ----------------------------------------------------------------------------
# Layer glue (im2col, sub-pixel weight packing, pixel shuffle, GN aux matrices)
# ----------------------------------------------------------------------------
def _patches3x3(x_nhwc_bf16):
    """3x3 im2col of the zero-padded input; feature order (py, px, ci)."""
    B, H, W, C = x_nhwc_bf16.shape
    xp = jnp.pad(x_nhwc_bf16, ((0, 0), (1, 1), (1, 1), (0, 0)))
    cols = [xp[:, py:py + H, px:px + W, :] for py in range(3) for px in range(3)]
    return jnp.concatenate(cols, axis=-1).reshape(B, H * W, 9 * C)


def _build_subpixel_weight(w_oihw):
    """ConvTranspose2d weight (cin, cout, 4, 4) -> (9*cin, 4*cout) matrix.

    Column group q = 2*r + s is the output sub-position (r, s); the tap at 3x3
    patch offset (py, px) maps to kernel index (3 - r - 2*(py-r), 3 - s - 2*(px-s))
    when (py-r), (px-s) in {0, 1}, else zero.
    """
    cin, cout = w_oihw.shape[0], w_oihw.shape[1]
    zero = jnp.zeros((cin, cout), w_oihw.dtype)
    row_blocks = []
    for py in range(3):
        for px in range(3):
            qcols = []
            for r in range(2):
                for s in range(2):
                    dy, dx = py - r, px - s
                    if dy in (0, 1) and dx in (0, 1):
                        ky, kx = 3 - r - 2 * dy, 3 - s - 2 * dx
                        qcols.append(w_oihw[:, :, ky, kx])
                    else:
                        qcols.append(zero)
            row_blocks.append(jnp.concatenate(qcols, axis=1))       # (cin, 4*cout)
    return jnp.concatenate(row_blocks, axis=0)                      # (9*cin, 4*cout)


def _pixel_shuffle(y_bml, H, W, cout):
    """(B, H*W, 4*cout) with lane = (2r+s)*cout + c  ->  (B, 2H, 2W, cout)."""
    B = y_bml.shape[0]
    y = y_bml.reshape(B, H, W, 2, 2, cout)
    return y.transpose(0, 1, 3, 2, 4, 5).reshape(B, 2 * H, 2 * W, cout)


def _gn_aux(channels, num_groups, reps, out_spatial):
    """fold (reps*C, C) and spread (C, reps*C) matrices (1/N folded into spread)."""
    cpg = channels // num_groups
    gidx = jnp.arange(channels) // cpg
    member = (gidx[:, None] == gidx[None, :]).astype(jnp.float32)
    inv_n = 1.0 / float(out_spatial * cpg)
    fold = jnp.tile(jnp.eye(channels, dtype=jnp.float32), (reps, 1))
    spread = jnp.tile(member * inv_n, (1, reps))
    return fold, spread


def head_convT_gn_relu(z_bn, w_oihw, gamma, beta, num_groups, eps=1e-5):
    """ConvTranspose2d(nz->C0, 4, 1, 0) on a 1x1 input + GroupNorm + ReLU."""
    B, nz = z_bn.shape
    C0 = w_oihw.shape[1]
    a = z_bn.reshape(B, 1, nz).astype(jnp.bfloat16)
    # lane layout: (ky*4 + kx) * C0 + co
    w1 = jnp.transpose(w_oihw, (0, 2, 3, 1)).reshape(nz, 16 * C0).astype(jnp.bfloat16)
    fold, spread = _gn_aux(C0, num_groups, reps=16, out_spatial=16)
    gamma_l = jnp.tile(gamma.astype(jnp.float32), 16).reshape(1, 16 * C0)
    beta_l = jnp.tile(beta.astype(jnp.float32), 16).reshape(1, 16 * C0)
    y = _fused_layer_call(a, w1, fold, spread, gamma_l, beta_l, eps)   # (B, 1, 16*C0)
    return y.reshape(B, 4, 4, C0)                                      # NHWC


def upconv_gn_relu(x_nhwc, w_oihw, gamma, beta, num_groups, eps=1e-5):
    """ConvTranspose2d(cin->cout, 4, 2, 1) + GroupNorm + ReLU (fused kernel)."""
    B, H, W, cin = x_nhwc.shape
    cout = w_oihw.shape[1]
    a = _patches3x3(x_nhwc.astype(jnp.bfloat16))                       # (B, HW, 9*cin)
    w_all = _build_subpixel_weight(w_oihw).astype(jnp.bfloat16)        # (9*cin, 4*cout)
    fold, spread = _gn_aux(cout, num_groups, reps=4, out_spatial=4 * H * W)
    gamma_l = jnp.tile(gamma.astype(jnp.float32), 4).reshape(1, 4 * cout)
    beta_l = jnp.tile(beta.astype(jnp.float32), 4).reshape(1, 4 * cout)
    y = _fused_layer_call(a, w_all, fold, spread, gamma_l, beta_l, eps)  # (B, HW, 4*cout)
    return _pixel_shuffle(y, H, W, cout)                               # (B, 2H, 2W, cout)


def upconv_tanh(x_nhwc, w_oihw):
    """Final ConvTranspose2d(cin->nc, 4, 2, 1) + Tanh."""
    B, H, W, cin = x_nhwc.shape
    cout = w_oihw.shape[1]
    a = _patches3x3(x_nhwc.astype(jnp.bfloat16))
    w_all = _build_subpixel_weight(w_oihw).astype(jnp.bfloat16)
    y = _final_layer_call(a, w_all)                                    # (B, HW, 4*nc)
    return _pixel_shuffle(y, H, W, cout)


# ----------------------------------------------------------------------------
# Generator forward (Pallas) and plain-JAX reference
# ----------------------------------------------------------------------------
def init_params(key, nz, ngf, nc, n_layers=4):
    dims = [ngf * m for m in [8, 4, 2, 1][:n_layers]]
    groups_list = [find_largest_divisor(d, 32) for d in dims]
    chans = [nz] + dims
    keys = jax.random.split(key, 3 * n_layers + 1)
    params = {}
    ki = 0
    for i in range(n_layers):
        params[f"w{i}"] = 0.02 * jax.random.normal(keys[ki], (chans[i], chans[i + 1], 4, 4),
                                                   jnp.float32); ki += 1
        params[f"g{i}"] = 1.0 + 0.02 * jax.random.normal(keys[ki], (dims[i],), jnp.float32); ki += 1
        params[f"b{i}"] = 0.02 * jax.random.normal(keys[ki], (dims[i],), jnp.float32); ki += 1
    params["w_out"] = 0.02 * jax.random.normal(keys[ki], (dims[-1], nc, 4, 4), jnp.float32)
    return params, dims, groups_list


def generator_forward(z_nchw, params, dims=None, groups_list=None):
    B = z_nchw.shape[0]
    z = z_nchw.reshape(B, -1).astype(jnp.float32)                      # (B, nz)
    x = head_convT_gn_relu(z, params["w0"], params["g0"], params["b0"], groups_list[0])
    for i in range(1, len(dims)):
        x = upconv_gn_relu(x, params[f"w{i}"], params[f"g{i}"], params[f"b{i}"], groups_list[i])
    x = upconv_tanh(x, params["w_out"])
    return jnp.transpose(x, (0, 3, 1, 2))                              # NHWC -> NCHW


def _convT_ref(x_nhwc, w_oihw, stride, pad):
    k = w_oihw.shape[2]
    w_dir = jnp.transpose(w_oihw[:, :, ::-1, ::-1], (2, 3, 0, 1))      # flipped, HWIO
    return jax.lax.conv_general_dilated(
        x_nhwc, w_dir, window_strides=(1, 1),
        padding=[(k - 1 - pad, k - 1 - pad)] * 2,
        lhs_dilation=(stride, stride),
        dimension_numbers=("NHWC", "HWIO", "NHWC"))


def _gn_ref(x_nhwc, gamma, beta, G, eps=1e-5):
    B, H, W, C = x_nhwc.shape
    xg = x_nhwc.reshape(B, H * W, G, C // G)
    mean = xg.mean(axis=(1, 3), keepdims=True)
    var = ((xg - mean) ** 2).mean(axis=(1, 3), keepdims=True)
    y = ((xg - mean) / jnp.sqrt(var + eps)).reshape(B, H, W, C)
    return y * gamma + beta


def generator_reference(z_nchw, params, dims, groups_list):
    x = jnp.transpose(z_nchw, (0, 2, 3, 1)).astype(jnp.float32)        # (B, 1, 1, nz)
    x = jax.nn.relu(_gn_ref(_convT_ref(x, params["w0"], 1, 0),
                            params["g0"], params["b0"], groups_list[0]))
    for i in range(1, len(dims)):
        x = jax.nn.relu(_gn_ref(_convT_ref(x, params[f"w{i}"], 2, 1),
                                params[f"g{i}"], params[f"b{i}"], groups_list[i]))
    x = jnp.tanh(_convT_ref(x, params["w_out"], 2, 1))
    return jnp.transpose(x, (0, 3, 1, 2))


if __name__ == "__main__":
    nz, ngf, nc = 16, 8, 3
    B = 2                                   # spatial: 1 -> 4 -> 8 -> 16 -> 32 -> 64
    key = jax.random.PRNGKey(0)
    kz, kp = jax.random.split(key)
    z = jax.random.normal(kz, (B, nz, 1, 1), jnp.float32)              # NCHW latent
    params, dims, groups_list = init_params(kp, nz, ngf, nc, n_layers=4)

    fwd = jax.jit(functools.partial(generator_forward, dims=dims, groups_list=groups_list))
    out = jax.block_until_ready(fwd(z, params))
    ref = jax.block_until_ready(generator_reference(z, params, dims, groups_list))

    assert out.shape == (B, nc, 64, 64), out.shape
    # Tolerance sized for bf16 MXU operands vs a float32 reference across 5 layers;
    # structural errors (wrong tap / group mapping) would be orders of magnitude larger.
    max_err = float(jnp.max(jnp.abs(out - ref)))
    assert jnp.allclose(out, ref, rtol=5e-2, atol=5e-2), max_err
    print("KERNEL_OK")
</pallas_src>

<mosaic_0001>
module attributes {stable_mosaic.version = 11 : i64} {
  func.func @_convT_gn_relu_kernel(%arg0: i32, %arg1: memref<1x1x16xbf16, #tpu.memory_space<vmem>>, %arg2: memref<16x1024xbf16, #tpu.memory_space<vmem>>, %arg3: memref<1024x64xf32, #tpu.memory_space<vmem>>, %arg4: memref<64x1024xf32, #tpu.memory_space<vmem>>, %arg5: memref<1x1024xf32, #tpu.memory_space<vmem>>, %arg6: memref<1x1024xf32, #tpu.memory_space<vmem>>, %arg7: memref<1x1x1024xf32, #tpu.memory_space<vmem>>) attributes {dimension_semantics = [#tpu.dimension_semantics<parallel>], iteration_bounds = array<i64: 2>, scalar_prefetch = 0 : i64, scratch_operands = 0 : i64, tpu.core_type = #tpu.core_type<tc>, window_params = [{transform_indices = @transform_0, window_bounds = array<i64: 1, 1, 16>}, {pipeline_mode = #tpu.pipeline_mode<synchronous>, transform_indices = @transform_1, window_bounds = array<i64: 16, 1024>}, {pipeline_mode = #tpu.pipeline_mode<synchronous>, transform_indices = @transform_2, window_bounds = array<i64: 1024, 64>}, {pipeline_mode = #tpu.pipeline_mode<synchronous>, transform_indices = @transform_3, window_bounds = array<i64: 64, 1024>}, {pipeline_mode = #tpu.pipeline_mode<synchronous>, transform_indices = @transform_4, window_bounds = array<i64: 1, 1024>}, {pipeline_mode = #tpu.pipeline_mode<synchronous>, transform_indices = @transform_5, window_bounds = array<i64: 1, 1024>}, {transform_indices = @transform_6, window_bounds = array<i64: 1, 1, 1024>}]} {
    %c0 = arith.constant 0 : index
    %c0_0 = arith.constant 0 : index
    %c0_1 = arith.constant 0 : index
    %0 = vector.load %arg1[%c0, %c0_0, %c0_1] : memref<1x1x16xbf16, #tpu.memory_space<vmem>>, vector<1x1x16xbf16>
    %1 = vector.shape_cast %0 : vector<1x1x16xbf16> to vector<1x16xbf16>
    %c0_2 = arith.constant 0 : index
    %c0_3 = arith.constant 0 : index
    %2 = vector.load %arg2[%c0_2, %c0_3] : memref<16x1024xbf16, #tpu.memory_space<vmem>>, vector<16x1024xbf16>
    %cst = arith.constant dense<0.000000e+00> : vector<1x1024xf32>
    %3 = tpu.matmul %1, %2, %cst {dimension_numbers = #tpu.dot_dimension_numbers<[1], [0], [0], [1], [0, 0, 1, 1], [], []>} : vector<1x16xbf16>, vector<16x1024xbf16>, vector<1x1024xf32> -> vector<1x1024xf32>
    %cst_4 = arith.constant dense<0.000000e+00> : vector<1024xf32>
    %4 = vector.multi_reduction <add>, %3, %cst_4 [0] : vector<1x1024xf32> to vector<1024xf32>
    %5 = vector.shape_cast %4 : vector<1024xf32> to vector<1x1024xf32>
    %6 = arith.mulf %3, %3 : vector<1x1024xf32>
    %cst_5 = arith.constant dense<0.000000e+00> : vector<1024xf32>
    %7 = vector.multi_reduction <add>, %6, %cst_5 [0] : vector<1x1024xf32> to vector<1024xf32>
    %8 = vector.shape_cast %7 : vector<1024xf32> to vector<1x1024xf32>
    %c0_6 = arith.constant 0 : index
    %c0_7 = arith.constant 0 : index
    %9 = vector.load %arg3[%c0_6, %c0_7] : memref<1024x64xf32, #tpu.memory_space<vmem>>, vector<1024x64xf32>
    %cst_8 = arith.constant dense<0.000000e+00> : vector<1x64xf32>
    %10 = tpu.matmul %5, %9, %cst_8 {dimension_numbers = #tpu.dot_dimension_numbers<[1], [0], [0], [1], [0, 0, 1, 1], [], []>} : vector<1x1024xf32>, vector<1024x64xf32>, vector<1x64xf32> -> vector<1x64xf32>
    %c0_9 = arith.constant 0 : index
    %c0_10 = arith.constant 0 : index
    %11 = vector.load %arg3[%c0_9, %c0_10] : memref<1024x64xf32, #tpu.memory_space<vmem>>, vector<1024x64xf32>
    %cst_11 = arith.constant dense<0.000000e+00> : vector<1x64xf32>
    %12 = tpu.matmul %8, %11, %cst_11 {dimension_numbers = #tpu.dot_dimension_numbers<[1], [0], [0], [1], [0, 0, 1, 1], [], []>} : vector<1x1024xf32>, vector<1024x64xf32>, vector<1x64xf32> -> vector<1x64xf32>
    %c0_12 = arith.constant 0 : index
    %c0_13 = arith.constant 0 : index
    %13 = vector.load %arg4[%c0_12, %c0_13] : memref<64x1024xf32, #tpu.memory_space<vmem>>, vector<64x1024xf32>
    %cst_14 = arith.constant dense<0.000000e+00> : vector<1x1024xf32>
    %14 = tpu.matmul %10, %13, %cst_14 {dimension_numbers = #tpu.dot_dimension_numbers<[1], [0], [0], [1], [0, 0, 1, 1], [], []>} : vector<1x64xf32>, vector<64x1024xf32>, vector<1x1024xf32> -> vector<1x1024xf32>
    %c0_15 = arith.constant 0 : index
    %c0_16 = arith.constant 0 : index
    %15 = vector.load %arg4[%c0_15, %c0_16] : memref<64x1024xf32, #tpu.memory_space<vmem>>, vector<64x1024xf32>
    %cst_17 = arith.constant dense<0.000000e+00> : vector<1x1024xf32>
    %16 = tpu.matmul %12, %15, %cst_17 {dimension_numbers = #tpu.dot_dimension_numbers<[1], [0], [0], [1], [0, 0, 1, 1], [], []>} : vector<1x64xf32>, vector<64x1024xf32>, vector<1x1024xf32> -> vector<1x1024xf32>
    %17 = arith.mulf %14, %14 : vector<1x1024xf32>
    %18 = arith.subf %16, %17 : vector<1x1024xf32>
    %cst_18 = arith.constant 0.000000e+00 : f32
    %19 = vector.broadcast %cst_18 : f32 to vector<1x1024xf32>
    %20 = arith.maximumf %18, %19 : vector<1x1024xf32>
    %21 = arith.subf %3, %14 : vector<1x1024xf32>
    %cst_19 = arith.constant 9.99999974E-6 : f32
    %22 = vector.broadcast %cst_19 : f32 to vector<1x1024xf32>
    %23 = arith.addf %20, %22 : vector<1x1024xf32>
    %24 = math.rsqrt %23 : vector<1x1024xf32>
    %25 = arith.mulf %21, %24 : vector<1x1024xf32>
    %c0_20 = arith.constant 0 : index
    %c0_21 = arith.constant 0 : index
    %26 = vector.load %arg5[%c0_20, %c0_21] : memref<1x1024xf32, #tpu.memory_space<vmem>>, vector<1x1024xf32>
    %27 = arith.mulf %25, %26 : vector<1x1024xf32>
    %c0_22 = arith.constant 0 : index
    %c0_23 = arith.constant 0 : index
    %28 = vector.load %arg6[%c0_22, %c0_23] : memref<1x1024xf32, #tpu.memory_space<vmem>>, vector<1x1024xf32>
    %29 = arith.addf %27, %28 : vector<1x1024xf32>
    %cst_24 = arith.constant 0.000000e+00 : f32
    %30 = vector.broadcast %cst_24 : f32 to vector<1x1024xf32>
    %31 = arith.maximumf %29, %30 : vector<1x1024xf32>
    %c0_25 = arith.constant 0 : index
    %c0_26 = arith.constant 0 : index
    %c0_27 = arith.constant 0 : index
    %32 = vector.load %arg7[%c0_25, %c0_26, %c0_27] : memref<1x1x1024xf32, #tpu.memory_space<vmem>>, vector<1x1x1024xf32>
    %33 = vector.shape_cast %32 : vector<1x1x1024xf32> to vector<1x1024xf32>
    %34 = vector.shape_cast %31 : vector<1x1024xf32> to vector<1x1x1024xf32>
    tpu.vector_store %arg7[%c0_25, %c0_26, %c0_27], %34 {strides = array<i32>} : memref<1x1x1024xf32, #tpu.memory_space<vmem>>, vector<1x1x1024xf32>,
    return
  }
  func.func @transform_0(%arg0: i32) -> (i32, i32, i32) {
    %c0_i32 = arith.constant 0 : i32
    %c0_i32_0 = arith.constant 0 : i32
    %c0_i32_1 = arith.constant 0 : i32
    return %arg0, %c0_i32, %c0_i32_0 : i32, i32, i32
  }
  func.func @transform_1(%arg0: i32) -> (i32, i32) {
    %c0_i32 = arith.constant 0 : i32
    %c0_i32_0 = arith.constant 0 : i32
    %c0_i32_1 = arith.constant 0 : i32
    return %c0_i32, %c0_i32_0 : i32, i32
  }
  func.func @transform_2(%arg0: i32) -> (i32, i32) {
    %c0_i32 = arith.constant 0 : i32
    %c0_i32_0 = arith.constant 0 : i32
    %c0_i32_1 = arith.constant 0 : i32
    return %c0_i32, %c0_i32_0 : i32, i32
  }
  func.func @transform_3(%arg0: i32) -> (i32, i32) {
    %c0_i32 = arith.constant 0 : i32
    %c0_i32_0 = arith.constant 0 : i32
    %c0_i32_1 = arith.constant 0 : i32
    return %c0_i32, %c0_i32_0 : i32, i32
  }
  func.func @transform_4(%arg0: i32) -> (i32, i32) {
    %c0_i32 = arith.constant 0 : i32
    %c0_i32_0 = arith.constant 0 : i32
    %c0_i32_1 = arith.constant 0 : i32
    return %c0_i32, %c0_i32_0 : i32, i32
  }
  func.func @transform_5(%arg0: i32) -> (i32, i32) {
    %c0_i32 = arith.constant 0 : i32
    %c0_i32_0 = arith.constant 0 : i32
    %c0_i32_1 = arith.constant 0 : i32
    return %c0_i32, %c0_i32_0 : i32, i32
  }
  func.func @transform_6(%arg0: i32) -> (i32, i32, i32) {
    %c0_i32 = arith.constant 0 : i32
    %c0_i32_0 = arith.constant 0 : i32
    %c0_i32_1 = arith.constant 0 : i32
    return %arg0, %c0_i32, %c0_i32_0 : i32, i32, i32
  }
}

module attributes {stable_mosaic.version = 11 : i64} {
  func.func @_convT_gn_relu_kernel(%arg0: i32, %arg1: memref<1x16x576xbf16, #tpu.memory_space<vmem>>, %arg2: memref<576x128xbf16, #tpu.memory_space<vmem>>, %arg3: memref<128x32xf32, #tpu.memory_space<vmem>>, %arg4: memref<32x128xf32, #tpu.memory_space<vmem>>, %arg5: memref<1x128xf32, #tpu.memory_space<vmem>>, %arg6: memref<1x128xf32, #tpu.memory_space<vmem>>, %arg7: memref<1x16x128xf32, #tpu.memory_space<vmem>>) attributes {dimension_semantics = [#tpu.dimension_semantics<parallel>], iteration_bounds = array<i64: 2>, scalar_prefetch = 0 : i64, scratch_operands = 0 : i64, tpu.core_type = #tpu.core_type<tc>, window_params = [{transform_indices = @transform_0, window_bounds = array<i64: 1, 16, 576>}, {pipeline_mode = #tpu.pipeline_mode<synchronous>, transform_indices = @transform_1, window_bounds = array<i64: 576, 128>}, {pipeline_mode = #tpu.pipeline_mode<synchronous>, transform_indices = @transform_2, window_bounds = array<i64: 128, 32>}, {pipeline_mode = #tpu.pipeline_mode<synchronous>, transform_indices = @transform_3, window_bounds = array<i64: 32, 128>}, {pipeline_mode = #tpu.pipeline_mode<synchronous>, transform_indices = @transform_4, window_bounds = array<i64: 1, 128>}, {pipeline_mode = #tpu.pipeline_mode<synchronous>, transform_indices = @transform_5, window_bounds = array<i64: 1, 128>}, {transform_indices = @transform_6, window_bounds = array<i64: 1, 16, 128>}]} {
    %c0 = arith.constant 0 : index
    %c0_0 = arith.constant 0 : index
    %c0_1 = arith.constant 0 : index
    %0 = vector.load %arg1[%c0, %c0_0, %c0_1] : memref<1x16x576xbf16, #tpu.memory_space<vmem>>, vector<1x16x576xbf16>
    %1 = vector.shape_cast %0 : vector<1x16x576xbf16> to vector<16x576xbf16>
    %c0_2 = arith.constant 0 : index
    %c0_3 = arith.constant 0 : index
    %2 = vector.load %arg2[%c0_2, %c0_3] : memref<576x128xbf16, #tpu.memory_space<vmem>>, vector<576x128xbf16>
    %cst = arith.constant dense<0.000000e+00> : vector<16x128xf32>
    %3 = tpu.matmul %1, %2, %cst {dimension_numbers = #tpu.dot_dimension_numbers<[1], [0], [0], [1], [0, 0, 1, 1], [], []>} : vector<16x576xbf16>, vector<576x128xbf16>, vector<16x128xf32> -> vector<16x128xf32>
    %cst_4 = arith.constant dense<0.000000e+00> : vector<128xf32>
    %4 = vector.multi_reduction <add>, %3, %cst_4 [0] : vector<16x128xf32> to vector<128xf32>
    %5 = vector.shape_cast %4 : vector<128xf32> to vector<1x128xf32>
    %6 = arith.mulf %3, %3 : vector<16x128xf32>
    %cst_5 = arith.constant dense<0.000000e+00> : vector<128xf32>
    %7 = vector.multi_reduction <add>, %6, %cst_5 [0] : vector<16x128xf32> to vector<128xf32>
    %8 = vector.shape_cast %7 : vector<128xf32> to vector<1x128xf32>
    %c0_6 = arith.constant 0 : index
    %c0_7 = arith.constant 0 : index
    %9 = vector.load %arg3[%c0_6, %c0_7] : memref<128x32xf32, #tpu.memory_space<vmem>>, vector<128x32xf32>
    %cst_8 = arith.constant dense<0.000000e+00> : vector<1x32xf32>
    %10 = tpu.matmul %5, %9, %cst_8 {dimension_numbers = #tpu.dot_dimension_numbers<[1], [0], [0], [1], [0, 0, 1, 1], [], []>} : vector<1x128xf32>, vector<128x32xf32>, vector<1x32xf32> -> vector<1x32xf32>
    %c0_9 = arith.constant 0 : index
    %c0_10 = arith.constant 0 : index
    %11 = vector.load %arg3[%c0_9, %c0_10] : memref<128x32xf32, #tpu.memory_space<vmem>>, vector<128x32xf32>
    %cst_11 = arith.constant dense<0.000000e+00> : vector<1x32xf32>
    %12 = tpu.matmul %8, %11, %cst_11 {dimension_numbers = #tpu.dot_dimension_numbers<[1], [0], [0], [1], [0, 0, 1, 1], [], []>} : vector<1x128xf32>, vector<128x32xf32>, vector<1x32xf32> -> vector<1x32xf32>
    %c0_12 = arith.constant 0 : index
    %c0_13 = arith.constant 0 : index
    %13 = vector.load %arg4[%c0_12, %c0_13] : memref<32x128xf32, #tpu.memory_space<vmem>>, vector<32x128xf32>
    %cst_14 = arith.constant dense<0.000000e+00> : vector<1x128xf32>
    %14 = tpu.matmul %10, %13, %cst_14 {dimension_numbers = #tpu.dot_dimension_numbers<[1], [0], [0], [1], [0, 0, 1, 1], [], []>} : vector<1x32xf32>, vector<32x128xf32>, vector<1x128xf32> -> vector<1x128xf32>
    %c0_15 = arith.constant 0 : index
    %c0_16 = arith.constant 0 : index
    %15 = vector.load %arg4[%c0_15, %c0_16] : memref<32x128xf32, #tpu.memory_space<vmem>>, vector<32x128xf32>
    %cst_17 = arith.constant dense<0.000000e+00> : vector<1x128xf32>
    %16 = tpu.matmul %12, %15, %cst_17 {dimension_numbers = #tpu.dot_dimension_numbers<[1], [0], [0], [1], [0, 0, 1, 1], [], []>} : vector<1x32xf32>, vector<32x128xf32>, vector<1x128xf32> -> vector<1x128xf32>
    %17 = arith.mulf %14, %14 : vector<1x128xf32>
    %18 = arith.subf %16, %17 : vector<1x128xf32>
    %cst_18 = arith.constant 0.000000e+00 : f32
    %19 = vector.broadcast %cst_18 : f32 to vector<1x128xf32>
    %20 = arith.maximumf %18, %19 : vector<1x128xf32>
    %21 = vector.broadcast %14 : vector<1x128xf32> to vector<16x128xf32>
    %22 = arith.subf %3, %21 : vector<16x128xf32>
    %cst_19 = arith.constant 9.99999974E-6 : f32
    %23 = vector.broadcast %cst_19 : f32 to vector<1x128xf32>
    %24 = arith.addf %20, %23 : vector<1x128xf32>
    %25 = math.rsqrt %24 : vector<1x128xf32>
    %26 = vector.broadcast %25 : vector<1x128xf32> to vector<16x128xf32>
    %27 = arith.mulf %22, %26 : vector<16x128xf32>
    %c0_20 = arith.constant 0 : index
    %c0_21 = arith.constant 0 : index
    %28 = vector.load %arg5[%c0_20, %c0_21] : memref<1x128xf32, #tpu.memory_space<vmem>>, vector<1x128xf32>
    %29 = vector.broadcast %28 : vector<1x128xf32> to vector<16x128xf32>
    %30 = arith.mulf %27, %29 : vector<16x128xf32>
    %c0_22 = arith.constant 0 : index
    %c0_23 = arith.constant 0 : index
    %31 = vector.load %arg6[%c0_22, %c0_23] : memref<1x128xf32, #tpu.memory_space<vmem>>, vector<1x128xf32>
    %32 = vector.broadcast %31 : vector<1x128xf32> to vector<16x128xf32>
    %33 = arith.addf %30, %32 : vector<16x128xf32>
    %cst_24 = arith.constant 0.000000e+00 : f32
    %34 = vector.broadcast %cst_24 : f32 to vector<16x128xf32>
    %35 = arith.maximumf %33, %34 : vector<16x128xf32>
    %c0_25 = arith.constant 0 : index
    %c0_26 = arith.constant 0 : index
    %c0_27 = arith.constant 0 : index
    %36 = vector.load %arg7[%c0_25, %c0_26, %c0_27] : memref<1x16x128xf32, #tpu.memory_space<vmem>>, vector<1x16x128xf32>
    %37 = vector.shape_cast %36 : vector<1x16x128xf32> to vector<16x128xf32>
    %38 = vector.shape_cast %35 : vector<16x128xf32> to vector<1x16x128xf32>
    tpu.vector_store %arg7[%c0_25, %c0_26, %c0_27], %38 {strides = array<i32>} : memref<1x16x128xf32, #tpu.memory_space<vmem>>, vector<1x16x128xf32>,
    return
  }
  func.func @transform_0(%arg0: i32) -> (i32, i32, i32) {
    %c0_i32 = arith.constant 0 : i32
    %c0_i32_0 = arith.constant 0 : i32
    %c0_i32_1 = arith.constant 0 : i32
    return %arg0, %c0_i32, %c0_i32_0 : i32, i32, i32
  }
  func.func @transform_1(%arg0: i32) -> (i32, i32) {
    %c0_i32 = arith.constant 0 : i32
    %c0_i32_0 = arith.constant 0 : i32
    %c0_i32_1 = arith.constant 0 : i32
    return %c0_i32, %c0_i32_0 : i32, i32
  }
  func.func @transform_2(%arg0: i32) -> (i32, i32) {
    %c0_i32 = arith.constant 0 : i32
    %c0_i32_0 = arith.constant 0 : i32
    %c0_i32_1 = arith.constant 0 : i32
    return %c0_i32, %c0_i32_0 : i32, i32
  }
  func.func @transform_3(%arg0: i32) -> (i32, i32) {
    %c0_i32 = arith.constant 0 : i32
    %c0_i32_0 = arith.constant 0 : i32
    %c0_i32_1 = arith.constant 0 : i32
    return %c0_i32, %c0_i32_0 : i32, i32
  }
  func.func @transform_4(%arg0: i32) -> (i32, i32) {
    %c0_i32 = arith.constant 0 : i32
    %c0_i32_0 = arith.constant 0 : i32
    %c0_i32_1 = arith.constant 0 : i32
    return %c0_i32, %c0_i32_0 : i32, i32
  }
  func.func @transform_5(%arg0: i32) -> (i32, i32) {
    %c0_i32 = arith.constant 0 : i32
    %c0_i32_0 = arith.constant 0 : i32
    %c0_i32_1 = arith.constant 0 : i32
    return %c0_i32, %c0_i32_0 : i32, i32
  }
  func.func @transform_6(%arg0: i32) -> (i32, i32, i32) {
    %c0_i32 = arith.constant 0 : i32
    %c0_i32_0 = arith.constant 0 : i32
    %c0_i32_1 = arith.constant 0 : i32
    return %arg0, %c0_i32, %c0_i32_0 : i32, i32, i32
  }
}

module attributes {stable_mosaic.version = 11 : i64} {
  func.func @_convT_gn_relu_kernel(%arg0: i32, %arg1: memref<1x64x288xbf16, #tpu.memory_space<vmem>>, %arg2: memref<288x64xbf16, #tpu.memory_space<vmem>>, %arg3: memref<64x16xf32, #tpu.memory_space<vmem>>, %arg4: memref<16x64xf32, #tpu.memory_space<vmem>>, %arg5: memref<1x64xf32, #tpu.memory_space<vmem>>, %arg6: memref<1x64xf32, #tpu.memory_space<vmem>>, %arg7: memref<1x64x64xf32, #tpu.memory_space<vmem>>) attributes {dimension_semantics = [#tpu.dimension_semantics<parallel>], iteration_bounds = array<i64: 2>, scalar_prefetch = 0 : i64, scratch_operands = 0 : i64, tpu.core_type = #tpu.core_type<tc>, window_params = [{transform_indices = @transform_0, window_bounds = array<i64: 1, 64, 288>}, {pipeline_mode = #tpu.pipeline_mode<synchronous>, transform_indices = @transform_1, window_bounds = array<i64: 288, 64>}, {pipeline_mode = #tpu.pipeline_mode<synchronous>, transform_indices = @transform_2, window_bounds = array<i64: 64, 16>}, {pipeline_mode = #tpu.pipeline_mode<synchronous>, transform_indices = @transform_3, window_bounds = array<i64: 16, 64>}, {pipeline_mode = #tpu.pipeline_mode<synchronous>, transform_indices = @transform_4, window_bounds = array<i64: 1, 64>}, {pipeline_mode = #tpu.pipeline_mode<synchronous>, transform_indices = @transform_5, window_bounds = array<i64: 1, 64>}, {transform_indices = @transform_6, window_bounds = array<i64: 1, 64, 64>}]} {
    %c0 = arith.constant 0 : index
    %c0_0 = arith.constant 0 : index
    %c0_1 = arith.constant 0 : index
    %0 = vector.load %arg1[%c0, %c0_0, %c0_1] : memref<1x64x288xbf16, #tpu.memory_space<vmem>>, vector<1x64x288xbf16>
    %1 = vector.shape_cast %0 : vector<1x64x288xbf16> to vector<64x288xbf16>
    %c0_2 = arith.constant 0 : index
    %c0_3 = arith.constant 0 : index
    %2 = vector.load %arg2[%c0_2, %c0_3] : memref<288x64xbf16, #tpu.memory_space<vmem>>, vector<288x64xbf16>
    %cst = arith.constant dense<0.000000e+00> : vector<64x64xf32>
    %3 = tpu.matmul %1, %2, %cst {dimension_numbers = #tpu.dot_dimension_numbers<[1], [0], [0], [1], [0, 0, 1, 1], [], []>} : vector<64x288xbf16>, vector<288x64xbf16>, vector<64x64xf32> -> vector<64x64xf32>
    %cst_4 = arith.constant dense<0.000000e+00> : vector<64xf32>
    %4 = vector.multi_reduction <add>, %3, %cst_4 [0] : vector<64x64xf32> to vector<64xf32>
    %5 = vector.shape_cast %4 : vector<64xf32> to vector<1x64xf32>
    %6 = arith.mulf %3, %3 : vector<64x64xf32>
    %cst_5 = arith.constant dense<0.000000e+00> : vector<64xf32>
    %7 = vector.multi_reduction <add>, %6, %cst_5 [0] : vector<64x64xf32> to vector<64xf32>
    %8 = vector.shape_cast %7 : vector<64xf32> to vector<1x64xf32>
    %c0_6 = arith.constant 0 : index
    %c0_7 = arith.constant 0 : index
    %9 = vector.load %arg3[%c0_6, %c0_7] : memref<64x16xf32, #tpu.memory_space<vmem>>, vector<64x16xf32>
    %cst_8 = arith.constant dense<0.000000e+00> : vector<1x16xf32>
    %10 = tpu.matmul %5, %9, %cst_8 {dimension_numbers = #tpu.dot_dimension_numbers<[1], [0], [0], [1], [0, 0, 1, 1], [], []>} : vector<1x64xf32>, vector<64x16xf32>, vector<1x16xf32> -> vector<1x16xf32>
    %c0_9 = arith.constant 0 : index
    %c0_10 = arith.constant 0 : index
    %11 = vector.load %arg3[%c0_9, %c0_10] : memref<64x16xf32, #tpu.memory_space<vmem>>, vector<64x16xf32>
    %cst_11 = arith.constant dense<0.000000e+00> : vector<1x16xf32>
    %12 = tpu.matmul %8, %11, %cst_11 {dimension_numbers = #tpu.dot_dimension_numbers<[1], [0], [0], [1], [0, 0, 1, 1], [], []>} : vector<1x64xf32>, vector<64x16xf32>, vector<1x16xf32> -> vector<1x16xf32>
    %c0_12 = arith.constant 0 : index
    %c0_13 = arith.constant 0 : index
    %13 = vector.load %arg4[%c0_12, %c0_13] : memref<16x64xf32, #tpu.memory_space<vmem>>, vector<16x64xf32>
    %cst_14 = arith.constant dense<0.000000e+00> : vector<1x64xf32>
    %14 = tpu.matmul %10, %13, %cst_14 {dimension_numbers = #tpu.dot_dimension_numbers<[1], [0], [0], [1], [0, 0, 1, 1], [], []>} : vector<1x16xf32>, vector<16x64xf32>, vector<1x64xf32> -> vector<1x64xf32>
    %c0_15 = arith.constant 0 : index
    %c0_16 = arith.constant 0 : index
    %15 = vector.load %arg4[%c0_15, %c0_16] : memref<16x64xf32, #tpu.memory_space<vmem>>, vector<16x64xf32>
    %cst_17 = arith.constant dense<0.000000e+00> : vector<1x64xf32>
    %16 = tpu.matmul %12, %15, %cst_17 {dimension_numbers = #tpu.dot_dimension_numbers<[1], [0], [0], [1], [0, 0, 1, 1], [], []>} : vector<1x16xf32>, vector<16x64xf32>, vector<1x64xf32> -> vector<1x64xf32>
    %17 = arith.mulf %14, %14 : vector<1x64xf32>
    %18 = arith.subf %16, %17 : vector<1x64xf32>
    %cst_18 = arith.constant 0.000000e+00 : f32
    %19 = vector.broadcast %cst_18 : f32 to vector<1x64xf32>
    %20 = arith.maximumf %18, %19 : vector<1x64xf32>
    %21 = vector.broadcast %14 : vector<1x64xf32> to vector<64x64xf32>
    %22 = arith.subf %3, %21 : vector<64x64xf32>
    %cst_19 = arith.constant 9.99999974E-6 : f32
    %23 = vector.broadcast %cst_19 : f32 to vector<1x64xf32>
    %24 = arith.addf %20, %23 : vector<1x64xf32>
    %25 = math.rsqrt %24 : vector<1x64xf32>
    %26 = vector.broadcast %25 : vector<1x64xf32> to vector<64x64xf32>
    %27 = arith.mulf %22, %26 : vector<64x64xf32>
    %c0_20 = arith.constant 0 : index
    %c0_21 = arith.constant 0 : index
    %28 = vector.load %arg5[%c0_20, %c0_21] : memref<1x64xf32, #tpu.memory_space<vmem>>, vector<1x64xf32>
    %29 = vector.broadcast %28 : vector<1x64xf32> to vector<64x64xf32>
    %30 = arith.mulf %27, %29 : vector<64x64xf32>
    %c0_22 = arith.constant 0 : index
    %c0_23 = arith.constant 0 : index
    %31 = vector.load %arg6[%c0_22, %c0_23] : memref<1x64xf32, #tpu.memory_space<vmem>>, vector<1x64xf32>
    %32 = vector.broadcast %31 : vector<1x64xf32> to vector<64x64xf32>
    %33 = arith.addf %30, %32 : vector<64x64xf32>
    %cst_24 = arith.constant 0.000000e+00 : f32
    %34 = vector.broadcast %cst_24 : f32 to vector<64x64xf32>
    %35 = arith.maximumf %33, %34 : vector<64x64xf32>
    %c0_25 = arith.constant 0 : index
    %c0_26 = arith.constant 0 : index
    %c0_27 = arith.constant 0 : index
    %36 = vector.load %arg7[%c0_25, %c0_26, %c0_27] : memref<1x64x64xf32, #tpu.memory_space<vmem>>, vector<1x64x64xf32>
    %37 = vector.shape_cast %36 : vector<1x64x64xf32> to vector<64x64xf32>
    %38 = vector.shape_cast %35 : vector<64x64xf32> to vector<1x64x64xf32>
    tpu.vector_store %arg7[%c0_25, %c0_26, %c0_27], %38 {strides = array<i32>} : memref<1x64x64xf32, #tpu.memory_space<vmem>>, vector<1x64x64xf32>,
    return
  }
  func.func @transform_0(%arg0: i32) -> (i32, i32, i32) {
    %c0_i32 = arith.constant 0 : i32
    %c0_i32_0 = arith.constant 0 : i32
    %c0_i32_1 = arith.constant 0 : i32
    return %arg0, %c0_i32, %c0_i32_0 : i32, i32, i32
  }
  func.func @transform_1(%arg0: i32) -> (i32, i32) {
    %c0_i32 = arith.constant 0 : i32
    %c0_i32_0 = arith.constant 0 : i32
    %c0_i32_1 = arith.constant 0 : i32
    return %c0_i32, %c0_i32_0 : i32, i32
  }
  func.func @transform_2(%arg0: i32) -> (i32, i32) {
    %c0_i32 = arith.constant 0 : i32
    %c0_i32_0 = arith.constant 0 : i32
    %c0_i32_1 = arith.constant 0 : i32
    return %c0_i32, %c0_i32_0 : i32, i32
  }
  func.func @transform_3(%arg0: i32) -> (i32, i32) {
    %c0_i32 = arith.constant 0 : i32
    %c0_i32_0 = arith.constant 0 : i32
    %c0_i32_1 = arith.constant 0 : i32
    return %c0_i32, %c0_i32_0 : i32, i32
  }
  func.func @transform_4(%arg0: i32) -> (i32, i32) {
    %c0_i32 = arith.constant 0 : i32
    %c0_i32_0 = arith.constant 0 : i32
    %c0_i32_1 = arith.constant 0 : i32
    return %c0_i32, %c0_i32_0 : i32, i32
  }
  func.func @transform_5(%arg0: i32) -> (i32, i32) {
    %c0_i32 = arith.constant 0 : i32
    %c0_i32_0 = arith.constant 0 : i32
    %c0_i32_1 = arith.constant 0 : i32
    return %c0_i32, %c0_i32_0 : i32, i32
  }
  func.func @transform_6(%arg0: i32) -> (i32, i32, i32) {
    %c0_i32 = arith.constant 0 : i32
    %c0_i32_0 = arith.constant 0 : i32
    %c0_i32_1 = arith.constant 0 : i32
    return %arg0, %c0_i32, %c0_i32_0 : i32, i32, i32
  }
}

module attributes {stable_mosaic.version = 11 : i64} {
  func.func @_convT_gn_relu_kernel(%arg0: i32, %arg1: memref<1x256x144xbf16, #tpu.memory_space<vmem>>, %arg2: memref<144x32xbf16, #tpu.memory_space<vmem>>, %arg3: memref<32x8xf32, #tpu.memory_space<vmem>>, %arg4: memref<8x32xf32, #tpu.memory_space<vmem>>, %arg5: memref<1x32xf32, #tpu.memory_space<vmem>>, %arg6: memref<1x32xf32, #tpu.memory_space<vmem>>, %arg7: memref<1x256x32xf32, #tpu.memory_space<vmem>>) attributes {dimension_semantics = [#tpu.dimension_semantics<parallel>], iteration_bounds = array<i64: 2>, scalar_prefetch = 0 : i64, scratch_operands = 0 : i64, tpu.core_type = #tpu.core_type<tc>, window_params = [{transform_indices = @transform_0, window_bounds = array<i64: 1, 256, 144>}, {pipeline_mode = #tpu.pipeline_mode<synchronous>, transform_indices = @transform_1, window_bounds = array<i64: 144, 32>}, {pipeline_mode = #tpu.pipeline_mode<synchronous>, transform_indices = @transform_2, window_bounds = array<i64: 32, 8>}, {pipeline_mode = #tpu.pipeline_mode<synchronous>, transform_indices = @transform_3, window_bounds = array<i64: 8, 32>}, {pipeline_mode = #tpu.pipeline_mode<synchronous>, transform_indices = @transform_4, window_bounds = array<i64: 1, 32>}, {pipeline_mode = #tpu.pipeline_mode<synchronous>, transform_indices = @transform_5, window_bounds = array<i64: 1, 32>}, {transform_indices = @transform_6, window_bounds = array<i64: 1, 256, 32>}]} {
    %c0 = arith.constant 0 : index
    %c0_0 = arith.constant 0 : index
    %c0_1 = arith.constant 0 : index
    %0 = vector.load %arg1[%c0, %c0_0, %c0_1] : memref<1x256x144xbf16, #tpu.memory_space<vmem>>, vector<1x256x144xbf16>
    %1 = vector.shape_cast %0 : vector<1x256x144xbf16> to vector<256x144xbf16>
    %c0_2 = arith.constant 0 : index
    %c0_3 = arith.constant 0 : index
    %2 = vector.load %arg2[%c0_2, %c0_3] : memref<144x32xbf16, #tpu.memory_space<vmem>>, vector<144x32xbf16>
    %cst = arith.constant dense<0.000000e+00> : vector<256x32xf32>
    %3 = tpu.matmul %1, %2, %cst {dimension_numbers = #tpu.dot_dimension_numbers<[1], [0], [0], [1], [0, 0, 1, 1], [], []>} : vector<256x144xbf16>, vector<144x32xbf16>, vector<256x32xf32> -> vector<256x32xf32>
    %cst_4 = arith.constant dense<0.000000e+00> : vector<32xf32>
    %4 = vector.multi_reduction <add>, %3, %cst_4 [0] : vector<256x32xf32> to vector<32xf32>
    %5 = vector.shape_cast %4 : vector<32xf32> to vector<1x32xf32>
    %6 = arith.mulf %3, %3 : vector<256x32xf32>
    %cst_5 = arith.constant dense<0.000000e+00> : vector<32xf32>
    %7 = vector.multi_reduction <add>, %6, %cst_5 [0] : vector<256x32xf32> to vector<32xf32>
    %8 = vector.shape_cast %7 : vector<32xf32> to vector<1x32xf32>
    %c0_6 = arith.constant 0 : index
    %c0_7 = arith.constant 0 : index
    %9 = vector.load %arg3[%c0_6, %c0_7] : memref<32x8xf32, #tpu.memory_space<vmem>>, vector<32x8xf32>
    %cst_8 = arith.constant dense<0.000000e+00> : vector<1x8xf32>
    %10 = tpu.matmul %5, %9, %cst_8 {dimension_numbers = #tpu.dot_dimension_numbers<[1], [0], [0], [1], [0, 0, 1, 1], [], []>} : vector<1x32xf32>, vector<32x8xf32>, vector<1x8xf32> -> vector<1x8xf32>
    %c0_9 = arith.constant 0 : index
    %c0_10 = arith.constant 0 : index
    %11 = vector.load %arg3[%c0_9, %c0_10] : memref<32x8xf32, #tpu.memory_space<vmem>>, vector<32x8xf32>
    %cst_11 = arith.constant dense<0.000000e+00> : vector<1x8xf32>
    %12 = tpu.matmul %8, %11, %cst_11 {dimension_numbers = #tpu.dot_dimension_numbers<[1], [0], [0], [1], [0, 0, 1, 1], [], []>} : vector<1x32xf32>, vector<32x8xf32>, vector<1x8xf32> -> vector<1x8xf32>
    %c0_12 = arith.constant 0 : index
    %c0_13 = arith.constant 0 : index
    %13 = vector.load %arg4[%c0_12, %c0_13] : memref<8x32xf32, #tpu.memory_space<vmem>>, vector<8x32xf32>
    %cst_14 = arith.constant dense<0.000000e+00> : vector<1x32xf32>
    %14 = tpu.matmul %10, %13, %cst_14 {dimension_numbers = #tpu.dot_dimension_numbers<[1], [0], [0], [1], [0, 0, 1, 1], [], []>} : vector<1x8xf32>, vector<8x32xf32>, vector<1x32xf32> -> vector<1x32xf32>
    %c0_15 = arith.constant 0 : index
    %c0_16 = arith.constant 0 : index
    %15 = vector.load %arg4[%c0_15, %c0_16] : memref<8x32xf32, #tpu.memory_space<vmem>>, vector<8x32xf32>
    %cst_17 = arith.constant dense<0.000000e+00> : vector<1x32xf32>
    %16 = tpu.matmul %12, %15, %cst_17 {dimension_numbers = #tpu.dot_dimension_numbers<[1], [0], [0], [1], [0, 0, 1, 1], [], []>} : vector<1x8xf32>, vector<8x32xf32>, vector<1x32xf32> -> vector<1x32xf32>
    %17 = arith.mulf %14, %14 : vector<1x32xf32>
    %18 = arith.subf %16, %17 : vector<1x32xf32>
    %cst_18 = arith.constant 0.000000e+00 : f32
    %19 = vector.broadcast %cst_18 : f32 to vector<1x32xf32>
    %20 = arith.maximumf %18, %19 : vector<1x32xf32>
    %21 = vector.broadcast %14 : vector<1x32xf32> to vector<256x32xf32>
    %22 = arith.subf %3, %21 : vector<256x32xf32>
    %cst_19 = arith.constant 9.99999974E-6 : f32
    %23 = vector.broadcast %cst_19 : f32 to vector<1x32xf32>
    %24 = arith.addf %20, %23 : vector<1x32xf32>
    %25 = math.rsqrt %24 : vector<1x32xf32>
    %26 = vector.broadcast %25 : vector<1x32xf32> to vector<256x32xf32>
    %27 = arith.mulf %22, %26 : vector<256x32xf32>
    %c0_20 = arith.constant 0 : index
    %c0_21 = arith.constant 0 : index
    %28 = vector.load %arg5[%c0_20, %c0_21] : memref<1x32xf32, #tpu.memory_space<vmem>>, vector<1x32xf32>
    %29 = vector.broadcast %28 : vector<1x32xf32> to vector<256x32xf32>
    %30 = arith.mulf %27, %29 : vector<256x32xf32>
    %c0_22 = arith.constant 0 : index
    %c0_23 = arith.constant 0 : index
    %31 = vector.load %arg6[%c0_22, %c0_23] : memref<1x32xf32, #tpu.memory_space<vmem>>, vector<1x32xf32>
    %32 = vector.broadcast %31 : vector<1x32xf32> to vector<256x32xf32>
    %33 = arith.addf %30, %32 : vector<256x32xf32>
    %cst_24 = arith.constant 0.000000e+00 : f32
    %34 = vector.broadcast %cst_24 : f32 to vector<256x32xf32>
    %35 = arith.maximumf %33, %34 : vector<256x32xf32>
    %c0_25 = arith.constant 0 : index
    %c0_26 = arith.constant 0 : index
    %c0_27 = arith.constant 0 : index
    %36 = vector.load %arg7[%c0_25, %c0_26, %c0_27] : memref<1x256x32xf32, #tpu.memory_space<vmem>>, vector<1x256x32xf32>
    %37 = vector.shape_cast %36 : vector<1x256x32xf32> to vector<256x32xf32>
    %38 = vector.shape_cast %35 : vector<256x32xf32> to vector<1x256x32xf32>
    tpu.vector_store %arg7[%c0_25, %c0_26, %c0_27], %38 {strides = array<i32>} : memref<1x256x32xf32, #tpu.memory_space<vmem>>, vector<1x256x32xf32>,
    return
  }
  func.func @transform_0(%arg0: i32) -> (i32, i32, i32) {
    %c0_i32 = arith.constant 0 : i32
    %c0_i32_0 = arith.constant 0 : i32
    %c0_i32_1 = arith.constant 0 : i32
    return %arg0, %c0_i32, %c0_i32_0 : i32, i32, i32
  }
  func.func @transform_1(%arg0: i32) -> (i32, i32) {
    %c0_i32 = arith.constant 0 : i32
    %c0_i32_0 = arith.constant 0 : i32
    %c0_i32_1 = arith.constant 0 : i32
    return %c0_i32, %c0_i32_0 : i32, i32
  }
  func.func @transform_2(%arg0: i32) -> (i32, i32) {
    %c0_i32 = arith.constant 0 : i32
    %c0_i32_0 = arith.constant 0 : i32
    %c0_i32_1 = arith.constant 0 : i32
    return %c0_i32, %c0_i32_0 : i32, i32
  }
  func.func @transform_3(%arg0: i32) -> (i32, i32) {
    %c0_i32 = arith.constant 0 : i32
    %c0_i32_0 = arith.constant 0 : i32
    %c0_i32_1 = arith.constant 0 : i32
    return %c0_i32, %c0_i32_0 : i32, i32
  }
  func.func @transform_4(%arg0: i32) -> (i32, i32) {
    %c0_i32 = arith.constant 0 : i32
    %c0_i32_0 = arith.constant 0 : i32
    %c0_i32_1 = arith.constant 0 : i32
    return %c0_i32, %c0_i32_0 : i32, i32
  }
  func.func @transform_5(%arg0: i32) -> (i32, i32) {
    %c0_i32 = arith.constant 0 : i32
    %c0_i32_0 = arith.constant 0 : i32
    %c0_i32_1 = arith.constant 0 : i32
    return %c0_i32, %c0_i32_0 : i32, i32
  }
  func.func @transform_6(%arg0: i32) -> (i32, i32, i32) {
    %c0_i32 = arith.constant 0 : i32
    %c0_i32_0 = arith.constant 0 : i32
    %c0_i32_1 = arith.constant 0 : i32
    return %arg0, %c0_i32, %c0_i32_0 : i32, i32, i32
  }
}

module attributes {stable_mosaic.version = 11 : i64} {
  func.func @_convT_tanh_kernel(%arg0: i32, %arg1: memref<1x1024x72xbf16, #tpu.memory_space<vmem>>, %arg2: memref<72x12xbf16, #tpu.memory_space<vmem>>, %arg3: memref<1x1024x12xf32, #tpu.memory_space<vmem>>) attributes {dimension_semantics = [#tpu.dimension_semantics<parallel>], iteration_bounds = array<i64: 2>, scalar_prefetch = 0 : i64, scratch_operands = 0 : i64, tpu.core_type = #tpu.core_type<tc>, window_params = [{transform_indices = @transform_0, window_bounds = array<i64: 1, 1024, 72>}, {pipeline_mode = #tpu.pipeline_mode<synchronous>, transform_indices = @transform_1, window_bounds = array<i64: 72, 12>}, {transform_indices = @transform_2, window_bounds = array<i64: 1, 1024, 12>}]} {
    %c0 = arith.constant 0 : index
    %c0_0 = arith.constant 0 : index
    %c0_1 = arith.constant 0 : index
    %0 = vector.load %arg1[%c0, %c0_0, %c0_1] : memref<1x1024x72xbf16, #tpu.memory_space<vmem>>, vector<1x1024x72xbf16>
    %1 = vector.shape_cast %0 : vector<1x1024x72xbf16> to vector<1024x72xbf16>
    %c0_2 = arith.constant 0 : index
    %c0_3 = arith.constant 0 : index
    %2 = vector.load %arg2[%c0_2, %c0_3] : memref<72x12xbf16, #tpu.memory_space<vmem>>, vector<72x12xbf16>
    %cst = arith.constant dense<0.000000e+00> : vector<1024x12xf32>
    %3 = tpu.matmul %1, %2, %cst {dimension_numbers = #tpu.dot_dimension_numbers<[1], [0], [0], [1], [0, 0, 1, 1], [], []>} : vector<1024x72xbf16>, vector<72x12xbf16>, vector<1024x12xf32> -> vector<1024x12xf32>
    %4 = math.tanh %3 : vector<1024x12xf32>
    %c0_4 = arith.constant 0 : index
    %c0_5 = arith.constant 0 : index
    %c0_6 = arith.constant 0 : index
    %5 = vector.load %arg3[%c0_4, %c0_5, %c0_6] : memref<1x1024x12xf32, #tpu.memory_space<vmem>>, vector<1x1024x12xf32>
    %6 = vector.shape_cast %5 : vector<1x1024x12xf32> to vector<1024x12xf32>
    %7 = vector.shape_cast %4 : vector<1024x12xf32> to vector<1x1024x12xf32>
    tpu.vector_store %arg3[%c0_4, %c0_5, %c0_6], %7 {strides = array<i32>} : memref<1x1024x12xf32, #tpu.memory_space<vmem>>, vector<1x1024x12xf32>,
    return
  }
  func.func @transform_0(%arg0: i32) -> (i32, i32, i32) {
    %c0_i32 = arith.constant 0 : i32
    %c0_i32_0 = arith.constant 0 : i32
    %c0_i32_1 = arith.constant 0 : i32
    return %arg0, %c0_i32, %c0_i32_0 : i32, i32, i32
  }
  func.func @transform_1(%arg0: i32) -> (i32, i32) {
    %c0_i32 = arith.constant 0 : i32
    %c0_i32_0 = arith.constant 0 : i32
    %c0_i32_1 = arith.constant 0 : i32
    return %c0_i32, %c0_i32_0 : i32, i32
  }
  func.func @transform_2(%arg0: i32) -> (i32, i32, i32) {
    %c0_i32 = arith.constant 0 : i32
    %c0_i32_0 = arith.constant 0 : i32
    %c0_i32_1 = arith.constant 0 : i32
    return %arg0, %c0_i32, %c0_i32_0 : i32, i32, i32
  }
}

</mosaic_0001>

<bundles_post_ra>
// kernel: tile.118
= control target key start
LH: loop header
LB: loop body
LE: loop exit
PB: predicated region body
PF: predicated region fallthrough
CT: control target
= control target key end

     0   :  { %2 = vsyncpa [#allocation1], 0  ;;  %s48_s8 = smov [#allocation0]   ;;  %s65_s0 = inlined_call_operand.hbm [shape: f32[32], index: 0, kind: input, shape index: {}]   ;;  %s66_s1 = inlined_call_operand.vmem [shape: f32[4,32], index: 1, kind: output, shape index: {}]  }
   0x1   :  { %s8_s0 = sshll.u32 %s65_s0, 4  ;;  %s10_s9 = sshll.u32 %s48_s8, 4  ;;  %s9_s0 = int_to_ptr.hbm [resolvable:$true] %s8_s0  ;;  %s11_s9 = int_to_ptr.vmem [resolvable:$true] %s10_s9 }
   0x2   :  { %13 = dma.hbm_to_vmem [thread:$0]  %s9_s0, 16, %s11_s9, [#allocation1]  }
   0x3   :  { %46 = dma.done.wait [#allocation1], 16  }
   0x4   :  { %47 = vsyncadd [#allocation1], 4294967280  ;;  %v18_v0 = vld [vmem:[#allocation0] ss:$0 sm:$0xff] }
   0x5   :  { %19 = vst [vmem:[%s66_s1] sm:$0xf] %v18_v0 }
   0x6   :  { %20 = vsyncpa [#allocation1], 1 }

// kernel: tile.119
= control target key start
LH: loop header
LB: loop body
LE: loop exit
PB: predicated region body
PF: predicated region fallthrough
CT: control target
= control target key end

     0   :  { %s37_s8 = smov 32   ;;  %s38_s9 = smov 64   ;;  %vm7_vm0 = vcmask 261120   ;;  %vm13_vm1 = vcmask 1048320   ;;  %vm19_vm2 = vcmask 785920   ;;  %vm25_vm3 = vcmask 523520   ;;  %s55_s0 = inlined_call_operand.vmem [shape: f32[4,32], index: 0, kind: input, shape index: {}]   ;;  %s56_s1 = inlined_call_operand.vmem [shape: f32[1,128], index: 1, kind: output, shape index: {}]  }
   0x1   :  { %v4_v0 = vld [vmem:[%s55_s0] sm:$0xf]  ;;  %s36_s0 = smov 96  }
   0x2   :  { %5 = vst [vmem:[#allocation1] sm:$0xf] %v4_v0 }
   0x9   :  { %v10_v1 = vld [vmem:[#allocation1 + $0x3] sm:$0x1]   ;;  %v22_v2 = vld [vmem:[#allocation1 + $0x1] sm:$0x1]   ;;  %v16_v3 = vld [vmem:[#allocation1 + $0x2] sm:$0x1]  }
   0xa   :  { %11 = vrot.lane.b32.xlu0 %v10_v1, %s36_s0  ;;  %23 = vrot.lane.b32.xlu1 %v22_v2, %s37_s8  ;;  %v6_v4 = vld [vmem:[#allocation1] sm:$0x1]  }
   0xb   :  { %8 = vst.msk [vmem:[#allocation0] sm:$0x1] %vm7_vm0, %v6_v4  }
  0x12   :  { %17 = vrot.lane.b32.xlu0 %v16_v3, %s38_s9 }
  0x7c   :  { %v12_v5 = vpop.permute.xlu0 %11   ;;  %v24_v6 = vpop.permute.xlu1 %23  }
  0x7d   :  { %14 = vst.msk [vmem:[#allocation0] sm:$0x1] %vm13_vm1, %v12_v5  }
  0x84   :  { %v18_v7 = vpop.permute.xlu0 %17  }
  0x85   :  { %20 = vst.msk [vmem:[#allocation0] sm:$0x1] %vm19_vm2, %v18_v7  }
  0x86   :  { %26 = vst.msk [vmem:[#allocation0] sm:$0x1] %vm25_vm3, %v24_v6  }
  0x8d   :  { %v29_v8 = vld [vmem:[#allocation0] sm:$0x1] }
  0x8e   :  { %32 = vst [vmem:[%s56_s1] sm:$0x1] %v29_v8 }

// kernel: tile.138
= control target key start
LH: loop header
LB: loop body
LE: loop exit
PB: predicated region body
PF: predicated region fallthrough
CT: control target
= control target key end

     0   :  { %2 = vsyncpa [#allocation1], 0  ;;  %s48_s8 = smov [#allocation0]   ;;  %s65_s0 = inlined_call_operand.hbm [shape: f32[16], index: 0, kind: input, shape index: {}]   ;;  %s66_s1 = inlined_call_operand.vmem [shape: f32[4,16], index: 1, kind: output, shape index: {}]  }
   0x1   :  { %s8_s0 = sshll.u32 %s65_s0, 4  ;;  %s10_s9 = sshll.u32 %s48_s8, 4  ;;  %s9_s0 = int_to_ptr.hbm [resolvable:$true] %s8_s0  ;;  %s11_s9 = int_to_ptr.vmem [resolvable:$true] %s10_s9 }
   0x2   :  { %13 = dma.hbm_to_vmem [thread:$0]  %s9_s0, 16, %s11_s9, [#allocation1]  }
   0x3   :  { %46 = dma.done.wait [#allocation1], 16  }
   0x4   :  { %47 = vsyncadd [#allocation1], 4294967280  ;;  %v18_v0 = vld [vmem:[#allocation0] ss:$0 sm:$0xff] }
   0x5   :  { %19 = vst [vmem:[%s66_s1] sm:$0xf] %v18_v0 }
   0x6   :  { %20 = vsyncpa [#allocation1], 1 }

// kernel: tile.139
= control target key start
LH: loop header
LB: loop body
LE: loop exit
PB: predicated region body
PF: predicated region fallthrough
CT: control target
= control target key end

     0   :  { %s37_s8 = smov 16   ;;  %s38_s9 = smov 32   ;;  %vm7_vm0 = vcmask 130048   ;;  %vm13_vm1 = vcmask 523648   ;;  %vm19_vm2 = vcmask 392448   ;;  %vm25_vm3 = vcmask 261248   ;;  %s55_s0 = inlined_call_operand.vmem [shape: f32[4,16], index: 0, kind: input, shape index: {}]   ;;  %s56_s1 = inlined_call_operand.vmem [shape: f32[1,64], index: 1, kind: output, shape index: {}]  }
   0x1   :  { %v4_v0 = vld [vmem:[%s55_s0] sm:$0xf]  ;;  %s36_s0 = smov 48  }
   0x2   :  { %5 = vst [vmem:[#allocation1] sm:$0xf] %v4_v0 }
   0x9   :  { %v10_v1 = vld [vmem:[#allocation1 + $0x3] sm:$0x1]   ;;  %v22_v2 = vld [vmem:[#allocation1 + $0x1] sm:$0x1]   ;;  %v16_v3 = vld [vmem:[#allocation1 + $0x2] sm:$0x1]  }
   0xa   :  { %11 = vrot.lane.b32.xlu0 %v10_v1, %s36_s0  ;;  %23 = vrot.lane.b32.xlu1 %v22_v2, %s37_s8  ;;  %v6_v4 = vld [vmem:[#allocation1] sm:$0x1]  }
   0xb   :  { %8 = vst.msk [vmem:[#allocation0] sm:$0x1] %vm7_vm0, %v6_v4  }
  0x12   :  { %17 = vrot.lane.b32.xlu0 %v16_v3, %s38_s9 }
  0x7c   :  { %v12_v5 = vpop.permute.xlu0 %11   ;;  %v24_v6 = vpop.permute.xlu1 %23  }
  0x7d   :  { %14 = vst.msk [vmem:[#allocation0] sm:$0x1] %vm13_vm1, %v12_v5  }
  0x84   :  { %v18_v7 = vpop.permute.xlu0 %17  }
  0x85   :  { %20 = vst.msk [vmem:[#allocation0] sm:$0x1] %vm19_vm2, %v18_v7  }
  0x86   :  { %26 = vst.msk [vmem:[#allocation0] sm:$0x1] %vm25_vm3, %v24_v6  }
  0x8d   :  { %v29_v8 = vld [vmem:[#allocation0] sm:$0x1] }
  0x8e   :  { %32 = vst [vmem:[%s56_s1] sm:$0x1] %v29_v8 }

// kernel: tile.158
= control target key start
LH: loop header
LB: loop body
LE: loop exit
PB: predicated region body
PF: predicated region fallthrough
CT: control target
= control target key end

     0   :  { %2 = vsyncpa [#allocation1], 0  ;;  %s48_s8 = smov [#allocation0]   ;;  %s65_s0 = inlined_call_operand.hbm [shape: f32[8], index: 0, kind: input, shape index: {}]   ;;  %s66_s1 = inlined_call_operand.vmem [shape: f32[4,8], index: 1, kind: output, shape index: {}]  }
   0x1   :  { %s8_s0 = sshll.u32 %s65_s0, 4  ;;  %s10_s9 = sshll.u32 %s48_s8, 4  ;;  %s9_s0 = int_to_ptr.hbm [resolvable:$true] %s8_s0  ;;  %s11_s9 = int_to_ptr.vmem [resolvable:$true] %s10_s9 }
   0x2   :  { %13 = dma.hbm_to_vmem [thread:$0]  %s9_s0, 16, %s11_s9, [#allocation1]  }
   0x3   :  { %46 = dma.done.wait [#allocation1], 16  }
   0x4   :  { %47 = vsyncadd [#allocation1], 4294967280  ;;  %v18_v0 = vld [vmem:[#allocation0] ss:$0 sm:$0xff] }
   0x5   :  { %19 = vst [vmem:[%s66_s1] sm:$0xf] %v18_v0 }
   0x6   :  { %20 = vsyncpa [#allocation1], 1 }

// kernel: tile.159
= control target key start
LH: loop header
LB: loop body
LE: loop exit
PB: predicated region body
PF: predicated region fallthrough
CT: control target
= control target key end

     0   :  { %s37_s8 = smov 8   ;;  %s38_s9 = smov 16   ;;  %vm7_vm0 = vcmask 64512   ;;  %vm13_vm1 = vcmask 261312   ;;  %vm19_vm2 = vcmask 195712   ;;  %vm25_vm3 = vcmask 130112   ;;  %s55_s0 = inlined_call_operand.vmem [shape: f32[4,8], index: 0, kind: input, shape index: {}]   ;;  %s56_s1 = inlined_call_operand.vmem [shape: f32[1,32], index: 1, kind: output, shape index: {}]  }
   0x1   :  { %v4_v0 = vld [vmem:[%s55_s0] sm:$0xf]  ;;  %s36_s0 = smov 24  }
   0x2   :  { %5 = vst [vmem:[#allocation1] sm:$0xf] %v4_v0 }
   0x9   :  { %v10_v1 = vld [vmem:[#allocation1 + $0x3] sm:$0x1]   ;;  %v22_v2 = vld [vmem:[#allocation1 + $0x1] sm:$0x1]   ;;  %v16_v3 = vld [vmem:[#allocation1 + $0x2] sm:$0x1]  }
   0xa   :  { %11 = vrot.lane.b32.xlu0 %v10_v1, %s36_s0  ;;  %23 = vrot.lane.b32.xlu1 %v22_v2, %s37_s8  ;;  %v6_v4 = vld [vmem:[#allocation1] sm:$0x1]  }
   0xb   :  { %8 = vst.msk [vmem:[#allocation0] sm:$0x1] %vm7_vm0, %v6_v4  }
  0x12   :  { %17 = vrot.lane.b32.xlu0 %v16_v3, %s38_s9 }
  0x7c   :  { %v12_v5 = vpop.permute.xlu0 %11   ;;  %v24_v6 = vpop.permute.xlu1 %23  }
  0x7d   :  { %14 = vst.msk [vmem:[#allocation0] sm:$0x1] %vm13_vm1, %v12_v5  }
  0x84   :  { %v18_v7 = vpop.permute.xlu0 %17  }
  0x85   :  { %20 = vst.msk [vmem:[#allocation0] sm:$0x1] %vm19_vm2, %v18_v7  }
  0x86   :  { %26 = vst.msk [vmem:[#allocation0] sm:$0x1] %vm25_vm3, %v24_v6  }
  0x8d   :  { %v29_v8 = vld [vmem:[#allocation0] sm:$0x1] }
  0x8e   :  { %32 = vst [vmem:[%s56_s1] sm:$0x1] %v29_v8 }

// kernel: tile.99
= control target key start
LH: loop header
LB: loop body
LE: loop exit
PB: predicated region body
PF: predicated region fallthrough
CT: control target
= control target key end

     0   :  { %vm3_vm0 = vcmask 523264   ;;  %vm10_vm1 = vcmask 1048064   ;;  %s111_s0 = inlined_call_operand.vmem [shape: f32[16,64], index: 0, kind: input, shape index: {}]   ;;  %s112_s1 = inlined_call_operand.vmem [shape: f32[1,1024], index: 1, kind: output, shape index: {}]  }
   0x1   :  { %v61_v0 = vld [vmem:[%s111_s0 + $0x1] ss:$2 sm:$0xff]   ;;  %v2_v1 = vld [vmem:[%s111_s0] ss:$2 sm:$0xff]   ;;  %s70_s0 = smov 64  }
   0x2   :  { %8 = vrot.lane.b32.xlu0 %v61_v0, %s70_s0  ;;  %4 = vst.msk [vmem:[#allocation0] ss:$8 sm:$0xf] %vm3_vm0, %v2_v1  }
   0x3   :  { %5 = vst.msk [vmem:[#allocation0] ss:$8 sm:$0xf0] %vm3_vm0, %v2_v1  }
  0x74   :  { %v9_v2 = vpop.permute.xlu0 %8  }
  0x75   :  { %11 = vst.msk [vmem:[#allocation0] ss:$8 sm:$0xf] %vm10_vm1, %v9_v2  }
  0x76   :  { %12 = vst.msk [vmem:[#allocation0] ss:$8 sm:$0xf0] %vm10_vm1, %v9_v2  }
  0x7c   :  { %v15_v3 = vld [vmem:[#allocation0] sm:$0x1]  ;;  %v20_v4 = vld [vmem:[#allocation0 + $0x8] sm:$0x1]  ;;  %v26_v5 = vld [vmem:[#allocation0 + $0x10] sm:$0x1] }
  0x7d   :  { %18 = vst [vmem:[%s112_s1] sm:$0x1] %v15_v3  ;;  %v32_v6 = vld [vmem:[#allocation0 + $0x18] sm:$0x1]  ;;  %v38_v7 = vld [vmem:[#allocation0 + $0x20] sm:$0x1] }
  0x7e   :  { %62 = vst [vmem:[%s112_s1 + $0x1] sm:$0x1] %v20_v4  ;;  %v44_v8 = vld [vmem:[#allocation0 + $0x28] sm:$0x1]  ;;  %v50_v9 = vld [vmem:[#allocation0 + $0x30] sm:$0x1] }
  0x7f   :  { %63 = vst [vmem:[%s112_s1 + $0x2] sm:$0x1] %v26_v5  ;;  %v56_v10 = vld [vmem:[#allocation0 + $0x38] sm:$0x1] }
  0x80   :  { %64 = vst [vmem:[%s112_s1 + $0x3] sm:$0x1] %v32_v6 }
  0x81   :  { %65 = vst [vmem:[%s112_s1 + $0x4] sm:$0x1] %v38_v7 }
  0x82   :  { %66 = vst [vmem:[%s112_s1 + $0x5] sm:$0x1] %v44_v8 }
  0x83   :  { %67 = vst [vmem:[%s112_s1 + $0x6] sm:$0x1] %v50_v9 }
  0x84   :  { %68 = vst [vmem:[%s112_s1 + $0x7] sm:$0x1] %v56_v10 }

// kernel: tile.98
= control target key start
LH: loop header
LB: loop body
LE: loop exit
PB: predicated region body
PF: predicated region fallthrough
CT: control target
= control target key end

     0   :  { %2 = vsyncpa [#allocation1], 0  ;;  %s51_s8 = smov [#allocation0]   ;;  %s71_s0 = inlined_call_operand.hbm [shape: f32[64], index: 0, kind: input, shape index: {}]   ;;  %s72_s1 = inlined_call_operand.vmem [shape: f32[16,64], index: 1, kind: output, shape index: {}]  }
   0x1   :  { %s8_s0 = sshll.u32 %s71_s0, 4  ;;  %s10_s9 = sshll.u32 %s51_s8, 4  ;;  %s9_s0 = int_to_ptr.hbm [resolvable:$true] %s8_s0  ;;  %s11_s9 = int_to_ptr.vmem [resolvable:$true] %s10_s9 }
   0x2   :  { %13 = dma.hbm_to_vmem [thread:$0]  %s9_s0, 16, %s11_s9, [#allocation1]  }
   0x3   :  { %49 = dma.done.wait [#allocation1], 16  }
   0x4   :  { %50 = vsyncadd [#allocation1], 4294967280  ;;  %v18_v0 = vld [vmem:[#allocation0] ss:$0 sm:$0xff] }
   0x5   :  { %19 = vst [vmem:[%s72_s1] sm:$0xff] %v18_v0 }
   0x6   :  { %23 = vst [vmem:[%s72_s1 + $0x8] sm:$0xff] %v18_v0 }
   0x7   :  { %22 = vsyncpa [#allocation1], 1 }

// kernel: tile.149
= control target key start
LH: loop header
LB: loop body
LE: loop exit
PB: predicated region body
PF: predicated region fallthrough
CT: control target
= control target key end

     0   :  { %vm36_vm0 = vcmask 1047556   ;;  %s81_s22 = smov 8   ;;  %s82_s23 = smov 16   ;;  %vm38_vm1 = vcmask 64512   ;;  %vm48_vm2 = vcmask 261312   ;;  %vm58_vm3 = vcmask 195712   ;;  %s133_s0 = inlined_call_operand.vmem [shape: f32[8,4,8], index: 0, kind: input, shape index: {}]   ;;  %s134_s1 = inlined_call_operand.vmem [shape: f32[8,32], index: 1, kind: output, shape index: {}]  }
   0x1   :  { %v70_v0 = vld [vmem:[%s133_s0 + $0x1c] sm:$0xf]  ;;  %v71_v1 = vld [vmem:[%s133_s0 + $0x18] sm:$0xf]  ;;  %v72_v2 = vld [vmem:[%s133_s0 + $0x14] sm:$0xf] }
   0x2   :  { %7 = vst [vmem:[#allocation0 + $0x38] sm:$0xf] %v70_v0  ;;  %v73_v3 = vld [vmem:[%s133_s0 + $0x10] sm:$0xf]  ;;  %v74_v4 = vld [vmem:[%s133_s0 + $0xc] sm:$0xf] }
   0x3   :  { %11 = vst [vmem:[#allocation0 + $0x30] sm:$0xf] %v71_v1  ;;  %v75_v5 = vld [vmem:[%s133_s0 + $0x8] sm:$0xf]  ;;  %v76_v6 = vld [vmem:[%s133_s0 + $0x4] sm:$0xf] }
   0x4   :  { %15 = vst [vmem:[#allocation0 + $0x28] sm:$0xf] %v72_v2  ;;  %v32_v7 = vld [vmem:[%s133_s0] sm:$0xf]  ;;  %s80_s0 = smov 24   ;;  %vm68_vm4 = vcmask 130112  }
   0x5   :  { %19 = vst [vmem:[#allocation0 + $0x20] sm:$0xf] %v73_v3 }
   0x6   :  { %23 = vst [vmem:[#allocation0 + $0x18] sm:$0xf] %v74_v4 }
   0x7   :  { %27 = vst [vmem:[#allocation0 + $0x10] sm:$0xf] %v75_v5 }
   0x8   :  { %31 = vst [vmem:[#allocation0 + $0x8] sm:$0xf] %v76_v6 }
   0x9   :  { %33 = vst [vmem:[#allocation0] sm:$0xf] %v32_v7 }
   0xc   :  { %v43_v8 = vld [vmem:[#allocation0 + $0x3] ss:$8 sm:$0xf0]   ;;  %v63_v9 = vld [vmem:[#allocation0 + $0x1] ss:$8 sm:$0xf0]  }
   0xd   :  { %v53_v15 = vld [vmem:[#allocation0 + $0x2] ss:$8 sm:$0xf0]   ;;  %v35_v18 = vld [vmem:[#allocation0] ss:$8 sm:$0xf0]  }
  0x10   :  { %v41_v10 = vld [vmem:[#allocation0 + $0x3] ss:$8 sm:$0xf]   ;;  %v61_v12 = vld [vmem:[#allocation0 + $0x1] ss:$8 sm:$0xf]  }
  0x11   :  { %v45_v11 = vsel %vm36_vm0, %v43_v8, %v41_v10  ;;  %v65_v13 = vsel %vm36_vm0, %v63_v9, %v61_v12  ;;  %v51_v14 = vld [vmem:[#allocation0 + $0x2] ss:$8 sm:$0xf]   ;;  %v34_v17 = vld [vmem:[#allocation0] ss:$8 sm:$0xf]  }
  0x12   :  { %46 = vrot.lane.b32.xlu0 %v45_v11, %s80_s0  ;;  %66 = vrot.lane.b32.xlu1 %v65_v13, %s81_s22  ;;  %v55_v16 = vsel %vm36_vm0, %v53_v15, %v51_v14  ;;  %v37_v19 = vsel %vm36_vm0, %v35_v18, %v34_v17 }
  0x13   :  { %39 = vst.msk [vmem:[%s134_s1] sm:$0xff] %vm38_vm1, %v37_v19  }
  0x1a   :  { %56 = vrot.lane.b32.xlu0 %v55_v16, %s82_s23 }
  0x84   :  { %v47_v20 = vpop.permute.xlu0 %46   ;;  %v67_v21 = vpop.permute.xlu1 %66  }
  0x85   :  { %49 = vst.msk [vmem:[%s134_s1] sm:$0xff] %vm48_vm2, %v47_v20  }
  0x8c   :  { %v57_v22 = vpop.permute.xlu0 %56  }
  0x8d   :  { %59 = vst.msk [vmem:[%s134_s1] sm:$0xff] %vm58_vm3, %v57_v22  }
  0x8e   :  { %69 = vst.msk [vmem:[%s134_s1] sm:$0xff] %vm68_vm4, %v67_v21  }

// kernel: tile.129
= control target key start
LH: loop header
LB: loop body
LE: loop exit
PB: predicated region body
PF: predicated region fallthrough
CT: control target
= control target key end

     0   :  { %vm68_vm0 = vcmask 1047556   ;;  %s167_s9 = smov 32   ;;  %s168_s10 = smov 16   ;;  %vm70_vm1 = vcmask 130048   ;;  %vm89_vm2 = vcmask 523648   ;;  %vm110_vm3 = vcmask 392448   ;;  %s259_s0 = inlined_call_operand.vmem [shape: f32[16,4,16], index: 0, kind: input, shape index: {}]   ;;  %s260_s1 = inlined_call_operand.vmem [shape: f32[16,64], index: 1, kind: output, shape index: {}]  }
   0x1   :  { %v152_v0 = vld [vmem:[%s259_s0 + $0x1c] sm:$0xf]  ;;  %v153_v1 = vld [vmem:[%s259_s0 + $0x18] sm:$0xf]  ;;  %v154_v2 = vld [vmem:[%s259_s0 + $0x14] sm:$0xf] }
   0x2   :  { %39 = vst [vmem:[#allocation0 + $0x38] sm:$0xf] %v152_v0  ;;  %v155_v3 = vld [vmem:[%s259_s0 + $0x10] sm:$0xf]  ;;  %v156_v4 = vld [vmem:[%s259_s0 + $0xc] sm:$0xf] }
   0x3   :  { %43 = vst [vmem:[#allocation0 + $0x30] sm:$0xf] %v153_v1  ;;  %v157_v5 = vld [vmem:[%s259_s0 + $0x8] sm:$0xf]  ;;  %v158_v6 = vld [vmem:[%s259_s0 + $0x4] sm:$0xf] }
   0x4   :  { %47 = vst [vmem:[#allocation0 + $0x28] sm:$0xf] %v154_v2  ;;  %v64_v7 = vld [vmem:[%s259_s0] sm:$0xf]  ;;  %v144_v8 = vld [vmem:[%s259_s0 + $0x3c] sm:$0xf] }
   0x5   :  { %51 = vst [vmem:[#allocation0 + $0x20] sm:$0xf] %v155_v3  ;;  %v145_v9 = vld [vmem:[%s259_s0 + $0x38] sm:$0xf]  ;;  %v146_v10 = vld [vmem:[%s259_s0 + $0x34] sm:$0xf] }
   0x6   :  { %55 = vst [vmem:[#allocation0 + $0x18] sm:$0xf] %v156_v4  ;;  %v147_v11 = vld [vmem:[%s259_s0 + $0x30] sm:$0xf]  ;;  %v148_v12 = vld [vmem:[%s259_s0 + $0x2c] sm:$0xf] }
   0x7   :  { %59 = vst [vmem:[#allocation0 + $0x10] sm:$0xf] %v157_v5  ;;  %v149_v13 = vld [vmem:[%s259_s0 + $0x28] sm:$0xf]  ;;  %v150_v15 = vld [vmem:[%s259_s0 + $0x24] sm:$0xf] }
   0x8   :  { %63 = vst [vmem:[#allocation0 + $0x8] sm:$0xf] %v158_v6  ;;  %v151_v17 = vld [vmem:[%s259_s0 + $0x20] sm:$0xf]  ;;  %s166_s0 = smov 48   ;;  %vm131_vm4 = vcmask 261248  }
   0x9   :  { %65 = vst [vmem:[#allocation0] sm:$0xf] %v64_v7 }
   0xa   :  { %7 = vst [vmem:[#allocation0 + $0x78] sm:$0xf] %v144_v8 }
   0xb   :  { %11 = vst [vmem:[#allocation0 + $0x70] sm:$0xf] %v145_v9 }
   0xc   :  { %v84_v14 = vld [vmem:[#allocation0 + $0x3] ss:$8 sm:$0xf0]   ;;  %15 = vst [vmem:[#allocation0 + $0x68] sm:$0xf] %v146_v10 }
   0xd   :  { %v105_v16 = vld [vmem:[#allocation0 + $0x2] ss:$8 sm:$0xf0]   ;;  %19 = vst [vmem:[#allocation0 + $0x60] sm:$0xf] %v147_v11 }
   0xe   :  { %23 = vst [vmem:[#allocation0 + $0x58] sm:$0xf] %v148_v12  ;;  %v126_v18 = vld [vmem:[#allocation0 + $0x1] ss:$8 sm:$0xf0]  }
   0xf   :  { %27 = vst [vmem:[#allocation0 + $0x50] sm:$0xf] %v149_v13  ;;  %v67_v35 = vld [vmem:[#allocation0] ss:$8 sm:$0xf0]  }
  0x10   :  { %v82_v19 = vld [vmem:[#allocation0 + $0x3] ss:$8 sm:$0xf]   ;;  %v103_v20 = vld [vmem:[#allocation0 + $0x2] ss:$8 sm:$0xf]  }
  0x11   :  { %v86_v21 = vsel %vm68_vm0, %v84_v14, %v82_v19  ;;  %v107_v22 = vsel %vm68_vm0, %v105_v16, %v103_v20  ;;  %v124_v23 = vld [vmem:[#allocation0 + $0x1] ss:$8 sm:$0xf]   ;;  %31 = vst [vmem:[#allocation0 + $0x48] sm:$0xf] %v150_v15 }
  0x12   :  { %87 = vrot.lane.b32.xlu0 %v86_v21, %s166_s0  ;;  %108 = vrot.lane.b32.xlu1 %v107_v22, %s167_s9  ;;  %v128_v24 = vsel %vm68_vm0, %v126_v18, %v124_v23  ;;  %35 = vst [vmem:[#allocation0 + $0x40] sm:$0xf] %v151_v17  ;;  %v66_v34 = vld [vmem:[#allocation0] ss:$8 sm:$0xf]  }
  0x13   :  { %129 = vrot.lane.b32.xlu2 %v128_v24, %s168_s10  ;;  %v69_v36 = vsel %vm68_vm0, %v67_v35, %v66_v34 }
  0x14   :  { %v94_v25 = vld [vmem:[#allocation0 + $0x43] ss:$8 sm:$0xf0]   ;;  %v115_v26 = vld [vmem:[#allocation0 + $0x42] ss:$8 sm:$0xf0]  }
  0x15   :  { %v136_v27 = vld [vmem:[#allocation0 + $0x41] ss:$8 sm:$0xf0]   ;;  %71 = vst.msk [vmem:[%s260_s1] sm:$0xff] %vm70_vm1, %v69_v36  }
  0x16   :  { %v75_v38 = vld [vmem:[#allocation0 + $0x40] ss:$8 sm:$0xf0]  }
  0x19   :  { %v92_v28 = vld [vmem:[#allocation0 + $0x43] ss:$8 sm:$0xf]   ;;  %v113_v29 = vld [vmem:[#allocation0 + $0x42] ss:$8 sm:$0xf]  }
  0x1a   :  { %v96_v30 = vsel %vm68_vm0, %v94_v25, %v92_v28  ;;  %v117_v31 = vsel %vm68_vm0, %v115_v26, %v113_v29  ;;  %v134_v32 = vld [vmem:[#allocation0 + $0x41] ss:$8 sm:$0xf]   ;;  %v73_v37 = vld [vmem:[#allocation0 + $0x40] ss:$8 sm:$0xf]  }
  0x1b   :  { %97 = vrot.lane.b32.xlu0 %v96_v30, %s166_s0  ;;  %118 = vrot.lane.b32.xlu1 %v117_v31, %s167_s9  ;;  %v138_v33 = vsel %vm68_vm0, %v136_v27, %v134_v32  ;;  %v77_v40 = vsel %vm68_vm0, %v75_v38, %v73_v37 }
  0x1c   :  { %139 = vrot.lane.b32.xlu2 %v138_v33, %s168_s10  ;;  %159 = vst.msk [vmem:[%s260_s1 + $0x8] sm:$0xff] %vm70_vm1, %v77_v40  }
  0x6d   :  { %v130_v39 = vpop.permute.xlu2 %129  }
  0x76   :  { %v140_v41 = vpop.permute.xlu2 %139  }
  0x84   :  { %v88_v42 = vpop.permute.xlu0 %87   ;;  %v109_v43 = vpop.permute.xlu1 %108  }
  0x85   :  { %90 = vst.msk [vmem:[%s260_s1] sm:$0xff] %vm89_vm2, %v88_v42  }
  0x86   :  { %111 = vst.msk [vmem:[%s260_s1] sm:$0xff] %vm110_vm3, %v109_v43  }
  0x87   :  { %132 = vst.msk [vmem:[%s260_s1] sm:$0xff] %vm131_vm4, %v130_v39  }
  0x8d   :  { %v98_v44 = vpop.permute.xlu0 %97   ;;  %v119_v45 = vpop.permute.xlu1 %118  }
  0x8e   :  { %160 = vst.msk [vmem:[%s260_s1 + $0x8] sm:$0xff] %vm89_vm2, %v98_v44  }
  0x8f   :  { %161 = vst.msk [vmem:[%s260_s1 + $0x8] sm:$0xff] %vm110_vm3, %v119_v45  }
  0x90   :  { %162 = vst.msk [vmem:[%s260_s1 + $0x8] sm:$0xff] %vm131_vm4, %v140_v41  }

// kernel: tile.109
= control target key start
LH: loop header
LB: loop body
LE: loop exit
PB: predicated region body
PF: predicated region fallthrough
CT: control target
= control target key end

     0   :  { %vm132_vm0 = vcmask 1047556   ;;  %s338_s15 = smov 96   ;;  %s339_s30 = smov 64   ;;  %vm134_vm1 = vcmask 261120   ;;  %vm171_vm2 = vcmask 1048320   ;;  %vm214_vm3 = vcmask 785920   ;;  %s535_s0 = inlined_call_operand.vmem [shape: f32[32,4,32], index: 0, kind: input, shape index: {}]   ;;  %s536_s1 = inlined_call_operand.vmem [shape: f32[32,128], index: 1, kind: output, shape index: {}]  }
   0x1   :  { %v316_v0 = vld [vmem:[%s535_s0 + $0x1c] sm:$0xf]  ;;  %v317_v1 = vld [vmem:[%s535_s0 + $0x18] sm:$0xf]  ;;  %v318_v2 = vld [vmem:[%s535_s0 + $0x14] sm:$0xf] }
   0x2   :  { %103 = vst [vmem:[#allocation0 + $0x38] sm:$0xf] %v316_v0  ;;  %v319_v3 = vld [vmem:[%s535_s0 + $0x10] sm:$0xf]  ;;  %v320_v4 = vld [vmem:[%s535_s0 + $0xc] sm:$0xf] }
   0x3   :  { %107 = vst [vmem:[#allocation0 + $0x30] sm:$0xf] %v317_v1  ;;  %v321_v5 = vld [vmem:[%s535_s0 + $0x8] sm:$0xf]  ;;  %v322_v6 = vld [vmem:[%s535_s0 + $0x4] sm:$0xf] }
   0x4   :  { %111 = vst [vmem:[#allocation0 + $0x28] sm:$0xf] %v318_v2  ;;  %v128_v7 = vld [vmem:[%s535_s0] sm:$0xf]  ;;  %v300_v8 = vld [vmem:[%s535_s0 + $0x5c] sm:$0xf] }
   0x5   :  { %115 = vst [vmem:[#allocation0 + $0x20] sm:$0xf] %v319_v3  ;;  %v301_v9 = vld [vmem:[%s535_s0 + $0x58] sm:$0xf]  ;;  %v302_v10 = vld [vmem:[%s535_s0 + $0x54] sm:$0xf] }
   0x6   :  { %119 = vst [vmem:[#allocation0 + $0x18] sm:$0xf] %v320_v4  ;;  %v303_v11 = vld [vmem:[%s535_s0 + $0x50] sm:$0xf]  ;;  %v304_v12 = vld [vmem:[%s535_s0 + $0x4c] sm:$0xf] }
   0x7   :  { %123 = vst [vmem:[#allocation0 + $0x10] sm:$0xf] %v321_v5  ;;  %v305_v13 = vld [vmem:[%s535_s0 + $0x48] sm:$0xf]  ;;  %v306_v14 = vld [vmem:[%s535_s0 + $0x44] sm:$0xf] }
   0x8   :  { %127 = vst [vmem:[#allocation0 + $0x8] sm:$0xf] %v322_v6  ;;  %v307_v15 = vld [vmem:[%s535_s0 + $0x40] sm:$0xf]  ;;  %v308_v17 = vld [vmem:[%s535_s0 + $0x3c] sm:$0xf] }
   0x9   :  { %129 = vst [vmem:[#allocation0] sm:$0xf] %v128_v7  ;;  %v309_v18 = vld [vmem:[%s535_s0 + $0x38] sm:$0xf]  ;;  %v310_v21 = vld [vmem:[%s535_s0 + $0x34] sm:$0xf] }
   0xa   :  { %39 = vst [vmem:[#allocation0 + $0xb8] sm:$0xf] %v300_v8  ;;  %v311_v22 = vld [vmem:[%s535_s0 + $0x30] sm:$0xf]  ;;  %v312_v23 = vld [vmem:[%s535_s0 + $0x2c] sm:$0xf] }
   0xb   :  { %43 = vst [vmem:[#allocation0 + $0xb0] sm:$0xf] %v301_v9  ;;  %v313_v24 = vld [vmem:[%s535_s0 + $0x28] sm:$0xf]  ;;  %v314_v25 = vld [vmem:[%s535_s0 + $0x24] sm:$0xf] }
   0xc   :  { %47 = vst [vmem:[#allocation0 + $0xa8] sm:$0xf] %v302_v10  ;;  %v166_v16 = vld [vmem:[#allocation0 + $0x3] ss:$8 sm:$0xf0]   ;;  %vm257_vm4 = vcmask 523520  }
   0xd   :  { %51 = vst [vmem:[#allocation0 + $0xa0] sm:$0xf] %v303_v11  ;;  %v315_v26 = vld [vmem:[%s535_s0 + $0x20] sm:$0xf]  ;;  %v292_v30 = vld [vmem:[%s535_s0 + $0x7c] sm:$0xf] }
   0xe   :  { %55 = vst [vmem:[#allocation0 + $0x98] sm:$0xf] %v304_v12  ;;  %v209_v29 = vld [vmem:[#allocation0 + $0x2] ss:$8 sm:$0xf0]  }
   0xf   :  { %59 = vst [vmem:[#allocation0 + $0x90] sm:$0xf] %v305_v13  ;;  %v293_v31 = vld [vmem:[%s535_s0 + $0x78] sm:$0xf]  ;;  %v294_v35 = vld [vmem:[%s535_s0 + $0x74] sm:$0xf] }
  0x10   :  { %v164_v19 = vld [vmem:[#allocation0 + $0x3] ss:$8 sm:$0xf]   ;;  %63 = vst [vmem:[#allocation0 + $0x88] sm:$0xf] %v306_v14 }
  0x11   :  { %v168_v20 = vsel %vm132_vm0, %v166_v16, %v164_v19  ;;  %67 = vst [vmem:[#allocation0 + $0x80] sm:$0xf] %v307_v15  ;;  %v207_v27 = vld [vmem:[#allocation0 + $0x2] ss:$8 sm:$0xf]  }
  0x12   :  { %169 = vrot.lane.b32.xlu0 %v168_v20, %s338_s15  ;;  %71 = vst [vmem:[#allocation0 + $0x78] sm:$0xf] %v308_v17  ;;  %v211_v32 = vsel %vm132_vm0, %v209_v29, %v207_v27  ;;  %v295_v36 = vld [vmem:[%s535_s0 + $0x70] sm:$0xf]  ;;  %v296_v37 = vld [vmem:[%s535_s0 + $0x6c] sm:$0xf] }
  0x13   :  { %75 = vst [vmem:[#allocation0 + $0x70] sm:$0xf] %v309_v18  ;;  %212 = vrot.lane.b32.xlu2 %v211_v32, %s339_s30  ;;  %v297_v38 = vld [vmem:[%s535_s0 + $0x68] sm:$0xf]  ;;  %v298_v39 = vld [vmem:[%s535_s0 + $0x64] sm:$0xf] }
  0x14   :  { %79 = vst [vmem:[#allocation0 + $0x68] sm:$0xf] %v310_v21  ;;  %v187_v28 = vld [vmem:[#allocation0 + $0x83] ss:$8 sm:$0xf0]  }
  0x15   :  { %83 = vst [vmem:[#allocation0 + $0x60] sm:$0xf] %v311_v22  ;;  %v299_v40 = vld [vmem:[%s535_s0 + $0x60] sm:$0xf]  ;;  %s340_s0 = smov 32  }
  0x16   :  { %87 = vst [vmem:[#allocation0 + $0x58] sm:$0xf] %v312_v23  ;;  %v230_v48 = vld [vmem:[#allocation0 + $0x82] ss:$8 sm:$0xf0]  }
  0x17   :  { %91 = vst [vmem:[#allocation0 + $0x50] sm:$0xf] %v313_v24  ;;  %v250_v49 = vld [vmem:[#allocation0 + $0x1] ss:$8 sm:$0xf]  }
  0x18   :  { %v185_v33 = vld [vmem:[#allocation0 + $0x83] ss:$8 sm:$0xf]   ;;  %95 = vst [vmem:[#allocation0 + $0x48] sm:$0xf] %v314_v25 }
  0x19   :  { %v189_v34 = vsel %vm132_vm0, %v187_v28, %v185_v33  ;;  %99 = vst [vmem:[#allocation0 + $0x40] sm:$0xf] %v315_v26  ;;  %v228_v47 = vld [vmem:[#allocation0 + $0x82] ss:$8 sm:$0xf]  }
  0x1a   :  { %190 = vrot.lane.b32.xlu1 %v189_v34, %s338_s15  ;;  %7 = vst [vmem:[#allocation0 + $0xf8] sm:$0xf] %v292_v30  ;;  %v252_v51 = vld [vmem:[#allocation0 + $0x1] ss:$8 sm:$0xf0]   ;;  %v232_v52 = vsel %vm132_vm0, %v230_v48, %v228_v47 }
  0x1b   :  { %11 = vst [vmem:[#allocation0 + $0xf0] sm:$0xf] %v293_v31  ;;  %v254_v55 = vsel %vm132_vm0, %v252_v51, %v250_v49  ;;  %v271_v1 = vld [vmem:[#allocation0 + $0x81] ss:$8 sm:$0xf]  }
  0x1c   :  { %15 = vst [vmem:[#allocation0 + $0xe8] sm:$0xf] %v294_v35  ;;  %v176_v41 = vld [vmem:[#allocation0 + $0x43] ss:$8 sm:$0xf0]  }
  0x1d   :  { %19 = vst [vmem:[#allocation0 + $0xe0] sm:$0xf] %v295_v36  ;;  %v219_v42 = vld [vmem:[#allocation0 + $0x42] ss:$8 sm:$0xf0]  }
  0x1e   :  { %23 = vst [vmem:[#allocation0 + $0xd8] sm:$0xf] %v296_v37  ;;  %v262_v57 = vld [vmem:[#allocation0 + $0x41] ss:$8 sm:$0xf0]  }
  0x1f   :  { %27 = vst [vmem:[#allocation0 + $0xd0] sm:$0xf] %v297_v38  ;;  %v273_v2 = vld [vmem:[#allocation0 + $0x81] ss:$8 sm:$0xf0]  }
  0x20   :  { %v174_v43 = vld [vmem:[#allocation0 + $0x43] ss:$8 sm:$0xf]   ;;  %31 = vst [vmem:[#allocation0 + $0xc8] sm:$0xf] %v298_v39  ;;  %v275_v3 = vsel %vm132_vm0, %v273_v2, %v271_v1 }
  0x21   :  { %v178_v44 = vsel %vm132_vm0, %v176_v41, %v174_v43  ;;  %35 = vst [vmem:[#allocation0 + $0xc0] sm:$0xf] %v299_v40  ;;  %v217_v45 = vld [vmem:[#allocation0 + $0x42] ss:$8 sm:$0xf]  }
  0x22   :  { %179 = vrot.lane.b32.xlu0 %v178_v44, %s338_s15  ;;  %v221_v46 = vsel %vm132_vm0, %v219_v42, %v217_v45  ;;  %v260_v56 = vld [vmem:[#allocation0 + $0x41] ss:$8 sm:$0xf]   ;;  %v130_v4 = vld [vmem:[#allocation0] ss:$8 sm:$0xf]  }
  0x23   :  { %222 = vrot.lane.b32.xlu2 %v221_v46, %s339_s30  ;;  %v264_v63 = vsel %vm132_vm0, %v262_v57, %v260_v56  ;;  %v131_v5 = vld [vmem:[#allocation0] ss:$8 sm:$0xf0]  }
  0x24   :  { %v198_v50 = vld [vmem:[#allocation0 + $0xc3] ss:$8 sm:$0xf0]   ;;  %v241_v59 = vld [vmem:[#allocation0 + $0xc2] ss:$8 sm:$0xf0]   ;;  %v133_v6 = vsel %vm132_vm0, %v131_v5, %v130_v4 }
  0x25   :  { %v284_v61 = vld [vmem:[#allocation0 + $0xc1] ss:$8 sm:$0xf0]   ;;  %135 = vst.msk [vmem:[%s536_s1] sm:$0xff] %vm134_vm1, %v133_v6  }
  0x26   :  { %v146_v7 = vld [vmem:[#allocation0 + $0x80] ss:$8 sm:$0xf]  }
  0x27   :  { %v148_v8 = vld [vmem:[#allocation0 + $0x80] ss:$8 sm:$0xf0]  }
  0x28   :  { %v196_v53 = vld [vmem:[#allocation0 + $0xc3] ss:$8 sm:$0xf]   ;;  %v239_v58 = vld [vmem:[#allocation0 + $0xc2] ss:$8 sm:$0xf]   ;;  %v150_v9 = vsel %vm132_vm0, %v148_v8, %v146_v7 }
  0x29   :  { %v200_v54 = vsel %vm132_vm0, %v198_v50, %v196_v53  ;;  %v282_v60 = vld [vmem:[#allocation0 + $0xc1] ss:$8 sm:$0xf]   ;;  %v243_v62 = vsel %vm132_vm0, %v241_v59, %v239_v58  ;;  %324 = vst.msk [vmem:[%s536_s1 + $0x10] sm:$0xff] %vm134_vm1, %v150_v9  }
  0x2a   :  { %201 = vrot.lane.b32.xlu1 %v200_v54, %s338_s15  ;;  %233 = vrot.lane.b32.xlu0 %v232_v52, %s339_s30  ;;  %v286_v0 = vsel %vm132_vm0, %v284_v61, %v282_v60  ;;  %v137_v11 = vld [vmem:[#allocation0 + $0x40] ss:$8 sm:$0xf]  }
  0x2b   :  { %255 = vrot.lane.b32.xlu2 %v254_v55, %s340_s0  ;;  %v139_v12 = vld [vmem:[#allocation0 + $0x40] ss:$8 sm:$0xf0]  }
  0x2c   :  { %v141_v13 = vsel %vm132_vm0, %v139_v12, %v137_v11  ;;  %v155_v14 = vld [vmem:[#allocation0 + $0xc0] ss:$8 sm:$0xf]  }
  0x2d   :  { %323 = vst.msk [vmem:[%s536_s1 + $0x8] sm:$0xff] %vm134_vm1, %v141_v13   ;;  %v157_v15 = vld [vmem:[#allocation0 + $0xc0] ss:$8 sm:$0xf0]  }
  0x2e   :  { %v159_v16 = vsel %vm132_vm0, %v157_v15, %v155_v14 }
  0x2f   :  { %325 = vst.msk [vmem:[%s536_s1 + $0x18] sm:$0xff] %vm134_vm1, %v159_v16  }
  0x32   :  { %244 = vrot.lane.b32.xlu1 %v243_v62, %s339_s30  ;;  %265 = vrot.lane.b32.xlu0 %v264_v63, %s340_s0 }
  0x33   :  { %287 = vrot.lane.b32.xlu2 %v286_v0, %s340_s0 }
  0x3a   :  { %276 = vrot.lane.b32.xlu1 %v275_v3, %s340_s0 }
  0x6d   :  { %v213_v10 = vpop.permute.xlu2 %212  }
  0x7d   :  { %v223_v17 = vpop.permute.xlu2 %222  }
  0x84   :  { %v170_v18 = vpop.permute.xlu0 %169  }
  0x85   :  { %172 = vst.msk [vmem:[%s536_s1] sm:$0xff] %vm171_vm2, %v170_v18   ;;  %v256_v19 = vpop.permute.xlu2 %255  }
  0x86   :  { %215 = vst.msk [vmem:[%s536_s1] sm:$0xff] %vm214_vm3, %v213_v10  }
  0x87   :  { %258 = vst.msk [vmem:[%s536_s1] sm:$0xff] %vm257_vm4, %v256_v19  }
  0x8c   :  { %v191_v20 = vpop.permute.xlu1 %190  }
  0x8d   :  { %327 = vst.msk [vmem:[%s536_s1 + $0x10] sm:$0xff] %vm171_vm2, %v191_v20   ;;  %v288_v21 = vpop.permute.xlu2 %287  }
  0x94   :  { %v180_v22 = vpop.permute.xlu0 %179  }
  0x95   :  { %326 = vst.msk [vmem:[%s536_s1 + $0x8] sm:$0xff] %vm171_vm2, %v180_v22  }
  0x96   :  { %329 = vst.msk [vmem:[%s536_s1 + $0x8] sm:$0xff] %vm214_vm3, %v223_v17  }
  0x9c   :  { %v202_v23 = vpop.permute.xlu1 %201   ;;  %v234_v24 = vpop.permute.xlu0 %233  }
  0x9d   :  { %328 = vst.msk [vmem:[%s536_s1 + $0x18] sm:$0xff] %vm171_vm2, %v202_v23  }
  0x9e   :  { %330 = vst.msk [vmem:[%s536_s1 + $0x10] sm:$0xff] %vm214_vm3, %v234_v24  }
  0xa4   :  { %v245_v25 = vpop.permute.xlu1 %244   ;;  %v266_v26 = vpop.permute.xlu0 %265  }
  0xa5   :  { %331 = vst.msk [vmem:[%s536_s1 + $0x18] sm:$0xff] %vm214_vm3, %v245_v25  }
  0xa6   :  { %332 = vst.msk [vmem:[%s536_s1 + $0x8] sm:$0xff] %vm257_vm4, %v266_v26  }
  0xa7   :  { %334 = vst.msk [vmem:[%s536_s1 + $0x18] sm:$0xff] %vm257_vm4, %v288_v21  }
  0xac   :  { %v277_v27 = vpop.permute.xlu1 %276  }
  0xad   :  { %333 = vst.msk [vmem:[%s536_s1 + $0x10] sm:$0xff] %vm257_vm4, %v277_v27  }

// kernel: tile.89
= control target key start
LH: loop header
LB: loop body
LE: loop exit
PB: predicated region body
PF: predicated region fallthrough
CT: control target
= control target key end

     0   :  { %s448_s6 = smov 3  ;;  %s451_s7 = smov 12  ;;  %vm453_vm0 = vcmask 1043458   ;;  %vm458_vm1 = vcmask 1045508   ;;  %vm463_vm2 = vcmask 1047558   ;;  %vm3_vm3 = vcmask 523264   ;;  %s4529_s0 = inlined_call_operand.vmem [shape: f32[64,16,64], index: 0, kind: input, shape index: {}]   ;;  %s4530_s1 = inlined_call_operand.vmem [shape: f32[64,1024], index: 1, kind: output, shape index: {}]  }
   0x1   :  { %v2107_v0 = vld [vmem:[%s4529_s0 + $0x1] ss:$16 sm:%s448_s6]   ;;  %s456_s12 = smov 48  ;;  %s461_s13 = smov 192  ;;  %vm467_vm4 = vcmask 1048064  }
   0x2   :  { %v2108_v1 = vld [vmem:[%s4529_s0 + $0x1] ss:$16 sm:%s451_s7]   ;;  %s493_s18 = smov 3  ;;  %s496_s21 = smov 12 }
   0x3   :  { %v454_v2 = vsel %vm453_vm0, %v2108_v1, %v2107_v0  ;;  %v2109_v3 = vld [vmem:[%s4529_s0 + $0x1] ss:$16 sm:%s456_s12]   ;;  %s501_s22 = smov 48  ;;  %s506_s27 = smov 192 }
   0x4   :  { %v2110_v4 = vld [vmem:[%s4529_s0 + $0x1] ss:$16 sm:%s461_s13]   ;;  %v459_v5 = vsel %vm458_vm1, %v2109_v3, %v454_v2  ;;  %s470_s28 = smov 3  ;;  %s2427_s29 = smov 64  }
   0x5   :  { %v2116_v6 = vld [vmem:[%s4529_s0 + $0x81] ss:$16 sm:%s493_s18]   ;;  %v464_v7 = vsel %vm463_vm2, %v2110_v4, %v459_v5  ;;  %s473_s3 = smov 12  ;;  %s478_s4 = smov 48  ;;  %v2111_v13 = vld [vmem:[%s4529_s0 + $0x9] ss:$16 sm:%s470_s28]  }
   0x6   :  { %v2117_v8 = vld [vmem:[%s4529_s0 + $0x81] ss:$16 sm:%s496_s21]   ;;  %465 = vrot.lane.b32.xlu0 %v464_v7, %s2427_s29  ;;  %s483_s9 = smov 192  ;;  %s516_s10 = smov 3 }
   0x7   :  { %v2118_v9 = vld [vmem:[%s4529_s0 + $0x81] ss:$16 sm:%s501_s22]   ;;  %v499_v10 = vsel %vm453_vm0, %v2117_v8, %v2116_v6  ;;  %v2112_v14 = vld [vmem:[%s4529_s0 + $0x9] ss:$16 sm:%s473_s3]   ;;  %s519_s15 = smov 12  ;;  %s524_s16 = smov 48 }
   0x8   :  { %v2119_v11 = vld [vmem:[%s4529_s0 + $0x81] ss:$16 sm:%s506_s27]   ;;  %v504_v12 = vsel %vm458_vm1, %v2118_v9, %v499_v10  ;;  %v476_v16 = vsel %vm453_vm0, %v2112_v14, %v2111_v13  ;;  %v2113_v17 = vld [vmem:[%s4529_s0 + $0x9] ss:$16 sm:%s478_s4]   ;;  %s529_s19 = smov 192  ;;  %s585_s20 = smov 3 }
   0x9   :  { %v509_v15 = vsel %vm463_vm2, %v2119_v11, %v504_v12  ;;  %v2114_v18 = vld [vmem:[%s4529_s0 + $0x9] ss:$16 sm:%s483_s9]   ;;  %v481_v19 = vsel %vm458_vm1, %v2113_v17, %v476_v16  ;;  %s588_s25 = smov 12  ;;  %s593_s26 = smov 48  ;;  %v2136_v26 = vld [vmem:[%s4529_s0 + $0x181] ss:$16 sm:%s585_s20]  }
   0xa   :  { %510 = vrot.lane.b32.xlu1 %v509_v15, %s2427_s29  ;;  %v2121_v20 = vld [vmem:[%s4529_s0 + $0x89] ss:$16 sm:%s516_s10]   ;;  %v486_v23 = vsel %vm463_vm2, %v2114_v18, %v481_v19  ;;  %s608_s3 = smov 3  ;;  %s611_s6 = smov 12 }
   0xb   :  { %v2122_v21 = vld [vmem:[%s4529_s0 + $0x89] ss:$16 sm:%s519_s15]   ;;  %v2137_v28 = vld [vmem:[%s4529_s0 + $0x181] ss:$16 sm:%s588_s25]   ;;  %s598_s9 = smov 192  ;;  %s616_s12 = smov 48 }
   0xc   :  { %v2123_v22 = vld [vmem:[%s4529_s0 + $0x89] ss:$16 sm:%s524_s16]   ;;  %v522_v24 = vsel %vm453_vm0, %v2122_v21, %v2121_v20  ;;  %v591_v29 = vsel %vm453_vm0, %v2137_v28, %v2136_v26  ;;  %v2138_v30 = vld [vmem:[%s4529_s0 + $0x181] ss:$16 sm:%s593_s26]   ;;  %s621_s15 = smov 192  ;;  %s654_s16 = smov 3 }
   0xd   :  { %v2124_v25 = vld [vmem:[%s4529_s0 + $0x89] ss:$16 sm:%s529_s19]   ;;  %v527_v27 = vsel %vm458_vm1, %v2123_v22, %v522_v24  ;;  %s657_s17 = smov 12  ;;  %s539_s18 = smov 3  ;;  %v596_v34 = vsel %vm458_vm1, %v2138_v30, %v591_v29  ;;  %v2139_v35 = vld [vmem:[%s4529_s0 + $0x181] ss:$16 sm:%s598_s9]  }
   0xe   :  { %v2141_v31 = vld [vmem:[%s4529_s0 + $0x189] ss:$16 sm:%s608_s3]   ;;  %487 = vrot.lane.b32.xlu0 %v486_v23, %s2427_s29  ;;  %v532_v32 = vsel %vm463_vm2, %v2124_v25, %v527_v27  ;;  %s542_s23 = smov 12  ;;  %s547_s24 = smov 48  ;;  %v601_v42 = vsel %vm463_vm2, %v2139_v35, %v596_v34 }
   0xf   :  { %v2142_v33 = vld [vmem:[%s4529_s0 + $0x189] ss:$16 sm:%s611_s6]   ;;  %s662_s30 = smov 48  ;;  %s552_s2 = smov 192  ;;  %v2126_v41 = vld [vmem:[%s4529_s0 + $0x101] ss:$16 sm:%s539_s18]  }
  0x10   :  { %v614_v36 = vsel %vm453_vm0, %v2142_v33, %v2141_v31  ;;  %v2143_v37 = vld [vmem:[%s4529_s0 + $0x189] ss:$16 sm:%s616_s12]   ;;  %s677_s7 = smov 3  ;;  %s680_s8 = smov 12  ;;  %v2127_v44 = vld [vmem:[%s4529_s0 + $0x101] ss:$16 sm:%s542_s23]  }
  0x11   :  { %v2144_v38 = vld [vmem:[%s4529_s0 + $0x189] ss:$16 sm:%s621_s15]   ;;  %v619_v43 = vsel %vm458_vm1, %v2143_v37, %v614_v36  ;;  %v2128_v45 = vld [vmem:[%s4529_s0 + $0x101] ss:$16 sm:%s547_s24]   ;;  %s667_s15 = smov 192  ;;  %v545_v47 = vsel %vm453_vm0, %v2127_v44, %v2126_v41  ;;  %s685_s22 = smov 48 }
  0x12   :  { %533 = vrot.lane.b32.xlu1 %v532_v32, %s2427_s29  ;;  %v2151_v39 = vld [vmem:[%s4529_s0 + $0x209] ss:$16 sm:%s654_s16]   ;;  %v550_v50 = vsel %vm458_vm1, %v2128_v45, %v545_v47  ;;  %s723_s23 = smov 3  ;;  %v624_v53 = vsel %vm463_vm2, %v2144_v38, %v619_v43  ;;  %s690_s24 = smov 192 }
  0x13   :  { %v2152_v40 = vld [vmem:[%s4529_s0 + $0x209] ss:$16 sm:%s657_s17]   ;;  %v2129_v48 = vld [vmem:[%s4529_s0 + $0x101] ss:$16 sm:%s552_s2]   ;;  %s726_s25 = smov 12  ;;  %s562_s28 = smov 3 }
  0x14   :  { %v2153_v46 = vld [vmem:[%s4529_s0 + $0x209] ss:$16 sm:%s662_s30]   ;;  %v660_v49 = vsel %vm453_vm0, %v2152_v40, %v2151_v39  ;;  %v2156_v51 = vld [vmem:[%s4529_s0 + $0x281] ss:$16 sm:%s677_s7]   ;;  %v555_v54 = vsel %vm463_vm2, %v2129_v48, %v550_v50  ;;  %s565_s30 = smov 12  ;;  %s570_s6 = smov 48 }
  0x15   :  { %v2157_v52 = vld [vmem:[%s4529_s0 + $0x281] ss:$16 sm:%s680_s8]   ;;  %v2154_v55 = vld [vmem:[%s4529_s0 + $0x209] ss:$16 sm:%s667_s15]   ;;  %v665_v56 = vsel %vm458_vm1, %v2153_v46, %v660_v49  ;;  %s575_s7 = smov 192  ;;  %s731_s12 = smov 48 }
  0x16   :  { %602 = vrot.lane.b32.xlu0 %v601_v42, %s2427_s29  ;;  %556 = vrot.lane.b32.xlu2 %v555_v54, %s2427_s29  ;;  %v683_v57 = vsel %vm453_vm0, %v2157_v52, %v2156_v51  ;;  %v2158_v58 = vld [vmem:[%s4529_s0 + $0x281] ss:$16 sm:%s685_s22]   ;;  %s746_s17 = smov 3  ;;  %s749_s18 = smov 12  ;;  %v670_v0 = vsel %vm463_vm2, %v2154_v55, %v665_v56 }
  0x17   :  { %v2166_v59 = vld [vmem:[%s4529_s0 + $0x301] ss:$16 sm:%s723_s23]   ;;  %v2131_v62 = vld [vmem:[%s4529_s0 + $0x109] ss:$16 sm:%s562_s28]   ;;  %v688_v1 = vsel %vm458_vm1, %v2158_v58, %v683_v57  ;;  %s736_s19 = smov 192  ;;  %s754_s26 = smov 48 }
  0x18   :  { %v2159_v60 = vld [vmem:[%s4529_s0 + $0x281] ss:$16 sm:%s690_s24]   ;;  %v2132_v63 = vld [vmem:[%s4529_s0 + $0x109] ss:$16 sm:%s565_s30]   ;;  %s792_s3 = smov 3  ;;  %s795_s4 = smov 12 }
  0x19   :  { %v2167_v61 = vld [vmem:[%s4529_s0 + $0x301] ss:$16 sm:%s726_s25]   ;;  %v568_v2 = vsel %vm453_vm0, %v2132_v63, %v2131_v62  ;;  %v2133_v3 = vld [vmem:[%s4529_s0 + $0x109] ss:$16 sm:%s570_s6]   ;;  %v693_v11 = vsel %vm463_vm2, %v2159_v60, %v688_v1  ;;  %s634_s10 = smov 12  ;;  %s639_s11 = smov 48 }
  0x1a   :  { %625 = vrot.lane.b32.xlu1 %v624_v53, %s2427_s29  ;;  %v2134_v4 = vld [vmem:[%s4529_s0 + $0x109] ss:$16 sm:%s575_s7]   ;;  %v573_v6 = vsel %vm458_vm1, %v2133_v3, %v568_v2  ;;  %v729_v7 = vsel %vm453_vm0, %v2167_v61, %v2166_v59  ;;  %s631_s7 = smov 3  ;;  %s815_s25 = smov 3 }
  0x1b   :  { %v2168_v5 = vld [vmem:[%s4529_s0 + $0x301] ss:$16 sm:%s731_s12]   ;;  %v578_v8 = vsel %vm463_vm2, %v2134_v4, %v573_v6  ;;  %v2171_v9 = vld [vmem:[%s4529_s0 + $0x309] ss:$16 sm:%s746_s17]   ;;  %s759_s12 = smov 192  ;;  %s644_s17 = smov 192 }
  0x1c   :  { %v2172_v10 = vld [vmem:[%s4529_s0 + $0x309] ss:$16 sm:%s749_s18]   ;;  %v2169_v12 = vld [vmem:[%s4529_s0 + $0x301] ss:$16 sm:%s736_s19]   ;;  %v734_v14 = vsel %vm458_vm1, %v2168_v5, %v729_v7  ;;  %s800_s18 = smov 48  ;;  %s805_s30 = smov 192 }
  0x1d   :  { %v2173_v13 = vld [vmem:[%s4529_s0 + $0x309] ss:$16 sm:%s754_s26]   ;;  %v752_v15 = vsel %vm453_vm0, %v2172_v10, %v2171_v9  ;;  %v2146_v18 = vld [vmem:[%s4529_s0 + $0x201] ss:$16 sm:%s631_s7]   ;;  %s818_s26 = smov 12  ;;  %v739_v21 = vsel %vm463_vm2, %v2169_v12, %v734_v14  ;;  %s823_s6 = smov 48 }
  0x1e   :  { %671 = vrot.lane.b32.xlu0 %v670_v0, %s2427_s29  ;;  %579 = vrot.lane.b32.xlu2 %v578_v8, %s2427_s29  ;;  %v2181_v16 = vld [vmem:[%s4529_s0 + $0x389] ss:$16 sm:%s792_s3]   ;;  %v757_v22 = vsel %vm458_vm1, %v2173_v13, %v752_v15  ;;  %s861_s7 = smov 3  ;;  %s700_s13 = smov 3 }
  0x1f   :  { %v2182_v17 = vld [vmem:[%s4529_s0 + $0x389] ss:$16 sm:%s795_s4]   ;;  %v2147_v19 = vld [vmem:[%s4529_s0 + $0x201] ss:$16 sm:%s634_s10]   ;;  %s703_s16 = smov 12  ;;  %s708_s19 = smov 48 }
  0x20   :  { %v2148_v20 = vld [vmem:[%s4529_s0 + $0x201] ss:$16 sm:%s639_s11]   ;;  %v2174_v23 = vld [vmem:[%s4529_s0 + $0x309] ss:$16 sm:%s759_s12]   ;;  %v637_v24 = vsel %vm453_vm0, %v2147_v19, %v2146_v18  ;;  %v798_v28 = vsel %vm453_vm0, %v2182_v17, %v2181_v16  ;;  %s864_s12 = smov 12  ;;  %s713_s20 = smov 192 }
  0x21   :  { %v2149_v25 = vld [vmem:[%s4529_s0 + $0x201] ss:$16 sm:%s644_s17]   ;;  %v2183_v26 = vld [vmem:[%s4529_s0 + $0x389] ss:$16 sm:%s800_s18]   ;;  %v642_v27 = vsel %vm458_vm1, %v2148_v20, %v637_v24  ;;  %v762_v32 = vsel %vm463_vm2, %v2174_v23, %v757_v22  ;;  %s828_s21 = smov 192  ;;  %s869_s28 = smov 48 }
  0x22   :  { %694 = vrot.lane.b32.xlu1 %v693_v11, %s2427_s29  ;;  %v647_v29 = vsel %vm463_vm2, %v2149_v25, %v642_v27  ;;  %v2186_v30 = vld [vmem:[%s4529_s0 + $0x3] ss:$16 sm:%s815_s25]   ;;  %v803_v35 = vsel %vm458_vm1, %v2183_v26, %v798_v28  ;;  %s887_s8 = smov 12  ;;  %s874_s11 = smov 192 }
  0x23   :  { %v2187_v31 = vld [vmem:[%s4529_s0 + $0x3] ss:$16 sm:%s818_s26]   ;;  %v2184_v33 = vld [vmem:[%s4529_s0 + $0x389] ss:$16 sm:%s805_s30]   ;;  %s892_s14 = smov 48  ;;  %s930_s15 = smov 3 }
  0x24   :  { %v2188_v34 = vld [vmem:[%s4529_s0 + $0x3] ss:$16 sm:%s823_s6]   ;;  %v821_v36 = vsel %vm453_vm0, %v2187_v31, %v2186_v30  ;;  %v2161_v39 = vld [vmem:[%s4529_s0 + $0x289] ss:$16 sm:%s700_s13]   ;;  %v808_v44 = vsel %vm463_vm2, %v2184_v33, %v803_v35  ;;  %s777_s24 = smov 48  ;;  %s933_s27 = smov 12 }
  0x25   :  { %v2196_v37 = vld [vmem:[%s4529_s0 + $0x83] ss:$16 sm:%s861_s7]   ;;  %v2162_v40 = vld [vmem:[%s4529_s0 + $0x289] ss:$16 sm:%s703_s16]   ;;  %s884_s7 = smov 3  ;;  %v826_v45 = vsel %vm458_vm1, %v2188_v34, %v821_v36  ;;  %s897_s30 = smov 192 }
  0x26   :  { %740 = vrot.lane.b32.xlu0 %v739_v21, %s2427_s29  ;;  %648 = vrot.lane.b32.xlu2 %v647_v29, %s2427_s29  ;;  %v2197_v38 = vld [vmem:[%s4529_s0 + $0x83] ss:$16 sm:%s864_s12]   ;;  %v706_v41 = vsel %vm453_vm0, %v2162_v40, %v2161_v39  ;;  %s956_s16 = smov 12  ;;  %s838_s23 = smov 3 }
  0x27   :  { %v2163_v42 = vld [vmem:[%s4529_s0 + $0x289] ss:$16 sm:%s708_s19]   ;;  %v2189_v46 = vld [vmem:[%s4529_s0 + $0x3] ss:$16 sm:%s828_s21]   ;;  %v867_v50 = vsel %vm453_vm0, %v2197_v38, %v2196_v37  ;;  %s772_s21 = smov 12  ;;  %s943_s19 = smov 192 }
  0x28   :  { %v2164_v43 = vld [vmem:[%s4529_s0 + $0x289] ss:$16 sm:%s713_s20]   ;;  %v711_v47 = vsel %vm458_vm1, %v2163_v42, %v706_v41  ;;  %v2198_v48 = vld [vmem:[%s4529_s0 + $0x83] ss:$16 sm:%s869_s28]   ;;  %s769_s20 = smov 3  ;;  %v831_v53 = vsel %vm463_vm2, %v2189_v46, %v826_v45  ;;  %s782_s28 = smov 192 }
  0x29   :  { %v716_v49 = vsel %vm463_vm2, %v2164_v43, %v711_v47  ;;  %v2201_v51 = vld [vmem:[%s4529_s0 + $0x8b] ss:$16 sm:%s884_s7]   ;;  %v2199_v54 = vld [vmem:[%s4529_s0 + $0x83] ss:$16 sm:%s874_s11]   ;;  %v872_v56 = vsel %vm458_vm1, %v2198_v48, %v867_v50  ;;  %s851_s6 = smov 192  ;;  %s999_s7 = smov 3 }
  0x2a   :  { %763 = vrot.lane.b32.xlu1 %v762_v32, %s2427_s29  ;;  %v2202_v52 = vld [vmem:[%s4529_s0 + $0x8b] ss:$16 sm:%s887_s8]   ;;  %s938_s8 = smov 48  ;;  %v877_v2 = vsel %vm463_vm2, %v2199_v54, %v872_v56  ;;  %s966_s11 = smov 192 }
  0x2b   :  { %v2203_v55 = vld [vmem:[%s4529_s0 + $0x8b] ss:$16 sm:%s892_s14]   ;;  %v890_v57 = vsel %vm453_vm0, %v2202_v52, %v2201_v51  ;;  %v2176_v59 = vld [vmem:[%s4529_s0 + $0x381] ss:$16 sm:%s769_s20]   ;;  %s961_s20 = smov 48  ;;  %s910_s3 = smov 12 }
  0x2c   :  { %v2211_v58 = vld [vmem:[%s4529_s0 + $0x10b] ss:$16 sm:%s930_s15]   ;;  %v2177_v60 = vld [vmem:[%s4529_s0 + $0x381] ss:$16 sm:%s772_s21]   ;;  %s953_s15 = smov 3  ;;  %v895_v3 = vsel %vm458_vm1, %v2203_v55, %v890_v57  ;;  %s915_s9 = smov 48 }
  0x2d   :  { %v775_v61 = vsel %vm453_vm0, %v2177_v60, %v2176_v59  ;;  %v2178_v62 = vld [vmem:[%s4529_s0 + $0x381] ss:$16 sm:%s777_s24]   ;;  %v2212_v63 = vld [vmem:[%s4529_s0 + $0x10b] ss:$16 sm:%s933_s27]   ;;  %s1025_s24 = smov 12  ;;  %s1012_s27 = smov 192 }
  0x2e   :  { %809 = vrot.lane.b32.xlu0 %v808_v44, %s2427_s29  ;;  %717 = vrot.lane.b32.xlu2 %v716_v49, %s2427_s29  ;;  %v780_v0 = vsel %vm458_vm1, %v2178_v62, %v775_v61  ;;  %v2179_v1 = vld [vmem:[%s4529_s0 + $0x381] ss:$16 sm:%s782_s28]   ;;  %v936_v7 = vsel %vm453_vm0, %v2212_v63, %v2211_v58  ;;  %s841_s28 = smov 12  ;;  %s920_s14 = smov 192 }
  0x2f   :  { %v2204_v4 = vld [vmem:[%s4529_s0 + $0x8b] ss:$16 sm:%s897_s30]   ;;  %v785_v6 = vsel %vm463_vm2, %v2179_v1, %v780_v0  ;;  %v2216_v8 = vld [vmem:[%s4529_s0 + $0x183] ss:$16 sm:%s953_s15]   ;;  %s846_s30 = smov 48  ;;  %s1068_s15 = smov 3 }
  0x30   :  { %v2213_v5 = vld [vmem:[%s4529_s0 + $0x10b] ss:$16 sm:%s938_s8]   ;;  %v2217_v9 = vld [vmem:[%s4529_s0 + $0x183] ss:$16 sm:%s956_s16]   ;;  %v900_v10 = vsel %vm463_vm2, %v2204_v4, %v895_v3  ;;  %s1002_s8 = smov 12  ;;  %s1007_s16 = smov 48 }
  0x31   :  { %v2214_v11 = vld [vmem:[%s4529_s0 + $0x10b] ss:$16 sm:%s943_s19]   ;;  %v2218_v12 = vld [vmem:[%s4529_s0 + $0x183] ss:$16 sm:%s961_s20]   ;;  %v941_v14 = vsel %vm458_vm1, %v2213_v5, %v936_v7  ;;  %v959_v15 = vsel %vm453_vm0, %v2217_v9, %v2216_v8  ;;  %s1035_s21 = smov 192  ;;  %s1094_s4 = smov 12 }
  0x32   :  { %832 = vrot.lane.b32.xlu1 %v831_v53, %s2427_s29  ;;  %v2191_v13 = vld [vmem:[%s4529_s0 + $0xb] ss:$16 sm:%s838_s23]   ;;  %s1022_s23 = smov 3  ;;  %v946_v23 = vsel %vm463_vm2, %v2214_v11, %v941_v14  ;;  %v964_v24 = vsel %vm458_vm1, %v2218_v12, %v959_v15  ;;  %s976_s5 = smov 3 }
  0x33   :  { %v2192_v16 = vld [vmem:[%s4529_s0 + $0xb] ss:$16 sm:%s841_s28]   ;;  %v2226_v20 = vld [vmem:[%s4529_s0 + $0x203] ss:$16 sm:%s999_s7]   ;;  %s907_s28 = smov 3  ;;  %s984_s13 = smov 48 }
  0x34   :  { %v2193_v17 = vld [vmem:[%s4529_s0 + $0xb] ss:$16 sm:%s846_s30]   ;;  %v844_v18 = vsel %vm453_vm0, %v2192_v16, %v2191_v13  ;;  %v2227_v21 = vld [vmem:[%s4529_s0 + $0x203] ss:$16 sm:%s1002_s8]   ;;  %s1030_s8 = smov 48  ;;  %s1099_s17 = smov 48 }
  0x35   :  { %v2194_v19 = vld [vmem:[%s4529_s0 + $0xb] ss:$16 sm:%s851_s6]   ;;  %v849_v22 = vsel %vm458_vm1, %v2193_v17, %v844_v18  ;;  %v2219_v25 = vld [vmem:[%s4529_s0 + $0x183] ss:$16 sm:%s966_s11]   ;;  %v1005_v28 = vsel %vm453_vm0, %v2227_v21, %v2226_v20  ;;  %s989_s22 = smov 192  ;;  %s1160_s7 = smov 3 }
  0x36   :  { %878 = vrot.lane.b32.xlu0 %v877_v2, %s2427_s29  ;;  %786 = vrot.lane.b32.xlu2 %v785_v6, %s2427_s29  ;;  %v2228_v26 = vld [vmem:[%s4529_s0 + $0x203] ss:$16 sm:%s1007_s16]   ;;  %v854_v27 = vsel %vm463_vm2, %v2194_v19, %v849_v22  ;;  %v969_v31 = vsel %vm463_vm2, %v2219_v25, %v964_v24  ;;  %s1071_s16 = smov 12  ;;  %s1053_s19 = smov 48 }
  0x37   :  { %v2231_v29 = vld [vmem:[%s4529_s0 + $0x20b] ss:$16 sm:%s1022_s23]   ;;  %v2229_v32 = vld [vmem:[%s4529_s0 + $0x203] ss:$16 sm:%s1012_s27]   ;;  %v1010_v35 = vsel %vm458_vm1, %v2228_v26, %v1005_v28  ;;  %s1091_s27 = smov 3  ;;  %s1137_s23 = smov 3 }
  0x38   :  { %v2232_v30 = vld [vmem:[%s4529_s0 + $0x20b] ss:$16 sm:%s1025_s24]   ;;  %v2206_v33 = vld [vmem:[%s4529_s0 + $0x103] ss:$16 sm:%s907_s28]   ;;  %s1076_s24 = smov 48  ;;  %v1015_v44 = vsel %vm463_vm2, %v2229_v32, %v1010_v35  ;;  %s1168_s25 = smov 48 }
  0x39   :  { %v2207_v34 = vld [vmem:[%s4529_s0 + $0x103] ss:$16 sm:%s910_s3]   ;;  %v1028_v36 = vsel %vm453_vm0, %v2232_v30, %v2231_v29  ;;  %v2233_v37 = vld [vmem:[%s4529_s0 + $0x20b] ss:$16 sm:%s1030_s8]   ;;  %s979_s8 = smov 12  ;;  %s1104_s3 = smov 192 }
  0x3a   :  { %901 = vrot.lane.b32.xlu1 %v900_v10, %s2427_s29  ;;  %v913_v38 = vsel %vm453_vm0, %v2207_v34, %v2206_v33  ;;  %v2208_v39 = vld [vmem:[%s4529_s0 + $0x103] ss:$16 sm:%s915_s9]   ;;  %v1033_v45 = vsel %vm458_vm1, %v2233_v37, %v1028_v36  ;;  %s1209_s6 = smov 12  ;;  %s1173_s11 = smov 192  ;;  %v2962_v35 = vld [vmem:[%s4529_s0] ss:$2 sm:$0xff]  }
  0x3b   :  { %v918_v40 = vsel %vm458_vm1, %v2208_v39, %v913_v38  ;;  %v2209_v41 = vld [vmem:[%s4529_s0 + $0x103] ss:$16 sm:%s920_s14]   ;;  %v2241_v42 = vld [vmem:[%s4529_s0 + $0x28b] ss:$16 sm:%s1068_s15]   ;;  %s1081_s14 = smov 192  ;;  %s1214_s12 = smov 48 }
  0x3c   :  { %v2242_v43 = vld [vmem:[%s4529_s0 + $0x28b] ss:$16 sm:%s1071_s16]   ;;  %v923_v48 = vsel %vm463_vm2, %v2209_v41, %v918_v40  ;;  %v2246_v49 = vld [vmem:[%s4529_s0 + $0x303] ss:$16 sm:%s1091_s27]   ;;  %s1229_s15 = smov 3  ;;  %s1114_s16 = smov 3 }
  0x3d   :  { %v2234_v46 = vld [vmem:[%s4529_s0 + $0x20b] ss:$16 sm:%s1035_s21]   ;;  %v1074_v50 = vsel %vm453_vm0, %v2242_v43, %v2241_v42  ;;  %v2247_v51 = vld [vmem:[%s4529_s0 + $0x303] ss:$16 sm:%s1094_s4]   ;;  %s1145_s4 = smov 48  ;;  %s1232_s21 = smov 12 }
  0x3e   :  { %947 = vrot.lane.b32.xlu0 %v946_v23, %s2427_s29  ;;  %855 = vrot.lane.b32.xlu2 %v854_v27, %s2427_s29  ;;  %v2243_v47 = vld [vmem:[%s4529_s0 + $0x28b] ss:$16 sm:%s1076_s24]   ;;  %v1038_v53 = vsel %vm463_vm2, %v2234_v46, %v1033_v45  ;;  %s1140_s24 = smov 12  ;;  %v1097_v59 = vsel %vm453_vm0, %v2247_v51, %v2246_v49  ;;  %s1122_s27 = smov 48 }
  0x3f   :  { %v2221_v52 = vld [vmem:[%s4529_s0 + $0x18b] ss:$16 sm:%s976_s5]   ;;  %v1079_v57 = vsel %vm458_vm1, %v2243_v47, %v1074_v50  ;;  %v2248_v60 = vld [vmem:[%s4529_s0 + $0x303] ss:$16 sm:%s1099_s17]   ;;  %s1206_s5 = smov 3  ;;  %s1242_s10 = smov 192 }
  0x40   :  { %v2222_v54 = vld [vmem:[%s4529_s0 + $0x18b] ss:$16 sm:%s979_s8]   ;;  %s1163_s8 = smov 12  ;;  %v2256_v63 = vld [vmem:[%s4529_s0 + $0x383] ss:$16 sm:%s1137_s23]   ;;  %v1102_v2 = vsel %vm458_vm1, %v2248_v60, %v1097_v59  ;;  %s1183_s23 = smov 3 }
  0x41   :  { %v982_v55 = vsel %vm453_vm0, %v2222_v54, %v2221_v52  ;;  %v2223_v56 = vld [vmem:[%s4529_s0 + $0x18b] ss:$16 sm:%s984_s13]   ;;  %v2257_v0 = vld [vmem:[%s4529_s0 + $0x383] ss:$16 sm:%s1140_s24]   ;;  %s1045_s13 = smov 3  ;;  %s1150_s24 = smov 192 }
  0x42   :  { %970 = vrot.lane.b32.xlu1 %v969_v31, %s2427_s29  ;;  %v2244_v58 = vld [vmem:[%s4529_s0 + $0x28b] ss:$16 sm:%s1081_s14]   ;;  %v987_v61 = vsel %vm458_vm1, %v2223_v56, %v982_v55  ;;  %s1048_s14 = smov 12  ;;  %v1143_v8 = vsel %vm453_vm0, %v2257_v0, %v2256_v63  ;;  %s1186_s26 = smov 12 }
  0x43   :  { %v2224_v62 = vld [vmem:[%s4529_s0 + $0x18b] ss:$16 sm:%s989_s22]   ;;  %v1084_v1 = vsel %vm463_vm2, %v2244_v58, %v1079_v57  ;;  %v2249_v3 = vld [vmem:[%s4529_s0 + $0x303] ss:$16 sm:%s1104_s3]   ;;  %s1117_s22 = smov 12  ;;  %s1352_s2 = smov 48 }
  0x44   :  { %v2258_v4 = vld [vmem:[%s4529_s0 + $0x383] ss:$16 sm:%s1145_s4]   ;;  %v992_v5 = vsel %vm463_vm2, %v2224_v62, %v987_v61  ;;  %v2261_v6 = vld [vmem:[%s4529_s0 + $0x38b] ss:$16 sm:%s1160_s7]   ;;  %v1107_v11 = vsel %vm463_vm2, %v2249_v3, %v1102_v2  ;;  %s1058_s4 = smov 192  ;;  %s1237_s7 = smov 48 }
  0x45   :  { %v2262_v7 = vld [vmem:[%s4529_s0 + $0x38b] ss:$16 sm:%s1163_s8]   ;;  %v2236_v9 = vld [vmem:[%s4529_s0 + $0x283] ss:$16 sm:%s1045_s13]   ;;  %v1148_v14 = vsel %vm458_vm1, %v2258_v4, %v1143_v8  ;;  %s1127_s13 = smov 192  ;;  %s3022_s3 = smov 192 }
  0x46   :  { %1016 = vrot.lane.b32.xlu0 %v1015_v44, %s2427_s29  ;;  %924 = vrot.lane.b32.xlu2 %v923_v48, %s2427_s29  ;;  %v2237_v10 = vld [vmem:[%s4529_s0 + $0x283] ss:$16 sm:%s1048_s14]   ;;  %v1166_v16 = vsel %vm453_vm0, %v2262_v7, %v2261_v6  ;;  %s1275_s14 = smov 3  ;;  %s3045_s17 = smov 192 }
  0x47   :  { %v1051_v12 = vsel %vm453_vm0, %v2237_v10, %v2236_v9  ;;  %v2238_v13 = vld [vmem:[%s4529_s0 + $0x283] ss:$16 sm:%s1053_s19]   ;;  %v2263_v17 = vld [vmem:[%s4529_s0 + $0x38b] ss:$16 sm:%s1168_s25]   ;;  %s3058_s25 = smov 12  ;;  %s1255_s20 = smov 12 }
  0x48   :  { %v2259_v15 = vld [vmem:[%s4529_s0 + $0x383] ss:$16 sm:%s1150_s24]   ;;  %v1056_v18 = vsel %vm458_vm1, %v2238_v13, %v1051_v12  ;;  %v2271_v20 = vld [vmem:[%s4529_s0 + $0xd] ss:$16 sm:%s1206_s5]   ;;  %v1171_v23 = vsel %vm458_vm1, %v2263_v17, %v1166_v16  ;;  %s1298_s5 = smov 3  ;;  %s1347_s24 = smov 12 }
  0x49   :  { %v2239_v19 = vld [vmem:[%s4529_s0 + $0x283] ss:$16 sm:%s1058_s4]   ;;  %v2272_v21 = vld [vmem:[%s4529_s0 + $0xd] ss:$16 sm:%s1209_s6]   ;;  %v1153_v22 = vsel %vm463_vm2, %v2259_v15, %v1148_v14  ;;  %s1219_s4 = smov 192  ;;  %s1301_s6 = smov 12 }
  0x4a   :  { %1039 = vrot.lane.b32.xlu1 %v1038_v53, %s2427_s29  ;;  %v2264_v24 = vld [vmem:[%s4529_s0 + $0x38b] ss:$16 sm:%s1173_s11]   ;;  %v1061_v26 = vsel %vm463_vm2, %v2239_v19, %v1056_v18  ;;  %v1212_v29 = vsel %vm453_vm0, %v2272_v21, %v2271_v20  ;;  %4 = vst.msk [vmem:[%s4530_s1] ss:$8 sm:$0xf] %vm3_vm3, %v2962_v35   ;;  %s1191_s11 = smov 48 }
  0x4b   :  { %v2273_v25 = vld [vmem:[%s4529_s0 + $0xd] ss:$16 sm:%s1214_s12]   ;;  %v2276_v27 = vld [vmem:[%s4529_s0 + $0x85] ss:$16 sm:%s1229_s15]   ;;  %v1176_v32 = vsel %vm463_vm2, %v2264_v24, %v1171_v23  ;;  %s1278_s15 = smov 12  ;;  %s1288_s12 = smov 192 }
  0x4c   :  { %v2251_v28 = vld [vmem:[%s4529_s0 + $0x30b] ss:$16 sm:%s1114_s16]   ;;  %v2277_v30 = vld [vmem:[%s4529_s0 + $0x85] ss:$16 sm:%s1232_s21]   ;;  %v1217_v36 = vsel %vm458_vm1, %v2273_v25, %v1212_v29  ;;  %s1375_s16 = smov 48  ;;  %s1260_s30 = smov 48 }
  0x4d   :  { %v2252_v31 = vld [vmem:[%s4529_s0 + $0x30b] ss:$16 sm:%s1117_s22]   ;;  %v2274_v37 = vld [vmem:[%s4529_s0 + $0xd] ss:$16 sm:%s1219_s4]   ;;  %v1235_v38 = vsel %vm453_vm0, %v2277_v30, %v2276_v27  ;;  %s1283_s22 = smov 48  ;;  %s1482_s18 = smov 3 }
  0x4e   :  { %1085 = vrot.lane.b32.xlu0 %v1084_v1, %s2427_s29  ;;  %993 = vrot.lane.b32.xlu2 %v992_v5, %s2427_s29  ;;  %v1120_v33 = vsel %vm453_vm0, %v2252_v31, %v2251_v28  ;;  %v2253_v34 = vld [vmem:[%s4529_s0 + $0x30b] ss:$16 sm:%s1122_s27]   ;;  %v1222_v44 = vsel %vm463_vm2, %v2274_v37, %v1217_v36  ;;  %s1196_s27 = smov 192  ;;  %s1321_s21 = smov 3 }
  0x4f   :  { %v2278_v39 = vld [vmem:[%s4529_s0 + $0x85] ss:$16 sm:%s1237_s7]   ;;  %v1125_v40 = vsel %vm458_vm1, %v2253_v34, %v1120_v33  ;;  %v2254_v41 = vld [vmem:[%s4529_s0 + $0x30b] ss:$16 sm:%s1127_s13]   ;;  %s1306_s13 = smov 48  ;;  %s1252_s7 = smov 3 }
  0x50   :  { %v2286_v42 = vld [vmem:[%s4529_s0 + $0x105] ss:$16 sm:%s1275_s14]   ;;  %v1240_v45 = vsel %vm458_vm1, %v2278_v39, %v1235_v38  ;;  %v1130_v48 = vsel %vm463_vm2, %v2254_v41, %v1125_v40  ;;  %v2291_v52 = vld [vmem:[%s4529_s0 + $0x10d] ss:$16 sm:%s1298_s5]   ;;  %s1426_s5 = smov 192  ;;  %s1574_s14 = smov 3 }
  0x51   :  { %v2287_v43 = vld [vmem:[%s4529_s0 + $0x105] ss:$16 sm:%s1278_s15]   ;;  %v2292_v53 = vld [vmem:[%s4529_s0 + $0x10d] ss:$16 sm:%s1301_s6]   ;;  %s1449_s15 = smov 192  ;;  %s1398_s6 = smov 48 }
  0x52   :  { %1108 = vrot.lane.b32.xlu1 %v1107_v11, %s2427_s29  ;;  %v2279_v46 = vld [vmem:[%s4529_s0 + $0x85] ss:$16 sm:%s1242_s10]   ;;  %v1281_v51 = vsel %vm453_vm0, %v2287_v43, %v2286_v42  ;;  %v3019_v57 = vld [vmem:[%s4529_s0 + $0x10] ss:$2 sm:$0xff]   ;;  %v1304_v60 = vsel %vm453_vm0, %v2292_v53, %v2291_v52  ;;  %s1367_s10 = smov 3  ;;  %s1587_s9 = smov 192 }
  0x53   :  { %v2288_v47 = vld [vmem:[%s4529_s0 + $0x105] ss:$16 sm:%s1283_s22]   ;;  %s1311_s22 = smov 192  ;;  %v1245_v54 = vsel %vm463_vm2, %v2279_v46, %v1240_v45  ;;  %1919 = vst.msk [vmem:[%s4530_s1 + $0x1] ss:$8 sm:$0xf] %vm3_vm3, %v3019_v57  }
  0x54   :  { %v2266_v49 = vld [vmem:[%s4529_s0 + $0x5] ss:$16 sm:%s1183_s23]   ;;  %s1344_s23 = smov 3  ;;  %v1286_v58 = vsel %vm458_vm1, %v2288_v47, %v1281_v51  ;;  %v2293_v61 = vld [vmem:[%s4529_s0 + $0x10d] ss:$16 sm:%s1306_s13]   ;;  %s1495_s13 = smov 192 }
  0x55   :  { %v2267_v50 = vld [vmem:[%s4529_s0 + $0x5] ss:$16 sm:%s1186_s26]   ;;  %v2294_v62 = vld [vmem:[%s4529_s0 + $0x10d] ss:$16 sm:%s1311_s22]   ;;  %v1309_v5 = vsel %vm458_vm1, %v2293_v61, %v1304_v60  ;;  %s1436_s22 = smov 3  ;;  %s1467_s8 = smov 48 }
  0x56   :  { %1154 = vrot.lane.b32.xlu0 %v1153_v22, %s2427_s29  ;;  %1062 = vrot.lane.b32.xlu2 %v1061_v26, %s2427_s29  ;;  %v1189_v55 = vsel %vm453_vm0, %v2267_v50, %v2266_v49  ;;  %v2268_v56 = vld [vmem:[%s4529_s0 + $0x5] ss:$16 sm:%s1191_s11]   ;;  %s1370_s11 = smov 12  ;;  %v1314_v15 = vsel %vm463_vm2, %v2294_v62, %v1309_v5  ;;  %s1651_s4 = smov 48 }
  0x57   :  { %v2289_v59 = vld [vmem:[%s4529_s0 + $0x105] ss:$16 sm:%s1288_s12]   ;;  %v1194_v63 = vsel %vm458_vm1, %v2268_v56, %v1189_v55  ;;  %v1921_v1 = vld [vmem:[%s4529_s0 + $0x20] ss:$2 sm:$0xff]   ;;  %v1924_v10 = vld [vmem:[%s4529_s0 + $0x30] ss:$2 sm:$0xff]  }
  0x58   :  { %v2269_v0 = vld [vmem:[%s4529_s0 + $0x5] ss:$16 sm:%s1196_s27]   ;;  %v2301_v2 = vld [vmem:[%s4529_s0 + $0x18d] ss:$16 sm:%s1344_s23]   ;;  %v1291_v4 = vsel %vm463_vm2, %v2289_v59, %v1286_v58  ;;  %s1439_s27 = smov 12  ;;  %s1444_s12 = smov 48 }
  0x59   :  { %v2302_v3 = vld [vmem:[%s4529_s0 + $0x18d] ss:$16 sm:%s1347_s24]   ;;  %s3056_s24 = smov 3  ;;  %v2306_v7 = vld [vmem:[%s4529_s0 + $0x205] ss:$16 sm:%s1367_s10]   ;;  %v1199_v9 = vsel %vm463_vm2, %v2269_v0, %v1194_v63  ;;  %s1324_s23 = smov 12 }
  0x5a   :  { %1177 = vrot.lane.b32.xlu1 %v1176_v32, %s2427_s29  ;;  %v2303_v6 = vld [vmem:[%s4529_s0 + $0x18d] ss:$16 sm:%s1352_s2]   ;;  %1922 = vst.msk [vmem:[%s4530_s1 + $0x2] ss:$8 sm:$0xf] %vm3_vm3, %v1921_v1   ;;  %v1350_v13 = vsel %vm453_vm0, %v2302_v3, %v2301_v2  ;;  %s1393_s2 = smov 12 }
  0x5b   :  { %v2307_v8 = vld [vmem:[%s4529_s0 + $0x205] ss:$16 sm:%s1370_s11]   ;;  %v1927_v11 = vld [vmem:[%s4529_s0 + $0x40] ss:$2 sm:$0xff]   ;;  %v1930_v12 = vld [vmem:[%s4529_s0 + $0x50] ss:$2 sm:$0xff]   ;;  %v1355_v20 = vsel %vm458_vm1, %v2303_v6, %v1350_v13 }
  0x5c   :  { %1925 = vst.msk [vmem:[%s4530_s1 + $0x3] ss:$8 sm:$0xf] %vm3_vm3, %v1924_v10   ;;  %v1933_v14 = vld [vmem:[%s4529_s0 + $0x60] ss:$2 sm:$0xff]   ;;  %v1373_v21 = vsel %vm453_vm0, %v2307_v8, %v2306_v7  ;;  %s1403_s10 = smov 192 }
  0x5d   :  { %v2304_v16 = vld [vmem:[%s4529_s0 + $0x18d] ss:$16 sm:%s3022_s3]   ;;  %v2308_v17 = vld [vmem:[%s4529_s0 + $0x205] ss:$16 sm:%s1375_s16]   ;;  %s1513_s16 = smov 48  ;;  %s1472_s11 = smov 192 }
  0x5e   :  { %1223 = vrot.lane.b32.xlu0 %v1222_v44, %s2427_s29  ;;  %1131 = vrot.lane.b32.xlu2 %v1130_v48, %s2427_s29  ;;  %1928 = vst.msk [vmem:[%s4530_s1 + $0x4] ss:$8 sm:$0xf] %vm3_vm3, %v1927_v11   ;;  %v1936_v18 = vld [vmem:[%s4529_s0 + $0x70] ss:$2 sm:$0xff]   ;;  %v1360_v30 = vsel %vm463_vm2, %v2304_v16, %v1355_v20  ;;  %v1378_v31 = vsel %vm458_vm1, %v2308_v17, %v1373_v21  ;;  %s1531_s26 = smov 12 }
  0x5f   :  { %1931 = vst.msk [vmem:[%s4530_s1 + $0x5] ss:$8 sm:$0xf] %vm3_vm3, %v1930_v12   ;;  %v2281_v19 = vld [vmem:[%s4529_s0 + $0x8d] ss:$16 sm:%s1252_s7]   ;;  %s1265_s7 = smov 192 }
  0x60   :  { %v2316_v22 = vld [vmem:[%s4529_s0 + $0x285] ss:$16 sm:%s3056_s24]   ;;  %1934 = vst.msk [vmem:[%s4530_s1 + $0x6] ss:$8 sm:$0xf] %vm3_vm3, %v1933_v14   ;;  %s1712_s19 = smov 3 }
  0x61   :  { %v2317_v23 = vld [vmem:[%s4529_s0 + $0x285] ss:$16 sm:%s3058_s25]   ;;  %s1421_s25 = smov 48  ;;  %v2282_v24 = vld [vmem:[%s4529_s0 + $0x8d] ss:$16 sm:%s1255_s20]   ;;  %s1761_s20 = smov 12 }
  0x62   :  { %1246 = vrot.lane.b32.xlu1 %v1245_v54, %s2427_s29  ;;  %v2309_v25 = vld [vmem:[%s4529_s0 + $0x205] ss:$16 sm:%s3045_s17]   ;;  %1937 = vst.msk [vmem:[%s4530_s1 + $0x7] ss:$8 sm:$0xf] %vm3_vm3, %v1936_v18   ;;  %v1258_v26 = vsel %vm453_vm0, %v2282_v24, %v2281_v19  ;;  %s1508_s17 = smov 12 }
  0x63   :  { %v2283_v27 = vld [vmem:[%s4529_s0 + $0x8d] ss:$16 sm:%s1260_s30]   ;;  %5 = vst.msk [vmem:[%s4530_s1] ss:$8 sm:$0xf0] %vm3_vm3, %v2962_v35   ;;  %v1419_v35 = vsel %vm453_vm0, %v2317_v23, %v2316_v22  ;;  %v1383_v37 = vsel %vm463_vm2, %v2309_v25, %v1378_v31  ;;  %s1582_s30 = smov 48 }
  0x64   :  { %v1263_v28 = vsel %vm458_vm1, %v2283_v27, %v1258_v26  ;;  %v2284_v29 = vld [vmem:[%s4529_s0 + $0x8d] ss:$16 sm:%s1265_s7]   ;;  %v2318_v32 = vld [vmem:[%s4529_s0 + $0x285] ss:$16 sm:%s1421_s25]   ;;  %s1505_s25 = smov 3  ;;  %s1835_s24 = smov 48 }
  0x65   :  { %1920 = vst.msk [vmem:[%s4530_s1 + $0x1] ss:$8 sm:$0xf0] %vm3_vm3, %v3019_v57   ;;  %v1268_v33 = vsel %vm463_vm2, %v2284_v29, %v1263_v28  ;;  %v2321_v34 = vld [vmem:[%s4529_s0 + $0x28d] ss:$16 sm:%s1436_s22]   ;;  %s1485_s22 = smov 12  ;;  %v1424_v39 = vsel %vm458_vm1, %v2318_v32, %v1419_v35 }
  0x66   :  { %1292 = vrot.lane.b32.xlu0 %v1291_v4, %s2427_s29  ;;  %1200 = vrot.lane.b32.xlu2 %v1199_v9, %s2427_s29  ;;  %1923 = vst.msk [vmem:[%s4530_s1 + $0x2] ss:$8 sm:$0xf0] %vm3_vm3, %v1921_v1   ;;  %v1963_v46 = vld [vmem:[%s4529_s0 + $0x100] ss:$2 sm:$0xff]   ;;  %s1669_s28 = smov 12 }
  0x67   :  { %1926 = vst.msk [vmem:[%s4530_s1 + $0x3] ss:$8 sm:$0xf0] %vm3_vm3, %v1924_v10   ;;  %v2322_v36 = vld [vmem:[%s4529_s0 + $0x28d] ss:$16 sm:%s1439_s27]   ;;  %s1490_s27 = smov 48 }
  0x68   :  { %1929 = vst.msk [vmem:[%s4530_s1 + $0x4] ss:$8 sm:$0xf0] %vm3_vm3, %v1927_v11   ;;  %v2319_v38 = vld [vmem:[%s4529_s0 + $0x285] ss:$16 sm:%s1426_s5]   ;;  %v1442_v40 = vsel %vm453_vm0, %v2322_v36, %v2321_v34  ;;  %s1334_s5 = smov 192 }
  0x69   :  { %1932 = vst.msk [vmem:[%s4530_s1 + $0x5] ss:$8 sm:$0xf0] %vm3_vm3, %v1930_v12   ;;  %v2323_v41 = vld [vmem:[%s4529_s0 + $0x28d] ss:$16 sm:%s1444_s12]   ;;  %v1429_v48 = vsel %vm463_vm2, %v2319_v38, %v1424_v39  ;;  %s1909_s7 = smov 192 }
  0x6a   :  { %1315 = vrot.lane.b32.xlu1 %v1314_v15, %s2427_s29  ;;  %1935 = vst.msk [vmem:[%s4530_s1 + $0x6] ss:$8 sm:$0xf0] %vm3_vm3, %v1933_v14   ;;  %v2324_v42 = vld [vmem:[%s4529_s0 + $0x28d] ss:$16 sm:%s1449_s15]   ;;  %v1447_v49 = vsel %vm458_vm1, %v2323_v41, %v1442_v40  ;;  %s1738_s15 = smov 12 }
  0x6b   :  { %1938 = vst.msk [vmem:[%s4530_s1 + $0x7] ss:$8 sm:$0xf0] %vm3_vm3, %v1936_v18   ;;  %v2331_v43 = vld [vmem:[%s4529_s0 + $0x30d] ss:$16 sm:%s1482_s18]   ;;  %v1452_v55 = vsel %vm463_vm2, %v2324_v42, %v1447_v49  ;;  %s1643_s18 = smov 3 }
  0x6c   :  { %v2332_v45 = vld [vmem:[%s4529_s0 + $0x30d] ss:$16 sm:%s1485_s22]   ;;  %v1966_v47 = vld [vmem:[%s4529_s0 + $0x110] ss:$2 sm:$0xff]   ;;  %v1969_v51 = vld [vmem:[%s4529_s0 + $0x120] ss:$2 sm:$0xff]  }
  0x6d   :  { %v2333_v50 = vld [vmem:[%s4529_s0 + $0x30d] ss:$16 sm:%s1490_s27]   ;;  %1964 = vst.msk [vmem:[%s4530_s1 + $0x80] ss:$8 sm:$0xf] %vm3_vm3, %v1963_v46   ;;  %v1488_v53 = vsel %vm453_vm0, %v2332_v45, %v2331_v43  ;;  %s1329_s27 = smov 48 }
  0x6e   :  { %1361 = vrot.lane.b32.xlu0 %v1360_v30, %s2427_s29  ;;  %1269 = vrot.lane.b32.xlu2 %v1268_v33, %s2427_s29  ;;  %1967 = vst.msk [vmem:[%s4530_s1 + $0x81] ss:$8 sm:$0xf] %vm3_vm3, %v1966_v47   ;;  %v1972_v52 = vld [vmem:[%s4529_s0 + $0x130] ss:$2 sm:$0xff]   ;;  %v1493_v60 = vsel %vm458_vm1, %v2333_v50, %v1488_v53  ;;  %s1577_s22 = smov 12 }
  0x6f   :  { %1970 = vst.msk [vmem:[%s4530_s1 + $0x82] ss:$8 sm:$0xf] %vm3_vm3, %v1969_v51   ;;  %v1975_v54 = vld [vmem:[%s4529_s0 + $0x140] ss:$2 sm:$0xff]   ;;  %s1812_s12 = smov 48 }
  0x70   :  { %v557_v44 = vpop.permute.xlu2 %556   ;;  %v2334_v56 = vld [vmem:[%s4529_s0 + $0x30d] ss:$16 sm:%s1495_s13]   ;;  %1973 = vst.msk [vmem:[%s4530_s1 + $0x83] ss:$8 sm:$0xf] %vm3_vm3, %v1972_v52   ;;  %s1840_s13 = smov 192 }
  0x71   :  { %v1978_v57 = vld [vmem:[%s4529_s0 + $0x150] ss:$2 sm:$0xff]   ;;  %1976 = vst.msk [vmem:[%s4530_s1 + $0x84] ss:$8 sm:$0xf] %vm3_vm3, %v1975_v54   ;;  %v1498_v63 = vsel %vm463_vm2, %v2334_v56, %v1493_v60  ;;  %s1873_s3 = smov 3 }
  0x72   :  { %1384 = vrot.lane.b32.xlu1 %v1383_v37, %s2427_s29  ;;  %v1981_v58 = vld [vmem:[%s4529_s0 + $0x160] ss:$2 sm:$0xff]   ;;  %1979 = vst.msk [vmem:[%s4530_s1 + $0x85] ss:$8 sm:$0xf] %vm3_vm3, %v1978_v57  }
  0x73   :  { %v1984_v61 = vld [vmem:[%s4529_s0 + $0x170] ss:$2 sm:$0xff]   ;;  %1982 = vst.msk [vmem:[%s4530_s1 + $0x86] ss:$8 sm:$0xf] %vm3_vm3, %v1981_v58  }
  0x74   :  { %1985 = vst.msk [vmem:[%s4530_s1 + $0x87] ss:$8 sm:$0xf] %vm3_vm3, %v1984_v61   ;;  %v2296_v1 = vld [vmem:[%s4529_s0 + $0x185] ss:$16 sm:%s1321_s21]   ;;  %s1528_s21 = smov 3 }
  0x75   :  { %2130 = vst.msk [vmem:[%s4530_s1 + $0x80] sm:$0xff] %vm467_vm4, %v557_v44   ;;  %v1939_v2 = vld [vmem:[%s4529_s0 + $0x80] ss:$2 sm:$0xff]   ;;  %v2297_v4 = vld [vmem:[%s4529_s0 + $0x185] ss:$16 sm:%s1324_s23]   ;;  %s1646_s23 = smov 12 }
  0x76   :  { %1430 = vrot.lane.b32.xlu0 %v1429_v48, %s2427_s29  ;;  %1965 = vst.msk [vmem:[%s4530_s1 + $0x80] ss:$8 sm:$0xf0] %vm3_vm3, %v1963_v46   ;;  %v1942_v5 = vld [vmem:[%s4529_s0 + $0x90] ss:$2 sm:$0xff]   ;;  %v1327_v6 = vsel %vm453_vm0, %v2297_v4, %v2296_v1 }
  0x77   :  { %1968 = vst.msk [vmem:[%s4530_s1 + $0x81] ss:$8 sm:$0xf0] %vm3_vm3, %v1966_v47   ;;  %v2298_v7 = vld [vmem:[%s4529_s0 + $0x185] ss:$16 sm:%s1329_s27]   ;;  %s1390_s27 = smov 3 }
  0x78   :  { %v466_v59 = vpop.permute.xlu0 %465   ;;  %v3284_v62 = vpop.permute.xlu2 %579   ;;  %1971 = vst.msk [vmem:[%s4530_s1 + $0x82] ss:$8 sm:$0xf0] %vm3_vm3, %v1969_v51   ;;  %v1945_v8 = vld [vmem:[%s4529_s0 + $0xa0] ss:$2 sm:$0xff]   ;;  %v1332_v9 = vsel %vm458_vm1, %v2298_v7, %v1327_v6 }
  0x79   :  { %468 = vst.msk [vmem:[%s4530_s1] sm:$0xff] %vm467_vm4, %v466_v59   ;;  %v2299_v10 = vld [vmem:[%s4529_s0 + $0x185] ss:$16 sm:%s1334_s5]   ;;  %v1948_v11 = vld [vmem:[%s4529_s0 + $0xb0] ss:$2 sm:$0xff]   ;;  %s1518_s5 = smov 192 }
  0x7a   :  { %1453 = vrot.lane.b32.xlu1 %v1452_v55, %s2427_s29  ;;  %1974 = vst.msk [vmem:[%s4530_s1 + $0x83] ss:$8 sm:$0xf0] %vm3_vm3, %v1972_v52   ;;  %v1337_v12 = vsel %vm463_vm2, %v2299_v10, %v1332_v9  ;;  %v2336_v13 = vld [vmem:[%s4529_s0 + $0x385] ss:$16 sm:%s1505_s25]   ;;  %s1551_s25 = smov 3 }
  0x7b   :  { %1977 = vst.msk [vmem:[%s4530_s1 + $0x84] ss:$8 sm:$0xf0] %vm3_vm3, %v1975_v54   ;;  %v1951_v15 = vld [vmem:[%s4529_s0 + $0xc0] ss:$2 sm:$0xff]   ;;  %1338 = vrot.lane.b32.xlu2 %v1337_v12, %s2427_s29 }
  0x7c   :  { %v3295_v0 = vpop.permute.xlu1 %510   ;;  %1980 = vst.msk [vmem:[%s4530_s1 + $0x85] ss:$8 sm:$0xf0] %vm3_vm3, %v1978_v57   ;;  %v2337_v16 = vld [vmem:[%s4529_s0 + $0x385] ss:$16 sm:%s1508_s17]   ;;  %s1554_s17 = smov 12 }
  0x7d   :  { %1983 = vst.msk [vmem:[%s4530_s1 + $0x86] ss:$8 sm:$0xf0] %vm3_vm3, %v1981_v58   ;;  %v1954_v17 = vld [vmem:[%s4529_s0 + $0xd0] ss:$2 sm:$0xff]   ;;  %v1511_v18 = vsel %vm453_vm0, %v2337_v16, %v2336_v13 }
  0x7e   :  { %1499 = vrot.lane.b32.xlu0 %v1498_v63, %s2427_s29  ;;  %1986 = vst.msk [vmem:[%s4530_s1 + $0x87] ss:$8 sm:$0xf0] %vm3_vm3, %v1984_v61   ;;  %v2338_v19 = vld [vmem:[%s4529_s0 + $0x385] ss:$16 sm:%s1513_s16]   ;;  %s1559_s16 = smov 48 }
  0x7f   :  { %1940 = vst.msk [vmem:[%s4530_s1 + $0x40] ss:$8 sm:$0xf] %vm3_vm3, %v1939_v2   ;;  %v1957_v20 = vld [vmem:[%s4529_s0 + $0xe0] ss:$2 sm:$0xff]   ;;  %v1516_v21 = vsel %vm458_vm1, %v2338_v19, %v1511_v18 }
  0x80   :  { %v3324_v3 = vpop.permute.xlu0 %487   ;;  %1943 = vst.msk [vmem:[%s4530_s1 + $0x41] ss:$8 sm:$0xf] %vm3_vm3, %v1942_v5   ;;  %v2339_v22 = vld [vmem:[%s4529_s0 + $0x385] ss:$16 sm:%s1518_s5]   ;;  %s1564_s5 = smov 192  ;;  %v3426_v30 = vpop.permute.xlu2 %648  }
  0x81   :  { %1946 = vst.msk [vmem:[%s4530_s1 + $0x42] ss:$8 sm:$0xf] %vm3_vm3, %v1945_v8   ;;  %v1960_v23 = vld [vmem:[%s4529_s0 + $0xf0] ss:$2 sm:$0xff]   ;;  %v1521_v24 = vsel %vm463_vm2, %v2339_v22, %v1516_v21 }
  0x82   :  { %v2346_v25 = vld [vmem:[%s4529_s0 + $0x7] ss:$16 sm:%s1551_s25]   ;;  %1949 = vst.msk [vmem:[%s4530_s1 + $0x43] ss:$8 sm:$0xf] %vm3_vm3, %v1948_v11   ;;  %1522 = vrot.lane.b32.xlu1 %v1521_v24, %s2427_s29  ;;  %s1735_s25 = smov 3 }
  0x83   :  { %v2347_v26 = vld [vmem:[%s4529_s0 + $0x7] ss:$16 sm:%s1554_s17]   ;;  %1952 = vst.msk [vmem:[%s4530_s1 + $0x44] ss:$8 sm:$0xf] %vm3_vm3, %v1951_v15   ;;  %s1817_s17 = smov 192 }
  0x84   :  { %v3362_v14 = vpop.permute.xlu1 %533   ;;  %v1557_v28 = vsel %vm453_vm0, %v2347_v26, %v2346_v25  ;;  %v2348_v29 = vld [vmem:[%s4529_s0 + $0x7] ss:$16 sm:%s1559_s16]   ;;  %1955 = vst.msk [vmem:[%s4530_s1 + $0x45] ss:$8 sm:$0xf] %vm3_vm3, %v1954_v17   ;;  %s1766_s16 = smov 48 }
  0x85   :  { %v1562_v31 = vsel %vm458_vm1, %v2348_v29, %v1557_v28  ;;  %v2349_v32 = vld [vmem:[%s4529_s0 + $0x7] ss:$16 sm:%s1564_s5]   ;;  %1958 = vst.msk [vmem:[%s4530_s1 + $0x46] ss:$8 sm:$0xf] %vm3_vm3, %v1957_v20   ;;  %s1462_s5 = smov 12 }
  0x86   :  { %v1567_v33 = vsel %vm463_vm2, %v2349_v32, %v1562_v31  ;;  %1961 = vst.msk [vmem:[%s4530_s1 + $0x47] ss:$8 sm:$0xf] %vm3_vm3, %v1960_v23   ;;  %v2311_v34 = vld [vmem:[%s4529_s0 + $0x20d] ss:$16 sm:%s1390_s27]   ;;  %s1827_s27 = smov 3 }
  0x87   :  { %1568 = vrot.lane.b32.xlu0 %v1567_v33, %s2427_s29  ;;  %2120 = vst.msk [vmem:[%s4530_s1 + $0x40] sm:$0xff] %vm467_vm4, %v3295_v0   ;;  %v2312_v35 = vld [vmem:[%s4529_s0 + $0x20d] ss:$16 sm:%s1393_s2]   ;;  %s1771_s2 = smov 192 }
  0x88   :  { %v3416_v27 = vpop.permute.xlu0 %602   ;;  %1941 = vst.msk [vmem:[%s4530_s1 + $0x40] ss:$8 sm:$0xf0] %vm3_vm3, %v1939_v2   ;;  %v1987_v36 = vld [vmem:[%s4529_s0 + $0x180] ss:$2 sm:$0xff]   ;;  %v1396_v37 = vsel %vm453_vm0, %v2312_v35, %v2311_v34 }
  0x89   :  { %1944 = vst.msk [vmem:[%s4530_s1 + $0x41] ss:$8 sm:$0xf0] %vm3_vm3, %v1942_v5   ;;  %v2313_v38 = vld [vmem:[%s4529_s0 + $0x20d] ss:$16 sm:%s1398_s6]   ;;  %s1536_s6 = smov 48 }
  0x8a   :  { %1947 = vst.msk [vmem:[%s4530_s1 + $0x42] ss:$8 sm:$0xf0] %vm3_vm3, %v1945_v8   ;;  %v1990_v39 = vld [vmem:[%s4529_s0 + $0x190] ss:$2 sm:$0xff]   ;;  %v1401_v40 = vsel %vm458_vm1, %v2313_v38, %v1396_v37 }
  0x8b   :  { %1950 = vst.msk [vmem:[%s4530_s1 + $0x43] ss:$8 sm:$0xf0] %vm3_vm3, %v1948_v11   ;;  %v2314_v41 = vld [vmem:[%s4529_s0 + $0x20d] ss:$16 sm:%s1403_s10]   ;;  %s1656_s10 = smov 192 }
  0x8c   :  { %1953 = vst.msk [vmem:[%s4530_s1 + $0x44] ss:$8 sm:$0xf0] %vm3_vm3, %v1951_v15   ;;  %v1993_v42 = vld [vmem:[%s4529_s0 + $0x1a0] ss:$2 sm:$0xff]   ;;  %v1406_v43 = vsel %vm463_vm2, %v2314_v41, %v1401_v40  ;;  %v3561_v56 = vpop.permute.xlu1 %625  }
  0x8d   :  { %1956 = vst.msk [vmem:[%s4530_s1 + $0x45] ss:$8 sm:$0xf0] %vm3_vm3, %v1954_v17   ;;  %v2351_v44 = vld [vmem:[%s4529_s0 + $0xf] ss:$16 sm:%s1574_s14]   ;;  %1407 = vrot.lane.b32.xlu2 %v1406_v43, %s2427_s29  ;;  %s1620_s14 = smov 3 }
  0x8e   :  { %1959 = vst.msk [vmem:[%s4530_s1 + $0x46] ss:$8 sm:$0xf0] %vm3_vm3, %v1957_v20   ;;  %v1996_v45 = vld [vmem:[%s4529_s0 + $0x1b0] ss:$2 sm:$0xff]  }
  0x8f   :  { %1962 = vst.msk [vmem:[%s4530_s1 + $0x47] ss:$8 sm:$0xf0] %vm3_vm3, %v1960_v23   ;;  %v2352_v46 = vld [vmem:[%s4529_s0 + $0xf] ss:$16 sm:%s1577_s22]   ;;  %s1623_s22 = smov 12 }
  0x90   :  { %2115 = vst.msk [vmem:[%s4530_s1 + $0x20] sm:$0xff] %vm467_vm4, %v3324_v3   ;;  %v1999_v47 = vld [vmem:[%s4529_s0 + $0x1c0] ss:$2 sm:$0xff]   ;;  %v1580_v48 = vsel %vm453_vm0, %v2352_v46, %v2351_v44  ;;  %v2353_v49 = vld [vmem:[%s4529_s0 + $0xf] ss:$16 sm:%s1582_s30]   ;;  %s1628_s30 = smov 48  ;;  %v3563_v57 = vpop.permute.xlu0 %671  }
  0x91   :  { %2135 = vst.msk [vmem:[%s4530_s1 + $0xa0] sm:$0xff] %vm467_vm4, %v3284_v62   ;;  %v2002_v50 = vld [vmem:[%s4529_s0 + $0x1d0] ss:$2 sm:$0xff]   ;;  %v1585_v51 = vsel %vm458_vm1, %v2353_v49, %v1580_v48  ;;  %v2354_v52 = vld [vmem:[%s4529_s0 + $0xf] ss:$16 sm:%s1587_s9]   ;;  %s1633_s9 = smov 192  ;;  %v3584_v62 = vpop.permute.xlu2 %717  }
  0x92   :  { %2125 = vst.msk [vmem:[%s4530_s1 + $0x60] sm:$0xff] %vm467_vm4, %v3362_v14   ;;  %v2005_v53 = vld [vmem:[%s4529_s0 + $0x1e0] ss:$2 sm:$0xff]   ;;  %v1590_v54 = vsel %vm463_vm2, %v2354_v52, %v1585_v51  ;;  %v2361_v55 = vld [vmem:[%s4529_s0 + $0x8f] ss:$16 sm:%s1620_s14]   ;;  %s1758_s14 = smov 3 }
  0x93   :  { %1988 = vst.msk [vmem:[%s4530_s1 + $0xc0] ss:$8 sm:$0xf] %vm3_vm3, %v1987_v36   ;;  %v2008_v58 = vld [vmem:[%s4529_s0 + $0x1f0] ss:$2 sm:$0xff]   ;;  %1591 = vrot.lane.b32.xlu1 %v1590_v54, %s2427_s29 }
  0x94   :  { %1991 = vst.msk [vmem:[%s4530_s1 + $0xc1] ss:$8 sm:$0xf] %vm3_vm3, %v1990_v39   ;;  %v2362_v59 = vld [vmem:[%s4529_s0 + $0x8f] ss:$16 sm:%s1623_s22]   ;;  %v3727_v28 = vpop.permute.xlu1 %694   ;;  %s1794_s22 = smov 192 }
  0x95   :  { %1994 = vst.msk [vmem:[%s4530_s1 + $0xc2] ss:$8 sm:$0xf] %vm3_vm3, %v1993_v42   ;;  %v1626_v60 = vsel %vm453_vm0, %v2362_v59, %v2361_v55  ;;  %v2363_v61 = vld [vmem:[%s4529_s0 + $0x8f] ss:$16 sm:%s1628_s30]   ;;  %s1459_s30 = smov 3 }
  0x96   :  { %1997 = vst.msk [vmem:[%s4530_s1 + $0xc3] ss:$8 sm:$0xf] %vm3_vm3, %v1996_v45   ;;  %v1631_v63 = vsel %vm458_vm1, %v2363_v61, %v1626_v60  ;;  %v2364_v0 = vld [vmem:[%s4529_s0 + $0x8f] ss:$16 sm:%s1633_s9]   ;;  %s1807_s9 = smov 12 }
  0x97   :  { %2000 = vst.msk [vmem:[%s4530_s1 + $0xc4] ss:$8 sm:$0xf] %vm3_vm3, %v1999_v47   ;;  %v1636_v1 = vsel %vm463_vm2, %v2364_v0, %v1631_v63  ;;  %v2326_v2 = vld [vmem:[%s4529_s0 + $0x305] ss:$16 sm:%s1459_s30]   ;;  %s1904_s30 = smov 48 }
  0x98   :  { %2003 = vst.msk [vmem:[%s4530_s1 + $0xc5] ss:$8 sm:$0xf] %vm3_vm3, %v2002_v50   ;;  %1637 = vrot.lane.b32.xlu0 %v1636_v1, %s2427_s29  ;;  %v2327_v3 = vld [vmem:[%s4529_s0 + $0x305] ss:$16 sm:%s1462_s5]   ;;  %v3729_v29 = vpop.permute.xlu0 %740   ;;  %s1830_s5 = smov 12 }
  0x99   :  { %2006 = vst.msk [vmem:[%s4530_s1 + $0xc6] ss:$8 sm:$0xf] %vm3_vm3, %v2005_v53   ;;  %v2011_v4 = vld [vmem:[%s4529_s0 + $0x200] ss:$2 sm:$0xff]   ;;  %v1465_v5 = vsel %vm453_vm0, %v2327_v3, %v2326_v2 }
  0x9a   :  { %2009 = vst.msk [vmem:[%s4530_s1 + $0xc7] ss:$8 sm:$0xf] %vm3_vm3, %v2008_v58   ;;  %v2328_v6 = vld [vmem:[%s4529_s0 + $0x305] ss:$16 sm:%s1467_s8]   ;;  %s1781_s8 = smov 3 }
  0x9b   :  { %2140 = vst.msk [vmem:[%s4530_s1 + $0xc0] sm:$0xff] %vm467_vm4, %v3416_v27   ;;  %v2014_v7 = vld [vmem:[%s4529_s0 + $0x210] ss:$2 sm:$0xff]   ;;  %v1470_v8 = vsel %vm458_vm1, %v2328_v6, %v1465_v5  ;;  %v2329_v9 = vld [vmem:[%s4529_s0 + $0x305] ss:$16 sm:%s1472_s11]   ;;  %s1541_s11 = smov 192 }
  0x9c   :  { %1989 = vst.msk [vmem:[%s4530_s1 + $0xc0] ss:$8 sm:$0xf0] %vm3_vm3, %v1987_v36   ;;  %v2017_v10 = vld [vmem:[%s4529_s0 + $0x220] ss:$2 sm:$0xff]   ;;  %v1475_v11 = vsel %vm463_vm2, %v2329_v9, %v1470_v8  ;;  %v3977_v6 = vpop.permute.xlu1 %763  }
  0x9d   :  { %1992 = vst.msk [vmem:[%s4530_s1 + $0xc1] ss:$8 sm:$0xf0] %vm3_vm3, %v1990_v39   ;;  %v2366_v12 = vld [vmem:[%s4529_s0 + $0x107] ss:$16 sm:%s1643_s18]   ;;  %1476 = vrot.lane.b32.xlu2 %v1475_v11, %s2427_s29  ;;  %s1689_s18 = smov 3 }
  0x9e   :  { %1995 = vst.msk [vmem:[%s4530_s1 + $0xc2] ss:$8 sm:$0xf0] %vm3_vm3, %v1993_v42   ;;  %v2020_v13 = vld [vmem:[%s4529_s0 + $0x230] ss:$2 sm:$0xff]  }
  0x9f   :  { %1998 = vst.msk [vmem:[%s4530_s1 + $0xc3] ss:$8 sm:$0xf0] %vm3_vm3, %v1996_v45   ;;  %v2367_v14 = vld [vmem:[%s4529_s0 + $0x107] ss:$16 sm:%s1646_s23]   ;;  %s1692_s23 = smov 12 }
  0xa0   :  { %2001 = vst.msk [vmem:[%s4530_s1 + $0xc4] ss:$8 sm:$0xf0] %vm3_vm3, %v1999_v47   ;;  %v2023_v15 = vld [vmem:[%s4529_s0 + $0x240] ss:$2 sm:$0xff]   ;;  %v1649_v16 = vsel %vm453_vm0, %v2367_v14, %v2366_v12  ;;  %v3850_v47 = vpop.permute.xlu2 %786  }
  0xa1   :  { %2004 = vst.msk [vmem:[%s4530_s1 + $0xc5] ss:$8 sm:$0xf0] %vm3_vm3, %v2002_v50   ;;  %v2368_v17 = vld [vmem:[%s4529_s0 + $0x107] ss:$16 sm:%s1651_s4]   ;;  %s1697_s4 = smov 48 }
  0xa2   :  { %2007 = vst.msk [vmem:[%s4530_s1 + $0xc6] ss:$8 sm:$0xf0] %vm3_vm3, %v2005_v53   ;;  %v2026_v18 = vld [vmem:[%s4529_s0 + $0x250] ss:$2 sm:$0xff]   ;;  %v1654_v19 = vsel %vm458_vm1, %v2368_v17, %v1649_v16 }
  0xa3   :  { %2010 = vst.msk [vmem:[%s4530_s1 + $0xc7] ss:$8 sm:$0xf0] %vm3_vm3, %v2008_v58   ;;  %v2369_v20 = vld [vmem:[%s4529_s0 + $0x107] ss:$16 sm:%s1656_s10]   ;;  %s1702_s10 = smov 192 }
  0xa4   :  { %2012 = vst.msk [vmem:[%s4530_s1 + $0x100] ss:$8 sm:$0xf] %vm3_vm3, %v2011_v4   ;;  %v2029_v21 = vld [vmem:[%s4529_s0 + $0x260] ss:$2 sm:$0xff]   ;;  %v1659_v22 = vsel %vm463_vm2, %v2369_v20, %v1654_v19 }
  0xa5   :  { %2015 = vst.msk [vmem:[%s4530_s1 + $0x101] ss:$8 sm:$0xf] %vm3_vm3, %v2014_v7   ;;  %v2376_v23 = vld [vmem:[%s4529_s0 + $0x187] ss:$16 sm:%s1689_s18]   ;;  %1660 = vrot.lane.b32.xlu1 %v1659_v22, %s2427_s29  ;;  %s1789_s18 = smov 48 }
  0xa6   :  { %2018 = vst.msk [vmem:[%s4530_s1 + $0x102] ss:$8 sm:$0xf] %vm3_vm3, %v2017_v10   ;;  %v2032_v24 = vld [vmem:[%s4529_s0 + $0x270] ss:$2 sm:$0xff]  }
  0xa7   :  { %v2377_v25 = vld [vmem:[%s4529_s0 + $0x187] ss:$16 sm:%s1692_s23]   ;;  %2021 = vst.msk [vmem:[%s4530_s1 + $0x103] ss:$8 sm:$0xf] %vm3_vm3, %v2020_v13   ;;  %s1899_s23 = smov 12 }
  0xa8   :  { %v1695_v26 = vsel %vm453_vm0, %v2377_v25, %v2376_v23  ;;  %v2378_v27 = vld [vmem:[%s4529_s0 + $0x187] ss:$16 sm:%s1697_s4]   ;;  %2024 = vst.msk [vmem:[%s4530_s1 + $0x104] ss:$8 sm:$0xf] %vm3_vm3, %v2023_v15   ;;  %s1804_s4 = smov 3 }
  0xa9   :  { %v1700_v31 = vsel %vm458_vm1, %v2378_v27, %v1695_v26  ;;  %v2379_v32 = vld [vmem:[%s4529_s0 + $0x187] ss:$16 sm:%s1702_s10]   ;;  %2027 = vst.msk [vmem:[%s4530_s1 + $0x105] ss:$8 sm:$0xf] %vm3_vm3, %v2026_v18   ;;  %s1725_s10 = smov 192 }
  0xaa   :  { %v1705_v33 = vsel %vm463_vm2, %v2379_v32, %v1700_v31  ;;  %2030 = vst.msk [vmem:[%s4530_s1 + $0x106] ss:$8 sm:$0xf] %vm3_vm3, %v2029_v21   ;;  %v2038_v34 = vld [vmem:[%s4529_s0 + $0x290] ss:$2 sm:$0xff]  }
  0xab   :  { %1706 = vrot.lane.b32.xlu0 %v1705_v33, %s2427_s29  ;;  %2033 = vst.msk [vmem:[%s4530_s1 + $0x107] ss:$8 sm:$0xf] %vm3_vm3, %v2032_v24   ;;  %v2041_v35 = vld [vmem:[%s4529_s0 + $0x2a0] ss:$2 sm:$0xff]  }
  0xac   :  { %2150 = vst.msk [vmem:[%s4530_s1 + $0x100] sm:$0xff] %vm467_vm4, %v3426_v30   ;;  %v2035_v30 = vld [vmem:[%s4529_s0 + $0x280] ss:$2 sm:$0xff]   ;;  %v2044_v36 = vld [vmem:[%s4529_s0 + $0x2b0] ss:$2 sm:$0xff]  }
  0xad   :  { %2013 = vst.msk [vmem:[%s4530_s1 + $0x100] ss:$8 sm:$0xf0] %vm3_vm3, %v2011_v4   ;;  %v2047_v37 = vld [vmem:[%s4529_s0 + $0x2c0] ss:$2 sm:$0xff]  }
  0xae   :  { %2016 = vst.msk [vmem:[%s4530_s1 + $0x101] ss:$8 sm:$0xf0] %vm3_vm3, %v2014_v7   ;;  %v2341_v38 = vld [vmem:[%s4529_s0 + $0x38d] ss:$16 sm:%s1528_s21]   ;;  %v3979_v7 = vpop.permute.xlu0 %809   ;;  %s1666_s21 = smov 3 }
  0xaf   :  { %2019 = vst.msk [vmem:[%s4530_s1 + $0x102] ss:$8 sm:$0xf0] %vm3_vm3, %v2017_v10   ;;  %v2050_v39 = vld [vmem:[%s4529_s0 + $0x2d0] ss:$2 sm:$0xff]   ;;  %v3995_v10 = vpop.permute.xlu2 %855  }
  0xb0   :  { %2022 = vst.msk [vmem:[%s4530_s1 + $0x103] ss:$8 sm:$0xf0] %vm3_vm3, %v2020_v13   ;;  %v2342_v40 = vld [vmem:[%s4529_s0 + $0x38d] ss:$16 sm:%s1531_s26]   ;;  %s1715_s26 = smov 12 }
  0xb1   :  { %2025 = vst.msk [vmem:[%s4530_s1 + $0x104] ss:$8 sm:$0xf0] %vm3_vm3, %v2023_v15   ;;  %v2053_v41 = vld [vmem:[%s4529_s0 + $0x2e0] ss:$2 sm:$0xff]   ;;  %v1534_v42 = vsel %vm453_vm0, %v2342_v40, %v2341_v38 }
  0xb2   :  { %2028 = vst.msk [vmem:[%s4530_s1 + $0x105] ss:$8 sm:$0xf0] %vm3_vm3, %v2026_v18   ;;  %v2343_v43 = vld [vmem:[%s4529_s0 + $0x38d] ss:$16 sm:%s1536_s6]   ;;  %s1720_s6 = smov 48 }
  0xb3   :  { %2031 = vst.msk [vmem:[%s4530_s1 + $0x106] ss:$8 sm:$0xf0] %vm3_vm3, %v2029_v21   ;;  %v2056_v44 = vld [vmem:[%s4529_s0 + $0x2f0] ss:$2 sm:$0xff]   ;;  %v1539_v45 = vsel %vm458_vm1, %v2343_v43, %v1534_v42  ;;  %v4045_v21 = vpop.permute.xlu1 %832  }
  0xb4   :  { %2034 = vst.msk [vmem:[%s4530_s1 + $0x107] ss:$8 sm:$0xf0] %vm3_vm3, %v2032_v24   ;;  %v2344_v46 = vld [vmem:[%s4529_s0 + $0x38d] ss:$16 sm:%s1541_s11]   ;;  %s1784_s11 = smov 12 }
  0xb5   :  { %2145 = vst.msk [vmem:[%s4530_s1 + $0xe0] sm:$0xff] %vm467_vm4, %v3561_v56   ;;  %v1544_v48 = vsel %vm463_vm2, %v2344_v46, %v1539_v45  ;;  %v2381_v49 = vld [vmem:[%s4529_s0 + $0x18f] ss:$16 sm:%s1712_s19]   ;;  %v2059_v63 = vld [vmem:[%s4529_s0 + $0x300] ss:$2 sm:$0xff]   ;;  %s1896_s19 = smov 3 }
  0xb6   :  { %2155 = vst.msk [vmem:[%s4530_s1 + $0x120] sm:$0xff] %vm467_vm4, %v3563_v57   ;;  %1545 = vrot.lane.b32.xlu2 %v1544_v48, %s2427_s29  ;;  %v2382_v50 = vld [vmem:[%s4529_s0 + $0x18f] ss:$16 sm:%s1715_s26]   ;;  %v4047_v22 = vpop.permute.xlu0 %878   ;;  %s1748_s26 = smov 192 }
  0xb7   :  { %2037 = vst.msk [vmem:[%s4530_s1 + $0x140] ss:$8 sm:$0xf0] %vm3_vm3, %v2035_v30   ;;  %v1718_v51 = vsel %vm453_vm0, %v2382_v50, %v2381_v49  ;;  %v2383_v52 = vld [vmem:[%s4529_s0 + $0x18f] ss:$16 sm:%s1720_s6]   ;;  %v4065_v27 = vpop.permute.xlu2 %924  }
  0xb8   :  { %2040 = vst.msk [vmem:[%s4530_s1 + $0x141] ss:$8 sm:$0xf0] %vm3_vm3, %v2038_v34   ;;  %v1723_v53 = vsel %vm458_vm1, %v2383_v52, %v1718_v51  ;;  %v2384_v54 = vld [vmem:[%s4529_s0 + $0x18f] ss:$16 sm:%s1725_s10]  }
  0xb9   :  { %2043 = vst.msk [vmem:[%s4530_s1 + $0x142] ss:$8 sm:$0xf0] %vm3_vm3, %v2041_v35   ;;  %v1728_v55 = vsel %vm463_vm2, %v2384_v54, %v1723_v53  ;;  %v2391_v56 = vld [vmem:[%s4529_s0 + $0x20f] ss:$16 sm:%s1758_s14]   ;;  %s1597_s14 = smov 3 }
  0xba   :  { %2046 = vst.msk [vmem:[%s4530_s1 + $0x143] ss:$8 sm:$0xf0] %vm3_vm3, %v2044_v36   ;;  %1729 = vrot.lane.b32.xlu1 %v1728_v55, %s2427_s29  ;;  %v2392_v57 = vld [vmem:[%s4529_s0 + $0x20f] ss:$16 sm:%s1761_s20]   ;;  %s1600_s20 = smov 12 }
  0xbb   :  { %2049 = vst.msk [vmem:[%s4530_s1 + $0x144] ss:$8 sm:$0xf0] %vm3_vm3, %v2047_v37   ;;  %v1764_v58 = vsel %vm453_vm0, %v2392_v57, %v2391_v56  ;;  %v2393_v59 = vld [vmem:[%s4529_s0 + $0x20f] ss:$16 sm:%s1766_s16]   ;;  %s1605_s16 = smov 48 }
  0xbc   :  { %2052 = vst.msk [vmem:[%s4530_s1 + $0x145] ss:$8 sm:$0xf0] %vm3_vm3, %v2050_v39   ;;  %v1769_v60 = vsel %vm458_vm1, %v2393_v59, %v1764_v58  ;;  %v2394_v61 = vld [vmem:[%s4529_s0 + $0x20f] ss:$16 sm:%s1771_s2]   ;;  %s1610_s2 = smov 192 }
  0xbd   :  { %2055 = vst.msk [vmem:[%s4530_s1 + $0x146] ss:$8 sm:$0xf0] %vm3_vm3, %v2053_v41   ;;  %v2062_v0 = vld [vmem:[%s4529_s0 + $0x310] ss:$2 sm:$0xff]  }
  0xbe   :  { %2058 = vst.msk [vmem:[%s4530_s1 + $0x147] ss:$8 sm:$0xf0] %vm3_vm3, %v2056_v44   ;;  %v2065_v1 = vld [vmem:[%s4529_s0 + $0x320] ss:$2 sm:$0xff]   ;;  %v4148_v45 = vpop.permute.xlu0 %947  }
  0xbf   :  { %2165 = vst.msk [vmem:[%s4530_s1 + $0x160] sm:$0xff] %vm467_vm4, %v3584_v62   ;;  %v1774_v62 = vsel %vm463_vm2, %v2394_v61, %v1769_v60  ;;  %v2068_v2 = vld [vmem:[%s4529_s0 + $0x330] ss:$2 sm:$0xff]   ;;  %v2071_v3 = vld [vmem:[%s4529_s0 + $0x340] ss:$2 sm:$0xff]   ;;  %v4174_v53 = vpop.permute.xlu2 %993  }
  0xc0   :  { %2036 = vst.msk [vmem:[%s4530_s1 + $0x140] ss:$8 sm:$0xf] %vm3_vm3, %v2035_v30   ;;  %1775 = vrot.lane.b32.xlu0 %v1774_v62, %s2427_s29  ;;  %v2074_v4 = vld [vmem:[%s4529_s0 + $0x350] ss:$2 sm:$0xff]  }
  0xc1   :  { %2039 = vst.msk [vmem:[%s4530_s1 + $0x141] ss:$8 sm:$0xf] %vm3_vm3, %v2038_v34   ;;  %v2077_v5 = vld [vmem:[%s4529_s0 + $0x360] ss:$2 sm:$0xff]  }
  0xc2   :  { %2042 = vst.msk [vmem:[%s4530_s1 + $0x142] ss:$8 sm:$0xf] %vm3_vm3, %v2041_v35   ;;  %v2080_v8 = vld [vmem:[%s4529_s0 + $0x370] ss:$2 sm:$0xff]  }
  0xc3   :  { %2045 = vst.msk [vmem:[%s4530_s1 + $0x143] ss:$8 sm:$0xf] %vm3_vm3, %v2044_v36   ;;  %v2356_v9 = vld [vmem:[%s4529_s0 + $0x87] ss:$16 sm:%s1597_s14]  }
  0xc4   :  { %2048 = vst.msk [vmem:[%s4530_s1 + $0x144] ss:$8 sm:$0xf] %vm3_vm3, %v2047_v37   ;;  %v2357_v11 = vld [vmem:[%s4529_s0 + $0x87] ss:$16 sm:%s1600_s20]  }
  0xc5   :  { %2051 = vst.msk [vmem:[%s4530_s1 + $0x145] ss:$8 sm:$0xf] %vm3_vm3, %v2050_v39   ;;  %v1603_v12 = vsel %vm453_vm0, %v2357_v11, %v2356_v9  ;;  %v2358_v13 = vld [vmem:[%s4529_s0 + $0x87] ss:$16 sm:%s1605_s16]  }
  0xc6   :  { %2054 = vst.msk [vmem:[%s4530_s1 + $0x146] ss:$8 sm:$0xf] %vm3_vm3, %v2053_v41   ;;  %v1608_v14 = vsel %vm458_vm1, %v2358_v13, %v1603_v12  ;;  %v2359_v15 = vld [vmem:[%s4529_s0 + $0x87] ss:$16 sm:%s1610_s2]  }
  0xc7   :  { %2057 = vst.msk [vmem:[%s4530_s1 + $0x147] ss:$8 sm:$0xf] %vm3_vm3, %v2056_v44   ;;  %v1613_v16 = vsel %vm463_vm2, %v2359_v15, %v1608_v14  ;;  %v2396_v17 = vld [vmem:[%s4529_s0 + $0x287] ss:$16 sm:%s1781_s8]   ;;  %s1674_s8 = smov 48  ;;  %v4146_v44 = vpop.permute.xlu1 %901  }
  0xc8   :  { %2160 = vst.msk [vmem:[%s4530_s1 + $0x140] sm:$0xff] %vm467_vm4, %v3727_v28   ;;  %1614 = vrot.lane.b32.xlu2 %v1613_v16, %s2427_s29  ;;  %v2397_v18 = vld [vmem:[%s4529_s0 + $0x287] ss:$16 sm:%s1784_s11]  }
  0xc9   :  { %2060 = vst.msk [vmem:[%s4530_s1 + $0x180] ss:$8 sm:$0xf] %vm3_vm3, %v2059_v63   ;;  %v1787_v19 = vsel %vm453_vm0, %v2397_v18, %v2396_v17  ;;  %v2398_v20 = vld [vmem:[%s4529_s0 + $0x287] ss:$16 sm:%s1789_s18]  }
  0xca   :  { %2063 = vst.msk [vmem:[%s4530_s1 + $0x181] ss:$8 sm:$0xf] %vm3_vm3, %v2062_v0   ;;  %v1792_v23 = vsel %vm458_vm1, %v2398_v20, %v1787_v19  ;;  %v2399_v24 = vld [vmem:[%s4529_s0 + $0x287] ss:$16 sm:%s1794_s22]   ;;  %s1886_s22 = smov 192 }
  0xcb   :  { %2066 = vst.msk [vmem:[%s4530_s1 + $0x182] ss:$8 sm:$0xf] %vm3_vm3, %v2065_v1   ;;  %v1797_v25 = vsel %vm463_vm2, %v2399_v24, %v1792_v23  ;;  %v2406_v26 = vld [vmem:[%s4529_s0 + $0x307] ss:$16 sm:%s1827_s27]  }
  0xcc   :  { %2069 = vst.msk [vmem:[%s4530_s1 + $0x183] ss:$8 sm:$0xf] %vm3_vm3, %v2068_v2   ;;  %v4074_v28 = vld [vmem:[%s4529_s0 + $0x380] ss:$2 sm:$0xff]   ;;  %1798 = vrot.lane.b32.xlu1 %v1797_v25, %s2427_s29 }
  0xcd   :  { %2072 = vst.msk [vmem:[%s4530_s1 + $0x184] ss:$8 sm:$0xf] %vm3_vm3, %v2071_v3   ;;  %v4087_v31 = vld [vmem:[%s4529_s0 + $0x390] ss:$2 sm:$0xff]  }
  0xce   :  { %2075 = vst.msk [vmem:[%s4530_s1 + $0x185] ss:$8 sm:$0xf] %vm3_vm3, %v2074_v4   ;;  %v2408_v33 = vld [vmem:[%s4529_s0 + $0x307] ss:$16 sm:%s1835_s24]  }
  0xcf   :  { %2078 = vst.msk [vmem:[%s4530_s1 + $0x186] ss:$8 sm:$0xf] %vm3_vm3, %v2077_v5   ;;  %v4100_v30 = vld [vmem:[%s4529_s0 + $0x3a0] ss:$2 sm:$0xff]  }
  0xd0   :  { %2081 = vst.msk [vmem:[%s4530_s1 + $0x187] ss:$8 sm:$0xf] %vm3_vm3, %v2080_v8   ;;  %v2409_v35 = vld [vmem:[%s4529_s0 + $0x307] ss:$16 sm:%s1840_s13]   ;;  %s1679_s13 = smov 192 }
  0xd1   :  { %2170 = vst.msk [vmem:[%s4530_s1 + $0x180] sm:$0xff] %vm467_vm4, %v3729_v29   ;;  %v2407_v29 = vld [vmem:[%s4529_s0 + $0x307] ss:$16 sm:%s1830_s5]   ;;  %v4113_v36 = vld [vmem:[%s4529_s0 + $0x3b0] ss:$2 sm:$0xff]  }
  0xd2   :  { %2061 = vst.msk [vmem:[%s4530_s1 + $0x180] ss:$8 sm:$0xf0] %vm3_vm3, %v2059_v63   ;;  %v1833_v32 = vsel %vm453_vm0, %v2407_v29, %v2406_v26  ;;  %v2371_v38 = vld [vmem:[%s4529_s0 + $0x10f] ss:$16 sm:%s1666_s21]   ;;  %s1850_s21 = smov 3  ;;  %v971_v63 = vpop.permute.xlu1 %970  }
  0xd3   :  { %2064 = vst.msk [vmem:[%s4530_s1 + $0x181] ss:$8 sm:$0xf0] %vm3_vm3, %v2062_v0   ;;  %v1838_v34 = vsel %vm458_vm1, %v2408_v33, %v1833_v32  ;;  %v4126_v39 = vld [vmem:[%s4529_s0 + $0x3c0] ss:$2 sm:$0xff]   ;;  %v1017_v0 = vpop.permute.xlu0 %1016  }
  0xd4   :  { %2067 = vst.msk [vmem:[%s4530_s1 + $0x182] ss:$8 sm:$0xf0] %vm3_vm3, %v2065_v1   ;;  %v1843_v37 = vsel %vm463_vm2, %v2409_v35, %v1838_v34  ;;  %v2372_v40 = vld [vmem:[%s4529_s0 + $0x10f] ss:$16 sm:%s1669_s28]   ;;  %s1853_s28 = smov 12 }
  0xd5   :  { %2070 = vst.msk [vmem:[%s4530_s1 + $0x183] ss:$8 sm:$0xf0] %vm3_vm3, %v2068_v2   ;;  %1844 = vrot.lane.b32.xlu0 %v1843_v37, %s2427_s29  ;;  %v4140_v41 = vld [vmem:[%s4529_s0 + $0x3d0] ss:$2 sm:$0xff]   ;;  %v1672_v42 = vsel %vm453_vm0, %v2372_v40, %v2371_v38 }
  0xd6   :  { %2073 = vst.msk [vmem:[%s4530_s1 + $0x184] ss:$8 sm:$0xf0] %vm3_vm3, %v2071_v3   ;;  %v2373_v43 = vld [vmem:[%s4529_s0 + $0x10f] ss:$16 sm:%s1674_s8]   ;;  %s1858_s8 = smov 48 }
  0xd7   :  { %2076 = vst.msk [vmem:[%s4530_s1 + $0x185] ss:$8 sm:$0xf0] %vm3_vm3, %v2074_v4   ;;  %v2101_v46 = vld [vmem:[%s4529_s0 + $0x3e0] ss:$2 sm:$0xff]   ;;  %v1677_v48 = vsel %vm458_vm1, %v2373_v43, %v1672_v42 }
  0xd8   :  { %2079 = vst.msk [vmem:[%s4530_s1 + $0x186] ss:$8 sm:$0xf0] %vm3_vm3, %v2077_v5   ;;  %v2374_v49 = vld [vmem:[%s4529_s0 + $0x10f] ss:$16 sm:%s1679_s13]   ;;  %s1863_s13 = smov 192  ;;  %v1063_v5 = vpop.permute.xlu2 %1062  }
  0xd9   :  { %2082 = vst.msk [vmem:[%s4530_s1 + $0x187] ss:$8 sm:$0xf0] %vm3_vm3, %v2080_v8   ;;  %v2104_v50 = vld [vmem:[%s4529_s0 + $0x3f0] ss:$2 sm:$0xff]   ;;  %v1682_v51 = vsel %vm463_vm2, %v2374_v49, %v1677_v48 }
  0xda   :  { %2084 = vst.msk [vmem:[%s4530_s1 + $0x1c0] ss:$8 sm:$0xf] %vm3_vm3, %v4074_v28   ;;  %v2411_v52 = vld [vmem:[%s4529_s0 + $0x30f] ss:$16 sm:%s1850_s21]   ;;  %1683 = vrot.lane.b32.xlu2 %v1682_v51, %s2427_s29  ;;  %s1743_s21 = smov 48  ;;  %v1040_v19 = vpop.permute.xlu1 %1039  }
  0xdb   :  { %2087 = vst.msk [vmem:[%s4530_s1 + $0x1c1] ss:$8 sm:$0xf] %vm3_vm3, %v4087_v31   ;;  %v2412_v54 = vld [vmem:[%s4529_s0 + $0x30f] ss:$16 sm:%s1853_s28]   ;;  %v1086_v20 = vpop.permute.xlu0 %1085   ;;  %s1876_s28 = smov 12 }
  0xdc   :  { %2090 = vst.msk [vmem:[%s4530_s1 + $0x1c2] ss:$8 sm:$0xf] %vm3_vm3, %v4100_v30   ;;  %v1856_v55 = vsel %vm453_vm0, %v2412_v54, %v2411_v52  ;;  %v2413_v56 = vld [vmem:[%s4529_s0 + $0x30f] ss:$16 sm:%s1858_s8]  }
  0xdd   :  { %2093 = vst.msk [vmem:[%s4530_s1 + $0x1c3] ss:$8 sm:$0xf] %vm3_vm3, %v4113_v36   ;;  %v1861_v57 = vsel %vm458_vm1, %v2413_v56, %v1856_v55  ;;  %v2414_v58 = vld [vmem:[%s4529_s0 + $0x30f] ss:$16 sm:%s1863_s13]  }
  0xde   :  { %2096 = vst.msk [vmem:[%s4530_s1 + $0x1c4] ss:$8 sm:$0xf] %vm3_vm3, %v4126_v39   ;;  %v1866_v59 = vsel %vm463_vm2, %v2414_v58, %v1861_v57  ;;  %v2421_v60 = vld [vmem:[%s4529_s0 + $0x38f] ss:$16 sm:%s1896_s19]  }
  0xdf   :  { %2099 = vst.msk [vmem:[%s4530_s1 + $0x1c5] ss:$8 sm:$0xf] %vm3_vm3, %v4140_v41   ;;  %1867 = vrot.lane.b32.xlu1 %v1866_v59, %s2427_s29  ;;  %v2422_v61 = vld [vmem:[%s4529_s0 + $0x38f] ss:$16 sm:%s1899_s23]  }
  0xe0   :  { %2102 = vst.msk [vmem:[%s4530_s1 + $0x1c6] ss:$8 sm:$0xf] %vm3_vm3, %v2101_v46   ;;  %v2423_v62 = vld [vmem:[%s4529_s0 + $0x38f] ss:$16 sm:%s1904_s30]   ;;  %v1132_v24 = vpop.permute.xlu2 %1131  }
  0xe1   :  { %2105 = vst.msk [vmem:[%s4530_s1 + $0x1c7] ss:$8 sm:$0xf] %vm3_vm3, %v2104_v50   ;;  %v2424_v2 = vld [vmem:[%s4529_s0 + $0x38f] ss:$16 sm:%s1909_s7]  }
  0xe2   :  { %2180 = vst.msk [vmem:[%s4530_s1 + $0x1c0] sm:$0xff] %vm467_vm4, %v3850_v47   ;;  %v1902_v47 = vsel %vm453_vm0, %v2422_v61, %v2421_v60  ;;  %v2386_v4 = vld [vmem:[%s4529_s0 + $0x207] ss:$16 sm:%s1735_s25]   ;;  %v1109_v26 = vpop.permute.xlu1 %1108  }
  0xe3   :  { %2085 = vst.msk [vmem:[%s4530_s1 + $0x1c0] ss:$8 sm:$0xf0] %vm3_vm3, %v4074_v28   ;;  %v1907_v1 = vsel %vm458_vm1, %v2423_v62, %v1902_v47  ;;  %v2387_v8 = vld [vmem:[%s4529_s0 + $0x207] ss:$16 sm:%s1738_s15]  }
  0xe4   :  { %2088 = vst.msk [vmem:[%s4530_s1 + $0x1c1] ss:$8 sm:$0xf0] %vm3_vm3, %v4087_v31   ;;  %v1912_v3 = vsel %vm463_vm2, %v2424_v2, %v1907_v1  ;;  %v1741_v9 = vsel %vm453_vm0, %v2387_v8, %v2386_v4  ;;  %v2388_v11 = vld [vmem:[%s4529_s0 + $0x207] ss:$16 sm:%s1743_s21]  }
  0xe5   :  { %2091 = vst.msk [vmem:[%s4530_s1 + $0x1c2] ss:$8 sm:$0xf0] %vm3_vm3, %v4100_v30   ;;  %1913 = vrot.lane.b32.xlu0 %v1912_v3, %s2427_s29  ;;  %v1746_v12 = vsel %vm458_vm1, %v2388_v11, %v1741_v9  ;;  %v2389_v13 = vld [vmem:[%s4529_s0 + $0x207] ss:$16 sm:%s1748_s26]  }
  0xe6   :  { %2094 = vst.msk [vmem:[%s4530_s1 + $0x1c3] ss:$8 sm:$0xf0] %vm3_vm3, %v4113_v36   ;;  %v1751_v14 = vsel %vm463_vm2, %v2389_v13, %v1746_v12  ;;  %v2401_v15 = vld [vmem:[%s4529_s0 + $0x28f] ss:$16 sm:%s1804_s4]  }
  0xe7   :  { %2097 = vst.msk [vmem:[%s4530_s1 + $0x1c4] ss:$8 sm:$0xf0] %vm3_vm3, %v4126_v39   ;;  %1752 = vrot.lane.b32.xlu2 %v1751_v14, %s2427_s29  ;;  %v2402_v16 = vld [vmem:[%s4529_s0 + $0x28f] ss:$16 sm:%s1807_s9]  }
  0xe8   :  { %2100 = vst.msk [vmem:[%s4530_s1 + $0x1c5] ss:$8 sm:$0xf0] %vm3_vm3, %v4140_v41   ;;  %v1810_v17 = vsel %vm453_vm0, %v2402_v16, %v2401_v15  ;;  %v2403_v18 = vld [vmem:[%s4529_s0 + $0x28f] ss:$16 sm:%s1812_s12]   ;;  %s1881_s12 = smov 48  ;;  %v1201_v31 = vpop.permute.xlu2 %1200  }
  0xe9   :  { %2103 = vst.msk [vmem:[%s4530_s1 + $0x1c6] ss:$8 sm:$0xf0] %vm3_vm3, %v2101_v46   ;;  %v2404_v23 = vld [vmem:[%s4529_s0 + $0x28f] ss:$16 sm:%s1817_s17]  }
  0xea   :  { %2106 = vst.msk [vmem:[%s4530_s1 + $0x1c7] ss:$8 sm:$0xf0] %vm3_vm3, %v2104_v50   ;;  %v2418_v25 = vld [vmem:[%s4529_s0 + $0x387] ss:$16 sm:%s1881_s12]   ;;  %v1178_v33 = vpop.permute.xlu1 %1177  }
  0xeb   :  { %2175 = vst.msk [vmem:[%s4530_s1 + $0x1a0] sm:$0xff] %vm467_vm4, %v3977_v6   ;;  %v1815_v6 = vsel %vm458_vm1, %v2403_v18, %v1810_v17  ;;  %v2419_v29 = vld [vmem:[%s4529_s0 + $0x387] ss:$16 sm:%s1886_s22]  }
  0xec   :  { %2185 = vst.msk [vmem:[%s4530_s1 + $0x1e0] sm:$0xff] %vm467_vm4, %v3979_v7   ;;  %v2416_v7 = vld [vmem:[%s4529_s0 + $0x387] ss:$16 sm:%s1873_s3]  }
  0xed   :  { %2195 = vst.msk [vmem:[%s4530_s1 + $0x28] sm:$0xff] %vm467_vm4, %v3995_v10   ;;  %v2417_v10 = vld [vmem:[%s4529_s0 + $0x387] ss:$16 sm:%s1876_s28]  }
  0xee   :  { %2190 = vst.msk [vmem:[%s4530_s1 + $0x8] sm:$0xff] %vm467_vm4, %v4045_v21   ;;  %v1820_v21 = vsel %vm463_vm2, %v2404_v23, %v1815_v6 }
  0xef   :  { %2200 = vst.msk [vmem:[%s4530_s1 + $0x48] sm:$0xff] %vm467_vm4, %v4047_v22   ;;  %v1879_v22 = vsel %vm453_vm0, %v2417_v10, %v2416_v7  ;;  %1821 = vrot.lane.b32.xlu2 %v1820_v21, %s2427_s29 }
  0xf0   :  { %2210 = vst.msk [vmem:[%s4530_s1 + $0x88] sm:$0xff] %vm467_vm4, %v4065_v27   ;;  %v1155_v27 = vpop.permute.xlu0 %1154   ;;  %v1884_v28 = vsel %vm458_vm1, %v2418_v25, %v1879_v22  ;;  %v1270_v34 = vpop.permute.xlu2 %1269  }
  0xf1   :  { %2205 = vst.msk [vmem:[%s4530_s1 + $0x68] sm:$0xff] %vm467_vm4, %v4146_v44   ;;  %v1889_v32 = vsel %vm463_vm2, %v2419_v29, %v1884_v28 }
  0xf2   :  { %2215 = vst.msk [vmem:[%s4530_s1 + $0xa8] sm:$0xff] %vm467_vm4, %v4148_v45   ;;  %v1247_v35 = vpop.permute.xlu1 %1246  }
  0xf3   :  { %2225 = vst.msk [vmem:[%s4530_s1 + $0xe8] sm:$0xff] %vm467_vm4, %v4174_v53  }
  0xf4   :  { %2220 = vst.msk [vmem:[%s4530_s1 + $0xc8] sm:$0xff] %vm467_vm4, %v971_v63  }
  0xf5   :  { %2230 = vst.msk [vmem:[%s4530_s1 + $0x108] sm:$0xff] %vm467_vm4, %v1017_v0  }
  0xf6   :  { %2240 = vst.msk [vmem:[%s4530_s1 + $0x148] sm:$0xff] %vm467_vm4, %v1063_v5  }
  0xf7   :  { %2235 = vst.msk [vmem:[%s4530_s1 + $0x128] sm:$0xff] %vm467_vm4, %v1040_v19   ;;  %1890 = vrot.lane.b32.xlu2 %v1889_v32, %s2427_s29 }
  0xf8   :  { %2245 = vst.msk [vmem:[%s4530_s1 + $0x168] sm:$0xff] %vm467_vm4, %v1086_v20   ;;  %v1224_v30 = vpop.permute.xlu0 %1223   ;;  %v1339_v37 = vpop.permute.xlu2 %1338  }
  0xf9   :  { %2255 = vst.msk [vmem:[%s4530_s1 + $0x1a8] sm:$0xff] %vm467_vm4, %v1132_v24  }
  0xfa   :  { %2250 = vst.msk [vmem:[%s4530_s1 + $0x188] sm:$0xff] %vm467_vm4, %v1109_v26   ;;  %v1316_v38 = vpop.permute.xlu1 %1315  }
  0xfb   :  { %2260 = vst.msk [vmem:[%s4530_s1 + $0x1c8] sm:$0xff] %vm467_vm4, %v1155_v27  }
  0xfc   :  { %2270 = vst.msk [vmem:[%s4530_s1 + $0x10] sm:$0xff] %vm467_vm4, %v1201_v31  }
  0xfd   :  { %2265 = vst.msk [vmem:[%s4530_s1 + $0x1e8] sm:$0xff] %vm467_vm4, %v1178_v33  }
  0xfe   :  { %2275 = vst.msk [vmem:[%s4530_s1 + $0x30] sm:$0xff] %vm467_vm4, %v1224_v30  }
  0xff   :  { %2285 = vst.msk [vmem:[%s4530_s1 + $0x70] sm:$0xff] %vm467_vm4, %v1270_v34  }
 0x100   :  { %v1293_v36 = vpop.permute.xlu0 %1292   ;;  %2280 = vst.msk [vmem:[%s4530_s1 + $0x50] sm:$0xff] %vm467_vm4, %v1247_v35   ;;  %v1408_v40 = vpop.permute.xlu2 %1407  }
 0x101   :  { %2290 = vst.msk [vmem:[%s4530_s1 + $0x90] sm:$0xff] %vm467_vm4, %v1293_v36  }
 0x102   :  { %2300 = vst.msk [vmem:[%s4530_s1 + $0xd0] sm:$0xff] %vm467_vm4, %v1339_v37   ;;  %v1385_v41 = vpop.permute.xlu1 %1384  }
 0x103   :  { %2295 = vst.msk [vmem:[%s4530_s1 + $0xb0] sm:$0xff] %vm467_vm4, %v1316_v38  }
 0x104   :  { %2315 = vst.msk [vmem:[%s4530_s1 + $0x130] sm:$0xff] %vm467_vm4, %v1408_v40  }
 0x105   :  { %2310 = vst.msk [vmem:[%s4530_s1 + $0x110] sm:$0xff] %vm467_vm4, %v1385_v41  }
 0x108   :  { %v1362_v39 = vpop.permute.xlu0 %1361   ;;  %v1477_v43 = vpop.permute.xlu2 %1476  }
 0x109   :  { %2305 = vst.msk [vmem:[%s4530_s1 + $0xf0] sm:$0xff] %vm467_vm4, %v1362_v39  }
 0x10a   :  { %2330 = vst.msk [vmem:[%s4530_s1 + $0x190] sm:$0xff] %vm467_vm4, %v1477_v43   ;;  %v1454_v44 = vpop.permute.xlu1 %1453  }
 0x10b   :  { %2325 = vst.msk [vmem:[%s4530_s1 + $0x170] sm:$0xff] %vm467_vm4, %v1454_v44  }
 0x110   :  { %v1431_v42 = vpop.permute.xlu0 %1430   ;;  %v1546_v46 = vpop.permute.xlu2 %1545  }
 0x111   :  { %2320 = vst.msk [vmem:[%s4530_s1 + $0x150] sm:$0xff] %vm467_vm4, %v1431_v42  }
 0x112   :  { %2345 = vst.msk [vmem:[%s4530_s1 + $0x1f0] sm:$0xff] %vm467_vm4, %v1546_v46   ;;  %v1523_v48 = vpop.permute.xlu1 %1522  }
 0x113   :  { %2340 = vst.msk [vmem:[%s4530_s1 + $0x1d0] sm:$0xff] %vm467_vm4, %v1523_v48  }
 0x118   :  { %v1500_v45 = vpop.permute.xlu0 %1499  }
 0x119   :  { %2335 = vst.msk [vmem:[%s4530_s1 + $0x1b0] sm:$0xff] %vm467_vm4, %v1500_v45  }
 0x11a   :  { %v1592_v50 = vpop.permute.xlu1 %1591  }
 0x11b   :  { %2355 = vst.msk [vmem:[%s4530_s1 + $0x38] sm:$0xff] %vm467_vm4, %v1592_v50  }
 0x120   :  { %v1569_v49 = vpop.permute.xlu0 %1568  }
 0x121   :  { %2350 = vst.msk [vmem:[%s4530_s1 + $0x18] sm:$0xff] %vm467_vm4, %v1569_v49  }
 0x122   :  { %v1615_v52 = vpop.permute.xlu2 %1614   ;;  %v1661_v53 = vpop.permute.xlu1 %1660  }
 0x123   :  { %2360 = vst.msk [vmem:[%s4530_s1 + $0x58] sm:$0xff] %vm467_vm4, %v1615_v52  }
 0x124   :  { %2370 = vst.msk [vmem:[%s4530_s1 + $0x98] sm:$0xff] %vm467_vm4, %v1661_v53  }
 0x128   :  { %v1638_v51 = vpop.permute.xlu0 %1637  }
 0x129   :  { %2365 = vst.msk [vmem:[%s4530_s1 + $0x78] sm:$0xff] %vm467_vm4, %v1638_v51  }
 0x12c   :  { %v1730_v56 = vpop.permute.xlu1 %1729  }
 0x12d   :  { %2385 = vst.msk [vmem:[%s4530_s1 + $0xf8] sm:$0xff] %vm467_vm4, %v1730_v56  }
 0x130   :  { %v1707_v54 = vpop.permute.xlu0 %1706  }
 0x131   :  { %2380 = vst.msk [vmem:[%s4530_s1 + $0xd8] sm:$0xff] %vm467_vm4, %v1707_v54  }
 0x134   :  { %v1684_v55 = vpop.permute.xlu2 %1683  }
 0x135   :  { %2375 = vst.msk [vmem:[%s4530_s1 + $0xb8] sm:$0xff] %vm467_vm4, %v1684_v55  }
 0x138   :  { %v1776_v57 = vpop.permute.xlu0 %1775  }
 0x139   :  { %2395 = vst.msk [vmem:[%s4530_s1 + $0x138] sm:$0xff] %vm467_vm4, %v1776_v57  }
 0x13e   :  { %v1799_v59 = vpop.permute.xlu1 %1798  }
 0x13f   :  { %2400 = vst.msk [vmem:[%s4530_s1 + $0x158] sm:$0xff] %vm467_vm4, %v1799_v59  }
 0x141   :  { %v1753_v58 = vpop.permute.xlu2 %1752  }
 0x142   :  { %2390 = vst.msk [vmem:[%s4530_s1 + $0x118] sm:$0xff] %vm467_vm4, %v1753_v58  }
 0x147   :  { %v1845_v61 = vpop.permute.xlu0 %1844  }
 0x148   :  { %2410 = vst.msk [vmem:[%s4530_s1 + $0x198] sm:$0xff] %vm467_vm4, %v1845_v61  }
 0x149   :  { %v1822_v60 = vpop.permute.xlu2 %1821  }
 0x14a   :  { %2405 = vst.msk [vmem:[%s4530_s1 + $0x178] sm:$0xff] %vm467_vm4, %v1822_v60  }
 0x151   :  { %v1891_v47 = vpop.permute.xlu2 %1890   ;;  %v1868_v62 = vpop.permute.xlu1 %1867  }
 0x152   :  { %2420 = vst.msk [vmem:[%s4530_s1 + $0x1d8] sm:$0xff] %vm467_vm4, %v1891_v47  }
 0x153   :  { %2415 = vst.msk [vmem:[%s4530_s1 + $0x1b8] sm:$0xff] %vm467_vm4, %v1868_v62  }
 0x157   :  { %v1914_v63 = vpop.permute.xlu0 %1913  }
 0x158   :  { %2425 = vst.msk [vmem:[%s4530_s1 + $0x1f8] sm:$0xff] %vm467_vm4, %v1914_v63  }

// kernel: generator_forward.6
= control target key start
LH: loop header
LB: loop body
LE: loop exit
PB: predicated region body
PF: predicated region fallthrough
CT: control target
= control target key end

     0   :  { %s1135_s21 = smov 0   ;;  %s1346_s0 = inlined_call_operand.vmem [shape: bf16[2,16,576], index: 0, kind: input, shape index: {}]   ;;  %s1347_s1 = inlined_call_operand.vmem [shape: bf16[576,128], index: 1, kind: input, shape index: {}]   ;;  %s1348_s2 = inlined_call_operand.vmem [shape: f32[128,32], index: 2, kind: input, shape index: {}]   ;;  %s1349_s3 = inlined_call_operand.vmem [shape: f32[32,128], index: 3, kind: input, shape index: {}]   ;;  %s1350_s4 = inlined_call_operand.vmem [shape: f32[1,128], index: 4, kind: input, shape index: {}]   ;;  %s1351_s5 = inlined_call_operand.vmem [shape: f32[1,128], index: 5, kind: input, shape index: {}]   ;;  %s1352_s6 = inlined_call_operand.vmem [shape: f32[2,16,128], index: 6, kind: output, shape index: {}]  }
   0x1 LB: > { %s860_s22 = sadd.s32 4294967295, %s1098_s21   ;;  %p864_p0 = scmp.ge.s32.totalorder %s1098_s21, 1  ;;  %s1098_s21 = sphi %s1135_s21, %s16_s21  }
   0x2   : > { %p212_p1 = scmp.lt.s32.totalorder %s1098_s21, 3 }
   0x4   : > { %p213_p2 = pnand %p864_p0, %p212_p1 }
   0x5   : > { %p242_p3 = scmp.lt.s32.totalorder (!%p213_p2), %s860_s22, 1 }
   0x6   : > { %216 = sbr.rel (%p213_p2) target bundleno = 511 (0x1ff), region = 44 }
   0xb   : > { %v1050_v0 = vld [vmem:[%s1347_s1 + $0x38] sm:$0xff]  ;;  %v1049_v4 = vld [vmem:[%s1347_s1 + $0x30] sm:$0xff]  ;;  %v1048_v8 = vld [vmem:[%s1347_s1 + $0x28] sm:$0xff]  ;;  %s1354_s22 = smov (!%p242_p3, %s860_s22), 1  ;;  %vm572_vm0 = vcmask 523264   ;;  %vm722_vm1 = vcmask 261120  }
   0xc   : > { %v1058_v1 = vld [vmem:[%s1347_s1 + $0x78] sm:$0xff]  ;;  %576 = vmatpush.bf16.msra.mxu0 %v1050_v0  ;;  %v1057_v5 = vld [vmem:[%s1347_s1 + $0x70] sm:$0xff]  ;;  %v1056_v9 = vld [vmem:[%s1347_s1 + $0x68] sm:$0xff]  ;;  %s1079_s23 = smul.u32 40, %s1354_s22  ;;  %s1037_s9 = sshll.u32 %s1354_s22, 4 }
   0xd   : > { %v1066_v2 = vld [vmem:[%s1347_s1 + $0xb8] sm:$0xff]  ;;  %590 = vmatpush.bf16.msra.mxu1 %v1058_v1  ;;  %v1065_v6 = vld [vmem:[%s1347_s1 + $0xb0] sm:$0xff]  ;;  %v1064_v10 = vld [vmem:[%s1347_s1 + $0xa8] sm:$0xff]  ;;  %s251_s13 = scalar_lea.vmem %s1352_s6, %s1037_s9 }
   0xe   : > { %v1074_v3 = vld [vmem:[%s1347_s1 + $0xf8] sm:$0xff]  ;;  %604 = vmatpush.bf16.msra.mxu2 %v1066_v2  ;;  %v1073_v7 = vld [vmem:[%s1347_s1 + $0xf0] sm:$0xff]  ;;  %v1072_v11 = vld [vmem:[%s1347_s1 + $0xe8] sm:$0xff]  ;;  %s1231_s10 = scalar_lea.vmem %s1346_s0, %s1079_s23 }
   0xf   : > { %618 = vmatpush.bf16.msra.mxu3 %v1074_v3  ;;  %v1047_v12 = vld [vmem:[%s1347_s1 + $0x20] sm:$0xff]  ;;  %v1046_v16 = vld [vmem:[%s1347_s1 + $0x18] sm:$0xff]  ;;  %v1045_v20 = vld [vmem:[%s1347_s1 + $0x10] sm:$0xff] }
  0x10   : > { %577 = vmatpush.bf16.msra.mxu0 %v1049_v4  ;;  %v1055_v13 = vld [vmem:[%s1347_s1 + $0x60] sm:$0xff]  ;;  %v1054_v17 = vld [vmem:[%s1347_s1 + $0x58] sm:$0xff]  ;;  %v1053_v21 = vld [vmem:[%s1347_s1 + $0x50] sm:$0xff] }
  0x11   : > { %591 = vmatpush.bf16.msra.mxu1 %v1057_v5  ;;  %v1063_v14 = vld [vmem:[%s1347_s1 + $0xa0] sm:$0xff]  ;;  %v1062_v18 = vld [vmem:[%s1347_s1 + $0x98] sm:$0xff]  ;;  %v1061_v22 = vld [vmem:[%s1347_s1 + $0x90] sm:$0xff] }
  0x12   : > { %605 = vmatpush.bf16.msra.mxu2 %v1065_v6  ;;  %v1071_v15 = vld [vmem:[%s1347_s1 + $0xe0] sm:$0xff]  ;;  %v1070_v19 = vld [vmem:[%s1347_s1 + $0xd8] sm:$0xff]  ;;  %v1069_v23 = vld [vmem:[%s1347_s1 + $0xd0] sm:$0xff] }
  0x13   : > { %619 = vmatpush.bf16.msra.mxu3 %v1073_v7  ;;  %v1044_v24 = vld [vmem:[%s1347_s1 + $0x8] sm:$0xff]  ;;  %v1043_v28 = vld [vmem:[%s1347_s1] sm:$0xff]  ;;  %v1040_v33 = vld [vmem:[%s1231_s10 + $0x10] sm:$0xf0] }
  0x14   : > { %578 = vmatpush.bf16.msra.mxu0 %v1048_v8  ;;  %v1052_v25 = vld [vmem:[%s1347_s1 + $0x48] sm:$0xff]  ;;  %v1051_v29 = vld [vmem:[%s1347_s1 + $0x40] sm:$0xff]  ;;  %v872_v35 = vld [vmem:[%s1231_s10 + $0x14] sm:$0xf0] }
  0x15   : > { %592 = vmatpush.bf16.msra.mxu1 %v1056_v9  ;;  %v1060_v26 = vld [vmem:[%s1347_s1 + $0x88] sm:$0xff]  ;;  %v1059_v30 = vld [vmem:[%s1347_s1 + $0x80] sm:$0xff]  ;;  %v1041_v37 = vld [vmem:[%s1231_s10 + $0x18] sm:$0xf0] }
  0x16   : > { %606 = vmatpush.bf16.msra.mxu2 %v1064_v10  ;;  %v1068_v27 = vld [vmem:[%s1347_s1 + $0xc8] sm:$0xff]  ;;  %v1067_v31 = vld [vmem:[%s1347_s1 + $0xc0] sm:$0xff]  ;;  %v1078_v40 = vld [vmem:[%s1347_s1 + $0x118] sm:$0xff] }
  0x17   : > { %620 = vmatpush.bf16.msra.mxu3 %v1072_v11  ;;  %v870_v32 = vld [vmem:[%s1231_s10] sm:$0xf]  ;;  %v1038_v34 = vld [vmem:[%s1231_s10 + $0x4] sm:$0xf]  ;;  %v878_v36 = vld [vmem:[%s1231_s10 + $0x8] sm:$0xf] }
  0x18   : > { %579 = vmatpush.bf16.msra.mxu0 %v1047_v12  ;;  %v1039_v38 = vld [vmem:[%s1231_s10 + $0xc] sm:$0xf]  ;;  %v880_v39 = vld [vmem:[%s1231_s10 + $0x1c] sm:$0xf0]  ;;  %v871_v41 = vor.u32 %v1040_v33, %v870_v32  ;;  %v875_v42 = vor.u32 %v1038_v34, %v872_v35  ;;  %v879_v43 = vor.u32 %v1041_v37, %v878_v36  ;;  %v1077_v45 = vld [vmem:[%s1347_s1 + $0x110] sm:$0xff] }
  0x19   : > { %593 = vmatpush.bf16.msra.mxu1 %v1055_v13  ;;  %v883_v44 = vor.u32 %v1039_v38, %v880_v39  ;;  %v1076_v46 = vld [vmem:[%s1347_s1 + $0x108] sm:$0xff]  ;;  %v1075_v47 = vld [vmem:[%s1347_s1 + $0x100] sm:$0xff]  ;;  %v886_v48 = vld [vmem:[%s1231_s10 + $0x10] sm:$0xf] }
  0x1a   : > { %607 = vmatpush.bf16.msra.mxu2 %v1063_v14  ;;  %v1042_v49 = vld [vmem:[%s1231_s10 + $0x20] sm:$0xf0]  ;;  %v677_v51 = vld [vmem:[%s1348_s2 + $0x78] sm:$0xff]  ;;  %v676_v52 = vld [vmem:[%s1348_s2 + $0x70] sm:$0xff] }
  0x1b   : > { %621 = vmatpush.bf16.msra.mxu3 %v1071_v15  ;;  %v887_v50 = vor.u32 %v1042_v49, %v886_v48  ;;  %v675_v53 = vld [vmem:[%s1348_s2 + $0x68] sm:$0xff]  ;;  %v674_v54 = vld [vmem:[%s1348_s2 + $0x60] sm:$0xff]  ;;  %v673_v55 = vld [vmem:[%s1348_s2 + $0x58] sm:$0xff] }
  0x1c   : > { %580 = vmatpush.bf16.msra.mxu0 %v1046_v16  ;;  %v672_v56 = vld [vmem:[%s1348_s2 + $0x50] sm:$0xff]  ;;  %v671_v57 = vld [vmem:[%s1348_s2 + $0x48] sm:$0xff]  ;;  %v670_v58 = vld [vmem:[%s1348_s2 + $0x40] sm:$0xff] }
  0x1d   : > { %594 = vmatpush.bf16.msra.mxu1 %v1054_v17  ;;  %v669_v59 = vld [vmem:[%s1348_s2 + $0x38] sm:$0xff]  ;;  %v668_v60 = vld [vmem:[%s1348_s2 + $0x30] sm:$0xff]  ;;  %v667_v61 = vld [vmem:[%s1348_s2 + $0x28] sm:$0xff] }
  0x1e   : > { %608 = vmatpush.bf16.msra.mxu2 %v1062_v18  ;;  %v666_v62 = vld [vmem:[%s1348_s2 + $0x20] sm:$0xff]  ;;  %v665_v0 = vld [vmem:[%s1348_s2 + $0x18] sm:$0xff]  ;;  %v664_v1 = vld [vmem:[%s1348_s2 + $0x10] sm:$0xff] }
  0x1f   : > { %622 = vmatpush.bf16.msra.mxu3 %v1070_v19  ;;  %v663_v3 = vld [vmem:[%s1348_s2 + $0x8] sm:$0xff]  ;;  %v662_v4 = vld [vmem:[%s1348_s2] sm:$0xff]  ;;  %v721_v7 = vld [vmem:[%s1349_s3 + $0x18] sm:$0xff] }
  0x20   : > { %581 = vmatpush.bf16.msra.mxu0 %v1045_v20  ;;  %v720_v8 = vld [vmem:[%s1349_s3 + $0x10] sm:$0xff]  ;;  %v719_v10 = vld [vmem:[%s1349_s3 + $0x8] sm:$0xff]  ;;  %v718_v13 = vld [vmem:[%s1349_s3] sm:$0xff] }
  0x21   : > { %595 = vmatpush.bf16.msra.mxu1 %v1053_v21 }
  0x22   : > { %609 = vmatpush.bf16.msra.mxu2 %v1061_v22 }
  0x23   : > { %623 = vmatpush.bf16.msra.mxu3 %v1069_v23 }
  0x24   : > { %582 = vmatpush.bf16.msra.mxu0 %v1044_v24 }
  0x25   : > { %596 = vmatpush.bf16.msra.mxu1 %v1052_v25 }
  0x26   : > { %610 = vmatpush.bf16.msra.mxu2 %v1060_v26 }
  0x27   : > { %624 = vmatpush.bf16.msra.mxu3 %v1068_v27 }
  0x28   : > { %583 = vmatpush.bf16.msra.mxu0 %v1043_v28 }
  0x29   : > { %597 = vmatpush.bf16.msra.mxu1 %v1051_v29 }
  0x2a   : > { %611 = vmatpush.bf16.msra.mxu2 %v1059_v30 }
  0x2b   : > { %625 = vmatpush.bf16.msra.mxu3 %v1067_v31  ;;  %584 = vmatmul.bf16.vlgmr.msra.gmra.mxu0 %v871_v41 }
  0x2c   : > { %636 = vmatpush.bf16.msrb.mxu0 %v1078_v40  ;;  %598 = vmatmul.bf16.vlgmr.msra.gmra.mxu1 %v875_v42 }
  0x2d   : > { %612 = vmatmul.bf16.vlgmr.msra.gmra.mxu2 %v879_v43  ;;  %678 = vmatpush.msrb.mxu1 %v677_v51 }
  0x2e   : > { %626 = vmatmul.bf16.vlgmr.msra.gmra.mxu3 %v883_v44  ;;  %698 = vmatpush.msrb.mxu2 %v677_v51 }
  0x2f   : > { %679 = vmatpush.msrb.mxu1 %v676_v52  ;;  %738 = vmatpush.msrb.mxu3 %v721_v7 }
  0x30   : > { %637 = vmatpush.bf16.msrb.mxu0 %v1077_v45  ;;  %699 = vmatpush.msrb.mxu2 %v676_v52 }
  0x31   : > { %680 = vmatpush.msrb.mxu1 %v675_v53  ;;  %739 = vmatpush.msrb.mxu3 %v720_v8 }
  0x32   : > { %700 = vmatpush.msrb.mxu2 %v675_v53 }
  0x33   : > { %681 = vmatpush.msrb.mxu1 %v674_v54  ;;  %740 = vmatpush.msrb.mxu3 %v719_v10 }
  0x34   : > { %638 = vmatpush.bf16.msrb.mxu0 %v1076_v46  ;;  %701 = vmatpush.msrb.mxu2 %v674_v54 }
  0x35   : > { %682 = vmatpush.msrb.mxu1 %v673_v55  ;;  %741 = vmatpush.msrb.mxu3 %v718_v13 }
  0x36   : > { %702 = vmatpush.msrb.mxu2 %v673_v55 }
  0x37   : > { %683 = vmatpush.msrb.mxu1 %v672_v56  ;;  %761 = vmatpush.msra.mxu3 %v721_v7 }
  0x38   : > { %639 = vmatpush.bf16.msrb.mxu0 %v1075_v47  ;;  %703 = vmatpush.msrb.mxu2 %v672_v56 }
  0x39   : > { %684 = vmatpush.msrb.mxu1 %v671_v57  ;;  %762 = vmatpush.msra.mxu3 %v720_v8 }
  0x3a   : > { %704 = vmatpush.msrb.mxu2 %v671_v57 }
  0x3b   : > { %1032 = vmatmul.msk.bf16.vlgmr.msrb.gmra.mxu0 %vm572_vm0, %v887_v50  ;;  %685 = vmatpush.msrb.mxu1 %v670_v58 }
  0x3c   : > { %705 = vmatpush.msrb.mxu2 %v670_v58  ;;  %763 = vmatpush.msra.mxu3 %v719_v10 }
  0x3d   : > { %686 = vmatpush.msrb.mxu1 %v669_v59 }
  0x3e   : > { %706 = vmatpush.msrb.mxu2 %v669_v59  ;;  %764 = vmatpush.msra.mxu3 %v718_v13 }
  0x3f   : > { %687 = vmatpush.msrb.mxu1 %v668_v60 }
  0x40   : > { %707 = vmatpush.msrb.mxu2 %v668_v60  ;;  %v1088_v60 = vld [vmem:[%s1350_s4] ss:$0 sm:$0xff] }
  0x41   : > { %688 = vmatpush.msrb.mxu1 %v667_v61 }
  0x42   : > { %708 = vmatpush.msrb.mxu2 %v667_v61 }
  0x43   : > { %689 = vmatpush.msrb.mxu1 %v666_v62 }
  0x44   : > { %709 = vmatpush.msrb.mxu2 %v666_v62 }
  0x45   : > { %690 = vmatpush.msrb.mxu1 %v665_v0 }
  0x46   : > { %710 = vmatpush.msrb.mxu2 %v665_v0 }
  0x47   : > { %691 = vmatpush.msrb.mxu1 %v664_v1 }
  0x48   : > { %711 = vmatpush.msrb.mxu2 %v664_v1 }
  0x49   : > { %692 = vmatpush.msrb.mxu1 %v663_v3 }
  0x4a   : > { %712 = vmatpush.msrb.mxu2 %v663_v3 }
  0x4b   : > { %693 = vmatpush.msrb.mxu1 %v662_v4 }
  0x4c   : > { %713 = vmatpush.msrb.mxu2 %v662_v4 }
  0xa8   : > { %v585_v63 = vpop.f32.mrf.mxu0 }
  0xa9   : > { %v599_v2 = vpop.f32.mrf.mxu1 }
  0xaa   : > { %v600_v12 = vadd.f32 %v599_v2, %v585_v63  ;;  %v1089_v63 = vld [vmem:[%s1351_s5] ss:$0 sm:$0xff] }
  0xb0   : > { %v613_v5 = vpop.f32.mrf.mxu2  ;;  %v587_v6 = vpop.f32.mrf.mxu0 }
  0xb1   : > { %v627_v9 = vpop.f32.mrf.mxu3  ;;  %v601_v11 = vpop.f32.mrf.mxu1  ;;  %v614_v16 = vadd.f32 %v613_v5, %v600_v12 }
  0xb2   : > { %v602_v17 = vadd.f32 %v601_v11, %v587_v6 }
  0xb3   : > { %v628_v19 = vadd.f32 %v627_v9, %v614_v16 }
  0xb8   : > { %v615_v14 = vpop.f32.mrf.mxu2  ;;  %v641_v15 = vpop.f32.mrf.mxu0 }
  0xb9   : > { %v616_v18 = vadd.f32 %v615_v14, %v602_v17  ;;  %v629_v20 = vpop.f32.mrf.mxu3  ;;  %v642_v22 = vadd.f32 %v641_v15, %v628_v19 }
  0xbb   : > { %v630_v21 = vadd.f32 %v629_v20, %v616_v18  ;;  %v653_v25 = vmul.f32 %v642_v22, %v642_v22 }
  0xc0   : > { %v643_v23 = vpop.f32.mrf.mxu0 }
  0xc1   : > { %v644_v24 = vadd.f32 %v643_v23, %v630_v21 }
  0xc3   : > { %v646_v26 = vadd.f32 %v644_v24, %v642_v22  ;;  %v654_v27 = vmul.f32 %v644_v24, %v644_v24 }
  0xc5   : > { %v647_v28 = vrot.slane %v646_v26, 4  ;;  %v655_v29 = vadd.f32 %v654_v27, %v653_v25 }
  0xc7   : > { %v648_v30 = vadd.f32 %v647_v28, %v646_v26  ;;  %v656_v31 = vrot.slane %v655_v29, 4 }
  0xc9   : > { %v649_v32 = vrot.slane %v648_v30, 2  ;;  %v657_v33 = vadd.f32 %v656_v31, %v655_v29 }
  0xcb   : > { %v650_v34 = vadd.f32 %v649_v32, %v648_v30  ;;  %v658_v35 = vrot.slane %v657_v33, 2 }
  0xcd   : > { %v651_v36 = vrot.slane %v650_v34, 1  ;;  %v659_v37 = vadd.f32 %v658_v35, %v657_v33 }
  0xcf   : > { %v652_v38 = vadd.f32 %v651_v36, %v650_v34  ;;  %v660_v39 = vrot.slane %v659_v37, 1 }
  0xd1   : > { %694 = vmatmul.f32.vlgmr.msrb.gmra.mxu1 %v652_v38  ;;  %v661_v40 = vadd.f32 %v660_v39, %v659_v37 }
  0xd3   : > { %714 = vmatmul.f32.vlgmr.msrb.gmra.mxu2 %v661_v40 }
 0x14e   : > { %v695_v41 = vpop.f32.mrf.mxu1 }
 0x14f   : > { %1033 = vmatmul.msk.f32.vlgmr.msrb.gmra.mxu3 %vm722_vm1, %v695_v41 }
 0x156   : > { %v715_v42 = vpop.f32.mrf.mxu2 }
 0x157   : > { %1034 = vmatmul.msk.f32.vlgmr.msra.gmra.mxu3 %vm722_vm1, %v715_v42 }
 0x1d2   : > { %v743_v43 = vpop.f32.mrf.mxu3 }
 0x1d3   : > { %v769_v44 = vmul.f32 %v743_v43, %v743_v43  ;;  %v772_v54 = vperm.slane %v743_v43, 0 }
 0x1d5   : > { %v773_v57 = vsub.f32 %v642_v22, %v772_v54  ;;  %v774_v58 = vsub.f32 %v644_v24, %v772_v54 }
 0x1da   : > { %v766_v45 = vpop.f32.mrf.mxu3 }
 0x1db   : > { %v770_v46 = vsub.f32 %v766_v45, %v769_v44 }
 0x1dd   : > { %v771_v47 = vmax.f32 %v770_v46, 0.0 }
 0x1df   : > { %v775_v48 = vadd.f32 1e-05, %v771_v47 }
 0x1e1   : > { %1090 = vrsqrt.f32 %v775_v48  ;;  %vm782_vm3 = vweird.f32 %v775_v48 }
 0x1e7   : > { %v1091_v49 = vpop.eup %1090 }
 0x1e8   : > { %v777_v50 = vmul.f32 %v1091_v49, %v775_v48  ;;  %vm783_vm2 = vweird.f32 %v1091_v49 }
 0x1e9   : > { %vm784_vm4 = vmor %vm782_vm3, %vm783_vm2 }
 0x1ea   : > { %v778_v51 = vmul.f32 %v1091_v49, %v777_v50 }
 0x1ec   : > { %v779_v52 = vmul.f32 0.5, %v778_v51 }
 0x1ee   : > { %v780_v53 = vsub.f32 1.5, %v779_v52 }
 0x1f0   : > { %v781_v55 = vmul.f32 %v1091_v49, %v780_v53 }
 0x1f2   : > { %v785_v56 = vsel %vm784_vm4, %v1091_v49, %v781_v55 }
 0x1f3   : > { %v786_v59 = vperm.slane %v785_v56, 0 }
 0x1f5   : > { %v787_v61 = vmul.f32 %v786_v59, %v773_v57  ;;  %v788_v62 = vmul.f32 %v786_v59, %v774_v58 }
 0x1f7   : > { %v793_v0 = vmul.f32 %v1088_v60, %v787_v61  ;;  %v794_v1 = vmul.f32 %v1088_v60, %v788_v62 }
 0x1f9   : > { %v799_v2 = vadd.f32 %v1089_v63, %v793_v0  ;;  %v800_v3 = vadd.f32 %v1089_v63, %v794_v1 }
 0x1fb   : > { %v801_v4 = vmax.f32 %v799_v2, 0.0  ;;  %v802_v5 = vmax.f32 %v800_v3, 0.0 }
 0x1fd   : > { %803 = vst [vmem:[%s251_s13] sm:$0xff] %v801_v4 }
 0x1fe   : > { %804 = vst [vmem:[%s251_s13 + $0x8] sm:$0xff] %v802_v5 }
 0x1ff PF: > { %s16_s21 = sadd.s32 1, %s1098_s21  }
 0x200   : > { %p13_p4 = scmp.ge.s32.totalorder %s16_s21, 4  }
 0x202   :  { %15 = sbr.rel (!%p13_p4) target bundleno = 1 (0x1), region = 74 }

// kernel: generator_forward.5
= control target key start
LH: loop header
LB: loop body
LE: loop exit
PB: predicated region body
PF: predicated region fallthrough
CT: control target
= control target key end

     0   :  { %s1673_s21 = smov 0   ;;  %s3384_s0 = inlined_call_operand.vmem [shape: bf16[2,1,16], index: 0, kind: input, shape index: {}]   ;;  %s3385_s1 = inlined_call_operand.vmem [shape: bf16[16,1024], index: 1, kind: input, shape index: {}]   ;;  %s3386_s2 = inlined_call_operand.vmem [shape: f32[1024,64], index: 2, kind: input, shape index: {}]   ;;  %s3387_s3 = inlined_call_operand.vmem [shape: f32[64,1024], index: 3, kind: input, shape index: {}]   ;;  %s3388_s4 = inlined_call_operand.vmem [shape: f32[1,1024], index: 4, kind: input, shape index: {}]   ;;  %s3389_s5 = inlined_call_operand.vmem [shape: f32[1,1024], index: 5, kind: input, shape index: {}]   ;;  %s3390_s6 = inlined_call_operand.vmem [shape: f32[2,1,1024], index: 6, kind: output, shape index: {}]  }
   0x1 LB: > { %s1534_s22 = sadd.s32 4294967295, %s1636_s21   ;;  %p1538_p0 = scmp.ge.s32.totalorder %s1636_s21, 1  ;;  %s1636_s21 = sphi %s1673_s21, %s16_s21  }
   0x2   : > { %p210_p1 = scmp.lt.s32.totalorder %s1636_s21, 3 }
   0x4   : > { %p211_p2 = pnand %p1538_p0, %p210_p1 }
   0x6   : > { %214 = sbr.rel (%p211_p2) target bundleno = 539 (0x21b), region = 44 }
   0xb   : > { %v1542_v0 = vld [vmem:[%s3385_s1] sm:$0xf]  ;;  %v1598_v2 = vld [vmem:[%s3385_s1 + $0x4] sm:$0xf]  ;;  %v1550_v5 = vld [vmem:[%s3385_s1 + $0x8] sm:$0xf] }
   0xc   : > { %v1602_v1 = vld [vmem:[%s3385_s1 + $0x1c] sm:$0xf0]  ;;  %v1544_v4 = vld [vmem:[%s3385_s1 + $0x20] sm:$0xf0]  ;;  %v1603_v6 = vld [vmem:[%s3385_s1 + $0x24] sm:$0xf0] }
   0xd   : > { %v1543_v3 = vor.u32 %v1602_v1, %v1542_v0  ;;  %v1547_v7 = vor.u32 %v1598_v2, %v1544_v4  ;;  %v1551_v8 = vor.u32 %v1603_v6, %v1550_v5  ;;  %v1599_v9 = vld [vmem:[%s3385_s1 + $0xc] sm:$0xf]  ;;  %p237_p3 = scmp.lt.s32.totalorder %s1534_s22, 1  ;;  %v1558_v12 = vld [vmem:[%s3385_s1 + $0x10] sm:$0xf]  ;;  %vm294_vm0 = vcmask 130048  }
   0xe   : > { %v1552_v10 = vld [vmem:[%s3385_s1 + $0x28] sm:$0xf0]  ;;  %v1604_v13 = vld [vmem:[%s3385_s1 + $0x2c] sm:$0xf0]  ;;  %v1566_v14 = vld [vmem:[%s3385_s1 + $0x18] sm:$0xf] }
   0xf   : > { %305 = vmatpush.bf16.msra.mxu0 %v1543_v3  ;;  %v1555_v11 = vor.u32 %v1599_v9, %v1552_v10  ;;  %318 = vmatpush.bf16.msra.mxu1 %v1547_v7  ;;  %s3686_s22 = smov (!%p237_p3, %s1534_s22), 1  ;;  %v1559_v15 = vor.u32 %v1604_v13, %v1558_v12  ;;  %v1605_v16 = vld [vmem:[%s3385_s1 + $0x34] sm:$0xf0]  ;;  %v1600_v17 = vld [vmem:[%s3385_s1 + $0x14] sm:$0xf]  ;;  %v1790_v33 = vld [vmem:[%s3386_s2 + $0x68] sm:$0xff] }
  0x10   : > { %331 = vmatpush.bf16.msra.mxu2 %v1551_v8  ;;  %v1567_v18 = vor.u32 %v1605_v16, %v1566_v14  ;;  %v1560_v19 = vld [vmem:[%s3385_s1 + $0x30] sm:$0xf0]  ;;  %v1601_v20 = vld [vmem:[%s3385_s1 + $0x1c] sm:$0xf]  ;;  %s239_s11 = scalar_lea.vmem %s3384_s0, %s3686_s22  ;;  %v1795_v34 = vld [vmem:[%s3386_s2 + $0xe8] sm:$0xff]  ;;  %vm938_vm1 = vcmask 523264  }
  0x11   : > { %344 = vmatpush.bf16.msra.mxu3 %v1555_v11  ;;  %v1568_v21 = vld [vmem:[%s3385_s1 + $0x38] sm:$0xf0]  ;;  %v1563_v22 = vor.u32 %v1600_v17, %v1560_v19  ;;  %v1735_v24 = vld [vmem:[%s239_s11] sm:$0x1]  ;;  %v1768_v29 = vld [vmem:[%s3386_s2 + $0x70] sm:$0xff]  ;;  %s1539_s28 = sshll.u32 %s3686_s22, 3 }
  0x12   : > { %v1571_v23 = vor.u32 %v1601_v20, %v1568_v21  ;;  %1572 = vmatmul.msk.bf16.vlgmr.msra.gmra.mxu0 %vm294_vm0, %v1735_v24  ;;  %1573 = vmatmul.msk.bf16.vlgmr.msra.gmra.mxu1 %vm294_vm0, %v1735_v24  ;;  %v1744_v25 = vld [vmem:[%s3386_s2 + $0x78] sm:$0xff]  ;;  %v1773_v30 = vld [vmem:[%s3386_s2 + $0xf0] sm:$0xff]  ;;  %v1804_v35 = vld [vmem:[%s3386_s2 + $0x168] sm:$0xff]  ;;  %s243_s7 = scalar_lea.vmem %s3390_s6, %s1539_s28 }
  0x13   : > { %357 = vmatpush.bf16.msrb.mxu0 %v1559_v15  ;;  %v1749_v26 = vld [vmem:[%s3386_s2 + $0xf8] sm:$0xff]  ;;  %1574 = vmatmul.msk.bf16.vlgmr.msra.gmra.mxu2 %vm294_vm0, %v1735_v24  ;;  %v1780_v31 = vld [vmem:[%s3386_s2 + $0x170] sm:$0xff]  ;;  %v1809_v36 = vld [vmem:[%s3386_s2 + $0x1e8] sm:$0xff] }
  0x14   : > { %383 = vmatpush.bf16.msrb.mxu2 %v1567_v18  ;;  %1575 = vmatmul.msk.bf16.vlgmr.msra.gmra.mxu3 %vm294_vm0, %v1735_v24  ;;  %v1758_v27 = vld [vmem:[%s3386_s2 + $0x178] sm:$0xff]  ;;  %v1785_v32 = vld [vmem:[%s3386_s2 + $0x1f0] sm:$0xff]  ;;  %v1814_v37 = vld [vmem:[%s3386_s2 + $0x60] sm:$0xff] }
  0x15   : > { %v1763_v28 = vld [vmem:[%s3386_s2 + $0x1f8] sm:$0xff]  ;;  %370 = vmatpush.bf16.msrb.mxu1 %v1563_v22  ;;  %396 = vmatpush.bf16.msrb.mxu3 %v1571_v23  ;;  %v1819_v38 = vld [vmem:[%s3386_s2 + $0xe0] sm:$0xff]  ;;  %v1862_v45 = vld [vmem:[%s3386_s2 + $0x50] sm:$0xff] }
  0x16   : > { %v1828_v39 = vld [vmem:[%s3386_s2 + $0x160] sm:$0xff]  ;;  %v1838_v41 = vld [vmem:[%s3386_s2 + $0x58] sm:$0xff]  ;;  %v1867_v46 = vld [vmem:[%s3386_s2 + $0xd0] sm:$0xff] }
  0x17   : > { %554 = vmatpush.msra.mxu0 %v1744_v25  ;;  %v1833_v40 = vld [vmem:[%s3386_s2 + $0x1e0] sm:$0xff]  ;;  %v1843_v42 = vld [vmem:[%s3386_s2 + $0xd8] sm:$0xff]  ;;  %v1876_v47 = vld [vmem:[%s3386_s2 + $0x150] sm:$0xff] }
  0x18   : > { %594 = vmatpush.msra.mxu2 %v1758_v27  ;;  %v1852_v43 = vld [vmem:[%s3386_s2 + $0x158] sm:$0xff]  ;;  %v1881_v48 = vld [vmem:[%s3386_s2 + $0x1d0] sm:$0xff]  ;;  %v1886_v49 = vld [vmem:[%s3386_s2 + $0x48] sm:$0xff] }
  0x19   : > { %574 = vmatpush.msra.mxu1 %v1749_v26  ;;  %614 = vmatpush.msra.mxu3 %v1763_v28  ;;  %v1857_v44 = vld [vmem:[%s3386_s2 + $0x1d8] sm:$0xff]  ;;  %v1891_v50 = vld [vmem:[%s3386_s2 + $0xc8] sm:$0xff]  ;;  %v1904_v51 = vld [vmem:[%s3386_s2 + $0x40] sm:$0xff] }
  0x1a   : > { %555 = vmatpush.msra.mxu0 %v1768_v29  ;;  %595 = vmatpush.msra.mxu2 %v1780_v31  ;;  %v1909_v52 = vld [vmem:[%s3386_s2 + $0xc0] sm:$0xff]  ;;  %v1918_v53 = vld [vmem:[%s3386_s2 + $0x148] sm:$0xff]  ;;  %v1932_v55 = vld [vmem:[%s3386_s2 + $0x38] sm:$0xff] }
  0x1b   : > { %575 = vmatpush.msra.mxu1 %v1773_v30  ;;  %615 = vmatpush.msra.mxu3 %v1785_v32  ;;  %v1923_v54 = vld [vmem:[%s3386_s2 + $0x1c8] sm:$0xff]  ;;  %v1937_v56 = vld [vmem:[%s3386_s2 + $0xb8] sm:$0xff]  ;;  %v1944_v57 = vld [vmem:[%s3386_s2 + $0x140] sm:$0xff] }
  0x1c   : > { %556 = vmatpush.msra.mxu0 %v1790_v33  ;;  %596 = vmatpush.msra.mxu2 %v1804_v35  ;;  %v1949_v58 = vld [vmem:[%s3386_s2 + $0x1c0] sm:$0xff]  ;;  %v1954_v59 = vld [vmem:[%s3386_s2 + $0x30] sm:$0xff]  ;;  %v1968_v61 = vld [vmem:[%s3386_s2 + $0x138] sm:$0xff] }
  0x1d   : > { %576 = vmatpush.msra.mxu1 %v1795_v34  ;;  %616 = vmatpush.msra.mxu3 %v1809_v36  ;;  %v1959_v60 = vld [vmem:[%s3386_s2 + $0xb0] sm:$0xff]  ;;  %v1973_v62 = vld [vmem:[%s3386_s2 + $0x1b8] sm:$0xff]  ;;  %v1978_v63 = vld [vmem:[%s3386_s2 + $0x28] sm:$0xff] }
  0x1e   : > { %557 = vmatpush.msra.mxu0 %v1814_v37  ;;  %597 = vmatpush.msra.mxu2 %v1828_v39  ;;  %v1983_v0 = vld [vmem:[%s3386_s2 + $0xa8] sm:$0xff]  ;;  %v1992_v1 = vld [vmem:[%s3386_s2 + $0x130] sm:$0xff]  ;;  %v2002_v3 = vld [vmem:[%s3386_s2 + $0x20] sm:$0xff] }
  0x1f   : > { %577 = vmatpush.msra.mxu1 %v1819_v38  ;;  %617 = vmatpush.msra.mxu3 %v1833_v40  ;;  %v1997_v2 = vld [vmem:[%s3386_s2 + $0x1b0] sm:$0xff]  ;;  %v2007_v4 = vld [vmem:[%s3386_s2 + $0xa0] sm:$0xff]  ;;  %v2016_v5 = vld [vmem:[%s3386_s2 + $0x128] sm:$0xff] }
  0x20   : > { %558 = vmatpush.msra.mxu0 %v1838_v41  ;;  %598 = vmatpush.msra.mxu2 %v1852_v43  ;;  %v2021_v6 = vld [vmem:[%s3386_s2 + $0x1a8] sm:$0xff]  ;;  %v2026_v7 = vld [vmem:[%s3386_s2 + $0x18] sm:$0xff]  ;;  %v2040_v9 = vld [vmem:[%s3386_s2 + $0x120] sm:$0xff] }
  0x21   : > { %578 = vmatpush.msra.mxu1 %v1843_v42  ;;  %618 = vmatpush.msra.mxu3 %v1857_v44  ;;  %v2031_v8 = vld [vmem:[%s3386_s2 + $0x98] sm:$0xff]  ;;  %v2045_v10 = vld [vmem:[%s3386_s2 + $0x1a0] sm:$0xff]  ;;  %v2050_v11 = vld [vmem:[%s3386_s2 + $0x10] sm:$0xff] }
  0x22   : > { %559 = vmatpush.msra.mxu0 %v1862_v45  ;;  %599 = vmatpush.msra.mxu2 %v1876_v47  ;;  %v2055_v12 = vld [vmem:[%s3386_s2 + $0x90] sm:$0xff]  ;;  %v2064_v13 = vld [vmem:[%s3386_s2 + $0x118] sm:$0xff]  ;;  %v2074_v15 = vld [vmem:[%s3386_s2 + $0x8] sm:$0xff] }
  0x23   : > { %579 = vmatpush.msra.mxu1 %v1867_v46  ;;  %619 = vmatpush.msra.mxu3 %v1881_v48  ;;  %3491 = vst [vmem:[#allocation2_spill] sm:$0xff] %v2064_v13  ;;  %v2069_v14 = vld [vmem:[%s3386_s2 + $0x198] sm:$0xff]  ;;  %v2079_v16 = vld [vmem:[%s3386_s2 + $0x88] sm:$0xff]  ;;  %v2088_v17 = vld [vmem:[%s3386_s2 + $0x110] sm:$0xff] }
  0x24   : > { %560 = vmatpush.msra.mxu0 %v1886_v49  ;;  %1577 = vmatmul.msk.bf16.vlgmr.msrb.gmra.mxu1 %vm294_vm0, %v1735_v24  ;;  %3492 = vst [vmem:[#allocation3_spill] sm:$0xff] %v2069_v14  ;;  %v2093_v18 = vld [vmem:[%s3386_s2 + $0x190] sm:$0xff]  ;;  %v2098_v19 = vld [vmem:[%s3386_s2] sm:$0xff]  ;;  %v2112_v21 = vld [vmem:[%s3386_s2 + $0x278] sm:$0xff] }
  0x25   : > { %580 = vmatpush.msra.mxu1 %v1891_v50  ;;  %1576 = vmatmul.msk.bf16.vlgmr.msrb.gmra.mxu0 %vm294_vm0, %v1735_v24  ;;  %3493 = vst [vmem:[#allocation4_spill] sm:$0xff] %v2088_v17  ;;  %v2103_v20 = vld [vmem:[%s3386_s2 + $0x80] sm:$0xff]  ;;  %v2117_v22 = vld [vmem:[%s3386_s2 + $0x2f8] sm:$0xff]  ;;  %v2124_v23 = vld [vmem:[%s3386_s2 + $0x108] sm:$0xff] }
  0x26   : > { %1578 = vmatmul.msk.bf16.vlgmr.msrb.gmra.mxu2 %vm294_vm0, %v1735_v24  ;;  %1579 = vmatmul.msk.bf16.vlgmr.msrb.gmra.mxu3 %vm294_vm0, %v1735_v24  ;;  %3494 = vst [vmem:[#allocation5_spill] sm:$0xff] %v2093_v18  ;;  %v2129_v24 = vld [vmem:[%s3386_s2 + $0x188] sm:$0xff] }
  0x27   : > { %561 = vmatpush.msra.mxu0 %v1904_v51  ;;  %581 = vmatpush.msra.mxu1 %v1909_v52  ;;  %3495 = vst [vmem:[#allocation6_spill] sm:$0xff] %v2112_v21 }
  0x28   : > { %600 = vmatpush.msra.mxu2 %v1918_v53  ;;  %620 = vmatpush.msra.mxu3 %v1923_v54  ;;  %3496 = vst [vmem:[#allocation7_spill] sm:$0xff] %v2117_v22 }
  0x29   : > { %562 = vmatpush.msra.mxu0 %v1932_v55  ;;  %582 = vmatpush.msra.mxu1 %v1937_v56  ;;  %3497 = vst [vmem:[#allocation8_spill] sm:$0xff] %v2124_v23 }
  0x2a   : > { %601 = vmatpush.msra.mxu2 %v1944_v57  ;;  %621 = vmatpush.msra.mxu3 %v1949_v58  ;;  %3498 = vst [vmem:[#allocation9_spill] sm:$0xff] %v2129_v24 }
  0x2b   : > { %563 = vmatpush.msra.mxu0 %v1954_v59  ;;  %583 = vmatpush.msra.mxu1 %v1959_v60 }
  0x2c   : > { %602 = vmatpush.msra.mxu2 %v1968_v61  ;;  %622 = vmatpush.msra.mxu3 %v1973_v62 }
  0x2d   : > { %564 = vmatpush.msra.mxu0 %v1978_v63  ;;  %584 = vmatpush.msra.mxu1 %v1983_v0 }
  0x2e   : > { %603 = vmatpush.msra.mxu2 %v1992_v1  ;;  %623 = vmatpush.msra.mxu3 %v1997_v2 }
  0x2f   : > { %565 = vmatpush.msra.mxu0 %v2002_v3  ;;  %585 = vmatpush.msra.mxu1 %v2007_v4 }
  0x30   : > { %604 = vmatpush.msra.mxu2 %v2016_v5  ;;  %624 = vmatpush.msra.mxu3 %v2021_v6 }
  0x31   : > { %566 = vmatpush.msra.mxu0 %v2026_v7  ;;  %586 = vmatpush.msra.mxu1 %v2031_v8 }
  0x32   : > { %605 = vmatpush.msra.mxu2 %v2040_v9  ;;  %625 = vmatpush.msra.mxu3 %v2045_v10 }
  0x33   : > { %567 = vmatpush.msra.mxu0 %v2050_v11  ;;  %587 = vmatpush.msra.mxu1 %v2055_v12 }
  0x34   : > { %606 = vmatpush.msra.mxu2 %v2064_v13  ;;  %626 = vmatpush.msra.mxu3 %v2069_v14  ;;  %v2148_v14 = vld [vmem:[%s3386_s2 + $0x100] sm:$0xff] }
  0x35   : > { %568 = vmatpush.msra.mxu0 %v2074_v15  ;;  %588 = vmatpush.msra.mxu1 %v2079_v16  ;;  %3501 = vst [vmem:[#allocation12_spill] sm:$0xff] %v2148_v14  ;;  %v2153_v13 = vld [vmem:[%s3386_s2 + $0x180] sm:$0xff] }
  0x36   : > { %607 = vmatpush.msra.mxu2 %v2088_v17  ;;  %627 = vmatpush.msra.mxu3 %v2093_v18  ;;  %v2136_v17 = vld [vmem:[%s3386_s2 + $0x270] sm:$0xff]  ;;  %3502 = vst [vmem:[#allocation13_spill] sm:$0xff] %v2153_v13 }
  0x37   : > { %569 = vmatpush.msra.mxu0 %v2098_v19  ;;  %589 = vmatpush.msra.mxu1 %v2103_v20  ;;  %3499 = vst [vmem:[#allocation10_spill] sm:$0xff] %v2136_v17  ;;  %v2141_v18 = vld [vmem:[%s3386_s2 + $0x2f0] sm:$0xff] }
  0x38   : > { %3500 = vst [vmem:[#allocation11_spill] sm:$0xff] %v2141_v18  ;;  %608 = vmatpush.msra.mxu2 %v2124_v23  ;;  %628 = vmatpush.msra.mxu3 %v2129_v24  ;;  %v2172_v23 = vld [vmem:[%s3386_s2 + $0x378] sm:$0xff] }
  0x39   : > { %634 = vmatpush.msrb.mxu0 %v2112_v21  ;;  %654 = vmatpush.msrb.mxu1 %v2117_v22  ;;  %v2160_v21 = vld [vmem:[%s3386_s2 + $0x268] sm:$0xff]  ;;  %3505 = vst [vmem:[#allocation16_spill] sm:$0xff] %v2172_v23  ;;  %v2177_v24 = vld [vmem:[%s3386_s2 + $0x3f8] sm:$0xff] }
  0x3a   : > { %3503 = vst [vmem:[#allocation14_spill] sm:$0xff] %v2160_v21  ;;  %v2165_v22 = vld [vmem:[%s3386_s2 + $0x2e8] sm:$0xff]  ;;  %609 = vmatpush.msra.mxu2 %v2148_v14  ;;  %629 = vmatpush.msra.mxu3 %v2153_v13  ;;  %v2196_v14 = vld [vmem:[%s3386_s2 + $0x370] sm:$0xff] }
  0x3b   : > { %3504 = vst [vmem:[#allocation15_spill] sm:$0xff] %v2165_v22  ;;  %635 = vmatpush.msrb.mxu0 %v2136_v17  ;;  %655 = vmatpush.msrb.mxu1 %v2141_v18  ;;  %v2184_v17 = vld [vmem:[%s3386_s2 + $0x260] sm:$0xff]  ;;  %v2201_v13 = vld [vmem:[%s3386_s2 + $0x3f0] sm:$0xff] }
  0x3c   : > { %3506 = vst [vmem:[#allocation17_spill] sm:$0xff] %v2177_v24  ;;  %v2189_v18 = vld [vmem:[%s3386_s2 + $0x2e0] sm:$0xff]  ;;  %674 = vmatpush.msrb.mxu2 %v2172_v23  ;;  %694 = vmatpush.msrb.mxu3 %v2177_v24  ;;  %v2220_v23 = vld [vmem:[%s3386_s2 + $0x368] sm:$0xff] }
  0x3d   : > { %3507 = vst [vmem:[#allocation18_spill] sm:$0xff] %v2184_v17  ;;  %636 = vmatpush.msrb.mxu0 %v2160_v21  ;;  %656 = vmatpush.msrb.mxu1 %v2165_v22  ;;  %v2208_v21 = vld [vmem:[%s3386_s2 + $0x258] sm:$0xff]  ;;  %v2225_v24 = vld [vmem:[%s3386_s2 + $0x3e8] sm:$0xff] }
  0x3e   : > { %3508 = vst [vmem:[#allocation19_spill] sm:$0xff] %v2189_v18  ;;  %v2213_v22 = vld [vmem:[%s3386_s2 + $0x2d8] sm:$0xff]  ;;  %675 = vmatpush.msrb.mxu2 %v2196_v14  ;;  %695 = vmatpush.msrb.mxu3 %v2201_v13 }
  0x3f   : > { %3509 = vst [vmem:[#allocation20_spill] sm:$0xff] %v2196_v14  ;;  %637 = vmatpush.msrb.mxu0 %v2184_v17  ;;  %657 = vmatpush.msrb.mxu1 %v2189_v18  ;;  %v2232_v17 = vld [vmem:[%s3386_s2 + $0x250] sm:$0xff]  ;;  %v2244_v14 = vld [vmem:[%s3386_s2 + $0x360] sm:$0xff] }
  0x40   : > { %3510 = vst [vmem:[#allocation21_spill] sm:$0xff] %v2201_v13  ;;  %v2237_v18 = vld [vmem:[%s3386_s2 + $0x2d0] sm:$0xff]  ;;  %v2249_v13 = vld [vmem:[%s3386_s2 + $0x3e0] sm:$0xff]  ;;  %676 = vmatpush.msrb.mxu2 %v2220_v23  ;;  %696 = vmatpush.msrb.mxu3 %v2225_v24 }
  0x41   : > { %3511 = vst [vmem:[#allocation22_spill] sm:$0xff] %v2208_v21  ;;  %638 = vmatpush.msrb.mxu0 %v2208_v21  ;;  %658 = vmatpush.msrb.mxu1 %v2213_v22  ;;  %v2256_v21 = vld [vmem:[%s3386_s2 + $0x248] sm:$0xff] }
  0x42   : > { %3512 = vst [vmem:[#allocation23_spill] sm:$0xff] %v2213_v22  ;;  %v2261_v22 = vld [vmem:[%s3386_s2 + $0x2c8] sm:$0xff]  ;;  %677 = vmatpush.msrb.mxu2 %v2244_v14  ;;  %697 = vmatpush.msrb.mxu3 %v2249_v13 }
  0x43   : > { %3513 = vst [vmem:[#allocation24_spill] sm:$0xff] %v2220_v23  ;;  %639 = vmatpush.msrb.mxu0 %v2232_v17  ;;  %659 = vmatpush.msrb.mxu1 %v2237_v18  ;;  %v2268_v23 = vld [vmem:[%s3386_s2 + $0x358] sm:$0xff] }
  0x44   : > { %3514 = vst [vmem:[#allocation25_spill] sm:$0xff] %v2225_v24  ;;  %v2273_v24 = vld [vmem:[%s3386_s2 + $0x3d8] sm:$0xff]  ;;  %678 = vmatpush.msrb.mxu2 %v2268_v23 }
  0x45   : > { %3515 = vst [vmem:[#allocation26_spill] sm:$0xff] %v2232_v17  ;;  %v2280_v17 = vld [vmem:[%s3386_s2 + $0x240] sm:$0xff]  ;;  %640 = vmatpush.msrb.mxu0 %v2256_v21  ;;  %660 = vmatpush.msrb.mxu1 %v2261_v22 }
  0x46   : > { %3516 = vst [vmem:[#allocation27_spill] sm:$0xff] %v2237_v18  ;;  %v2285_v18 = vld [vmem:[%s3386_s2 + $0x2c0] sm:$0xff]  ;;  %698 = vmatpush.msrb.mxu3 %v2273_v24 }
  0x47   : > { %3517 = vst [vmem:[#allocation28_spill] sm:$0xff] %v2244_v14  ;;  %v2292_v14 = vld [vmem:[%s3386_s2 + $0x350] sm:$0xff]  ;;  %641 = vmatpush.msrb.mxu0 %v2280_v17  ;;  %661 = vmatpush.msrb.mxu1 %v2285_v18 }
  0x48   : > { %3518 = vst [vmem:[#allocation29_spill] sm:$0xff] %v2249_v13  ;;  %v2297_v13 = vld [vmem:[%s3386_s2 + $0x3d0] sm:$0xff]  ;;  %679 = vmatpush.msrb.mxu2 %v2292_v14 }
  0x49   : > { %3519 = vst [vmem:[#allocation30_spill] sm:$0xff] %v2256_v21  ;;  %v2304_v21 = vld [vmem:[%s3386_s2 + $0x238] sm:$0xff]  ;;  %699 = vmatpush.msrb.mxu3 %v2297_v13 }
  0x4a   : > { %3520 = vst [vmem:[#allocation31_spill] sm:$0xff] %v2261_v22  ;;  %v2309_v22 = vld [vmem:[%s3386_s2 + $0x2b8] sm:$0xff]  ;;  %642 = vmatpush.msrb.mxu0 %v2304_v21 }
  0x4b   : > { %3521 = vst [vmem:[#allocation32_spill] sm:$0xff] %v2268_v23  ;;  %v2316_v23 = vld [vmem:[%s3386_s2 + $0x348] sm:$0xff]  ;;  %662 = vmatpush.msrb.mxu1 %v2309_v22 }
  0x4c   : > { %3522 = vst [vmem:[#allocation33_spill] sm:$0xff] %v2273_v24  ;;  %v2321_v24 = vld [vmem:[%s3386_s2 + $0x3c8] sm:$0xff]  ;;  %680 = vmatpush.msrb.mxu2 %v2316_v23 }
  0x4d   : > { %3523 = vst [vmem:[#allocation34_spill] sm:$0xff] %v2280_v17  ;;  %v2328_v17 = vld [vmem:[%s3386_s2 + $0x230] sm:$0xff]  ;;  %700 = vmatpush.msrb.mxu3 %v2321_v24 }
  0x4e   : > { %3524 = vst [vmem:[#allocation35_spill] sm:$0xff] %v2285_v18  ;;  %v2333_v18 = vld [vmem:[%s3386_s2 + $0x2b0] sm:$0xff]  ;;  %643 = vmatpush.msrb.mxu0 %v2328_v17 }
  0x4f   : > { %3525 = vst [vmem:[#allocation36_spill] sm:$0xff] %v2292_v14  ;;  %v2340_v14 = vld [vmem:[%s3386_s2 + $0x340] sm:$0xff]  ;;  %663 = vmatpush.msrb.mxu1 %v2333_v18 }
  0x50   : > { %3526 = vst [vmem:[#allocation37_spill] sm:$0xff] %v2297_v13  ;;  %v2345_v13 = vld [vmem:[%s3386_s2 + $0x3c0] sm:$0xff]  ;;  %681 = vmatpush.msrb.mxu2 %v2340_v14 }
  0x51   : > { %3527 = vst [vmem:[#allocation38_spill] sm:$0xff] %v2304_v21  ;;  %v2352_v21 = vld [vmem:[%s3386_s2 + $0x228] sm:$0xff]  ;;  %701 = vmatpush.msrb.mxu3 %v2345_v13 }
  0x52   : > { %3528 = vst [vmem:[#allocation39_spill] sm:$0xff] %v2309_v22  ;;  %v2357_v22 = vld [vmem:[%s3386_s2 + $0x2a8] sm:$0xff]  ;;  %644 = vmatpush.msrb.mxu0 %v2352_v21 }
  0x53   : > { %3529 = vst [vmem:[#allocation40_spill] sm:$0xff] %v2316_v23  ;;  %v2364_v23 = vld [vmem:[%s3386_s2 + $0x338] sm:$0xff]  ;;  %664 = vmatpush.msrb.mxu1 %v2357_v22 }
  0x54   : > { %3530 = vst [vmem:[#allocation41_spill] sm:$0xff] %v2321_v24  ;;  %v2369_v24 = vld [vmem:[%s3386_s2 + $0x3b8] sm:$0xff]  ;;  %682 = vmatpush.msrb.mxu2 %v2364_v23 }
  0x55   : > { %3531 = vst [vmem:[#allocation42_spill] sm:$0xff] %v2328_v17  ;;  %v2376_v17 = vld [vmem:[%s3386_s2 + $0x220] sm:$0xff]  ;;  %702 = vmatpush.msrb.mxu3 %v2369_v24 }
  0x56   : > { %3532 = vst [vmem:[#allocation43_spill] sm:$0xff] %v2333_v18  ;;  %v2381_v18 = vld [vmem:[%s3386_s2 + $0x2a0] sm:$0xff]  ;;  %645 = vmatpush.msrb.mxu0 %v2376_v17 }
  0x57   : > { %3533 = vst [vmem:[#allocation44_spill] sm:$0xff] %v2340_v14  ;;  %v2388_v14 = vld [vmem:[%s3386_s2 + $0x330] sm:$0xff]  ;;  %665 = vmatpush.msrb.mxu1 %v2381_v18 }
  0x58   : > { %3534 = vst [vmem:[#allocation45_spill] sm:$0xff] %v2345_v13  ;;  %v2393_v13 = vld [vmem:[%s3386_s2 + $0x3b0] sm:$0xff]  ;;  %683 = vmatpush.msrb.mxu2 %v2388_v14 }
  0x59   : > { %3535 = vst [vmem:[#allocation46_spill] sm:$0xff] %v2352_v21  ;;  %v2400_v21 = vld [vmem:[%s3386_s2 + $0x218] sm:$0xff]  ;;  %703 = vmatpush.msrb.mxu3 %v2393_v13 }
  0x5a   : > { %3536 = vst [vmem:[#allocation47_spill] sm:$0xff] %v2357_v22  ;;  %v2405_v22 = vld [vmem:[%s3386_s2 + $0x298] sm:$0xff]  ;;  %646 = vmatpush.msrb.mxu0 %v2400_v21 }
  0x5b   : > { %3537 = vst [vmem:[#allocation48_spill] sm:$0xff] %v2364_v23  ;;  %v2412_v23 = vld [vmem:[%s3386_s2 + $0x328] sm:$0xff]  ;;  %666 = vmatpush.msrb.mxu1 %v2405_v22 }
  0x5c   : > { %3538 = vst [vmem:[#allocation49_spill] sm:$0xff] %v2369_v24  ;;  %v2417_v24 = vld [vmem:[%s3386_s2 + $0x3a8] sm:$0xff]  ;;  %684 = vmatpush.msrb.mxu2 %v2412_v23 }
  0x5d   : > { %3539 = vst [vmem:[#allocation50_spill] sm:$0xff] %v2376_v17  ;;  %v2424_v17 = vld [vmem:[%s3386_s2 + $0x210] sm:$0xff]  ;;  %704 = vmatpush.msrb.mxu3 %v2417_v24 }
  0x5e   : > { %3540 = vst [vmem:[#allocation51_spill] sm:$0xff] %v2381_v18  ;;  %v2429_v18 = vld [vmem:[%s3386_s2 + $0x290] sm:$0xff]  ;;  %647 = vmatpush.msrb.mxu0 %v2424_v17 }
  0x5f   : > { %3541 = vst [vmem:[#allocation52_spill] sm:$0xff] %v2388_v14  ;;  %v2436_v14 = vld [vmem:[%s3386_s2 + $0x320] sm:$0xff]  ;;  %667 = vmatpush.msrb.mxu1 %v2429_v18 }
  0x60   : > { %3542 = vst [vmem:[#allocation53_spill] sm:$0xff] %v2393_v13  ;;  %v2441_v13 = vld [vmem:[%s3386_s2 + $0x3a0] sm:$0xff]  ;;  %685 = vmatpush.msrb.mxu2 %v2436_v14 }
  0x61   : > { %3543 = vst [vmem:[#allocation54_spill] sm:$0xff] %v2400_v21  ;;  %v2448_v21 = vld [vmem:[%s3386_s2 + $0x208] sm:$0xff]  ;;  %705 = vmatpush.msrb.mxu3 %v2441_v13 }
  0x62   : > { %3544 = vst [vmem:[#allocation55_spill] sm:$0xff] %v2405_v22  ;;  %v2453_v22 = vld [vmem:[%s3386_s2 + $0x288] sm:$0xff]  ;;  %648 = vmatpush.msrb.mxu0 %v2448_v21 }
  0x63   : > { %3545 = vst [vmem:[#allocation56_spill] sm:$0xff] %v2412_v23  ;;  %668 = vmatpush.msrb.mxu1 %v2453_v22  ;;  %v2469_v23 = vld [vmem:[%s3386_s2 + $0x280] sm:$0xff] }
  0x64   : > { %3546 = vst [vmem:[#allocation57_spill] sm:$0xff] %v2417_v24  ;;  %v2464_v24 = vld [vmem:[%s3386_s2 + $0x200] sm:$0xff] }
  0x65   : > { %3547 = vst [vmem:[#allocation58_spill] sm:$0xff] %v2436_v14  ;;  %v2474_v14 = vld [vmem:[%s3386_s2 + $0x318] sm:$0xff]  ;;  %649 = vmatpush.msrb.mxu0 %v2464_v24  ;;  %669 = vmatpush.msrb.mxu1 %v2469_v23 }
  0x66   : > { %3548 = vst [vmem:[#allocation59_spill] sm:$0xff] %v2441_v13  ;;  %v2481_v13 = vld [vmem:[%s3386_s2 + $0x398] sm:$0xff]  ;;  %686 = vmatpush.msrb.mxu2 %v2474_v14 }
  0x67   : > { %3549 = vst [vmem:[#allocation60_spill] sm:$0xff] %v2448_v21  ;;  %706 = vmatpush.msrb.mxu3 %v2481_v13 }
  0x68   : > { %3550 = vst [vmem:[#allocation61_spill] sm:$0xff] %v2453_v22  ;;  %v2488_v22 = vld [vmem:[%s3386_s2 + $0x310] sm:$0xff] }
  0x69   : > { %3551 = vst [vmem:[#allocation62_spill] sm:$0xff] %v2464_v24  ;;  %v2493_v24 = vld [vmem:[%s3386_s2 + $0x390] sm:$0xff]  ;;  %687 = vmatpush.msrb.mxu2 %v2488_v22 }
  0x6a   : > { %3552 = vst [vmem:[#allocation63_spill] sm:$0xff] %v2469_v23  ;;  %707 = vmatpush.msrb.mxu3 %v2493_v24 }
  0x6b   : > { %3553 = vst [vmem:[#allocation64_spill] sm:$0xff] %v2474_v14  ;;  %v2500_v14 = vld [vmem:[%s3386_s2 + $0x308] sm:$0xff] }
  0x6c   : > { %3554 = vst [vmem:[#allocation65_spill] sm:$0xff] %v2481_v13  ;;  %v2505_v13 = vld [vmem:[%s3386_s2 + $0x388] sm:$0xff]  ;;  %688 = vmatpush.msrb.mxu2 %v2500_v14 }
  0x6d   : > { %3555 = vst [vmem:[#allocation66_spill] sm:$0xff] %v2488_v22  ;;  %708 = vmatpush.msrb.mxu3 %v2505_v13  ;;  %v2512_v22 = vld [vmem:[%s3386_s2 + $0x300] sm:$0xff] }
  0x6e   : > { %3556 = vst [vmem:[#allocation67_spill] sm:$0xff] %v2493_v24  ;;  %v2517_v24 = vld [vmem:[%s3386_s2 + $0x380] sm:$0xff]  ;;  %689 = vmatpush.msrb.mxu2 %v2512_v22 }
  0x6f   : > { %3557 = vst [vmem:[#allocation68_spill] sm:$0xff] %v2505_v13  ;;  %709 = vmatpush.msrb.mxu3 %v2517_v24 }
  0x70   : > { %3558 = vst [vmem:[#allocation69_spill] sm:$0xff] %v2512_v22 }
  0x71   : > { %3559 = vst [vmem:[#allocation70_spill] sm:$0xff] %v2517_v24 }
  0x8f   : > { %v2521_v23 = vpop.f32.mrf.mxu0  ;;  %v2523_v21 = vpop.f32.mrf.mxu1 }
  0x90   : > { %3560 = vst [vmem:[#allocation71_spill] sm:$0xff] %v2521_v23  ;;  %570 = vmatmul.f32.vlgmr.msra.gmra.mxu0 %v2521_v23  ;;  %590 = vmatmul.f32.vlgmr.msra.gmra.mxu1 %v2523_v21 }
  0x91   : > { %3561 = vst [vmem:[#allocation72_spill] sm:$0xff] %v2523_v21  ;;  %714 = vmatpush.msra.mxu0 %v1744_v25  ;;  %734 = vmatpush.msra.mxu1 %v1749_v26 }
  0x93   : > { %715 = vmatpush.msra.mxu0 %v1768_v29  ;;  %735 = vmatpush.msra.mxu1 %v1773_v30 }
  0x95   : > { %716 = vmatpush.msra.mxu0 %v1790_v33  ;;  %736 = vmatpush.msra.mxu1 %v1795_v34 }
  0x96   : > { %v2533_v24 = vpop.f32.mrf.mxu2 }
  0x97   : > { %3562 = vst [vmem:[#allocation73_spill] sm:$0xff] %v2533_v24  ;;  %v2535_v22 = vpop.f32.mrf.mxu3  ;;  %610 = vmatmul.f32.vlgmr.msra.gmra.mxu2 %v2533_v24  ;;  %v309_v13 = vpop.f32.mrf.mxu0  ;;  %717 = vmatpush.msra.mxu0 %v1814_v37  ;;  %v411_v37 = vmul.f32 %v2523_v21, %v2523_v21  ;;  %v3060_v21 = vld [vmem:[%s3387_s3 + $0x30] sm:$0xff] }
  0x98   : > { %3563 = vst [vmem:[#allocation74_spill] sm:$0xff] %v2535_v22  ;;  %630 = vmatmul.f32.vlgmr.msra.gmra.mxu3 %v2535_v22  ;;  %v322_v25 = vpop.f32.mrf.mxu1  ;;  %737 = vmatpush.msra.mxu1 %v1819_v38  ;;  %v3568_v38 = vld [vmem:[#allocation2_spill] sm:$0xff]  ;;  %v3605_v13 = vld [vmem:[#allocation37_spill] sm:$0xff] }
  0x99   : > { %754 = vmatpush.msra.mxu2 %v1758_v27  ;;  %774 = vmatpush.msra.mxu3 %v1763_v28  ;;  %v3610_v25 = vld [vmem:[#allocation46_spill] sm:$0xff] }
  0x9a   : > { %718 = vmatpush.msra.mxu0 %v1838_v41  ;;  %738 = vmatpush.msra.mxu1 %v1843_v42  ;;  %v3571_v41 = vld [vmem:[#allocation7_spill] sm:$0xff]  ;;  %v3572_v42 = vld [vmem:[#allocation4_spill] sm:$0xff] }
  0x9b   : > { %755 = vmatpush.msra.mxu2 %v1780_v31  ;;  %775 = vmatpush.msra.mxu3 %v1785_v32 }
  0x9c   : > { %719 = vmatpush.msra.mxu0 %v1862_v45  ;;  %739 = vmatpush.msra.mxu1 %v1867_v46  ;;  %v3575_v45 = vld [vmem:[#allocation11_spill] sm:$0xff]  ;;  %v3576_v46 = vld [vmem:[#allocation8_spill] sm:$0xff] }
  0x9d   : > { %756 = vmatpush.msra.mxu2 %v1804_v35  ;;  %776 = vmatpush.msra.mxu3 %v1809_v36  ;;  %v410_v36 = vmul.f32 %v2521_v23, %v2521_v23  ;;  %v3065_v23 = vld [vmem:[%s3387_s3 + $0x38] sm:$0xff] }
  0x9e   : > { %720 = vmatpush.msra.mxu0 %v1886_v49  ;;  %740 = vmatpush.msra.mxu1 %v1891_v50  ;;  %v335_v26 = vpop.f32.mrf.mxu2  ;;  %v413_v49 = vmul.f32 %v2535_v22, %v2535_v22  ;;  %v3578_v50 = vld [vmem:[#allocation14_spill] sm:$0xff] }
  0x9f   : > { %v348_v27 = vpop.f32.mrf.mxu3  ;;  %757 = vmatpush.msra.mxu2 %v1828_v39  ;;  %777 = vmatpush.msra.mxu3 %v1833_v40  ;;  %v3569_v39 = vld [vmem:[#allocation3_spill] sm:$0xff]  ;;  %v3570_v40 = vld [vmem:[#allocation6_spill] sm:$0xff] }
  0xa0   : > { %721 = vmatpush.msra.mxu0 %v1904_v51  ;;  %741 = vmatpush.msra.mxu1 %v1909_v52  ;;  %v3579_v51 = vld [vmem:[#allocation15_spill] sm:$0xff]  ;;  %v3580_v52 = vld [vmem:[#allocation12_spill] sm:$0xff]  ;;  %v3048_v22 = vld [vmem:[%s3387_s3 + $0x20] sm:$0xff] }
  0xa1   : > { %v2557_v29 = vpop.f32.mrf.mxu1  ;;  %758 = vmatpush.msra.mxu2 %v1852_v43  ;;  %778 = vmatpush.msra.mxu3 %v1857_v44  ;;  %v3573_v43 = vld [vmem:[#allocation5_spill] sm:$0xff]  ;;  %v3574_v44 = vld [vmem:[#allocation10_spill] sm:$0xff]  ;;  %v3611_v26 = vld [vmem:[#allocation47_spill] sm:$0xff] }
  0xa2   : > { %v2555_v28 = vpop.f32.mrf.mxu0  ;;  %3565 = vst [vmem:[#allocation76_spill] sm:$0xff] %v2557_v29  ;;  %742 = vmatpush.msra.mxu1 %v1937_v56  ;;  %722 = vmatpush.msra.mxu0 %v1932_v55  ;;  %v3583_v55 = vld [vmem:[#allocation19_spill] sm:$0xff]  ;;  %v3584_v56 = vld [vmem:[#allocation16_spill] sm:$0xff] }
  0xa3   : > { %3564 = vst [vmem:[#allocation75_spill] sm:$0xff] %v2555_v28  ;;  %650 = vmatmul.f32.vlgmr.msrb.gmra.mxu0 %v2555_v28  ;;  %759 = vmatpush.msra.mxu2 %v1876_v47  ;;  %v3577_v47 = vld [vmem:[#allocation9_spill] sm:$0xff]  ;;  %v3612_v27 = vld [vmem:[#allocation44_spill] sm:$0xff] }
  0xa4   : > { %779 = vmatpush.msra.mxu3 %v1881_v48  ;;  %670 = vmatmul.f32.vlgmr.msrb.gmra.mxu1 %v2557_v29  ;;  %v412_v48 = vmul.f32 %v2533_v24, %v2533_v24  ;;  %v3053_v24 = vld [vmem:[%s3387_s3 + $0x28] sm:$0xff] }
  0xa5   : > { %723 = vmatpush.msra.mxu0 %v1954_v59  ;;  %743 = vmatpush.msra.mxu1 %v1959_v60  ;;  %v3587_v59 = vld [vmem:[#allocation23_spill] sm:$0xff]  ;;  %v3588_v60 = vld [vmem:[#allocation20_spill] sm:$0xff] }
  0xa6   : > { %760 = vmatpush.msra.mxu2 %v1918_v53  ;;  %780 = vmatpush.msra.mxu3 %v1923_v54  ;;  %v3581_v53 = vld [vmem:[#allocation13_spill] sm:$0xff]  ;;  %v3582_v54 = vld [vmem:[#allocation18_spill] sm:$0xff] }
  0xa7   : > { %724 = vmatpush.msra.mxu0 %v1978_v63  ;;  %744 = vmatpush.msra.mxu1 %v1983_v0  ;;  %v3591_v63 = vld [vmem:[#allocation27_spill] sm:$0xff]  ;;  %v3592_v0 = vld [vmem:[#allocation24_spill] sm:$0xff]  ;;  %3651 = vst [vmem:[#allocation18_spill] sm:$0xff] %v3048_v22 }
  0xa8   : > { %761 = vmatpush.msra.mxu2 %v1944_v57  ;;  %781 = vmatpush.msra.mxu3 %v1949_v58  ;;  %v3585_v57 = vld [vmem:[#allocation17_spill] sm:$0xff]  ;;  %v3586_v58 = vld [vmem:[#allocation22_spill] sm:$0xff] }
  0xa9   : > { %v2573_v30 = vpop.f32.mrf.mxu2  ;;  %v2575_v31 = vpop.f32.mrf.mxu3  ;;  %725 = vmatpush.msra.mxu0 %v2002_v3  ;;  %745 = vmatpush.msra.mxu1 %v2007_v4  ;;  %v3595_v3 = vld [vmem:[#allocation31_spill] sm:$0xff]  ;;  %v3596_v4 = vld [vmem:[#allocation28_spill] sm:$0xff] }
  0xaa   : > { %3566 = vst [vmem:[#allocation77_spill] sm:$0xff] %v2573_v30  ;;  %v361_v32 = vpop.f32.mrf.mxu0  ;;  %v374_v33 = vpop.f32.mrf.mxu1  ;;  %690 = vmatmul.f32.vlgmr.msrb.gmra.mxu2 %v2573_v30  ;;  %782 = vmatpush.msra.mxu3 %v1973_v62  ;;  %v3590_v62 = vld [vmem:[#allocation26_spill] sm:$0xff] }
  0xab   : > { %3567 = vst [vmem:[#allocation78_spill] sm:$0xff] %v2575_v31  ;;  %762 = vmatpush.msra.mxu2 %v1968_v61  ;;  %726 = vmatpush.msra.mxu0 %v2026_v7  ;;  %v3589_v61 = vld [vmem:[#allocation21_spill] sm:$0xff]  ;;  %v3599_v7 = vld [vmem:[#allocation35_spill] sm:$0xff]  ;;  %v3614_v33 = vld [vmem:[#allocation50_spill] sm:$0xff] }
  0xac   : > { %710 = vmatmul.f32.vlgmr.msrb.gmra.mxu3 %v2575_v31  ;;  %746 = vmatpush.msra.mxu1 %v2031_v8  ;;  %v3600_v8 = vld [vmem:[#allocation32_spill] sm:$0xff]  ;;  %v3613_v32 = vld [vmem:[#allocation45_spill] sm:$0xff] }
  0xad   : > { %763 = vmatpush.msra.mxu2 %v1992_v1  ;;  %783 = vmatpush.msra.mxu3 %v1997_v2  ;;  %v3593_v1 = vld [vmem:[#allocation25_spill] sm:$0xff]  ;;  %v3594_v2 = vld [vmem:[#allocation30_spill] sm:$0xff] }
  0xae   : > { %727 = vmatpush.msra.mxu0 %v2050_v11  ;;  %747 = vmatpush.msra.mxu1 %v2055_v12  ;;  %v3603_v11 = vld [vmem:[#allocation39_spill] sm:$0xff]  ;;  %v3604_v12 = vld [vmem:[#allocation36_spill] sm:$0xff] }
  0xaf   : > { %764 = vmatpush.msra.mxu2 %v2016_v5  ;;  %784 = vmatpush.msra.mxu3 %v2021_v6  ;;  %v3597_v5 = vld [vmem:[#allocation29_spill] sm:$0xff]  ;;  %v3598_v6 = vld [vmem:[#allocation34_spill] sm:$0xff] }
  0xb0   : > { %728 = vmatpush.msra.mxu0 %v2074_v15  ;;  %748 = vmatpush.msra.mxu1 %v2079_v16  ;;  %v3606_v15 = vld [vmem:[#allocation42_spill] sm:$0xff]  ;;  %v3607_v16 = vld [vmem:[#allocation43_spill] sm:$0xff] }
  0xb1   : > { %v387_v34 = vpop.f32.mrf.mxu2  ;;  %v400_v35 = vpop.f32.mrf.mxu3  ;;  %765 = vmatpush.msra.mxu2 %v2040_v9  ;;  %785 = vmatpush.msra.mxu3 %v2045_v10  ;;  %v3601_v9 = vld [vmem:[#allocation33_spill] sm:$0xff]  ;;  %v3602_v10 = vld [vmem:[#allocation38_spill] sm:$0xff] }
  0xb2   : > { %729 = vmatpush.msra.mxu0 %v2098_v19  ;;  %749 = vmatpush.msra.mxu1 %v2103_v20  ;;  %v3608_v19 = vld [vmem:[#allocation40_spill] sm:$0xff]  ;;  %v3609_v20 = vld [vmem:[#allocation41_spill] sm:$0xff]  ;;  %v3615_v34 = vld [vmem:[#allocation51_spill] sm:$0xff] }
  0xb3   : > { %766 = vmatpush.msra.mxu2 %v3568_v38  ;;  %786 = vmatpush.msra.mxu3 %v3569_v39  ;;  %v3616_v35 = vld [vmem:[#allocation48_spill] sm:$0xff]  ;;  %v3619_v38 = vld [vmem:[#allocation55_spill] sm:$0xff] }
  0xb4   : > { %730 = vmatmul.f32.vlgmr.msra.gmra.mxu0 %v410_v36  ;;  %750 = vmatmul.f32.vlgmr.msra.gmra.mxu1 %v411_v37  ;;  %v3617_v36 = vld [vmem:[#allocation49_spill] sm:$0xff]  ;;  %v3618_v37 = vld [vmem:[#allocation54_spill] sm:$0xff]  ;;  %v3620_v39 = vld [vmem:[#allocation52_spill] sm:$0xff] }
  0xb5   : > { %794 = vmatpush.msrb.mxu0 %v3570_v40  ;;  %814 = vmatpush.msrb.mxu1 %v3571_v41  ;;  %v3621_v40 = vld [vmem:[#allocation53_spill] sm:$0xff]  ;;  %v3622_v41 = vld [vmem:[#allocation56_spill] sm:$0xff] }
  0xb6   : > { %767 = vmatpush.msra.mxu2 %v3572_v42  ;;  %787 = vmatpush.msra.mxu3 %v3573_v43  ;;  %v3623_v42 = vld [vmem:[#allocation57_spill] sm:$0xff]  ;;  %v3624_v43 = vld [vmem:[#allocation60_spill] sm:$0xff] }
  0xb7   : > { %795 = vmatpush.msrb.mxu0 %v3574_v44  ;;  %815 = vmatpush.msrb.mxu1 %v3575_v45  ;;  %v3625_v44 = vld [vmem:[#allocation61_spill] sm:$0xff]  ;;  %v3626_v45 = vld [vmem:[#allocation58_spill] sm:$0xff] }
  0xb8   : > { %768 = vmatpush.msra.mxu2 %v3576_v46  ;;  %788 = vmatpush.msra.mxu3 %v3577_v47  ;;  %v3627_v46 = vld [vmem:[#allocation59_spill] sm:$0xff]  ;;  %v414_v47 = vmul.f32 %v2555_v28, %v2555_v28  ;;  %v3041_v28 = vld [vmem:[%s3387_s3 + $0x78] sm:$0xff] }
  0xb9   : > { %796 = vmatpush.msrb.mxu0 %v3578_v50  ;;  %816 = vmatpush.msrb.mxu1 %v3579_v51  ;;  %v3631_v50 = vld [vmem:[#allocation65_spill] sm:$0xff]  ;;  %v3632_v51 = vld [vmem:[#allocation66_spill] sm:$0xff]  ;;  %3650 = vst [vmem:[#allocation13_spill] sm:$0xff] %v3041_v28 }
  0xba   : > { %769 = vmatpush.msra.mxu2 %v3580_v52  ;;  %789 = vmatpush.msra.mxu3 %v3581_v53  ;;  %v3633_v52 = vld [vmem:[#allocation67_spill] sm:$0xff]  ;;  %v3634_v53 = vld [vmem:[#allocation68_spill] sm:$0xff] }
  0xbb   : > { %770 = vmatmul.f32.vlgmr.msra.gmra.mxu2 %v412_v48  ;;  %790 = vmatmul.f32.vlgmr.msra.gmra.mxu3 %v413_v49  ;;  %v3628_v48 = vld [vmem:[#allocation62_spill] sm:$0xff]  ;;  %v3630_v49 = vld [vmem:[#allocation64_spill] sm:$0xff] }
  0xbc   : > { %797 = vmatpush.msrb.mxu0 %v3582_v54  ;;  %817 = vmatpush.msrb.mxu1 %v3583_v55  ;;  %v416_v54 = vmul.f32 %v2573_v30, %v2573_v30  ;;  %v417_v55 = vmul.f32 %v2575_v31, %v2575_v31  ;;  %v3024_v31 = vld [vmem:[%s3387_s3 + $0x60] sm:$0xff]  ;;  %v3029_v30 = vld [vmem:[%s3387_s3 + $0x68] sm:$0xff] }
  0xbd   : > { %834 = vmatpush.msrb.mxu2 %v3584_v56  ;;  %854 = vmatpush.msrb.mxu3 %v3585_v57  ;;  %v3635_v56 = vld [vmem:[#allocation69_spill] sm:$0xff]  ;;  %v3636_v57 = vld [vmem:[#allocation70_spill] sm:$0xff]  ;;  %3647 = vst [vmem:[#allocation14_spill] sm:$0xff] %v3024_v31 }
  0xbe   : > { %798 = vmatpush.msrb.mxu0 %v3586_v58  ;;  %818 = vmatpush.msrb.mxu1 %v3587_v59  ;;  %v2692_v58 = vld [vmem:[%s3387_s3 + $0x1c0] sm:$0xff]  ;;  %v2702_v59 = vld [vmem:[%s3387_s3 + $0x1d0] sm:$0xff]  ;;  %3648 = vst [vmem:[#allocation15_spill] sm:$0xff] %v3029_v30 }
  0xbf   : > { %835 = vmatpush.msrb.mxu2 %v3588_v60  ;;  %855 = vmatpush.msrb.mxu3 %v3589_v61  ;;  %v2709_v60 = vld [vmem:[%s3387_s3 + $0x1d8] sm:$0xff]  ;;  %v2716_v61 = vld [vmem:[%s3387_s3 + $0x180] sm:$0xff] }
  0xc0   : > { %799 = vmatpush.msrb.mxu0 %v3590_v62  ;;  %819 = vmatpush.msrb.mxu1 %v3591_v63  ;;  %v2721_v62 = vld [vmem:[%s3387_s3 + $0x188] sm:$0xff]  ;;  %v2726_v63 = vld [vmem:[%s3387_s3 + $0x190] sm:$0xff] }
  0xc1   : > { %836 = vmatpush.msrb.mxu2 %v3592_v0  ;;  %856 = vmatpush.msrb.mxu3 %v3593_v1  ;;  %v2733_v0 = vld [vmem:[%s3387_s3 + $0x198] sm:$0xff]  ;;  %v2740_v1 = vld [vmem:[%s3387_s3 + $0x140] sm:$0xff] }
  0xc2   : > { %800 = vmatpush.msrb.mxu0 %v3594_v2  ;;  %820 = vmatpush.msrb.mxu1 %v3595_v3  ;;  %v2745_v2 = vld [vmem:[%s3387_s3 + $0x148] sm:$0xff]  ;;  %v2750_v3 = vld [vmem:[%s3387_s3 + $0x150] sm:$0xff] }
  0xc3   : > { %837 = vmatpush.msrb.mxu2 %v3596_v4  ;;  %857 = vmatpush.msrb.mxu3 %v3597_v5  ;;  %v2757_v4 = vld [vmem:[%s3387_s3 + $0x158] sm:$0xff]  ;;  %v2764_v5 = vld [vmem:[%s3387_s3 + $0x100] sm:$0xff] }
  0xc4   : > { %801 = vmatpush.msrb.mxu0 %v3598_v6  ;;  %821 = vmatpush.msrb.mxu1 %v3599_v7  ;;  %v2769_v6 = vld [vmem:[%s3387_s3 + $0x108] sm:$0xff]  ;;  %v2774_v7 = vld [vmem:[%s3387_s3 + $0x110] sm:$0xff] }
  0xc5   : > { %838 = vmatpush.msrb.mxu2 %v3600_v8  ;;  %858 = vmatpush.msrb.mxu3 %v3601_v9  ;;  %v2781_v8 = vld [vmem:[%s3387_s3 + $0x118] sm:$0xff]  ;;  %v2788_v9 = vld [vmem:[%s3387_s3 + $0xc0] sm:$0xff] }
  0xc6   : > { %802 = vmatpush.msrb.mxu0 %v3602_v10  ;;  %822 = vmatpush.msrb.mxu1 %v3603_v11  ;;  %v2793_v10 = vld [vmem:[%s3387_s3 + $0xc8] sm:$0xff]  ;;  %v2798_v11 = vld [vmem:[%s3387_s3 + $0xd0] sm:$0xff] }
  0xc7   : > { %839 = vmatpush.msrb.mxu2 %v3604_v12  ;;  %859 = vmatpush.msrb.mxu3 %v3605_v13  ;;  %v2805_v12 = vld [vmem:[%s3387_s3 + $0xd8] sm:$0xff]  ;;  %v2810_v13 = vld [vmem:[%s3387_s3 + $0x80] sm:$0xff] }
  0xc8   : > { %803 = vmatpush.msrb.mxu0 %v3606_v15  ;;  %823 = vmatpush.msrb.mxu1 %v3607_v16  ;;  %v2815_v15 = vld [vmem:[%s3387_s3 + $0x88] sm:$0xff]  ;;  %v2822_v16 = vld [vmem:[%s3387_s3 + $0x90] sm:$0xff] }
  0xc9   : > { %840 = vmatpush.msrb.mxu2 %v3608_v19  ;;  %860 = vmatpush.msrb.mxu3 %v3609_v20  ;;  %v2827_v19 = vld [vmem:[%s3387_s3 + $0x98] sm:$0xff]  ;;  %v2832_v20 = vld [vmem:[%s3387_s3 + $0x40] sm:$0xff] }
  0xca   : > { %804 = vmatpush.msrb.mxu0 %v3610_v25  ;;  %824 = vmatpush.msrb.mxu1 %v3611_v26  ;;  %v2839_v25 = vld [vmem:[%s3387_s3 + $0x48] sm:$0xff]  ;;  %v2844_v26 = vld [vmem:[%s3387_s3 + $0x50] sm:$0xff] }
  0xcb   : > { %841 = vmatpush.msrb.mxu2 %v3612_v27  ;;  %861 = vmatpush.msrb.mxu3 %v3613_v32  ;;  %v2849_v27 = vld [vmem:[%s3387_s3 + $0x58] sm:$0xff]  ;;  %v2856_v32 = vld [vmem:[%s3387_s3] sm:$0xff] }
  0xcc   : > { %805 = vmatpush.msrb.mxu0 %v3614_v33  ;;  %825 = vmatpush.msrb.mxu1 %v3615_v34  ;;  %v2861_v33 = vld [vmem:[%s3387_s3 + $0x8] sm:$0xff]  ;;  %v2868_v34 = vld [vmem:[%s3387_s3 + $0x10] sm:$0xff] }
  0xcd   : > { %842 = vmatpush.msrb.mxu2 %v3616_v35  ;;  %862 = vmatpush.msrb.mxu3 %v3617_v36  ;;  %v2873_v35 = vld [vmem:[%s3387_s3 + $0x18] sm:$0xff]  ;;  %v2880_v36 = vld [vmem:[%s3387_s3 + $0x1e0] sm:$0xff] }
  0xce   : > { %806 = vmatpush.msrb.mxu0 %v3618_v37  ;;  %826 = vmatpush.msrb.mxu1 %v3619_v38  ;;  %v2885_v37 = vld [vmem:[%s3387_s3 + $0x1e8] sm:$0xff]  ;;  %v2892_v38 = vld [vmem:[%s3387_s3 + $0x1f0] sm:$0xff] }
  0xcf   : > { %843 = vmatpush.msrb.mxu2 %v3620_v39  ;;  %863 = vmatpush.msrb.mxu3 %v3621_v40  ;;  %v2897_v39 = vld [vmem:[%s3387_s3 + $0x1f8] sm:$0xff]  ;;  %v2908_v40 = vld [vmem:[%s3387_s3 + $0x1a0] sm:$0xff] }
  0xd0   : > { %807 = vmatpush.msrb.mxu0 %v2424_v17  ;;  %827 = vmatpush.msrb.mxu1 %v2429_v18  ;;  %v415_v17 = vmul.f32 %v2557_v29, %v2557_v29  ;;  %v3629_v18 = vld [vmem:[#allocation63_spill] sm:$0xff]  ;;  %v3036_v29 = vld [vmem:[%s3387_s3 + $0x70] sm:$0xff] }
  0xd1   : > { %844 = vmatpush.msrb.mxu2 %v3622_v41  ;;  %864 = vmatpush.msrb.mxu3 %v3623_v42  ;;  %v2913_v41 = vld [vmem:[%s3387_s3 + $0x1a8] sm:$0xff]  ;;  %v2918_v42 = vld [vmem:[%s3387_s3 + $0x1b0] sm:$0xff]  ;;  %3649 = vst [vmem:[#allocation12_spill] sm:$0xff] %v3036_v29 }
  0xd2   : > { %808 = vmatpush.msrb.mxu0 %v3624_v43  ;;  %828 = vmatpush.msrb.mxu1 %v3625_v44  ;;  %v2925_v43 = vld [vmem:[%s3387_s3 + $0x1b8] sm:$0xff]  ;;  %v2932_v44 = vld [vmem:[%s3387_s3 + $0x160] sm:$0xff] }
  0xd3   : > { %845 = vmatpush.msrb.mxu2 %v3626_v45  ;;  %865 = vmatpush.msrb.mxu3 %v3627_v46  ;;  %v2937_v45 = vld [vmem:[%s3387_s3 + $0x168] sm:$0xff]  ;;  %v2942_v46 = vld [vmem:[%s3387_s3 + $0x170] sm:$0xff] }
  0xd4   : > { %809 = vmatpush.msrb.mxu0 %v3628_v48  ;;  %829 = vmatpush.msrb.mxu1 %v3629_v18  ;;  %v2961_v48 = vld [vmem:[%s3387_s3 + $0x128] sm:$0xff]  ;;  %v2966_v18 = vld [vmem:[%s3387_s3 + $0x130] sm:$0xff] }
  0xd5   : > { %846 = vmatpush.msrb.mxu2 %v3630_v49  ;;  %866 = vmatpush.msrb.mxu3 %v3631_v50  ;;  %3637 = vst [vmem:[#allocation2_spill] sm:$0xff] %v2966_v18  ;;  %v2973_v49 = vld [vmem:[%s3387_s3 + $0x138] sm:$0xff]  ;;  %v2978_v50 = vld [vmem:[%s3387_s3 + $0xe0] sm:$0xff] }
  0xd6   : > { %810 = vmatmul.f32.vlgmr.msrb.gmra.mxu0 %v414_v47  ;;  %830 = vmatmul.f32.vlgmr.msrb.gmra.mxu1 %v415_v17  ;;  %v2949_v47 = vld [vmem:[%s3387_s3 + $0x178] sm:$0xff]  ;;  %v2956_v17 = vld [vmem:[%s3387_s3 + $0x120] sm:$0xff]  ;;  %3638 = vst [vmem:[#allocation3_spill] sm:$0xff] %v2973_v49 }
  0xd7   : > { %847 = vmatpush.msrb.mxu2 %v3632_v51  ;;  %867 = vmatpush.msrb.mxu3 %v3633_v52  ;;  %3639 = vst [vmem:[#allocation6_spill] sm:$0xff] %v2978_v50  ;;  %v2983_v51 = vld [vmem:[%s3387_s3 + $0xe8] sm:$0xff]  ;;  %v2990_v52 = vld [vmem:[%s3387_s3 + $0xf0] sm:$0xff] }
  0xd8   : > { %950 = vmatpush.msra.mxu0 %v2692_v58  ;;  %3640 = vst [vmem:[#allocation7_spill] sm:$0xff] %v2983_v51 }
  0xd9   : > { %848 = vmatpush.msrb.mxu2 %v2500_v14  ;;  %868 = vmatpush.msrb.mxu3 %v3634_v53  ;;  %v2697_v14 = vld [vmem:[%s3387_s3 + $0x1c8] sm:$0xff]  ;;  %3641 = vst [vmem:[#allocation4_spill] sm:$0xff] %v2990_v52  ;;  %v2995_v53 = vld [vmem:[%s3387_s3 + $0xf8] sm:$0xff] }
  0xda   : > { %970 = vmatpush.msra.mxu1 %v2697_v14  ;;  %951 = vmatpush.msra.mxu0 %v2716_v61  ;;  %3642 = vst [vmem:[#allocation5_spill] sm:$0xff] %v2995_v53 }
  0xdb   : > { %849 = vmatpush.msrb.mxu2 %v3635_v56  ;;  %869 = vmatpush.msrb.mxu3 %v3636_v57  ;;  %v3012_v56 = vld [vmem:[%s3387_s3 + $0xb0] sm:$0xff]  ;;  %v3017_v57 = vld [vmem:[%s3387_s3 + $0xb8] sm:$0xff] }
  0xdc   : > { %850 = vmatmul.f32.vlgmr.msrb.gmra.mxu2 %v416_v54  ;;  %870 = vmatmul.f32.vlgmr.msrb.gmra.mxu3 %v417_v55  ;;  %v3000_v54 = vld [vmem:[%s3387_s3 + $0xa0] sm:$0xff]  ;;  %v3007_v55 = vld [vmem:[%s3387_s3 + $0xa8] sm:$0xff]  ;;  %3645 = vst [vmem:[#allocation8_spill] sm:$0xff] %v3012_v56 }
  0xdd   : > { %990 = vmatpush.msra.mxu2 %v2702_v59  ;;  %1010 = vmatpush.msra.mxu3 %v2709_v60  ;;  %3643 = vst [vmem:[#allocation10_spill] sm:$0xff] %v3000_v54 }
  0xde   : > { %971 = vmatpush.msra.mxu1 %v2721_v62  ;;  %952 = vmatpush.msra.mxu0 %v2740_v1  ;;  %3644 = vst [vmem:[#allocation11_spill] sm:$0xff] %v3007_v55 }
  0xdf   : > { %991 = vmatpush.msra.mxu2 %v2726_v63  ;;  %1011 = vmatpush.msra.mxu3 %v2733_v0  ;;  %3646 = vst [vmem:[#allocation9_spill] sm:$0xff] %v3017_v57 }
  0xe0   : > { %972 = vmatpush.msra.mxu1 %v2745_v2  ;;  %953 = vmatpush.msra.mxu0 %v2764_v5 }
  0xe1   : > { %992 = vmatpush.msra.mxu2 %v2750_v3  ;;  %1012 = vmatpush.msra.mxu3 %v2757_v4 }
  0xe2   : > { %973 = vmatpush.msra.mxu1 %v2769_v6  ;;  %954 = vmatpush.msra.mxu0 %v2788_v9 }
  0xe3   : > { %993 = vmatpush.msra.mxu2 %v2774_v7  ;;  %1013 = vmatpush.msra.mxu3 %v2781_v8 }
  0xe4   : > { %974 = vmatpush.msra.mxu1 %v2793_v10  ;;  %955 = vmatpush.msra.mxu0 %v2810_v13 }
  0xe5   : > { %994 = vmatpush.msra.mxu2 %v2798_v11  ;;  %1014 = vmatpush.msra.mxu3 %v2805_v12 }
  0xe6   : > { %975 = vmatpush.msra.mxu1 %v2815_v15  ;;  %956 = vmatpush.msra.mxu0 %v2832_v20 }
  0xe7   : > { %995 = vmatpush.msra.mxu2 %v2822_v16  ;;  %1015 = vmatpush.msra.mxu3 %v2827_v19 }
  0xe8   : > { %976 = vmatpush.msra.mxu1 %v2839_v25  ;;  %957 = vmatpush.msra.mxu0 %v2856_v32 }
  0xe9   : > { %996 = vmatpush.msra.mxu2 %v2844_v26  ;;  %1016 = vmatpush.msra.mxu3 %v2849_v27 }
  0xea   : > { %977 = vmatpush.msra.mxu1 %v2861_v33  ;;  %1030 = vmatpush.msrb.mxu0 %v2880_v36 }
  0xeb   : > { %997 = vmatpush.msra.mxu2 %v2868_v34  ;;  %1017 = vmatpush.msra.mxu3 %v2873_v35 }
  0xec   : > { %1050 = vmatpush.msrb.mxu1 %v2885_v37  ;;  %1031 = vmatpush.msrb.mxu0 %v2908_v40 }
  0xed   : > { %1070 = vmatpush.msrb.mxu2 %v2892_v38  ;;  %1090 = vmatpush.msrb.mxu3 %v2897_v39 }
  0xee   : > { %1051 = vmatpush.msrb.mxu1 %v2913_v41  ;;  %1032 = vmatpush.msrb.mxu0 %v2932_v44 }
  0xef   : > { %1071 = vmatpush.msrb.mxu2 %v2918_v42  ;;  %1091 = vmatpush.msrb.mxu3 %v2925_v43 }
  0xf0   : > { %1052 = vmatpush.msrb.mxu1 %v2937_v45  ;;  %1033 = vmatpush.msrb.mxu0 %v2956_v17 }
  0xf1   : > { %1072 = vmatpush.msrb.mxu2 %v2942_v46  ;;  %1092 = vmatpush.msrb.mxu3 %v2949_v47 }
  0xf2   : > { %1053 = vmatpush.msrb.mxu1 %v2961_v48  ;;  %1034 = vmatpush.msrb.mxu0 %v2978_v50 }
  0xf3   : > { %1073 = vmatpush.msrb.mxu2 %v2966_v18  ;;  %1093 = vmatpush.msrb.mxu3 %v2973_v49 }
  0xf4   : > { %1054 = vmatpush.msrb.mxu1 %v2983_v51  ;;  %1035 = vmatpush.msrb.mxu0 %v3000_v54 }
  0xf5   : > { %1074 = vmatpush.msrb.mxu2 %v2990_v52  ;;  %1094 = vmatpush.msrb.mxu3 %v2995_v53 }
  0xf6   : > { %1055 = vmatpush.msrb.mxu1 %v3007_v55  ;;  %1036 = vmatpush.msrb.mxu0 %v3024_v31 }
  0xf7   : > { %1075 = vmatpush.msrb.mxu2 %v3012_v56  ;;  %1095 = vmatpush.msrb.mxu3 %v3017_v57 }
  0xf8   : > { %1056 = vmatpush.msrb.mxu1 %v3029_v30  ;;  %1037 = vmatpush.msrb.mxu0 %v3048_v22 }
  0xf9   : > { %1076 = vmatpush.msrb.mxu2 %v3036_v29  ;;  %1096 = vmatpush.msrb.mxu3 %v3041_v28 }
  0xfa   : > { %1057 = vmatpush.msrb.mxu1 %v3053_v24 }
  0xfb   : > { %1077 = vmatpush.msrb.mxu2 %v3060_v21  ;;  %1097 = vmatpush.msrb.mxu3 %v3065_v23 }
 0x10d   : > { %v571_v57 = vpop.f32.mrf.mxu0  ;;  %v591_v56 = vpop.f32.mrf.mxu1 }
 0x10e   : > { %v592_v31 = vadd.f32 %v591_v56, %v571_v57 }
 0x11a   : > { %v611_v30 = vpop.f32.mrf.mxu2 }
 0x11b   : > { %v612_v55 = vadd.f32 %v611_v30, %v592_v31  ;;  %v631_v54 = vpop.f32.mrf.mxu3  ;;  %v3655_v30 = vld [vmem:[#allocation7_spill] sm:$0xff] }
 0x11d   : > { %v632_v53 = vadd.f32 %v631_v54, %v612_v55 }
 0x120   : > { %v651_v52 = vpop.f32.mrf.mxu0 }
 0x121   : > { %v652_v51 = vadd.f32 %v651_v52, %v632_v53  ;;  %v671_v50 = vpop.f32.mrf.mxu1 }
 0x123   : > { %v672_v49 = vadd.f32 %v671_v50, %v652_v51 }
 0x12d   : > { %v691_v29 = vpop.f32.mrf.mxu2 }
 0x12e   : > { %v692_v18 = vadd.f32 %v691_v29, %v672_v49  ;;  %v3654_v29 = vld [vmem:[#allocation6_spill] sm:$0xff] }
 0x12f   : > { %v711_v28 = vpop.f32.mrf.mxu3 }
 0x130   : > { %v712_v22 = vadd.f32 %v711_v28, %v692_v18  ;;  %v3653_v28 = vld [vmem:[#allocation3_spill] sm:$0xff] }
 0x131   : > { %v731_v31 = vpop.f32.mrf.mxu0 }
 0x132   : > { %1580 = vmatmul.msk.f32.vlgmr.msra.gmra.mxu0 %vm938_vm1, %v712_v22  ;;  %1581 = vmatmul.msk.f32.vlgmr.msra.gmra.mxu1 %vm938_vm1, %v712_v22 }
 0x133   : > { %1582 = vmatmul.msk.f32.vlgmr.msra.gmra.mxu2 %vm938_vm1, %v712_v22  ;;  %1583 = vmatmul.msk.f32.vlgmr.msra.gmra.mxu3 %vm938_vm1, %v712_v22 }
 0x134   : > { %1113 = vmatpush.msra.mxu0 %v2692_v58  ;;  %1133 = vmatpush.msra.mxu1 %v2697_v14  ;;  %v751_v58 = vpop.f32.mrf.mxu1  ;;  %v3656_v14 = vld [vmem:[#allocation4_spill] sm:$0xff] }
 0x135   : > { %1153 = vmatpush.msra.mxu2 %v2702_v59  ;;  %1173 = vmatpush.msra.mxu3 %v2709_v60  ;;  %v3657_v59 = vld [vmem:[#allocation5_spill] sm:$0xff]  ;;  %v3658_v60 = vld [vmem:[#allocation10_spill] sm:$0xff] }
 0x136   : > { %1114 = vmatpush.msra.mxu0 %v2716_v61  ;;  %1134 = vmatpush.msra.mxu1 %v2721_v62  ;;  %v3659_v61 = vld [vmem:[#allocation11_spill] sm:$0xff] }
 0x137   : > { %1154 = vmatpush.msra.mxu2 %v2726_v63  ;;  %1174 = vmatpush.msra.mxu3 %v2733_v0  ;;  %v3660_v63 = vld [vmem:[#allocation8_spill] sm:$0xff]  ;;  %v3661_v0 = vld [vmem:[#allocation9_spill] sm:$0xff] }
 0x138   : > { %1115 = vmatpush.msra.mxu0 %v2740_v1  ;;  %1135 = vmatpush.msra.mxu1 %v2745_v2  ;;  %v752_v1 = vadd.f32 %v751_v58, %v731_v31  ;;  %v3662_v2 = vld [vmem:[#allocation14_spill] sm:$0xff] }
 0x139   : > { %1155 = vmatpush.msra.mxu2 %v2750_v3  ;;  %1175 = vmatpush.msra.mxu3 %v2757_v4  ;;  %v3663_v3 = vld [vmem:[#allocation15_spill] sm:$0xff]  ;;  %v3664_v4 = vld [vmem:[#allocation12_spill] sm:$0xff] }
 0x13a   : > { %1584 = vmatmul.msk.f32.vlgmr.msrb.gmra.mxu0 %vm938_vm1, %v712_v22  ;;  %1585 = vmatmul.msk.f32.vlgmr.msrb.gmra.mxu1 %vm938_vm1, %v712_v22 }
 0x13b   : > { %1586 = vmatmul.msk.f32.vlgmr.msrb.gmra.mxu2 %vm938_vm1, %v712_v22  ;;  %1587 = vmatmul.msk.f32.vlgmr.msrb.gmra.mxu3 %vm938_vm1, %v712_v22  ;;  %v3652_v22 = vld [vmem:[#allocation2_spill] sm:$0xff] }
 0x13c   : > { %1116 = vmatpush.msra.mxu0 %v2764_v5  ;;  %1136 = vmatpush.msra.mxu1 %v2769_v6  ;;  %v3665_v5 = vld [vmem:[#allocation13_spill] sm:$0xff] }
 0x13d   : > { %1156 = vmatpush.msra.mxu2 %v2774_v7  ;;  %1176 = vmatpush.msra.mxu3 %v2781_v8  ;;  %v3666_v7 = vld [vmem:[#allocation18_spill] sm:$0xff] }
 0x13e   : > { %1117 = vmatpush.msra.mxu0 %v2788_v9  ;;  %1137 = vmatpush.msra.mxu1 %v2793_v10  ;;  %v771_v62 = vpop.f32.mrf.mxu2  ;;  %v791_v8 = vpop.f32.mrf.mxu3 }
 0x13f   : > { %1157 = vmatpush.msra.mxu2 %v2798_v11  ;;  %1177 = vmatpush.msra.mxu3 %v2805_v12  ;;  %v772_v6 = vadd.f32 %v771_v62, %v752_v1 }
 0x140   : > { %1118 = vmatpush.msra.mxu0 %v2810_v13  ;;  %1138 = vmatpush.msra.mxu1 %v2815_v15 }
 0x141   : > { %1158 = vmatpush.msra.mxu2 %v2822_v16  ;;  %1178 = vmatpush.msra.mxu3 %v2827_v19  ;;  %v792_v10 = vadd.f32 %v791_v8, %v772_v6 }
 0x142   : > { %1119 = vmatpush.msra.mxu0 %v2832_v20  ;;  %1139 = vmatpush.msra.mxu1 %v2839_v25 }
 0x143   : > { %1159 = vmatpush.msra.mxu2 %v2844_v26  ;;  %1179 = vmatpush.msra.mxu3 %v2849_v27 }
 0x144   : > { %1120 = vmatpush.msra.mxu0 %v2856_v32  ;;  %1140 = vmatpush.msra.mxu1 %v2861_v33 }
 0x145   : > { %1160 = vmatpush.msra.mxu2 %v2868_v34  ;;  %1180 = vmatpush.msra.mxu3 %v2873_v35 }
 0x146   : > { %1193 = vmatpush.msrb.mxu0 %v2880_v36  ;;  %1213 = vmatpush.msrb.mxu1 %v2885_v37 }
 0x147   : > { %1233 = vmatpush.msrb.mxu2 %v2892_v38  ;;  %1253 = vmatpush.msrb.mxu3 %v2897_v39 }
 0x148   : > { %1194 = vmatpush.msrb.mxu0 %v2908_v40  ;;  %1214 = vmatpush.msrb.mxu1 %v2913_v41 }
 0x149   : > { %1234 = vmatpush.msrb.mxu2 %v2918_v42  ;;  %1254 = vmatpush.msrb.mxu3 %v2925_v43 }
 0x14a   : > { %1195 = vmatpush.msrb.mxu0 %v2932_v44  ;;  %1215 = vmatpush.msrb.mxu1 %v2937_v45 }
 0x14b   : > { %1235 = vmatpush.msrb.mxu2 %v2942_v46  ;;  %1255 = vmatpush.msrb.mxu3 %v2949_v47 }
 0x14c   : > { %1196 = vmatpush.msrb.mxu0 %v2956_v17  ;;  %1216 = vmatpush.msrb.mxu1 %v2961_v48 }
 0x14d   : > { %1236 = vmatpush.msrb.mxu2 %v3652_v22  ;;  %1256 = vmatpush.msrb.mxu3 %v3653_v28 }
 0x14e   : > { %1197 = vmatpush.msrb.mxu0 %v3654_v29  ;;  %1217 = vmatpush.msrb.mxu1 %v3655_v30 }
 0x14f   : > { %1237 = vmatpush.msrb.mxu2 %v3656_v14  ;;  %1257 = vmatpush.msrb.mxu3 %v3657_v59 }
 0x150   : > { %1198 = vmatpush.msrb.mxu0 %v3658_v60  ;;  %1218 = vmatpush.msrb.mxu1 %v3659_v61 }
 0x151   : > { %1238 = vmatpush.msrb.mxu2 %v3660_v63  ;;  %1258 = vmatpush.msrb.mxu3 %v3661_v0 }
 0x152   : > { %1199 = vmatpush.msrb.mxu0 %v3662_v2  ;;  %1219 = vmatpush.msrb.mxu1 %v3663_v3  ;;  %v3667_v2 = vld [vmem:[#allocation71_spill] sm:$0xff] }
 0x153   : > { %1239 = vmatpush.msrb.mxu2 %v3664_v4  ;;  %1259 = vmatpush.msrb.mxu3 %v3665_v5  ;;  %v811_v9 = vpop.f32.mrf.mxu0  ;;  %v831_v12 = vpop.f32.mrf.mxu1  ;;  %v3668_v5 = vld [vmem:[#allocation72_spill] sm:$0xff] }
 0x154   : > { %1200 = vmatpush.msrb.mxu0 %v3666_v7  ;;  %1220 = vmatpush.msrb.mxu1 %v3053_v24  ;;  %v812_v11 = vadd.f32 %v811_v9, %v792_v10  ;;  %v3669_v7 = vld [vmem:[#allocation73_spill] sm:$0xff]  ;;  %v3670_v9 = vld [vmem:[#allocation74_spill] sm:$0xff] }
 0x155   : > { %1240 = vmatpush.msrb.mxu2 %v3060_v21  ;;  %1260 = vmatpush.msrb.mxu3 %v3065_v23 }
 0x156   : > { %v832_v13 = vadd.f32 %v831_v12, %v812_v11  ;;  %v3223_v11 = vld [vmem:[%s3388_s4] sm:$0xff] }
 0x15f   : > { %v851_v15 = vpop.f32.mrf.mxu2  ;;  %v871_v19 = vpop.f32.mrf.mxu3 }
 0x160   : > { %v852_v16 = vadd.f32 %v851_v15, %v832_v13  ;;  %v3671_v15 = vld [vmem:[#allocation75_spill] sm:$0xff] }
 0x162   : > { %v872_v20 = vadd.f32 %v871_v19, %v852_v16  ;;  %v3672_v19 = vld [vmem:[#allocation76_spill] sm:$0xff] }
 0x164   : > { %1588 = vmatmul.msk.f32.vlgmr.msra.gmra.mxu0 %vm938_vm1, %v872_v20  ;;  %1589 = vmatmul.msk.f32.vlgmr.msra.gmra.mxu1 %vm938_vm1, %v872_v20 }
 0x165   : > { %1590 = vmatmul.msk.f32.vlgmr.msra.gmra.mxu2 %vm938_vm1, %v872_v20  ;;  %1591 = vmatmul.msk.f32.vlgmr.msra.gmra.mxu3 %vm938_vm1, %v872_v20 }
 0x16c   : > { %1592 = vmatmul.msk.f32.vlgmr.msrb.gmra.mxu0 %vm938_vm1, %v872_v20  ;;  %1593 = vmatmul.msk.f32.vlgmr.msrb.gmra.mxu1 %vm938_vm1, %v872_v20 }
 0x16d   : > { %1594 = vmatmul.msk.f32.vlgmr.msrb.gmra.mxu2 %vm938_vm1, %v872_v20  ;;  %1595 = vmatmul.msk.f32.vlgmr.msrb.gmra.mxu3 %vm938_vm1, %v872_v20 }
 0x1af   : > { %v3153_v21 = vpop.f32.mrf.mxu0  ;;  %v3155_v23 = vpop.f32.mrf.mxu1 }
 0x1b0   : > { %v1265_v32 = vmul.f32 %v3153_v21, %v3153_v21  ;;  %v1266_v33 = vmul.f32 %v3155_v23, %v3155_v23  ;;  %v1289_v3 = vsub.f32 %v3667_v2, %v3153_v21  ;;  %v1290_v6 = vsub.f32 %v3668_v5, %v3155_v23 }
 0x1b1   : > { %v1400_v23 = vperm.slane %v3223_v11, 5 }
 0x1b6   : > { %v3157_v24 = vpop.f32.mrf.mxu2  ;;  %v3159_v25 = vpop.f32.mrf.mxu3 }
 0x1b7   : > { %v3161_v26 = vpop.f32.mrf.mxu0  ;;  %v3163_v27 = vpop.f32.mrf.mxu1  ;;  %v1267_v44 = vmul.f32 %v3157_v24, %v3157_v24  ;;  %v1268_v45 = vmul.f32 %v3159_v25, %v3159_v25  ;;  %v1291_v8 = vsub.f32 %v3669_v7, %v3157_v24  ;;  %v1292_v10 = vsub.f32 %v3670_v9, %v3159_v25 }
 0x1b8   : > { %v1269_v46 = vmul.f32 %v3161_v26, %v3161_v26  ;;  %v1270_v47 = vmul.f32 %v3163_v27, %v3163_v27  ;;  %v1293_v16 = vsub.f32 %v3671_v15, %v3161_v26  ;;  %v1294_v20 = vsub.f32 %v3672_v19, %v3163_v27 }
 0x1b9   : > { %v1399_v7 = vperm.slane %v3223_v11, 4 }
 0x1be   : > { %v3169_v34 = vpop.f32.mrf.mxu2  ;;  %v3171_v35 = vpop.f32.mrf.mxu3 }
 0x1bf   : > { %v1271_v14 = vmul.f32 %v3169_v34, %v3169_v34  ;;  %v1272_v62 = vmul.f32 %v3171_v35, %v3171_v35 }
 0x1e1   : > { %v1122_v36 = vpop.f32.mrf.mxu0  ;;  %v1142_v37 = vpop.f32.mrf.mxu1 }
 0x1e2   : > { %v1273_v38 = vsub.f32 %v1122_v36, %v1265_v32  ;;  %v1274_v39 = vsub.f32 %v1142_v37, %v1266_v33  ;;  %v3234_v32 = vld [vmem:[%s3389_s5] sm:$0xff] }
 0x1e3   : > { %v1424_v26 = vperm.slane %v3234_v32, 3  ;;  %v1425_v15 = vperm.slane %v3234_v32, 4 }
 0x1e4   : > { %v1281_v40 = vmax.f32 %v1273_v38, 0.0  ;;  %v1282_v41 = vmax.f32 %v1274_v39, 0.0  ;;  %v3673_v38 = vld [vmem:[#allocation77_spill] sm:$0xff] }
 0x1e5   : > { %v1295_v39 = vsub.f32 %v3673_v38, %v3169_v34 }
 0x1e6   : > { %v3173_v42 = vadd.f32 1e-05, %v1281_v40  ;;  %v3175_v43 = vadd.f32 1e-05, %v1282_v41  ;;  %v3674_v40 = vld [vmem:[#allocation78_spill] sm:$0xff] }
 0x1e7   : > { %v1296_v41 = vsub.f32 %v3674_v40, %v3171_v35 }
 0x1e8   : > { %1614 = vrsqrt.f32 %v3173_v42  ;;  %v1162_v17 = vpop.f32.mrf.mxu2  ;;  %v1182_v48 = vpop.f32.mrf.mxu3  ;;  %vm1321_vm2 = vweird.f32 %v3175_v43 }
 0x1e9   : > { %1616 = vrsqrt.f32 %v3175_v43  ;;  %v1275_v18 = vsub.f32 %v1162_v17, %v1267_v44  ;;  %v1276_v49 = vsub.f32 %v1182_v48, %v1268_v45  ;;  %v1202_v50 = vpop.f32.mrf.mxu0  ;;  %v1222_v51 = vpop.f32.mrf.mxu1  ;;  %v1396_v17 = vperm.slane %v3223_v11, 1 }
 0x1ea   : > { %v1277_v52 = vsub.f32 %v1202_v50, %v1269_v46  ;;  %v1278_v53 = vsub.f32 %v1222_v51, %v1270_v47  ;;  %v1395_v47 = vperm.slane %v3223_v11, 0  ;;  %v1422_v50 = vperm.slane %v3234_v32, 1 }
 0x1eb   : > { %v1283_v54 = vmax.f32 %v1275_v18, 0.0  ;;  %v1284_v55 = vmax.f32 %v1276_v49, 0.0 }
 0x1ec   : > { %v1285_v56 = vmax.f32 %v1277_v52, 0.0  ;;  %v1286_v57 = vmax.f32 %v1278_v53, 0.0 }
 0x1ed   : > { %v3187_v22 = vadd.f32 1e-05, %v1283_v54  ;;  %v3189_v28 = vadd.f32 1e-05, %v1284_v55 }
 0x1ee   : > { %v3191_v29 = vpop.eup %1614  ;;  %v3193_v30 = vadd.f32 1e-05, %v1285_v56  ;;  %v3195_v31 = vadd.f32 1e-05, %v1286_v57 }
 0x1ef   : > { %v3197_v58 = vpop.eup %1616  ;;  %1618 = vrsqrt.f32 %v3187_v22  ;;  %v1306_v63 = vmul.f32 %v3191_v29, %v3173_v42  ;;  %vm1331_vm3 = vweird.f32 %v3187_v22  ;;  %vm1341_vm10 = vweird.f32 %v3189_v28 }
 0x1f0   : > { %v1316_v59 = vmul.f32 %v3197_v58, %v3175_v43  ;;  %1620 = vrsqrt.f32 %v3189_v28  ;;  %v1242_v60 = vpop.f32.mrf.mxu2  ;;  %v1262_v61 = vpop.f32.mrf.mxu3  ;;  %vm1322_vm4 = vweird.f32 %v3197_v58  ;;  %vm1351_vm13 = vweird.f32 %v3193_v30 }
 0x1f1   : > { %1622 = vrsqrt.f32 %v3193_v30  ;;  %v1279_v1 = vsub.f32 %v1242_v60, %v1271_v14  ;;  %v1280_v4 = vsub.f32 %v1262_v61, %v1272_v62  ;;  %v1307_v44 = vmul.f32 %v3191_v29, %v1306_v63  ;;  %vm3276_vm7 = vmor %vm1321_vm2, %vm1322_vm4 }
 0x1f2   : > { %v1317_v0 = vmul.f32 %v3197_v58, %v1316_v59  ;;  %1624 = vrsqrt.f32 %v3195_v31  ;;  %vm1361_vm15 = vweird.f32 %v3195_v31  ;;  %vm1312_vm0 = vweird.f32 %v3191_v29 }
 0x1f3   : > { %v1287_v12 = vmax.f32 %v1279_v1, 0.0  ;;  %v1288_v36 = vmax.f32 %v1280_v4, 0.0  ;;  %v1308_v57 = vmul.f32 0.5, %v1307_v44  ;;  %vm1311_vm2 = vweird.f32 %v3173_v42 }
 0x1f4   : > { %v1318_v33 = vmul.f32 0.5, %v1317_v0 }
 0x1f5   : > { %v3225_v13 = vpop.eup %1618  ;;  %v3251_v18 = vadd.f32 1e-05, %v1287_v12  ;;  %v3263_v56 = vadd.f32 1e-05, %v1288_v36  ;;  %v1309_v12 = vsub.f32 1.5, %v1308_v57 }
 0x1f6   : > { %v3236_v37 = vpop.eup %1620  ;;  %v1326_v45 = vmul.f32 %v3225_v13, %v3187_v22  ;;  %v1319_v53 = vsub.f32 1.5, %v1318_v33  ;;  %vm1332_vm5 = vweird.f32 %v3225_v13 }
 0x1f7   : > { %v3245_v46 = vpop.eup %1622  ;;  %v1336_v48 = vmul.f32 %v3236_v37, %v3189_v28  ;;  %1626 = vrsqrt.f32 %v3251_v18  ;;  %vm1342_vm6 = vweird.f32 %v3236_v37  ;;  %vm3284_vm9 = vmor %vm1331_vm3, %vm1332_vm5  ;;  %vm1371_vm5 = vweird.f32 %v3251_v18 }
 0x1f8   : > { %v3253_v49 = vpop.eup %1624  ;;  %v1327_v51 = vmul.f32 %v3225_v13, %v1326_v45  ;;  %v1346_v52 = vmul.f32 %v3245_v46, %v3193_v30  ;;  %v1320_v0 = vmul.f32 %v3197_v58, %v1319_v53  ;;  %1628 = vrsqrt.f32 %v3263_v56  ;;  %vm3297_vm12 = vmor %vm1341_vm10, %vm1342_vm6 }
 0x1f9   : > { %v1337_v54 = vmul.f32 %v3236_v37, %v1336_v48  ;;  %v1356_v55 = vmul.f32 %v3253_v49, %v3195_v31  ;;  %vm1352_vm8 = vweird.f32 %v3245_v46  ;;  %vm1362_vm11 = vweird.f32 %v3253_v49  ;;  %vm3336_vm3 = vmor %vm1311_vm2, %vm1312_vm0 }
 0x1fa   : > { %v1328_v14 = vmul.f32 0.5, %v1327_v51  ;;  %v1347_v59 = vmul.f32 %v3245_v46, %v1346_v52  ;;  %v1397_v52 = vperm.slane %v3223_v11, 2  ;;  %vm3309_vm14 = vmor %vm1351_vm13, %vm1352_vm8  ;;  %vm1381_vm8 = vweird.f32 %v3263_v56 }
 0x1fb   : > { %v1338_v60 = vmul.f32 0.5, %v1337_v54  ;;  %v1357_v61 = vmul.f32 %v3253_v49, %v1356_v55  ;;  %v1324_v54 = vsel %vm3276_vm7, %v3197_v58, %v1320_v0  ;;  %vm1363_vm1 = vmor %vm1361_vm15, %vm1362_vm11  ;;  %vm1470_vm10 = vcmask 1042434  }
 0x1fc   : > { %v1329_v62 = vsub.f32 1.5, %v1328_v14  ;;  %v1348_v63 = vmul.f32 0.5, %v1347_v59  ;;  %v1310_v14 = vmul.f32 %v3191_v29, %v1309_v12  ;;  %vm1468_vm11 = vcmask 1040384  }
 0x1fd   : > { %v1339_v1 = vsub.f32 1.5, %v1338_v60  ;;  %v1358_v4 = vmul.f32 0.5, %v1357_v61  ;;  %v1627_v28 = vpop.eup %1626  ;;  %v1398_v60 = vperm.slane %v3223_v11, 3  ;;  %vm1474_vm13 = vcmask 1044484  }
 0x1fe   : > { %v1330_v36 = vmul.f32 %v3225_v13, %v1329_v62  ;;  %v1349_v44 = vsub.f32 1.5, %v1348_v63  ;;  %v1366_v58 = vmul.f32 %v1627_v28, %v3251_v18  ;;  %v1314_v5 = vsel %vm3336_vm3, %v3191_v29, %v1310_v14 }
 0x1ff   : > { %v1340_v48 = vmul.f32 %v3236_v37, %v1339_v1  ;;  %v1359_v43 = vsub.f32 1.5, %v1358_v4  ;;  %vm1372_vm4 = vweird.f32 %v1627_v28  ;;  %v1385_v29 = vmul.f32 %v1314_v5, %v1289_v3 }
 0x200   : > { %v1334_v51 = vsel %vm3284_vm9, %v3225_v13, %v1330_v36  ;;  %v1350_v53 = vmul.f32 %v3245_v46, %v1349_v44  ;;  %v1367_v62 = vmul.f32 %v1627_v28, %v1366_v58  ;;  %v1426_v1 = vperm.slane %v3234_v32, 5  ;;  %vm1373_vm7 = vmor %vm1371_vm5, %vm1372_vm4 }
 0x201   : > { %v1344_v13 = vsel %vm3297_vm12, %v3236_v37, %v1340_v48  ;;  %v1360_v57 = vmul.f32 %v3253_v49, %v1359_v43  ;;  %v1629_v37 = vpop.eup %1628  ;;  %v1387_v59 = vmul.f32 %v1334_v51, %v1291_v8  ;;  %v1427_v44 = vperm.slane %v3234_v32, 6 }
 0x202   : > { %v1354_v30 = vsel %vm3309_vm14, %v3245_v46, %v1350_v53  ;;  %v1388_v31 = vmul.f32 %v1344_v13, %v1292_v10  ;;  %v1386_v46 = vmul.f32 %v1324_v54, %v1290_v6  ;;  %v1376_v63 = vmul.f32 %v1629_v37, %v3263_v56 }
 0x203   : > { %v1364_v61 = vsel %vm1363_vm1, %v3253_v49, %v1360_v57  ;;  %v1389_v25 = vmul.f32 %v1354_v30, %v1293_v16  ;;  %v1423_v6 = vperm.slane %v3234_v32, 2  ;;  %v1368_v8 = vmul.f32 0.5, %v1367_v62 }
 0x204   : > { %v1390_v42 = vmul.f32 %v1364_v61, %v1294_v20  ;;  %v1377_v9 = vmul.f32 %v1629_v37, %v1376_v63  ;;  %v1413_v10 = vmul.f32 %v1397_v52, %v1387_v59  ;;  %v1414_v49 = vmul.f32 %v1398_v60, %v1388_v31 }
 0x205   : > { %v1412_v27 = vmul.f32 %v1396_v17, %v1386_v46  ;;  %v1369_v16 = vsub.f32 1.5, %v1368_v8  ;;  %v1415_v20 = vmul.f32 %v1399_v7, %v1389_v25  ;;  %vm1382_vm6 = vweird.f32 %v1629_v37 }
 0x206   : > { %v1378_v19 = vmul.f32 0.5, %v1377_v9  ;;  %v1416_v0 = vmul.f32 %v1400_v23, %v1390_v42  ;;  %v1439_v33 = vadd.f32 %v1423_v6, %v1413_v10  ;;  %v1440_v36 = vadd.f32 %v1424_v26, %v1414_v49  ;;  %vm1383_vm9 = vmor %vm1381_vm8, %vm1382_vm6 }
 0x207   : > { %v1370_v4 = vmul.f32 %v1627_v28, %v1369_v16  ;;  %v1401_v17 = vperm.slane %v3223_v11, 6  ;;  %v1438_v21 = vadd.f32 %v1422_v50, %v1412_v27  ;;  %v1441_v45 = vadd.f32 %v1425_v15, %v1415_v20 }
 0x208   : > { %v1379_v12 = vsub.f32 1.5, %v1378_v19  ;;  %v1442_v48 = vadd.f32 %v1426_v1, %v1416_v0  ;;  %v1402_v43 = vperm.slane %v3223_v11, 7  ;;  %v1411_v51 = vmul.f32 %v1395_v47, %v1385_v29 }
 0x209   : > { %v1374_v2 = vsel %vm1373_vm7, %v1627_v28, %v1370_v4  ;;  %v1421_v52 = vperm.slane %v3234_v32, 0  ;;  %v1428_v50 = vperm.slane %v3234_v32, 7  ;;  %v1447_v53 = vmax.f32 %v1439_v33, 0.0 }
 0x20a   : > { %v1380_v3 = vmul.f32 %v1629_v37, %v1379_v12  ;;  %v1391_v18 = vmul.f32 %v1374_v2, %v1295_v39  ;;  %v1448_v28 = vmax.f32 %v1440_v36, 0.0  ;;  %v1446_v34 = vmax.f32 %v1438_v21, 0.0 }
 0x20b   : > { %v1449_v38 = vmax.f32 %v1441_v45, 0.0  ;;  %v1450_v39 = vmax.f32 %v1442_v48, 0.0  ;;  %v1437_v11 = vadd.f32 %v1421_v52, %v1411_v51  ;;  %v1462_v47 = vrot.slane %v1447_v53, 6 }
 0x20c   : > { %v1384_v22 = vsel %vm1383_vm9, %v1629_v37, %v1380_v3  ;;  %v1417_v56 = vmul.f32 %v1401_v17, %v1391_v18  ;;  %v1463_v57 = vrot.slane %v1448_v28, 5  ;;  %v1461_v58 = vrot.slane %v1446_v34, 7 }
 0x20d   : > { %v1392_v54 = vmul.f32 %v1384_v22, %v1296_v41  ;;  %v1464_v32 = vrot.slane %v1449_v38, 4  ;;  %v1465_v37 = vrot.slane %v1450_v39, 3  ;;  %vm1472_vm12 = vcmask 1041408  }
 0x20e   : > { %v1443_v13 = vadd.f32 %v1427_v44, %v1417_v56  ;;  %vm1476_vm14 = vcmask 1046534   ;;  %v1445_v35 = vmax.f32 %v1437_v11, 0.0  ;;  %v1471_v40 = vsel %vm1470_vm10, %v1462_v47, %v1463_v57 }
 0x20f   : > { %v1418_v55 = vmul.f32 %v1402_v43, %v1392_v54  ;;  %vm1478_vm15 = vcmask 1045508   ;;  %vm1480_vm0 = vcmask 1043456   ;;  %v1475_v61 = vsel %vm1474_vm13, %v1464_v32, %v1465_v37 }
 0x210   : > { %v1451_v14 = vmax.f32 %v1443_v13, 0.0  ;;  %v1469_v60 = vsel %vm1468_vm11, %v1445_v35, %v1461_v58 }
 0x211   : > { %v1444_v30 = vadd.f32 %v1428_v50, %v1418_v55  ;;  %v1473_v62 = vsel %vm1472_vm12, %v1469_v60, %v1471_v40 }
 0x212   : > { %v1466_v59 = vrot.slane %v1451_v14, 2 }
 0x213   : > { %v1452_v31 = vmax.f32 %v1444_v30, 0.0 }
 0x215   : > { %v1467_v41 = vrot.slane %v1452_v31, 1 }
 0x217   : > { %v1477_v46 = vsel %vm1476_vm14, %v1466_v59, %v1467_v41 }
 0x218   : > { %v1479_v63 = vsel %vm1478_vm15, %v1475_v61, %v1477_v46 }
 0x219   : > { %v1481_v24 = vsel %vm1480_vm0, %v1473_v62, %v1479_v63 }
 0x21a   : > { %1483 = vst [vmem:[%s243_s7] sm:$0xff] %v1481_v24 }
 0x21b PF: > { %s16_s21 = sadd.s32 1, %s1636_s21  }
 0x21c   : > { %p13_p4 = scmp.ge.s32.totalorder %s16_s21, 4  }
 0x21e   :  { %15 = sbr.rel (!%p13_p4) target bundleno = 1 (0x1), region = 74 }

// kernel: generator_forward.7
= control target key start
LH: loop header
LB: loop body
LE: loop exit
PB: predicated region body
PF: predicated region fallthrough
CT: control target
= control target key end

     0   :  { %s1079_s21 = smov 0   ;;  %s1294_s0 = inlined_call_operand.vmem [shape: bf16[2,64,288], index: 0, kind: input, shape index: {}]   ;;  %s1295_s1 = inlined_call_operand.vmem [shape: bf16[288,64], index: 1, kind: input, shape index: {}]   ;;  %s1296_s2 = inlined_call_operand.vmem [shape: f32[64,16], index: 2, kind: input, shape index: {}]   ;;  %s1297_s3 = inlined_call_operand.vmem [shape: f32[16,64], index: 3, kind: input, shape index: {}]   ;;  %s1298_s4 = inlined_call_operand.vmem [shape: f32[1,64], index: 4, kind: input, shape index: {}]   ;;  %s1299_s5 = inlined_call_operand.vmem [shape: f32[1,64], index: 5, kind: input, shape index: {}]   ;;  %s1300_s6 = inlined_call_operand.vmem [shape: f32[2,64,64], index: 6, kind: output, shape index: {}]  }
   0x1 LB: > { %s854_s22 = sadd.s32 4294967295, %s1042_s21   ;;  %p858_p0 = scmp.ge.s32.totalorder %s1042_s21, 1  ;;  %s1042_s21 = sphi %s1079_s21, %s16_s21  }
   0x2   : > { %p212_p1 = scmp.lt.s32.totalorder %s1042_s21, 3 }
   0x4   : > { %p213_p2 = pnand %p858_p0, %p212_p1 }
   0x5   : > { %p242_p3 = scmp.lt.s32.totalorder (!%p213_p2), %s854_s22, 1 }
   0x6   : > { %216 = sbr.rel (%p213_p2) target bundleno = 559 (0x22f), region = 44 }
   0xb   : > { %v1012_v0 = vld [vmem:[%s1295_s1 + $0x38] sm:$0xff]  ;;  %v1011_v2 = vld [vmem:[%s1295_s1 + $0x30] sm:$0xff]  ;;  %v1022_v4 = vld [vmem:[%s1295_s1 + $0x88] sm:$0xff]  ;;  %s1302_s22 = smov (!%p242_p3, %s854_s22), 1  ;;  %vm473_vm0 = vcmask 261120   ;;  %vm573_vm1 = vcmask 523264  }
   0xc   : > { %v1020_v1 = vld [vmem:[%s1295_s1 + $0x78] sm:$0xff]  ;;  %486 = vmatpush.bf16.msra.mxu0 %v1012_v0  ;;  %v1019_v3 = vld [vmem:[%s1295_s1 + $0x70] sm:$0xff]  ;;  %550 = vmatpush.bf16.msra.mxu2 %v1022_v4  ;;  %v1021_v5 = vld [vmem:[%s1295_s1 + $0x80] sm:$0xff]  ;;  %s1023_s11 = smul.u32 96, %s1302_s22  ;;  %vm680_vm2 = vcmask 130048  }
   0xd   : > { %515 = vmatpush.bf16.msra.mxu1 %v1020_v1  ;;  %v1010_v6 = vld [vmem:[%s1295_s1 + $0x28] sm:$0xff]  ;;  %v1009_v11 = vld [vmem:[%s1295_s1 + $0x20] sm:$0xff]  ;;  %v1008_v13 = vld [vmem:[%s1295_s1 + $0x18] sm:$0xff] }
   0xe   : > { %v1018_v7 = vld [vmem:[%s1295_s1 + $0x68] sm:$0xff]  ;;  %s1117_s18 = scalar_lea.vmem %s1294_s0, %s1023_s11  ;;  %v1017_v12 = vld [vmem:[%s1295_s1 + $0x60] sm:$0xff]  ;;  %v1016_v14 = vld [vmem:[%s1295_s1 + $0x58] sm:$0xff] }
   0xf   : > { %v872_v8 = vld [vmem:[%s1117_s18 + $0x8] sm:$0xf]  ;;  %v995_v9 = vld [vmem:[%s1117_s18 + $0x10] sm:$0xf0]  ;;  %v884_v17 = vld [vmem:[%s1117_s18 + $0x20] sm:$0xf] }
  0x10   : > { %487 = vmatpush.bf16.msra.mxu0 %v1011_v2  ;;  %551 = vmatpush.bf16.msra.mxu2 %v1021_v5  ;;  %v873_v10 = vor.u32 %v995_v9, %v872_v8  ;;  %v1007_v15 = vld [vmem:[%s1295_s1 + $0x10] sm:$0xff]  ;;  %v998_v18 = vld [vmem:[%s1117_s18 + $0x28] sm:$0xf0]  ;;  %v1005_v22 = vld [vmem:[%s1295_s1] sm:$0xff] }
  0x11   : > { %516 = vmatpush.bf16.msra.mxu1 %v1019_v3  ;;  %v1015_v16 = vld [vmem:[%s1295_s1 + $0x50] sm:$0xff]  ;;  %v1006_v19 = vld [vmem:[%s1295_s1 + $0x8] sm:$0xff]  ;;  %v885_v21 = vor.u32 %v998_v18, %v884_v17  ;;  %v1013_v23 = vld [vmem:[%s1295_s1 + $0x40] sm:$0xff] }
  0x12   : > { %v1014_v20 = vld [vmem:[%s1295_s1 + $0x48] sm:$0xff]  ;;  %v864_v24 = vld [vmem:[%s1117_s18] sm:$0xf]  ;;  %v993_v26 = vld [vmem:[%s1117_s18 + $0x4] sm:$0xf] }
  0x13   : > { %982 = vmatmul.msk.bf16.vlgmr.msra.gmra.mxu2 %vm473_vm0, %v873_v10  ;;  %v994_v25 = vld [vmem:[%s1117_s18 + $0x8] sm:$0xf0]  ;;  %v866_v27 = vld [vmem:[%s1117_s18 + $0xc] sm:$0xf0]  ;;  %v896_v30 = vld [vmem:[%s1117_s18 + $0x38] sm:$0xf] }
  0x14   : > { %488 = vmatpush.bf16.msra.mxu0 %v1010_v6  ;;  %v865_v28 = vor.u32 %v994_v25, %v864_v24  ;;  %v869_v29 = vor.u32 %v993_v26, %v866_v27  ;;  %v1001_v31 = vld [vmem:[%s1117_s18 + $0x40] sm:$0xf0]  ;;  %v876_v33 = vld [vmem:[%s1117_s18 + $0x18] sm:$0xf]  ;;  %v996_v35 = vld [vmem:[%s1117_s18 + $0x1c] sm:$0xf] }
  0x15   : > { %517 = vmatpush.bf16.msra.mxu1 %v1018_v7  ;;  %v897_v32 = vor.u32 %v1001_v31, %v896_v30  ;;  %v997_v34 = vld [vmem:[%s1117_s18 + $0x20] sm:$0xf0]  ;;  %v878_v36 = vld [vmem:[%s1117_s18 + $0x24] sm:$0xf0]  ;;  %v908_v39 = vld [vmem:[%s1117_s18 + $0x50] sm:$0xf] }
  0x16   : > { %v877_v37 = vor.u32 %v997_v34, %v876_v33  ;;  %v881_v38 = vor.u32 %v996_v35, %v878_v36  ;;  %v1004_v40 = vld [vmem:[%s1117_s18 + $0x58] sm:$0xf0]  ;;  %v888_v42 = vld [vmem:[%s1117_s18 + $0x30] sm:$0xf]  ;;  %v999_v44 = vld [vmem:[%s1117_s18 + $0x34] sm:$0xf] }
  0x17   : > { %v909_v41 = vor.u32 %v1004_v40, %v908_v39  ;;  %v1000_v43 = vld [vmem:[%s1117_s18 + $0x38] sm:$0xf0]  ;;  %v890_v45 = vld [vmem:[%s1117_s18 + $0x3c] sm:$0xf0]  ;;  %v900_v48 = vld [vmem:[%s1117_s18 + $0x48] sm:$0xf] }
  0x18   : > { %489 = vmatpush.bf16.msra.mxu0 %v1009_v11  ;;  %v889_v46 = vor.u32 %v1000_v43, %v888_v42  ;;  %v893_v47 = vor.u32 %v999_v44, %v890_v45  ;;  %v1003_v49 = vld [vmem:[%s1117_s18 + $0x50] sm:$0xf0]  ;;  %v1002_v50 = vld [vmem:[%s1117_s18 + $0x4c] sm:$0xf]  ;;  %v902_v51 = vld [vmem:[%s1117_s18 + $0x54] sm:$0xf0] }
  0x19   : > { %518 = vmatpush.bf16.msra.mxu1 %v1017_v12  ;;  %v901_v52 = vor.u32 %v1003_v49, %v900_v48  ;;  %v905_v53 = vor.u32 %v1002_v50, %v902_v51  ;;  %v631_v0 = vld [vmem:[%s1296_s2 + $0x38] sm:$0xff]  ;;  %v630_v1 = vld [vmem:[%s1296_s2 + $0x30] sm:$0xff]  ;;  %v629_v4 = vld [vmem:[%s1296_s2 + $0x28] sm:$0xff]  ;;  %s992_s18 = sshll.u32 %s1302_s22, 6 }
  0x1a   : > { %643 = vmatpush.msra.mxu3 %v631_v0  ;;  %v628_v6 = vld [vmem:[%s1296_s2 + $0x20] sm:$0xff]  ;;  %v627_v7 = vld [vmem:[%s1296_s2 + $0x18] sm:$0xff]  ;;  %v626_v8 = vld [vmem:[%s1296_s2 + $0x10] sm:$0xff]  ;;  %s251_s24 = scalar_lea.vmem %s1300_s6, %s992_s18 }
  0x1b   : > { %v625_v11 = vld [vmem:[%s1296_s2 + $0x8] sm:$0xff]  ;;  %v624_v12 = vld [vmem:[%s1296_s2] sm:$0xff] }
  0x1c   : > { %490 = vmatpush.bf16.msra.mxu0 %v1008_v13  ;;  %644 = vmatpush.msra.mxu3 %v630_v1 }
  0x1d   : > { %519 = vmatpush.bf16.msra.mxu1 %v1016_v14 }
  0x1e   : > { %645 = vmatpush.msra.mxu3 %v629_v4 }
  0x20   : > { %491 = vmatpush.bf16.msra.mxu0 %v1007_v15  ;;  %646 = vmatpush.msra.mxu3 %v628_v6 }
  0x21   : > { %520 = vmatpush.bf16.msra.mxu1 %v1015_v16 }
  0x22   : > { %647 = vmatpush.msra.mxu3 %v627_v7 }
  0x23   : > { %983 = vmatmul.msk.bf16.gmra.mxu2 %vm473_vm0, %v885_v21 }
  0x24   : > { %492 = vmatpush.bf16.msra.mxu0 %v1006_v19  ;;  %648 = vmatpush.msra.mxu3 %v626_v8 }
  0x25   : > { %521 = vmatpush.bf16.msra.mxu1 %v1014_v20 }
  0x26   : > { %649 = vmatpush.msra.mxu3 %v625_v11 }
  0x28   : > { %493 = vmatpush.bf16.msra.mxu0 %v1005_v22  ;;  %650 = vmatpush.msra.mxu3 %v624_v12 }
  0x29   : > { %522 = vmatpush.bf16.msra.mxu1 %v1013_v23 }
  0x2a   : > { %666 = vmatpush.msrb.mxu3 %v631_v0 }
  0x2b   : > { %494 = vmatmul.bf16.vlgmr.msra.gmra.mxu0 %v865_v28 }
  0x2c   : > { %523 = vmatmul.bf16.vlgmr.msra.gmra.mxu1 %v869_v29  ;;  %667 = vmatpush.msrb.mxu3 %v630_v1 }
  0x2e   : > { %668 = vmatpush.msrb.mxu3 %v629_v4 }
  0x30   : > { %669 = vmatpush.msrb.mxu3 %v628_v6 }
  0x32   : > { %670 = vmatpush.msrb.mxu3 %v627_v7 }
  0x33   : > { %984 = vmatmul.msk.bf16.gmra.mxu2 %vm473_vm0, %v897_v32 }
  0x34   : > { %671 = vmatpush.msrb.mxu3 %v626_v8 }
  0x36   : > { %672 = vmatpush.msrb.mxu3 %v625_v11 }
  0x38   : > { %673 = vmatpush.msrb.mxu3 %v624_v12 }
  0x3b   : > { %499 = vmatmul.bf16.gmra.mxu0 %v877_v37 }
  0x3c   : > { %528 = vmatmul.bf16.gmra.mxu1 %v881_v38 }
  0x43   : > { %985 = vmatmul.msk.bf16.gmra.mxu2 %vm473_vm0, %v909_v41 }
  0x4b   : > { %504 = vmatmul.bf16.gmra.mxu0 %v889_v46 }
  0x4c   : > { %533 = vmatmul.bf16.gmra.mxu1 %v893_v47 }
  0x5b   : > { %509 = vmatmul.bf16.gmra.mxu0 %v901_v52 }
  0x5c   : > { %538 = vmatmul.bf16.gmra.mxu1 %v905_v53 }
  0x96   : > { %v553_v54 = vpop.f32.mrf.mxu2 }
  0x9e   : > { %v555_v55 = vpop.f32.mrf.mxu2 }
  0xa6   : > { %v558_v58 = vpop.f32.mrf.mxu2 }
  0xa8   : > { %v495_v56 = vpop.f32.mrf.mxu0 }
  0xa9   : > { %v524_v57 = vpop.f32.mrf.mxu1 }
  0xaa   : > { %v525_v15 = vadd.f32 %v524_v57, %v495_v56 }
  0xac   : > { %v1203_v21 = vadd.f32 %v553_v54, %v525_v15 }
  0xae   : > { %v560_v63 = vpop.f32.mrf.mxu2  ;;  %v595_v27 = vmul.f32 %v1203_v21, %v1203_v21  ;;  %v574_v32 = vsel %vm573_vm1, %v1203_v21, 0.0 }
  0xb0   : > { %v497_v59 = vpop.f32.mrf.mxu0  ;;  %v603_v40 = vsel %vm573_vm1, %v595_v27, 0.0  ;;  %v678_v27 = vld [vmem:[%s1297_s3] sm:$0xff] }
  0xb1   : > { %v526_v60 = vpop.f32.mrf.mxu1 }
  0xb2   : > { %v527_v13 = vadd.f32 %v526_v60, %v497_v59 }
  0xb4   : > { %v1201_v17 = vadd.f32 %v555_v55, %v527_v13 }
  0xb6   : > { %v563_v5 = vpop.f32.mrf.mxu2  ;;  %v596_v24 = vmul.f32 %v1201_v17, %v1201_v17  ;;  %v575_v28 = vsel %vm573_vm1, %v1201_v17, 0.0 }
  0xb7   : > { %v576_v41 = vadd.f32 %v575_v28, %v574_v32 }
  0xb8   : > { %v500_v61 = vpop.f32.mrf.mxu0  ;;  %v604_v33 = vsel %vm573_vm1, %v596_v24, 0.0 }
  0xb9   : > { %v529_v62 = vpop.f32.mrf.mxu1  ;;  %v605_v46 = vadd.f32 %v604_v33, %v603_v40 }
  0xba   : > { %v530_v16 = vadd.f32 %v529_v62, %v500_v61 }
  0xbc   : > { %v1205_v22 = vadd.f32 %v558_v58, %v530_v16 }
  0xbe   : > { %v565_v14 = vpop.f32.mrf.mxu2  ;;  %v597_v29 = vmul.f32 %v1205_v22, %v1205_v22  ;;  %v577_v36 = vsel %vm573_vm1, %v1205_v22, 0.0 }
  0xbf   : > { %v578_v47 = vadd.f32 %v577_v36, %v576_v41 }
  0xc0   : > { %v502_v2 = vpop.f32.mrf.mxu0  ;;  %v606_v42 = vsel %vm573_vm1, %v597_v29, 0.0 }
  0xc1   : > { %v531_v3 = vpop.f32.mrf.mxu1  ;;  %v607_v51 = vadd.f32 %v606_v42, %v605_v46 }
  0xc2   : > { %v532_v20 = vadd.f32 %v531_v3, %v502_v2 }
  0xc4   : > { %v1209_v25 = vadd.f32 %v560_v63, %v532_v20 }
  0xc6   : > { %v568_v31 = vpop.f32.mrf.mxu2  ;;  %v598_v37 = vmul.f32 %v1209_v25, %v1209_v25  ;;  %v579_v43 = vsel %vm573_vm1, %v1209_v25, 0.0 }
  0xc7   : > { %v580_v52 = vadd.f32 %v579_v43, %v578_v47 }
  0xc8   : > { %v505_v9 = vpop.f32.mrf.mxu0  ;;  %v608_v48 = vsel %vm573_vm1, %v598_v37, 0.0 }
  0xc9   : > { %v534_v10 = vpop.f32.mrf.mxu1  ;;  %v609_v56 = vadd.f32 %v608_v48, %v607_v51 }
  0xca   : > { %v535_v23 = vadd.f32 %v534_v10, %v505_v9 }
  0xcc   : > { %v1217_v30 = vadd.f32 %v563_v5, %v535_v23 }
  0xce   : > { %v599_v44 = vmul.f32 %v1217_v30, %v1217_v30  ;;  %v581_v49 = vsel %vm573_vm1, %v1217_v30, 0.0  ;;  %v570_v1 = vpop.f32.mrf.mxu2 }
  0xcf   : > { %v582_v57 = vadd.f32 %v581_v49, %v580_v52 }
  0xd0   : > { %v507_v18 = vpop.f32.mrf.mxu0  ;;  %v610_v53 = vsel %vm573_vm1, %v599_v44, 0.0 }
  0xd1   : > { %v536_v19 = vpop.f32.mrf.mxu1  ;;  %v611_v63 = vadd.f32 %v610_v53, %v609_v56 }
  0xd2   : > { %v537_v26 = vadd.f32 %v536_v19, %v507_v18 }
  0xd4   : > { %v1226_v38 = vadd.f32 %v565_v14, %v537_v26  ;;  %v679_v26 = vld [vmem:[%s1297_s3 + $0x8] sm:$0xff] }
  0xd6   : > { %v600_v50 = vmul.f32 %v1226_v38, %v1226_v38  ;;  %v583_v54 = vsel %vm573_vm1, %v1226_v38, 0.0 }
  0xd7   : > { %v584_v0 = vadd.f32 %v583_v54, %v582_v57  ;;  %v1032_v54 = vld [vmem:[%s1298_s4] ss:$0 sm:$0xff] }
  0xd8   : > { %v510_v34 = vpop.f32.mrf.mxu0  ;;  %v612_v60 = vsel %vm573_vm1, %v600_v50, 0.0 }
  0xd9   : > { %v539_v35 = vpop.f32.mrf.mxu1  ;;  %v613_v4 = vadd.f32 %v612_v60, %v611_v63 }
  0xda   : > { %v540_v39 = vadd.f32 %v539_v35, %v510_v34 }
  0xdc   : > { %v1234_v45 = vadd.f32 %v568_v31, %v540_v39 }
  0xde   : > { %v601_v55 = vmul.f32 %v1234_v45, %v1234_v45  ;;  %v585_v61 = vsel %vm573_vm1, %v1234_v45, 0.0 }
  0xdf   : > { %v586_v5 = vadd.f32 %v585_v61, %v584_v0 }
  0xe0   : > { %v512_v58 = vpop.f32.mrf.mxu0  ;;  %v614_v2 = vsel %vm573_vm1, %v601_v55, 0.0 }
  0xe1   : > { %v541_v59 = vpop.f32.mrf.mxu1  ;;  %v615_v8 = vadd.f32 %v614_v2, %v613_v4 }
  0xe2   : > { %v542_v62 = vadd.f32 %v541_v59, %v512_v58 }
  0xe4   : > { %v1250_v3 = vadd.f32 %v570_v1, %v542_v62 }
  0xe6   : > { %v587_v6 = vsel %vm573_vm1, %v1250_v3, 0.0  ;;  %v602_v7 = vmul.f32 %v1250_v3, %v1250_v3 }
  0xe7   : > { %v588_v9 = vadd.f32 %v587_v6, %v586_v5 }
  0xe8   : > { %v616_v10 = vsel %vm573_vm1, %v602_v7, 0.0 }
  0xe9   : > { %v617_v11 = vadd.f32 %v616_v10, %v615_v8  ;;  %v589_v12 = vrot.slane %v588_v9, 4 }
  0xeb   : > { %v618_v13 = vrot.slane %v617_v11, 4  ;;  %v590_v14 = vadd.f32 %v589_v12, %v588_v9 }
  0xed   : > { %v591_v15 = vrot.slane %v590_v14, 2  ;;  %v619_v16 = vadd.f32 %v618_v13, %v617_v11 }
  0xef   : > { %v592_v18 = vadd.f32 %v591_v15, %v590_v14  ;;  %v620_v19 = vrot.slane %v619_v16, 2 }
  0xf1   : > { %v593_v20 = vrot.slane %v592_v18, 1  ;;  %v621_v24 = vadd.f32 %v620_v19, %v619_v16 }
  0xf3   : > { %v594_v23 = vadd.f32 %v593_v20, %v592_v18  ;;  %v622_v28 = vrot.slane %v621_v24, 1 }
  0xf5   : > { %986 = vmatmul.msk.f32.vlgmr.msra.gmra.mxu3 %vm573_vm1, %v594_v23  ;;  %v623_v29 = vadd.f32 %v622_v28, %v621_v24 }
  0xf6   : > { %698 = vmatpush.msra.mxu3 %v679_v26 }
  0xf8   : > { %699 = vmatpush.msra.mxu3 %v678_v27 }
  0xfd   : > { %987 = vmatmul.msk.f32.vlgmr.msrb.gmra.mxu3 %vm573_vm1, %v623_v29 }
  0xfe   : > { %721 = vmatpush.msrb.mxu3 %v679_v26 }
 0x100   : > { %722 = vmatpush.msrb.mxu3 %v678_v27 }
 0x178   : > { %v652_v31 = vpop.f32.mrf.mxu3 }
 0x179   : > { %988 = vmatmul.msk.f32.vlgmr.msra.gmra.mxu3 %vm680_vm2, %v652_v31 }
 0x180   : > { %v675_v32 = vpop.f32.mrf.mxu3 }
 0x181   : > { %989 = vmatmul.msk.f32.vlgmr.msrb.gmra.mxu3 %vm680_vm2, %v675_v32 }
 0x1fc   : > { %v701_v33 = vpop.f32.mrf.mxu3 }
 0x1fd   : > { %v727_v34 = vmul.f32 %v701_v33, %v701_v33  ;;  %v730_v44 = vperm.slane %v701_v33, 0 }
 0x1ff   : > { %v731_v48 = vsub.f32 %v1203_v21, %v730_v44  ;;  %v732_v50 = vsub.f32 %v1201_v17, %v730_v44  ;;  %v733_v51 = vsub.f32 %v1205_v22, %v730_v44  ;;  %v734_v52 = vsub.f32 %v1209_v25, %v730_v44  ;;  %v1033_v25 = vld [vmem:[%s1299_s5] ss:$0 sm:$0xff] }
 0x200   : > { %v735_v55 = vsub.f32 %v1217_v30, %v730_v44  ;;  %v736_v56 = vsub.f32 %v1226_v38, %v730_v44  ;;  %v737_v57 = vsub.f32 %v1234_v45, %v730_v44  ;;  %v738_v21 = vsub.f32 %v1250_v3, %v730_v44 }
 0x204   : > { %v724_v35 = vpop.f32.mrf.mxu3 }
 0x205   : > { %v728_v36 = vsub.f32 %v724_v35, %v727_v34 }
 0x207   : > { %v729_v37 = vmax.f32 %v728_v36, 0.0 }
 0x209   : > { %v739_v39 = vadd.f32 1e-05, %v729_v37 }
 0x20b   : > { %1034 = vrsqrt.f32 %v739_v39  ;;  %vm746_vm4 = vweird.f32 %v739_v39 }
 0x211   : > { %v1035_v40 = vpop.eup %1034 }
 0x212   : > { %v741_v41 = vmul.f32 %v1035_v40, %v739_v39  ;;  %vm747_vm3 = vweird.f32 %v1035_v40 }
 0x213   : > { %vm748_vm5 = vmor %vm746_vm4, %vm747_vm3 }
 0x214   : > { %v742_v42 = vmul.f32 %v1035_v40, %v741_v41 }
 0x216   : > { %v743_v43 = vmul.f32 0.5, %v742_v42 }
 0x218   : > { %v744_v46 = vsub.f32 1.5, %v743_v43 }
 0x21a   : > { %v745_v47 = vmul.f32 %v1035_v40, %v744_v46 }
 0x21c   : > { %v749_v49 = vsel %vm748_vm5, %v1035_v40, %v745_v47 }
 0x21d   : > { %v750_v53 = vperm.slane %v749_v49, 0 }
 0x21f   : > { %v751_v58 = vmul.f32 %v750_v53, %v731_v48  ;;  %v752_v17 = vmul.f32 %v750_v53, %v732_v50  ;;  %v753_v59 = vmul.f32 %v750_v53, %v733_v51  ;;  %v754_v22 = vmul.f32 %v750_v53, %v734_v52 }
 0x220   : > { %v755_v60 = vmul.f32 %v750_v53, %v735_v55  ;;  %v756_v61 = vmul.f32 %v750_v53, %v736_v56  ;;  %v757_v62 = vmul.f32 %v750_v53, %v737_v57  ;;  %v758_v63 = vmul.f32 %v750_v53, %v738_v21 }
 0x221   : > { %v763_v30 = vmul.f32 %v1032_v54, %v751_v58  ;;  %v764_v0 = vmul.f32 %v1032_v54, %v752_v17  ;;  %v765_v38 = vmul.f32 %v1032_v54, %v753_v59  ;;  %v766_v1 = vmul.f32 %v1032_v54, %v754_v22 }
 0x222   : > { %v767_v45 = vmul.f32 %v1032_v54, %v755_v60  ;;  %v768_v2 = vmul.f32 %v1032_v54, %v756_v61  ;;  %v769_v3 = vmul.f32 %v1032_v54, %v757_v62  ;;  %v770_v4 = vmul.f32 %v1032_v54, %v758_v63 }
 0x223   : > { %v775_v5 = vadd.f32 %v1033_v25, %v763_v30  ;;  %v776_v6 = vadd.f32 %v1033_v25, %v764_v0  ;;  %v777_v7 = vadd.f32 %v1033_v25, %v765_v38  ;;  %v778_v8 = vadd.f32 %v1033_v25, %v766_v1 }
 0x224   : > { %v779_v9 = vadd.f32 %v1033_v25, %v767_v45  ;;  %v780_v10 = vadd.f32 %v1033_v25, %v768_v2  ;;  %v781_v11 = vadd.f32 %v1033_v25, %v769_v3  ;;  %v782_v15 = vadd.f32 %v1033_v25, %v770_v4 }
 0x225   : > { %v783_v12 = vmax.f32 %v775_v5, 0.0  ;;  %v784_v13 = vmax.f32 %v776_v6, 0.0  ;;  %v785_v14 = vmax.f32 %v777_v7, 0.0  ;;  %v786_v16 = vmax.f32 %v778_v8, 0.0 }
 0x226   : > { %v787_v18 = vmax.f32 %v779_v9, 0.0  ;;  %v788_v19 = vmax.f32 %v780_v10, 0.0  ;;  %v789_v20 = vmax.f32 %v781_v11, 0.0  ;;  %v790_v23 = vmax.f32 %v782_v15, 0.0 }
 0x227   : > { %791 = vst.msk [vmem:[%s251_s24] sm:$0xff] %vm573_vm1, %v783_v12 }
 0x228   : > { %792 = vst.msk [vmem:[%s251_s24 + $0x8] sm:$0xff] %vm573_vm1, %v784_v13 }
 0x229   : > { %793 = vst.msk [vmem:[%s251_s24 + $0x10] sm:$0xff] %vm573_vm1, %v785_v14 }
 0x22a   : > { %794 = vst.msk [vmem:[%s251_s24 + $0x18] sm:$0xff] %vm573_vm1, %v786_v16 }
 0x22b   : > { %795 = vst.msk [vmem:[%s251_s24 + $0x20] sm:$0xff] %vm573_vm1, %v787_v18 }
 0x22c   : > { %796 = vst.msk [vmem:[%s251_s24 + $0x28] sm:$0xff] %vm573_vm1, %v788_v19 }
 0x22d   : > { %797 = vst.msk [vmem:[%s251_s24 + $0x30] sm:$0xff] %vm573_vm1, %v789_v20 }
 0x22e   : > { %798 = vst.msk [vmem:[%s251_s24 + $0x38] sm:$0xff] %vm573_vm1, %v790_v23 }
 0x22f PF: > { %s16_s21 = sadd.s32 1, %s1042_s21  }
 0x230   : > { %p13_p4 = scmp.ge.s32.totalorder %s16_s21, 4  }
 0x232   :  { %15 = sbr.rel (!%p13_p4) target bundleno = 1 (0x1), region = 74 }

// kernel: generator_forward.8
= control target key start
LH: loop header
LB: loop body
LE: loop exit
PB: predicated region body
PF: predicated region fallthrough
CT: control target
= control target key end

     0   :  { %s1570_s21 = smov 0   ;;  %s2322_s0 = inlined_call_operand.vmem [shape: bf16[2,256,144], index: 0, kind: input, shape index: {}]   ;;  %s2323_s1 = inlined_call_operand.vmem [shape: bf16[144,32], index: 1, kind: input, shape index: {}]   ;;  %s2324_s2 = inlined_call_operand.vmem [shape: f32[32,8], index: 2, kind: input, shape index: {}]   ;;  %s2325_s3 = inlined_call_operand.vmem [shape: f32[8,32], index: 3, kind: input, shape index: {}]   ;;  %s2326_s4 = inlined_call_operand.vmem [shape: f32[1,32], index: 4, kind: input, shape index: {}]   ;;  %s2327_s5 = inlined_call_operand.vmem [shape: f32[1,32], index: 5, kind: input, shape index: {}]   ;;  %s2328_s6 = inlined_call_operand.vmem [shape: f32[2,256,32], index: 6, kind: output, shape index: {}]  }
   0x1 LB: > { %s1268_s22 = sadd.s32 4294967295, %s1533_s21   ;;  %p1272_p0 = scmp.ge.s32.totalorder %s1533_s21, 1  ;;  %s1533_s21 = sphi %s1570_s21, %s16_s21  }
   0x2   : > { %p212_p1 = scmp.lt.s32.totalorder %s1533_s21, 3 }
   0x4   : > { %p213_p2 = pnand %p1272_p0, %p212_p1 }
   0x5   : > { %p242_p3 = scmp.lt.s32.totalorder (!%p213_p2), %s1268_s22, 1 }
   0x6   : > { %216 = sbr.rel (%p213_p2) target bundleno = 678 (0x2a6), region = 44 }
   0xb   : > { %v1504_v0 = vld [vmem:[%s2323_s1 + $0x38] sm:$0xff]  ;;  %v1505_v1 = vld [vmem:[%s2323_s1 + $0x40] sm:$0xff]  ;;  %v1503_v2 = vld [vmem:[%s2323_s1 + $0x30] sm:$0xff]  ;;  %s2330_s22 = smov (!%p242_p3, %s1268_s22), 1  ;;  %vm501_vm0 = vcmask 130048   ;;  %vm728_vm1 = vcmask 261120  }
   0xc   : > { %550 = vmatpush.bf16.msra.mxu0 %v1504_v0  ;;  %646 = vmatpush.bf16.msra.mxu1 %v1505_v1  ;;  %s1463_s29 = sshll.u32 %s2330_s22, 8  ;;  %v1502_v5 = vld [vmem:[%s2323_s1 + $0x28] sm:$0xff]  ;;  %v1501_v7 = vld [vmem:[%s2323_s1 + $0x20] sm:$0xff]  ;;  %v1500_v8 = vld [vmem:[%s2323_s1 + $0x18] sm:$0xff]  ;;  %vm950_vm2 = vcmask 64512  }
   0xd   : > { %1506 = vmatpush.bf16.msra.mxu2 %v1504_v0  ;;  %1514 = vmatpush.bf16.msra.mxu3 %v1505_v1  ;;  %s1595_s8 = scalar_lea.vmem %s2322_s0, %s1463_s29  ;;  %v1499_v9 = vld [vmem:[%s2323_s1 + $0x10] sm:$0xff]  ;;  %v1498_v13 = vld [vmem:[%s2323_s1 + $0x8] sm:$0xff]  ;;  %v1497_v14 = vld [vmem:[%s2323_s1] sm:$0xff]  ;;  %s2143_s16 = scalar_lea.vmem %s2328_s6, %s1463_s29 }
   0xe   : > { %v1465_v3 = vld [vmem:[%s1595_s8 + $0x4] sm:$0xf]  ;;  %v1281_v4 = vld [vmem:[%s1595_s8 + $0x8] sm:$0xf0]  ;;  %v1467_v10 = vld [vmem:[%s1595_s8 + $0x14] sm:$0xf] }
   0xf   : > { %v1284_v6 = vor.u32 %v1465_v3, %v1281_v4  ;;  %v1289_v11 = vld [vmem:[%s1595_s8 + $0x18] sm:$0xf0]  ;;  %v1279_v15 = vld [vmem:[%s1595_s8] sm:$0xf]  ;;  %v1466_v16 = vld [vmem:[%s1595_s8 + $0x4] sm:$0xf0] }
  0x10   : > { %551 = vmatpush.bf16.msra.mxu0 %v1503_v2  ;;  %v1292_v12 = vor.u32 %v1467_v10, %v1289_v11  ;;  %v1343_v17 = vld [vmem:[%s1595_s8 + $0x80] sm:$0xf]  ;;  %v1482_v18 = vld [vmem:[%s1595_s8 + $0x84] sm:$0xf0]  ;;  %v1280_v19 = vor.u32 %v1466_v16, %v1279_v15  ;;  %v1469_v21 = vld [vmem:[%s1595_s8 + $0x24] sm:$0xf] }
  0x11   : > { %1507 = vmatpush.bf16.msra.mxu2 %v1503_v2  ;;  %1441 = vmatmul.msk.bf16.vlgmr.msra.gmra.mxu1 %vm501_vm0, %v1284_v6  ;;  %v1344_v20 = vor.u32 %v1482_v18, %v1343_v17  ;;  %v1297_v22 = vld [vmem:[%s1595_s8 + $0x28] sm:$0xf0]  ;;  %v1287_v24 = vld [vmem:[%s1595_s8 + $0x10] sm:$0xf]  ;;  %v1468_v25 = vld [vmem:[%s1595_s8 + $0x14] sm:$0xf0] }
  0x12   : > { %v1300_v23 = vor.u32 %v1469_v21, %v1297_v22  ;;  %v1351_v26 = vld [vmem:[%s1595_s8 + $0x90] sm:$0xf]  ;;  %v1484_v27 = vld [vmem:[%s1595_s8 + $0x94] sm:$0xf0]  ;;  %v1288_v28 = vor.u32 %v1468_v25, %v1287_v24  ;;  %v1485_v30 = vld [vmem:[%s1595_s8 + $0xa4] sm:$0xf] }
  0x13   : > { %v1352_v29 = vor.u32 %v1484_v27, %v1351_v26  ;;  %v1361_v31 = vld [vmem:[%s1595_s8 + $0xa8] sm:$0xf0]  ;;  %v1471_v32 = vld [vmem:[%s1595_s8 + $0x34] sm:$0xf]  ;;  %v1305_v33 = vld [vmem:[%s1595_s8 + $0x38] sm:$0xf0] }
  0x14   : > { %552 = vmatpush.bf16.msra.mxu0 %v1502_v5  ;;  %v1364_v34 = vor.u32 %v1485_v30, %v1361_v31  ;;  %v1308_v35 = vor.u32 %v1471_v32, %v1305_v33  ;;  %v1295_v36 = vld [vmem:[%s1595_s8 + $0x20] sm:$0xf]  ;;  %v1470_v37 = vld [vmem:[%s1595_s8 + $0x24] sm:$0xf0]  ;;  %v1487_v42 = vld [vmem:[%s1595_s8 + $0xb4] sm:$0xf] }
  0x15   : > { %1508 = vmatpush.bf16.msra.mxu2 %v1502_v5  ;;  %v1359_v38 = vld [vmem:[%s1595_s8 + $0xa0] sm:$0xf]  ;;  %v1486_v39 = vld [vmem:[%s1595_s8 + $0xa4] sm:$0xf0]  ;;  %v1296_v40 = vor.u32 %v1470_v37, %v1295_v36  ;;  %v1369_v43 = vld [vmem:[%s1595_s8 + $0xb8] sm:$0xf0] }
  0x16   : > { %1451 = vmatmul.msk.bf16.vlgmr.msra.gmra.mxu3 %vm501_vm0, %v1364_v34  ;;  %v1360_v41 = vor.u32 %v1486_v39, %v1359_v38  ;;  %v1473_v44 = vld [vmem:[%s1595_s8 + $0x44] sm:$0xf]  ;;  %v1313_v45 = vld [vmem:[%s1595_s8 + $0x48] sm:$0xf0]  ;;  %v1372_v46 = vor.u32 %v1487_v42, %v1369_v43  ;;  %v1303_v48 = vld [vmem:[%s1595_s8 + $0x30] sm:$0xf] }
  0x17   : > { %v1316_v47 = vor.u32 %v1473_v44, %v1313_v45  ;;  %v1472_v49 = vld [vmem:[%s1595_s8 + $0x34] sm:$0xf0]  ;;  %v1367_v50 = vld [vmem:[%s1595_s8 + $0xb0] sm:$0xf]  ;;  %v1489_v54 = vld [vmem:[%s1595_s8 + $0xc4] sm:$0xf] }
  0x18   : > { %553 = vmatpush.bf16.msra.mxu0 %v1501_v7  ;;  %v1488_v51 = vld [vmem:[%s1595_s8 + $0xb4] sm:$0xf0]  ;;  %v1304_v52 = vor.u32 %v1472_v49, %v1303_v48  ;;  %v1377_v55 = vld [vmem:[%s1595_s8 + $0xc8] sm:$0xf0]  ;;  %v1475_v56 = vld [vmem:[%s1595_s8 + $0x54] sm:$0xf] }
  0x19   : > { %1509 = vmatpush.bf16.msra.mxu2 %v1501_v7  ;;  %v1368_v53 = vor.u32 %v1488_v51, %v1367_v50  ;;  %v1321_v57 = vld [vmem:[%s1595_s8 + $0x58] sm:$0xf0]  ;;  %v1380_v58 = vor.u32 %v1489_v54, %v1377_v55  ;;  %v1311_v60 = vld [vmem:[%s1595_s8 + $0x40] sm:$0xf]  ;;  %v1474_v61 = vld [vmem:[%s1595_s8 + $0x44] sm:$0xf0] }
  0x1a   : > { %v1324_v59 = vor.u32 %v1475_v56, %v1321_v57  ;;  %v1375_v62 = vld [vmem:[%s1595_s8 + $0xc0] sm:$0xf]  ;;  %v1490_v63 = vld [vmem:[%s1595_s8 + $0xc4] sm:$0xf0]  ;;  %v1312_v0 = vor.u32 %v1474_v61, %v1311_v60  ;;  %v1491_v2 = vld [vmem:[%s1595_s8 + $0xd4] sm:$0xf] }
  0x1b   : > { %v1376_v1 = vor.u32 %v1490_v63, %v1375_v62  ;;  %v1385_v3 = vld [vmem:[%s1595_s8 + $0xd8] sm:$0xf0]  ;;  %v1477_v4 = vld [vmem:[%s1595_s8 + $0x64] sm:$0xf]  ;;  %v1329_v5 = vld [vmem:[%s1595_s8 + $0x68] sm:$0xf0] }
  0x1c   : > { %554 = vmatpush.bf16.msra.mxu0 %v1500_v8  ;;  %v1388_v6 = vor.u32 %v1491_v2, %v1385_v3  ;;  %v1332_v7 = vor.u32 %v1477_v4, %v1329_v5  ;;  %v1383_v10 = vld [vmem:[%s1595_s8 + $0xd0] sm:$0xf]  ;;  %v1492_v11 = vld [vmem:[%s1595_s8 + $0xd4] sm:$0xf0]  ;;  %v1393_v15 = vld [vmem:[%s1595_s8 + $0xe8] sm:$0xf0] }
  0x1d   : > { %1510 = vmatpush.bf16.msra.mxu2 %v1500_v8  ;;  %v1319_v8 = vld [vmem:[%s1595_s8 + $0x50] sm:$0xf]  ;;  %v1479_v16 = vld [vmem:[%s1595_s8 + $0x74] sm:$0xf]  ;;  %v1337_v17 = vld [vmem:[%s1595_s8 + $0x78] sm:$0xf0] }
  0x1e   : > { %v1478_v21 = vld [vmem:[%s1595_s8 + $0x64] sm:$0xf0]  ;;  %v1391_v22 = vld [vmem:[%s1595_s8 + $0xe0] sm:$0xf]  ;;  %v1495_v26 = vld [vmem:[%s1595_s8 + $0xf4] sm:$0xf] }
  0x1f   : > { %v1401_v27 = vld [vmem:[%s1595_s8 + $0xf8] sm:$0xf0]  ;;  %v1335_v33 = vld [vmem:[%s1595_s8 + $0x70] sm:$0xf]  ;;  %v1480_v34 = vld [vmem:[%s1595_s8 + $0x74] sm:$0xf0] }
  0x20   : > { %555 = vmatpush.bf16.msra.mxu0 %v1499_v9  ;;  %v1404_v30 = vor.u32 %v1495_v26, %v1401_v27  ;;  %v1496_v36 = vld [vmem:[%s1595_s8 + $0xf4] sm:$0xf0]  ;;  %v1336_v37 = vor.u32 %v1480_v34, %v1335_v33 }
  0x21   : > { %1511 = vmatpush.bf16.msra.mxu2 %v1499_v9  ;;  %1442 = vmatmul.msk.bf16.gmra.mxu1 %vm501_vm0, %v1292_v12  ;;  %v1476_v9 = vld [vmem:[%s1595_s8 + $0x54] sm:$0xf0] }
  0x22   : > { %v1320_v12 = vor.u32 %v1476_v9, %v1319_v8  ;;  %v1720_v5 = vld [vmem:[%s2324_s2 + $0x18] sm:$0xff] }
  0x23   : > { %918 = vmatpush.msrb.mxu3 %v1720_v5 }
  0x24   : > { %556 = vmatpush.bf16.msra.mxu0 %v1498_v13 }
  0x25   : > { %1512 = vmatpush.bf16.msra.mxu2 %v1498_v13  ;;  %v1384_v13 = vor.u32 %v1492_v11, %v1383_v10 }
  0x26   : > { %1452 = vmatmul.msk.bf16.gmra.mxu3 %vm501_vm0, %v1372_v46 }
  0x28   : > { %557 = vmatpush.bf16.msra.mxu0 %v1497_v14 }
  0x29   : > { %1513 = vmatpush.bf16.msra.mxu2 %v1497_v14  ;;  %v1493_v14 = vld [vmem:[%s1595_s8 + $0xe4] sm:$0xf] }
  0x2a   : > { %v1396_v18 = vor.u32 %v1493_v14, %v1393_v15 }
  0x2b   : > { %558 = vmatmul.bf16.vlgmr.msra.gmra.mxu0 %v1280_v19  ;;  %v1340_v19 = vor.u32 %v1479_v16, %v1337_v17  ;;  %v1740_v17 = vld [vmem:[%s2324_s2 + $0x10] sm:$0xff] }
  0x2c   : > { %598 = vmatmul.bf16.vlgmr.msra.gmra.mxu2 %v1344_v20  ;;  %v1327_v20 = vld [vmem:[%s1595_s8 + $0x60] sm:$0xf]  ;;  %919 = vmatpush.msrb.mxu3 %v1740_v17 }
  0x2d   : > { %v1328_v24 = vor.u32 %v1478_v21, %v1327_v20 }
  0x31   : > { %1443 = vmatmul.msk.bf16.gmra.mxu1 %vm501_vm0, %v1300_v23  ;;  %v1494_v23 = vld [vmem:[%s1595_s8 + $0xe4] sm:$0xf0] }
  0x32   : > { %v1392_v25 = vor.u32 %v1494_v23, %v1391_v22 }
  0x36   : > { %1453 = vmatmul.msk.bf16.gmra.mxu3 %vm501_vm0, %v1380_v58 }
  0x3b   : > { %563 = vmatmul.bf16.gmra.mxu0 %v1288_v28  ;;  %v1481_v28 = vld [vmem:[%s1595_s8 + $0x84] sm:$0xf] }
  0x3c   : > { %603 = vmatmul.bf16.gmra.mxu2 %v1352_v29  ;;  %v1345_v29 = vld [vmem:[%s1595_s8 + $0x88] sm:$0xf0] }
  0x3d   : > { %v1348_v31 = vor.u32 %v1481_v28, %v1345_v29 }
  0x41   : > { %1444 = vmatmul.msk.bf16.gmra.mxu1 %vm501_vm0, %v1308_v35  ;;  %v1399_v35 = vld [vmem:[%s1595_s8 + $0xf0] sm:$0xf] }
  0x42   : > { %v1400_v39 = vor.u32 %v1496_v36, %v1399_v35 }
  0x46   : > { %1454 = vmatmul.msk.bf16.gmra.mxu3 %vm501_vm0, %v1388_v6 }
  0x4b   : > { %568 = vmatmul.bf16.gmra.mxu0 %v1296_v40  ;;  %v1483_v40 = vld [vmem:[%s1595_s8 + $0x94] sm:$0xf] }
  0x4c   : > { %608 = vmatmul.bf16.gmra.mxu2 %v1360_v41  ;;  %v1353_v41 = vld [vmem:[%s1595_s8 + $0x98] sm:$0xf0] }
  0x4d   : > { %v1356_v42 = vor.u32 %v1483_v40, %v1353_v41 }
  0x51   : > { %1445 = vmatmul.msk.bf16.gmra.mxu1 %vm501_vm0, %v1316_v47 }
  0x56   : > { %1455 = vmatmul.msk.bf16.gmra.mxu3 %vm501_vm0, %v1396_v18 }
  0x5b   : > { %573 = vmatmul.bf16.gmra.mxu0 %v1304_v52 }
  0x5c   : > { %613 = vmatmul.bf16.gmra.mxu2 %v1368_v53 }
  0x61   : > { %1446 = vmatmul.msk.bf16.gmra.mxu1 %vm501_vm0, %v1324_v59 }
  0x66   : > { %1456 = vmatmul.msk.bf16.gmra.mxu3 %vm501_vm0, %v1404_v30 }
  0x6b   : > { %578 = vmatmul.bf16.gmra.mxu0 %v1312_v0 }
  0x6c   : > { %618 = vmatmul.bf16.gmra.mxu2 %v1376_v1 }
  0x71   : > { %1447 = vmatmul.msk.bf16.gmra.mxu1 %vm501_vm0, %v1332_v7 }
  0x7b   : > { %583 = vmatmul.bf16.gmra.mxu0 %v1320_v12 }
  0x7c   : > { %623 = vmatmul.bf16.gmra.mxu2 %v1384_v13 }
  0x81   : > { %1448 = vmatmul.msk.bf16.gmra.mxu1 %vm501_vm0, %v1340_v19 }
  0x8b   : > { %588 = vmatmul.bf16.gmra.mxu0 %v1328_v24 }
  0x8c   : > { %628 = vmatmul.bf16.gmra.mxu2 %v1392_v25 }
  0x8e   : > { %v648_v32 = vpop.f32.mrf.mxu1 }
  0x91   : > { %1449 = vmatmul.msk.bf16.gmra.mxu1 %vm501_vm0, %v1348_v31 }
  0x96   : > { %v650_v38 = vpop.f32.mrf.mxu1 }
  0x99   : > { %v698_v63 = vpop.f32.mrf.mxu3 }
  0x9b   : > { %593 = vmatmul.bf16.gmra.mxu0 %v1336_v37 }
  0x9c   : > { %633 = vmatmul.bf16.gmra.mxu2 %v1400_v39 }
  0x9e   : > { %v653_v43 = vpop.f32.mrf.mxu1 }
  0xa1   : > { %1450 = vmatmul.msk.bf16.gmra.mxu1 %vm501_vm0, %v1356_v42  ;;  %v1715_v4 = vpop.f32.mrf.mxu3 }
  0xa6   : > { %v655_v44 = vpop.f32.mrf.mxu1 }
  0xa8   : > { %v559_v45 = vpop.f32.mrf.mxu0 }
  0xa9   : > { %v1695_v46 = vadd.f32 %v648_v32, %v559_v45  ;;  %v1727_v10 = vpop.f32.mrf.mxu3 }
  0xab   : > { %v798_v29 = vmul.f32 %v1695_v46, %v1695_v46  ;;  %v729_v32 = vsel %vm728_vm1, %v1695_v46, 0.0 }
  0xad   : > { %v830_v39 = vsel %vm728_vm1, %v798_v29, 0.0 }
  0xae   : > { %v658_v48 = vpop.f32.mrf.mxu1 }
  0xaf   : > { %v1697_v47 = vpop.f32.mrf.mxu2 }
  0xb0   : > { %v561_v49 = vpop.f32.mrf.mxu0 }
  0xb1   : > { %v1699_v50 = vadd.f32 %v650_v38, %v561_v49  ;;  %v1735_v16 = vpop.f32.mrf.mxu3 }
  0xb3   : > { %v799_v28 = vmul.f32 %v1699_v50, %v1699_v50  ;;  %v730_v30 = vsel %vm728_vm1, %v1699_v50, 0.0 }
  0xb4   : > { %v731_v40 = vadd.f32 %v730_v30, %v729_v32 }
  0xb5   : > { %v831_v33 = vsel %vm728_vm1, %v799_v28, 0.0 }
  0xb6   : > { %v660_v52 = vpop.f32.mrf.mxu1 }
  0xb7   : > { %v1701_v51 = vpop.f32.mrf.mxu2 }
  0xb8   : > { %v564_v53 = vpop.f32.mrf.mxu0 }
  0xb9   : > { %v1703_v54 = vadd.f32 %v653_v43, %v564_v53  ;;  %v1747_v21 = vpop.f32.mrf.mxu3  ;;  %v1784_v43 = vld [vmem:[%s2324_s2 + $0x8] sm:$0xff] }
  0xba   : > { %920 = vmatpush.msrb.mxu3 %v1784_v43 }
  0xbb   : > { %v800_v31 = vmul.f32 %v1703_v54, %v1703_v54  ;;  %v732_v34 = vsel %vm728_vm1, %v1703_v54, 0.0 }
  0xbc   : > { %v733_v53 = vadd.f32 %v732_v34, %v731_v40 }
  0xbe   : > { %v663_v56 = vpop.f32.mrf.mxu1 }
  0xbf   : > { %v1705_v55 = vpop.f32.mrf.mxu2 }
  0xc0   : > { %v566_v57 = vpop.f32.mrf.mxu0 }
  0xc1   : > { %v1707_v58 = vadd.f32 %v655_v44, %v566_v57  ;;  %v1753_v25 = vpop.f32.mrf.mxu3  ;;  %v833_v44 = vsel %vm728_vm1, %v800_v31, 0.0 }
  0xc3   : > { %v801_v35 = vmul.f32 %v1707_v58, %v1707_v58  ;;  %v734_v45 = vsel %vm728_vm1, %v1707_v58, 0.0 }
  0xc4   : > { %v735_v28 = vadd.f32 %v734_v45, %v733_v53 }
  0xc5   : > { %v835_v57 = vsel %vm728_vm1, %v801_v35, 0.0 }
  0xc6   : > { %v665_v60 = vpop.f32.mrf.mxu1 }
  0xc7   : > { %v1709_v59 = vpop.f32.mrf.mxu2 }
  0xc8   : > { %v569_v61 = vpop.f32.mrf.mxu0 }
  0xc9   : > { %v1711_v62 = vadd.f32 %v658_v48, %v569_v61  ;;  %v1776_v38 = vpop.f32.mrf.mxu3 }
  0xcb   : > { %v802_v48 = vmul.f32 %v1711_v62, %v1711_v62  ;;  %v736_v61 = vsel %vm728_vm1, %v1711_v62, 0.0 }
  0xcc   : > { %v737_v32 = vadd.f32 %v736_v61, %v735_v28 }
  0xcd   : > { %v837_v29 = vsel %vm728_vm1, %v802_v48, 0.0 }
  0xce   : > { %v668_v1 = vpop.f32.mrf.mxu1 }
  0xcf   : > { %v609_v0 = vpop.f32.mrf.mxu2 }
  0xd0   : > { %v571_v2 = vpop.f32.mrf.mxu0  ;;  %v1713_v3 = vadd.f32 %v698_v63, %v609_v0 }
  0xd1   : > { %v1772_v36 = vadd.f32 %v660_v52, %v571_v2  ;;  %v832_v52 = vadd.f32 %v831_v33, %v830_v39 }
  0xd3   : > { %v803_v63 = vmul.f32 %v1772_v36, %v1772_v36  ;;  %v834_v2 = vadd.f32 %v833_v44, %v832_v52 }
  0xd5   : > { %v836_v31 = vadd.f32 %v835_v57, %v834_v2  ;;  %v839_v33 = vsel %vm728_vm1, %v803_v63, 0.0 }
  0xd6   : > { %v670_v7 = vpop.f32.mrf.mxu1 }
  0xd7   : > { %v1722_v6 = vpop.f32.mrf.mxu2  ;;  %v838_v35 = vadd.f32 %v837_v29, %v836_v31 }
  0xd8   : > { %v574_v8 = vpop.f32.mrf.mxu0 }
  0xd9   : > { %v1791_v49 = vadd.f32 %v663_v56, %v574_v8  ;;  %v738_v56 = vsel %vm728_vm1, %v1772_v36, 0.0  ;;  %v840_v52 = vadd.f32 %v839_v33, %v838_v35 }
  0xda   : > { %v739_v39 = vadd.f32 %v738_v56, %v737_v32 }
  0xdb   : > { %v804_v8 = vmul.f32 %v1791_v49, %v1791_v49 }
  0xdd   : > { %v841_v45 = vsel %vm728_vm1, %v804_v8, 0.0 }
  0xde   : > { %v1729_v11 = vpop.f32.mrf.mxu1  ;;  %v842_v28 = vadd.f32 %v841_v45, %v840_v52 }
  0xdf   : > { %v1725_v9 = vpop.f32.mrf.mxu2 }
  0xe0   : > { %v576_v12 = vpop.f32.mrf.mxu0 }
  0xe1   : > { %v1799_v0 = vadd.f32 %v665_v60, %v576_v12  ;;  %v740_v60 = vsel %vm728_vm1, %v1791_v49, 0.0 }
  0xe2   : > { %v741_v53 = vadd.f32 %v740_v60, %v739_v39 }
  0xe3   : > { %v805_v12 = vmul.f32 %v1799_v0, %v1799_v0 }
  0xe6   : > { %v1731_v13 = vpop.f32.mrf.mxu1 }
  0xe7   : > { %v1733_v15 = vpop.f32.mrf.mxu2 }
  0xe8   : > { %v579_v14 = vpop.f32.mrf.mxu0 }
  0xe9   : > { %v1806_v30 = vadd.f32 %v668_v1, %v579_v14  ;;  %v742_v1 = vsel %vm728_vm1, %v1799_v0, 0.0 }
  0xeb   : > { %v806_v14 = vmul.f32 %v1806_v30, %v1806_v30  ;;  %v744_v61 = vsel %vm728_vm1, %v1806_v30, 0.0 }
  0xee   : > { %v1743_v18 = vpop.f32.mrf.mxu1 }
  0xef   : > { %v1745_v20 = vpop.f32.mrf.mxu2 }
  0xf0   : > { %v581_v19 = vpop.f32.mrf.mxu0 }
  0xf1   : > { %v1813_v34 = vadd.f32 %v670_v7, %v581_v19  ;;  %v1825_v7 = vpop.f32.mrf.mxu3  ;;  %v843_v19 = vsel %vm728_vm1, %v805_v12, 0.0 }
  0xf2   : > { %v844_v31 = vadd.f32 %v843_v19, %v842_v28 }
  0xf3   : > { %v807_v63 = vmul.f32 %v1813_v34, %v1813_v34  ;;  %v746_v29 = vsel %vm728_vm1, %v1813_v34, 0.0 }
  0xf5   : > { %v847_v33 = vsel %vm728_vm1, %v807_v63, 0.0 }
  0xf6   : > { %v1749_v22 = vpop.f32.mrf.mxu1 }
  0xf7   : > { %v1751_v24 = vpop.f32.mrf.mxu2 }
  0xf8   : > { %v584_v23 = vpop.f32.mrf.mxu0 }
  0xf9   : > { %v1821_v48 = vadd.f32 %v1729_v11, %v584_v23  ;;  %v743_v11 = vadd.f32 %v742_v1, %v741_v53  ;;  %v845_v23 = vsel %vm728_vm1, %v806_v14, 0.0 }
  0xfa   : > { %v846_v12 = vadd.f32 %v845_v23, %v844_v31 }
  0xfb   : > { %v808_v56 = vmul.f32 %v1821_v48, %v1821_v48  ;;  %v745_v32 = vadd.f32 %v744_v61, %v743_v11  ;;  %v1866_v11 = vpop.f32.mrf.mxu3 }
  0xfc   : > { %v848_v52 = vadd.f32 %v847_v33, %v846_v12 }
  0xfd   : > { %v747_v35 = vadd.f32 %v746_v29, %v745_v32 }
  0xfe   : > { %v1755_v26 = vpop.f32.mrf.mxu1 }
  0xff   : > { %v1774_v37 = vpop.f32.mrf.mxu2 }
 0x100   : > { %v586_v27 = vpop.f32.mrf.mxu0 }
 0x101   : > { %v1833_v2 = vadd.f32 %v1731_v13, %v586_v27  ;;  %v748_v13 = vsel %vm728_vm1, %v1821_v48, 0.0 }
 0x102   : > { %v749_v53 = vadd.f32 %v748_v13, %v747_v35 }
 0x103   : > { %v809_v27 = vmul.f32 %v1833_v2, %v1833_v2 }
 0x106   : > { %v1779_v41 = vpop.f32.mrf.mxu1 }
 0x107   : > { %v1823_v57 = vpop.f32.mrf.mxu2 }
 0x108   : > { %v589_v42 = vpop.f32.mrf.mxu0 }
 0x109   : > { %v1841_v8 = vadd.f32 %v1743_v18, %v589_v42  ;;  %v849_v18 = vsel %vm728_vm1, %v808_v56, 0.0  ;;  %v750_v42 = vsel %vm728_vm1, %v1833_v2, 0.0 }
 0x10a   : > { %v850_v61 = vadd.f32 %v849_v18, %v848_v52  ;;  %v751_v63 = vadd.f32 %v750_v42, %v749_v53 }
 0x10b   : > { %v810_v1 = vmul.f32 %v1841_v8, %v1841_v8 }
 0x10d   : > { %v853_v23 = vsel %vm728_vm1, %v810_v1, 0.0 }
 0x10e   : > { %v688_v40 = vpop.f32.mrf.mxu1 }
 0x10f   : > { %v1864_v28 = vpop.f32.mrf.mxu2  ;;  %v1874_v32 = vadd.f32 %v688_v40, %v1697_v47 }
 0x110   : > { %v591_v44 = vpop.f32.mrf.mxu0 }
 0x111   : > { %v1849_v60 = vadd.f32 %v1749_v22, %v591_v44  ;;  %v851_v22 = vsel %vm728_vm1, %v809_v27, 0.0  ;;  %v752_v44 = vsel %vm728_vm1, %v1841_v8, 0.0  ;;  %v814_v40 = vmul.f32 %v1874_v32, %v1874_v32 }
 0x112   : > { %v852_v56 = vadd.f32 %v851_v22, %v850_v61  ;;  %v753_v31 = vadd.f32 %v752_v44, %v751_v63 }
 0x113   : > { %v811_v19 = vmul.f32 %v1849_v60, %v1849_v60 }
 0x114   : > { %v854_v27 = vadd.f32 %v853_v23, %v852_v56 }
 0x115   : > { %v855_v33 = vsel %vm728_vm1, %v811_v19, 0.0 }
 0x116   : > { %v690_v39 = vpop.f32.mrf.mxu1  ;;  %v856_v52 = vadd.f32 %v855_v33, %v854_v27 }
 0x117   : > { %v1880_v18 = vadd.f32 %v690_v39, %v1701_v51 }
 0x118   : > { %v594_v45 = vpop.f32.mrf.mxu0 }
 0x119   : > { %v1857_v14 = vadd.f32 %v1755_v26, %v594_v45  ;;  %v754_v26 = vsel %vm728_vm1, %v1849_v60, 0.0  ;;  %v815_v19 = vmul.f32 %v1880_v18, %v1880_v18  ;;  %v762_v56 = vsel %vm728_vm1, %v1880_v18, 0.0 }
 0x11a   : > { %v755_v12 = vadd.f32 %v754_v26, %v753_v31  ;;  %v1902_v26 = vpop.f32.mrf.mxu3 }
 0x11b   : > { %v812_v29 = vmul.f32 %v1857_v14, %v1857_v14  ;;  %v756_v13 = vsel %vm728_vm1, %v1857_v14, 0.0 }
 0x11c   : > { %v757_v47 = vadd.f32 %v756_v13, %v755_v12  ;;  %v1911_v12 = vadd.f32 %v1715_v4, %v1722_v6 }
 0x11d   : > { %v857_v42 = vsel %vm728_vm1, %v812_v29, 0.0  ;;  %v861_v29 = vsel %vm728_vm1, %v814_v40, 0.0 }
 0x11e   : > { %v693_v35 = vpop.f32.mrf.mxu1  ;;  %v858_v39 = vadd.f32 %v857_v42, %v856_v52  ;;  %v818_v52 = vmul.f32 %v1713_v3, %v1713_v3 }
 0x11f   : > { %v1889_v53 = vadd.f32 %v693_v35, %v1705_v55  ;;  %v1900_v55 = vpop.f32.mrf.mxu2  ;;  %v863_v35 = vsel %vm728_vm1, %v815_v19, 0.0 }
 0x120   : > { %v596_v45 = vpop.f32.mrf.mxu0 }
 0x121   : > { %v1884_v1 = vadd.f32 %v1779_v41, %v596_v45  ;;  %v760_v41 = vsel %vm728_vm1, %v1874_v32, 0.0  ;;  %v816_v31 = vmul.f32 %v1889_v53, %v1889_v53  ;;  %v764_v45 = vsel %vm728_vm1, %v1889_v53, 0.0 }
 0x123   : > { %v758_v22 = vsel %vm728_vm1, %v1884_v1, 0.0  ;;  %v813_v51 = vmul.f32 %v1884_v1, %v1884_v1  ;;  %v865_v4 = vsel %vm728_vm1, %v816_v31, 0.0 }
 0x124   : > { %v759_v44 = vadd.f32 %v758_v22, %v757_v47  ;;  %v1923_v22 = vadd.f32 %v1727_v10, %v1725_v9  ;;  %v1936_v9 = vadd.f32 %v1735_v16, %v1733_v15  ;;  %v1949_v15 = vadd.f32 %v1747_v21, %v1745_v20 }
 0x125   : > { %v859_v61 = vsel %vm728_vm1, %v813_v51, 0.0 }
 0x126   : > { %v761_v63 = vadd.f32 %v760_v41, %v759_v44  ;;  %v860_v23 = vadd.f32 %v859_v61, %v858_v39  ;;  %v695_v13 = vpop.f32.mrf.mxu1  ;;  %v768_v44 = vsel %vm728_vm1, %v1713_v3, 0.0  ;;  %v819_v41 = vmul.f32 %v1911_v12, %v1911_v12 }
 0x127   : > { %v1917_v42 = vadd.f32 %v695_v13, %v1709_v59  ;;  %v723_v13 = vpop.f32.mrf.mxu3 }
 0x128   : > { %v862_v33 = vadd.f32 %v861_v29, %v860_v23  ;;  %v763_v27 = vadd.f32 %v762_v56, %v761_v63  ;;  %v899_v63 = vld [vmem:[%s2324_s2] sm:$0xff]  ;;  %v869_v23 = vsel %vm728_vm1, %v818_v52, 0.0  ;;  %v770_v29 = vsel %vm728_vm1, %v1911_v12, 0.0 }
 0x129   : > { %v766_v6 = vsel %vm728_vm1, %v1917_v42, 0.0  ;;  %v817_v51 = vmul.f32 %v1917_v42, %v1917_v42  ;;  %v820_v56 = vmul.f32 %v1923_v22, %v1923_v22  ;;  %921 = vmatpush.msrb.mxu3 %v899_v63  ;;  %v1959_v52 = vadd.f32 %v1753_v25, %v1751_v24 }
 0x12a   : > { %v765_v47 = vadd.f32 %v764_v45, %v763_v27  ;;  %v864_v40 = vadd.f32 %v863_v35, %v862_v33  ;;  %v634_v33 = vpop.f32.mrf.mxu2  ;;  %v871_v27 = vsel %vm728_vm1, %v819_v41, 0.0  ;;  %v772_v35 = vsel %vm728_vm1, %v1923_v22, 0.0 }
 0x12b   : > { %v867_v10 = vsel %vm728_vm1, %v817_v51, 0.0  ;;  %941 = vmatpush.msra.mxu3 %v1720_v5  ;;  %v821_v45 = vmul.f32 %v1936_v9, %v1936_v9  ;;  %v774_v5 = vsel %vm728_vm1, %v1936_v9, 0.0  ;;  %v823_v25 = vmul.f32 %v1959_v52, %v1959_v52 }
 0x12c   : > { %v767_v39 = vadd.f32 %v766_v6, %v765_v47  ;;  %v866_v59 = vadd.f32 %v865_v4, %v864_v40  ;;  %v873_v47 = vsel %vm728_vm1, %v820_v56, 0.0  ;;  %v822_v40 = vmul.f32 %v1949_v15, %v1949_v15 }
 0x12d   : > { %942 = vmatpush.msra.mxu3 %v1740_v17  ;;  %v1969_v4 = vadd.f32 %v1776_v38, %v1774_v37  ;;  %v875_v24 = vsel %vm728_vm1, %v821_v45, 0.0  ;;  %v776_v17 = vsel %vm728_vm1, %v1949_v15, 0.0  ;;  %v778_v38 = vsel %vm728_vm1, %v1959_v52, 0.0 }
 0x12e   : > { %v769_v19 = vadd.f32 %v768_v44, %v767_v39  ;;  %v868_v61 = vadd.f32 %v867_v10, %v866_v59  ;;  %v1979_v39 = vadd.f32 %v1825_v7, %v1823_v57  ;;  %v877_v37 = vsel %vm728_vm1, %v822_v40, 0.0 }
 0x12f   : > { %943 = vmatpush.msra.mxu3 %v1784_v43  ;;  %v824_v43 = vmul.f32 %v1969_v4, %v1969_v4  ;;  %v1988_v41 = vadd.f32 %v1866_v11, %v1864_v28  ;;  %v879_v57 = vsel %vm728_vm1, %v823_v25, 0.0  ;;  %v780_v7 = vsel %vm728_vm1, %v1969_v4, 0.0 }
 0x130   : > { %v771_v16 = vadd.f32 %v770_v29, %v769_v19  ;;  %v870_v31 = vadd.f32 %v869_v23, %v868_v61  ;;  %v825_v61 = vmul.f32 %v1979_v39, %v1979_v39  ;;  %v782_v11 = vsel %vm728_vm1, %v1979_v39, 0.0 }
 0x131   : > { %944 = vmatpush.msra.mxu3 %v899_v63  ;;  %v1997_v63 = vadd.f32 %v1902_v26, %v1900_v55  ;;  %v881_v28 = vsel %vm728_vm1, %v824_v43, 0.0  ;;  %v784_v55 = vsel %vm728_vm1, %v1988_v41, 0.0 }
 0x132   : > { %v773_v20 = vadd.f32 %v772_v35, %v771_v16  ;;  %v872_v21 = vadd.f32 %v871_v27, %v870_v31  ;;  %v636_v56 = vpop.f32.mrf.mxu2  ;;  %v725_v16 = vpop.f32.mrf.mxu3  ;;  %v826_v31 = vmul.f32 %v1988_v41, %v1988_v41  ;;  %v2004_v27 = vadd.f32 %v723_v13, %v634_v33 }
 0x133   : > { %v827_v26 = vmul.f32 %v1997_v63, %v1997_v63  ;;  %v786_v33 = vsel %vm728_vm1, %v1997_v63, 0.0 }
 0x134   : > { %v775_v6 = vadd.f32 %v774_v5, %v773_v20  ;;  %v874_v51 = vadd.f32 %v873_v47, %v872_v21  ;;  %v883_v20 = vsel %vm728_vm1, %v825_v61, 0.0  ;;  %v2011_v21 = vadd.f32 %v725_v16, %v636_v56 }
 0x135   : > { %v885_v40 = vsel %vm728_vm1, %v826_v31, 0.0  ;;  %v828_v13 = vmul.f32 %v2004_v27, %v2004_v27 }
 0x136   : > { %v876_v59 = vadd.f32 %v875_v24, %v874_v51  ;;  %v777_v44 = vadd.f32 %v776_v17, %v775_v6  ;;  %v887_v24 = vsel %vm728_vm1, %v827_v26, 0.0  ;;  %v788_v17 = vsel %vm728_vm1, %v2004_v27, 0.0 }
 0x137   : > { %v829_v25 = vmul.f32 %v2011_v21, %v2011_v21 }
 0x138   : > { %v779_v10 = vadd.f32 %v778_v38, %v777_v44  ;;  %v878_v19 = vadd.f32 %v877_v37, %v876_v59  ;;  %v889_v37 = vsel %vm728_vm1, %v828_v13, 0.0  ;;  %v790_v38 = vsel %vm728_vm1, %v2011_v21, 0.0 }
 0x13a   : > { %v781_v23 = vadd.f32 %v780_v7, %v779_v10  ;;  %v880_v29 = vadd.f32 %v879_v57, %v878_v19  ;;  %v891_v19 = vsel %vm728_vm1, %v829_v25, 0.0 }
 0x13c   : > { %v783_v35 = vadd.f32 %v782_v11, %v781_v23  ;;  %v882_v45 = vadd.f32 %v881_v28, %v880_v29 }
 0x13e   : > { %v785_v47 = vadd.f32 %v784_v55, %v783_v35  ;;  %v884_v5 = vadd.f32 %v883_v20, %v882_v45  ;;  %v949_v45 = vld [vmem:[%s2325_s3] sm:$0xff] }
 0x140   : > { %v787_v6 = vadd.f32 %v786_v33, %v785_v47  ;;  %v886_v51 = vadd.f32 %v885_v40, %v884_v5 }
 0x142   : > { %v888_v59 = vadd.f32 %v887_v24, %v886_v51  ;;  %v789_v44 = vadd.f32 %v788_v17, %v787_v6 }
 0x144   : > { %v890_v43 = vadd.f32 %v889_v37, %v888_v59  ;;  %v791_v10 = vadd.f32 %v790_v38, %v789_v44 }
 0x146   : > { %v792_v57 = vrot.slane %v791_v10, 4  ;;  %v892_v7 = vadd.f32 %v891_v19, %v890_v43 }
 0x148   : > { %v793_v61 = vadd.f32 %v792_v57, %v791_v10  ;;  %v893_v23 = vrot.slane %v892_v7, 4 }
 0x14a   : > { %v794_v29 = vrot.slane %v793_v61, 2  ;;  %v894_v56 = vadd.f32 %v893_v23, %v892_v7 }
 0x14c   : > { %v895_v16 = vrot.slane %v894_v56, 2  ;;  %v795_v28 = vadd.f32 %v794_v29, %v793_v61 }
 0x14e   : > { %v796_v11 = vrot.slane %v795_v28, 1  ;;  %v896_v31 = vadd.f32 %v895_v16, %v894_v56 }
 0x150   : > { %v797_v35 = vadd.f32 %v796_v11, %v795_v28  ;;  %v897_v20 = vrot.slane %v896_v31, 1 }
 0x152   : > { %1457 = vmatmul.msk.f32.vlgmr.msrb.gmra.mxu3 %vm728_vm1, %v797_v35  ;;  %v898_v55 = vadd.f32 %v897_v20, %v896_v31 }
 0x153   : > { %969 = vmatpush.msrb.mxu3 %v949_v45 }
 0x15a   : > { %1458 = vmatmul.msk.f32.vlgmr.msra.gmra.mxu3 %vm728_vm1, %v898_v55 }
 0x15b   : > { %992 = vmatpush.msra.mxu3 %v949_v45 }
 0x1d5   : > { %v923_v26 = vpop.f32.mrf.mxu3 }
 0x1d6   : > { %1459 = vmatmul.msk.f32.vlgmr.msrb.gmra.mxu3 %vm950_vm2, %v923_v26 }
 0x1dd   : > { %v946_v47 = vpop.f32.mrf.mxu3 }
 0x1de   : > { %1460 = vmatmul.msk.f32.vlgmr.msra.gmra.mxu3 %vm950_vm2, %v946_v47 }
 0x259   : > { %v971_v5 = vpop.f32.mrf.mxu3 }
 0x25a   : > { %v997_v33 = vmul.f32 %v971_v5, %v971_v5  ;;  %v2032_v38 = vperm.slane %v971_v5, 0 }
 0x25c   : > { %v1001_v10 = vsub.f32 %v1695_v46, %v2032_v38  ;;  %v1002_v19 = vsub.f32 %v1699_v50, %v2032_v38  ;;  %v1003_v57 = vsub.f32 %v1703_v54, %v2032_v38  ;;  %v1004_v7 = vsub.f32 %v1707_v58, %v2032_v38 }
 0x25d   : > { %v1005_v23 = vsub.f32 %v1711_v62, %v2032_v38  ;;  %v1006_v29 = vsub.f32 %v1772_v36, %v2032_v38  ;;  %v1007_v46 = vsub.f32 %v1791_v49, %v2032_v38  ;;  %v1008_v50 = vsub.f32 %v1799_v0, %v2032_v38 }
 0x25e   : > { %v1009_v54 = vsub.f32 %v1806_v30, %v2032_v38  ;;  %v1010_v58 = vsub.f32 %v1813_v34, %v2032_v38  ;;  %v1011_v56 = vsub.f32 %v1821_v48, %v2032_v38  ;;  %v1012_v62 = vsub.f32 %v1833_v2, %v2032_v38 }
 0x25f   : > { %v1013_v36 = vsub.f32 %v1841_v8, %v2032_v38  ;;  %v1014_v49 = vsub.f32 %v1849_v60, %v2032_v38  ;;  %v1015_v0 = vsub.f32 %v1857_v14, %v2032_v38  ;;  %v1016_v30 = vsub.f32 %v1884_v1, %v2032_v38  ;;  %v2076_v8 = vld [vmem:[%s2326_s4] ss:$0 sm:$0xff] }
 0x260   : > { %v1017_v34 = vsub.f32 %v1874_v32, %v2032_v38  ;;  %v1018_v60 = vsub.f32 %v1880_v18, %v2032_v38  ;;  %v1019_v14 = vsub.f32 %v1889_v53, %v2032_v38  ;;  %v1020_v32 = vsub.f32 %v1917_v42, %v2032_v38 }
 0x261   : > { %v994_v40 = vpop.f32.mrf.mxu3  ;;  %v1021_v28 = vsub.f32 %v1713_v3, %v2032_v38  ;;  %v1022_v11 = vsub.f32 %v1911_v12, %v2032_v38  ;;  %v1023_v31 = vsub.f32 %v1923_v22, %v2032_v38  ;;  %v1024_v18 = vsub.f32 %v1936_v9, %v2032_v38 }
 0x262   : > { %v998_v13 = vsub.f32 %v994_v40, %v997_v33  ;;  %v1025_v45 = vsub.f32 %v1949_v15, %v2032_v38  ;;  %v1026_v20 = vsub.f32 %v1959_v52, %v2032_v38  ;;  %v2106_v33 = vld [vmem:[%s2327_s5] ss:$0 sm:$0xff] }
 0x264   : > { %v999_v6 = vmax.f32 %v998_v13, 0.0  ;;  %v1027_v13 = vsub.f32 %v1969_v4, %v2032_v38 }
 0x266   : > { %v1033_v51 = vadd.f32 1e-05, %v999_v6  ;;  %v1028_v6 = vsub.f32 %v1979_v39, %v2032_v38 }
 0x268   : > { %1525 = vrsqrt.f32 %v1033_v51  ;;  %vm1040_vm4 = vweird.f32 %v1033_v51 }
 0x26e   : > { %v1526_v24 = vpop.eup %1525 }
 0x26f   : > { %v1035_v17 = vmul.f32 %v1526_v24, %v1033_v51  ;;  %vm1041_vm3 = vweird.f32 %v1526_v24 }
 0x270   : > { %vm1042_vm5 = vmor %vm1040_vm4, %vm1041_vm3 }
 0x271   : > { %v1036_v25 = vmul.f32 %v1526_v24, %v1035_v17  ;;  %v1029_v17 = vsub.f32 %v1988_v41, %v2032_v38 }
 0x273   : > { %v1037_v59 = vmul.f32 0.5, %v1036_v25  ;;  %v1030_v25 = vsub.f32 %v1997_v63, %v2032_v38 }
 0x275   : > { %v1038_v44 = vsub.f32 1.5, %v1037_v59 }
 0x277   : > { %v1039_v37 = vmul.f32 %v1526_v24, %v1038_v44 }
 0x279   : > { %v1043_v43 = vsel %vm1042_vm5, %v1526_v24, %v1039_v37  ;;  %v1031_v37 = vsub.f32 %v2004_v27, %v2032_v38 }
 0x27a   : > { %v2042_v61 = vperm.slane %v1043_v43, 0 }
 0x27c   : > { %v1045_v48 = vmul.f32 %v2042_v61, %v1001_v10  ;;  %v1046_v16 = vmul.f32 %v2042_v61, %v1002_v19  ;;  %v1047_v2 = vmul.f32 %v2042_v61, %v1003_v57  ;;  %v1048_v1 = vmul.f32 %v2042_v61, %v1004_v7 }
 0x27d   : > { %v1049_v35 = vmul.f32 %v2042_v61, %v1005_v23  ;;  %v1050_v55 = vmul.f32 %v2042_v61, %v1006_v29  ;;  %v1051_v26 = vmul.f32 %v2042_v61, %v1007_v46  ;;  %v1052_v51 = vmul.f32 %v2042_v61, %v1008_v50 }
 0x27e   : > { %v1081_v47 = vmul.f32 %v2076_v8, %v1045_v48  ;;  %v1082_v5 = vmul.f32 %v2076_v8, %v1046_v16  ;;  %v1083_v40 = vmul.f32 %v2076_v8, %v1047_v2  ;;  %v1084_v24 = vmul.f32 %v2076_v8, %v1048_v1 }
 0x27f   : > { %v1053_v59 = vmul.f32 %v2042_v61, %v1009_v54  ;;  %v1085_v44 = vmul.f32 %v2076_v8, %v1049_v35  ;;  %v1054_v43 = vmul.f32 %v2042_v61, %v1010_v58  ;;  %v1055_v10 = vmul.f32 %v2042_v61, %v1011_v56 }
 0x280   : > { %v1086_v19 = vmul.f32 %v2076_v8, %v1050_v55  ;;  %v1087_v57 = vmul.f32 %v2076_v8, %v1051_v26  ;;  %v1117_v7 = vadd.f32 %v2106_v33, %v1081_v47  ;;  %v1118_v23 = vadd.f32 %v2106_v33, %v1082_v5 }
 0x281   : > { %v1119_v29 = vadd.f32 %v2106_v33, %v1083_v40  ;;  %v1032_v46 = vsub.f32 %v2011_v21, %v2032_v38  ;;  %v1056_v50 = vmul.f32 %v2042_v61, %v1012_v62  ;;  %v1088_v54 = vmul.f32 %v2076_v8, %v1052_v51 }
 0x282   : > { %v1120_v58 = vadd.f32 %v2106_v33, %v1084_v24  ;;  %v1057_v56 = vmul.f32 %v2042_v61, %v1013_v36  ;;  %v1058_v48 = vmul.f32 %v2042_v61, %v1014_v49  ;;  %v1089_v16 = vmul.f32 %v2076_v8, %v1053_v59 }
 0x283   : > { %v1121_v2 = vadd.f32 %v2106_v33, %v1085_v44  ;;  %v1059_v62 = vmul.f32 %v2042_v61, %v1015_v0  ;;  %v1090_v1 = vmul.f32 %v2076_v8, %v1054_v43  ;;  %v1091_v35 = vmul.f32 %v2076_v8, %v1055_v10 }
 0x284   : > { %v1122_v36 = vadd.f32 %v2106_v33, %v1086_v19  ;;  %v1123_v49 = vadd.f32 %v2106_v33, %v1087_v57  ;;  %v1149_v55 = vmax.f32 %v1117_v7, 0.0  ;;  %v1150_v26 = vmax.f32 %v1118_v23, 0.0 }
 0x285   : > { %v1151_v47 = vmax.f32 %v1119_v29, 0.0  ;;  %v1060_v5 = vmul.f32 %v2042_v61, %v1016_v30  ;;  %v1092_v40 = vmul.f32 %v2076_v8, %v1056_v50  ;;  %v1124_v51 = vadd.f32 %v2106_v33, %v1088_v54 }
 0x286   : > { %v1152_v0 = vmax.f32 %v1120_v58, 0.0  ;;  %v1061_v24 = vmul.f32 %v2042_v61, %v1017_v34  ;;  %v1093_v59 = vmul.f32 %v2076_v8, %v1057_v56  ;;  %v1125_v44 = vadd.f32 %v2106_v33, %v1089_v16  ;;  %1181 = vst.msk [vmem:[%s2143_s16] sm:$0xff] %vm728_vm1, %v1149_v55 }
 0x287   : > { %v1153_v43 = vmax.f32 %v1121_v2, 0.0  ;;  %v1062_v10 = vmul.f32 %v2042_v61, %v1018_v60  ;;  %v1094_v30 = vmul.f32 %v2076_v8, %v1058_v48  ;;  %v1126_v19 = vadd.f32 %v2106_v33, %v1090_v1  ;;  %1182 = vst.msk [vmem:[%s2143_s16 + $0x8] sm:$0xff] %vm728_vm1, %v1150_v26 }
 0x288   : > { %v1154_v57 = vmax.f32 %v1122_v36, 0.0  ;;  %v1063_v34 = vmul.f32 %v2042_v61, %v1019_v14  ;;  %v1095_v7 = vmul.f32 %v2076_v8, %v1059_v62  ;;  %v1127_v23 = vadd.f32 %v2106_v33, %v1091_v35  ;;  %1183 = vst.msk [vmem:[%s2143_s16 + $0x10] sm:$0xff] %vm728_vm1, %v1151_v47 }
 0x289   : > { %v1155_v29 = vmax.f32 %v1123_v49, 0.0  ;;  %v1064_v60 = vmul.f32 %v2042_v61, %v1020_v32  ;;  %v1096_v50 = vmul.f32 %v2076_v8, %v1060_v5  ;;  %v1128_v54 = vadd.f32 %v2106_v33, %v1092_v40  ;;  %1184 = vst.msk [vmem:[%s2143_s16 + $0x18] sm:$0xff] %vm728_vm1, %v1152_v0 }
 0x28a   : > { %v1156_v53 = vmax.f32 %v1124_v51, 0.0  ;;  %v1065_v14 = vmul.f32 %v2042_v61, %v1021_v28  ;;  %v1097_v58 = vmul.f32 %v2076_v8, %v1061_v24  ;;  %v1129_v56 = vadd.f32 %v2106_v33, %v1093_v59  ;;  %1185 = vst.msk [vmem:[%s2143_s16 + $0x20] sm:$0xff] %vm728_vm1, %v1153_v43 }
 0x28b   : > { %v1157_v42 = vmax.f32 %v1125_v44, 0.0  ;;  %v1066_v32 = vmul.f32 %v2042_v61, %v1022_v11  ;;  %v1098_v48 = vmul.f32 %v2076_v8, %v1062_v10  ;;  %v1130_v16 = vadd.f32 %v2106_v33, %v1094_v30  ;;  %1186 = vst.msk [vmem:[%s2143_s16 + $0x28] sm:$0xff] %vm728_vm1, %v1154_v57 }
 0x28c   : > { %v1158_v3 = vmax.f32 %v1126_v19, 0.0  ;;  %v1067_v28 = vmul.f32 %v2042_v61, %v1023_v31  ;;  %v1099_v2 = vmul.f32 %v2076_v8, %v1063_v34  ;;  %v1131_v62 = vadd.f32 %v2106_v33, %v1095_v7  ;;  %1187 = vst.msk [vmem:[%s2143_s16 + $0x30] sm:$0xff] %vm728_vm1, %v1155_v29 }
 0x28d   : > { %v1159_v12 = vmax.f32 %v1127_v23, 0.0  ;;  %v1068_v11 = vmul.f32 %v2042_v61, %v1024_v18  ;;  %v1100_v1 = vmul.f32 %v2076_v8, %v1064_v60  ;;  %v1132_v35 = vadd.f32 %v2106_v33, %v1096_v50  ;;  %1188 = vst.msk [vmem:[%s2143_s16 + $0x38] sm:$0xff] %vm728_vm1, %v1156_v53 }
 0x28e   : > { %v1160_v22 = vmax.f32 %v1128_v54, 0.0  ;;  %v1069_v31 = vmul.f32 %v2042_v61, %v1025_v45  ;;  %v1101_v36 = vmul.f32 %v2076_v8, %v1065_v14  ;;  %v1133_v49 = vadd.f32 %v2106_v33, %v1097_v58  ;;  %1189 = vst.msk [vmem:[%s2143_s16 + $0x40] sm:$0xff] %vm728_vm1, %v1157_v42 }
 0x28f   : > { %v1161_v9 = vmax.f32 %v1129_v56, 0.0  ;;  %v1070_v18 = vmul.f32 %v2042_v61, %v1026_v20  ;;  %v1102_v55 = vmul.f32 %v2076_v8, %v1066_v32  ;;  %v1134_v26 = vadd.f32 %v2106_v33, %v1098_v48  ;;  %1190 = vst.msk [vmem:[%s2143_s16 + $0x48] sm:$0xff] %vm728_vm1, %v1158_v3 }
 0x290   : > { %v1162_v15 = vmax.f32 %v1130_v16, 0.0  ;;  %v1071_v45 = vmul.f32 %v2042_v61, %v1027_v13  ;;  %v1103_v47 = vmul.f32 %v2076_v8, %v1067_v28  ;;  %v1135_v5 = vadd.f32 %v2106_v33, %v1099_v2  ;;  %1191 = vst.msk [vmem:[%s2143_s16 + $0x50] sm:$0xff] %vm728_vm1, %v1159_v12 }
 0x291   : > { %v1163_v52 = vmax.f32 %v1131_v62, 0.0  ;;  %v1072_v20 = vmul.f32 %v2042_v61, %v1028_v6  ;;  %v1104_v40 = vmul.f32 %v2076_v8, %v1068_v11  ;;  %v1136_v51 = vadd.f32 %v2106_v33, %v1100_v1  ;;  %1192 = vst.msk [vmem:[%s2143_s16 + $0x58] sm:$0xff] %vm728_vm1, %v1160_v22 }
 0x292   : > { %v1164_v4 = vmax.f32 %v1132_v35, 0.0  ;;  %v1073_v13 = vmul.f32 %v2042_v61, %v1029_v17  ;;  %v1105_v0 = vmul.f32 %v2076_v8, %v1069_v31  ;;  %v1137_v24 = vadd.f32 %v2106_v33, %v1101_v36  ;;  %1193 = vst.msk [vmem:[%s2143_s16 + $0x60] sm:$0xff] %vm728_vm1, %v1161_v9 }
 0x293   : > { %v1165_v39 = vmax.f32 %v1133_v49, 0.0  ;;  %v1074_v6 = vmul.f32 %v2042_v61, %v1030_v25  ;;  %v1106_v59 = vmul.f32 %v2076_v8, %v1070_v18  ;;  %v1138_v44 = vadd.f32 %v2106_v33, %v1102_v55  ;;  %1194 = vst.msk [vmem:[%s2143_s16 + $0x68] sm:$0xff] %vm728_vm1, %v1162_v15 }
 0x294   : > { %v1166_v41 = vmax.f32 %v1134_v26, 0.0  ;;  %v1075_v17 = vmul.f32 %v2042_v61, %v1031_v37  ;;  %v1107_v43 = vmul.f32 %v2076_v8, %v1071_v45  ;;  %v1139_v63 = vadd.f32 %v2106_v33, %v1103_v47  ;;  %1195 = vst.msk [vmem:[%s2143_s16 + $0x70] sm:$0xff] %vm728_vm1, %v1163_v52 }
 0x295   : > { %v1167_v10 = vmax.f32 %v1135_v5, 0.0  ;;  %v1076_v25 = vmul.f32 %v2042_v61, %v1032_v46  ;;  %v1108_v30 = vmul.f32 %v2076_v8, %v1072_v20  ;;  %v1140_v27 = vadd.f32 %v2106_v33, %v1104_v40  ;;  %1196 = vst.msk [vmem:[%s2143_s16 + $0x78] sm:$0xff] %vm728_vm1, %v1164_v4 }
 0x296   : > { %v1168_v19 = vmax.f32 %v1136_v51, 0.0  ;;  %v1109_v37 = vmul.f32 %v2076_v8, %v1073_v13  ;;  %v1141_v57 = vadd.f32 %v2106_v33, %v1105_v0  ;;  %v1169_v34 = vmax.f32 %v1137_v24, 0.0  ;;  %1197 = vst.msk [vmem:[%s2143_s16 + $0x80] sm:$0xff] %vm728_vm1, %v1165_v39 }
 0x297   : > { %v1110_v21 = vmul.f32 %v2076_v8, %v1074_v6  ;;  %v1142_v38 = vadd.f32 %v2106_v33, %v1106_v59  ;;  %v1170_v61 = vmax.f32 %v1138_v44, 0.0  ;;  %1198 = vst.msk [vmem:[%s2143_s16 + $0x88] sm:$0xff] %vm728_vm1, %v1166_v41  ;;  %v1111_v46 = vmul.f32 %v2076_v8, %v1075_v17 }
 0x298   : > { %v1143_v7 = vadd.f32 %v2106_v33, %v1107_v43  ;;  %v1171_v23 = vmax.f32 %v1139_v63, 0.0  ;;  %1199 = vst.msk [vmem:[%s2143_s16 + $0x90] sm:$0xff] %vm728_vm1, %v1167_v10  ;;  %v1112_v29 = vmul.f32 %v2076_v8, %v1076_v25  ;;  %v1144_v60 = vadd.f32 %v2106_v33, %v1108_v30 }
 0x299   : > { %v1172_v50 = vmax.f32 %v1140_v27, 0.0  ;;  %1200 = vst.msk [vmem:[%s2143_s16 + $0x98] sm:$0xff] %vm728_vm1, %v1168_v19  ;;  %v1145_v54 = vadd.f32 %v2106_v33, %v1109_v37  ;;  %v1173_v53 = vmax.f32 %v1141_v57, 0.0  ;;  %v1146_v14 = vadd.f32 %v2106_v33, %v1110_v21 }
 0x29a   : > { %1201 = vst.msk [vmem:[%s2143_s16 + $0xa0] sm:$0xff] %vm728_vm1, %v1169_v34  ;;  %v1174_v58 = vmax.f32 %v1142_v38, 0.0  ;;  %v1147_v8 = vadd.f32 %v2106_v33, %v1111_v46  ;;  %v1175_v56 = vmax.f32 %v1143_v7, 0.0  ;;  %v1148_v42 = vadd.f32 %v2106_v33, %v1112_v29 }
 0x29b   : > { %1202 = vst.msk [vmem:[%s2143_s16 + $0xa8] sm:$0xff] %vm728_vm1, %v1170_v61  ;;  %v1176_v32 = vmax.f32 %v1144_v60, 0.0  ;;  %v1177_v48 = vmax.f32 %v1145_v54, 0.0  ;;  %v1178_v16 = vmax.f32 %v1146_v14, 0.0 }
 0x29c   : > { %1203 = vst.msk [vmem:[%s2143_s16 + $0xb0] sm:$0xff] %vm728_vm1, %v1171_v23  ;;  %v1179_v3 = vmax.f32 %v1147_v8, 0.0  ;;  %v1180_v28 = vmax.f32 %v1148_v42, 0.0 }
 0x29d   : > { %1204 = vst.msk [vmem:[%s2143_s16 + $0xb8] sm:$0xff] %vm728_vm1, %v1172_v50 }
 0x29e   : > { %1205 = vst.msk [vmem:[%s2143_s16 + $0xc0] sm:$0xff] %vm728_vm1, %v1173_v53 }
 0x29f   : > { %1206 = vst.msk [vmem:[%s2143_s16 + $0xc8] sm:$0xff] %vm728_vm1, %v1174_v58 }
 0x2a0   : > { %1207 = vst.msk [vmem:[%s2143_s16 + $0xd0] sm:$0xff] %vm728_vm1, %v1175_v56 }
 0x2a1   : > { %1208 = vst.msk [vmem:[%s2143_s16 + $0xd8] sm:$0xff] %vm728_vm1, %v1176_v32 }
 0x2a2   : > { %1209 = vst.msk [vmem:[%s2143_s16 + $0xe0] sm:$0xff] %vm728_vm1, %v1177_v48 }
 0x2a3   : > { %1210 = vst.msk [vmem:[%s2143_s16 + $0xe8] sm:$0xff] %vm728_vm1, %v1178_v16 }
 0x2a4   : > { %1211 = vst.msk [vmem:[%s2143_s16 + $0xf0] sm:$0xff] %vm728_vm1, %v1179_v3 }
 0x2a5   : > { %1212 = vst.msk [vmem:[%s2143_s16 + $0xf8] sm:$0xff] %vm728_vm1, %v1180_v28 }
 0x2a6 PF: > { %s16_s21 = sadd.s32 1, %s1533_s21  }
 0x2a7   : > { %p13_p4 = scmp.ge.s32.totalorder %s16_s21, 4  }
 0x2a9   :  { %15 = sbr.rel (!%p13_p4) target bundleno = 1 (0x1), region = 74 }

// kernel: generator_forward.9
= control target key start
LH: loop header
LB: loop body
LE: loop exit
PB: predicated region body
PF: predicated region fallthrough
CT: control target
= control target key end

     0   :  { %s2186_s9 = smov 0   ;;  %s2610_s0 = inlined_call_operand.vmem [shape: bf16[2,1024,72], index: 0, kind: input, shape index: {}]   ;;  %s2611_s1 = inlined_call_operand.vmem [shape: bf16[72,12], index: 1, kind: input, shape index: {}]   ;;  %s2612_s2 = inlined_call_operand.vmem [shape: f32[2,1024,12], index: 2, kind: output, shape index: {}]  }
   0x1 LB: > { %s1467_s10 = sadd.s32 4294967295, %s2169_s9   ;;  %p1471_p0 = scmp.ge.s32.totalorder %s2169_s9, 1  ;;  %s2169_s9 = sphi %s2186_s9, %s12_s9  }
   0x2   : > { %p112_p1 = scmp.lt.s32.totalorder %s2169_s9, 3 }
   0x4   : > { %p113_p2 = pnand %p1471_p0, %p112_p1 }
   0x5   : > { %p134_p3 = scmp.lt.s32.totalorder (!%p113_p2), %s1467_s10, 1 }
   0x6   : > { %116 = sbr.rel (%p113_p2) target bundleno = 426 (0x1aa), region = 28 }
   0xb   : > { %v281_v0 = vld [vmem:[%s2611_s1 + $0x20] sm:$0xf]  ;;  %vm822_vm0 = vcmask 1043456   ;;  %v1883_v4 = vld [vmem:[%s2611_s1 + $0x18] sm:$0xff]  ;;  %v1882_v5 = vld [vmem:[%s2611_s1 + $0x10] sm:$0xff]  ;;  %s2614_s10 = smov (!%p134_p3, %s1467_s10), 1 }
   0xc   : > { %v619_v1 = vunpack.c.l.b16 %v281_v0  ;;  %v1881_v6 = vld [vmem:[%s2611_s1 + $0x8] sm:$0xff]  ;;  %s1814_s19 = sshll.u32 %s2614_s10, 9  ;;  %v1880_v7 = vld [vmem:[%s2611_s1] sm:$0xff]  ;;  %vm629_vm1 = vcmask 588800   ;;  %s1815_s25 = sshll.u32 %s2614_s10, 10  ;;  %vm1283_vm2 = vcmask 97280  }
   0xd   : > { %s2215_s24 = scalar_lea.vmem %s2610_s0, %s1814_s19  ;;  %s2293_s28 = scalar_lea.vmem %s2612_s2, %s1815_s25 }
   0xe   : > { %v624_v2 = vpack.c.b16 %v619_v1, %v619_v1  ;;  %v1816_v8 = vld [vmem:[%s2215_s24] sm:$0xff]  ;;  %v1817_v12 = vld [vmem:[%s2215_s24 + $0x8] sm:$0xff]  ;;  %v1818_v16 = vld [vmem:[%s2215_s24 + $0x10] sm:$0xff] }
   0xf   : > { %v1832_v9 = vld [vmem:[%s2215_s24 + $0x80] sm:$0xff]  ;;  %v1833_v13 = vld [vmem:[%s2215_s24 + $0x88] sm:$0xff]  ;;  %v1834_v17 = vld [vmem:[%s2215_s24 + $0x90] sm:$0xff] }
  0x10   : > { %v824_v3 = vsel %vm822_vm0, %v624_v2, 0  ;;  %v1848_v10 = vld [vmem:[%s2215_s24 + $0x100] sm:$0xff]  ;;  %v1849_v14 = vld [vmem:[%s2215_s24 + $0x108] sm:$0xff]  ;;  %v1850_v18 = vld [vmem:[%s2215_s24 + $0x110] sm:$0xff] }
  0x11   : > { %829 = vmatpush.bf16.msra.mxu0 %v824_v3  ;;  %1884 = vmatpush.bf16.msra.mxu1 %v824_v3  ;;  %v1864_v11 = vld [vmem:[%s2215_s24 + $0x180] sm:$0xff]  ;;  %v1865_v15 = vld [vmem:[%s2215_s24 + $0x188] sm:$0xff]  ;;  %v1866_v19 = vld [vmem:[%s2215_s24 + $0x190] sm:$0xff] }
  0x12   : > { %1885 = vmatpush.bf16.msra.mxu2 %v824_v3  ;;  %1886 = vmatpush.bf16.msra.mxu3 %v824_v3  ;;  %v1819_v20 = vld [vmem:[%s2215_s24 + $0x18] sm:$0xff]  ;;  %v1820_v24 = vld [vmem:[%s2215_s24 + $0x20] sm:$0xff]  ;;  %v1821_v28 = vld [vmem:[%s2215_s24 + $0x28] sm:$0xff] }
  0x13   : > { %v1835_v21 = vld [vmem:[%s2215_s24 + $0x98] sm:$0xff]  ;;  %v1836_v25 = vld [vmem:[%s2215_s24 + $0xa0] sm:$0xff]  ;;  %v1837_v29 = vld [vmem:[%s2215_s24 + $0xa8] sm:$0xff] }
  0x14   : > { %v1851_v22 = vld [vmem:[%s2215_s24 + $0x118] sm:$0xff]  ;;  %v1852_v26 = vld [vmem:[%s2215_s24 + $0x120] sm:$0xff]  ;;  %v1853_v30 = vld [vmem:[%s2215_s24 + $0x128] sm:$0xff] }
  0x15   : > { %830 = vmatpush.bf16.msra.mxu0 %v1883_v4  ;;  %1887 = vmatpush.bf16.msra.mxu1 %v1883_v4  ;;  %v1867_v23 = vld [vmem:[%s2215_s24 + $0x198] sm:$0xff]  ;;  %v1868_v27 = vld [vmem:[%s2215_s24 + $0x1a0] sm:$0xff]  ;;  %v1869_v31 = vld [vmem:[%s2215_s24 + $0x1a8] sm:$0xff] }
  0x16   : > { %1888 = vmatpush.bf16.msra.mxu2 %v1883_v4  ;;  %1889 = vmatpush.bf16.msra.mxu3 %v1883_v4  ;;  %v1822_v32 = vld [vmem:[%s2215_s24 + $0x30] sm:$0xff]  ;;  %v1823_v36 = vld [vmem:[%s2215_s24 + $0x38] sm:$0xff]  ;;  %v1824_v40 = vld [vmem:[%s2215_s24 + $0x40] sm:$0xff] }
  0x17   : > { %v1838_v33 = vld [vmem:[%s2215_s24 + $0xb0] sm:$0xff]  ;;  %v1839_v37 = vld [vmem:[%s2215_s24 + $0xb8] sm:$0xff]  ;;  %v1840_v41 = vld [vmem:[%s2215_s24 + $0xc0] sm:$0xff] }
  0x18   : > { %v1854_v34 = vld [vmem:[%s2215_s24 + $0x130] sm:$0xff]  ;;  %v1855_v38 = vld [vmem:[%s2215_s24 + $0x138] sm:$0xff]  ;;  %v1856_v44 = vld [vmem:[%s2215_s24 + $0x140] sm:$0xff] }
  0x19   : > { %831 = vmatpush.bf16.msra.mxu0 %v1882_v5  ;;  %1890 = vmatpush.bf16.msra.mxu1 %v1882_v5  ;;  %v1870_v35 = vld [vmem:[%s2215_s24 + $0x1b0] sm:$0xff]  ;;  %v1871_v39 = vld [vmem:[%s2215_s24 + $0x1b8] sm:$0xff]  ;;  %v1872_v45 = vld [vmem:[%s2215_s24 + $0x1c0] sm:$0xff] }
  0x1a   : > { %1891 = vmatpush.bf16.msra.mxu2 %v1882_v5  ;;  %1892 = vmatpush.bf16.msra.mxu3 %v1882_v5  ;;  %v1825_v56 = vld [vmem:[%s2215_s24 + $0x48] sm:$0xff] }
  0x1b   : > { %v1841_v57 = vld [vmem:[%s2215_s24 + $0xc8] sm:$0xff] }
  0x1c   : > { %v1857_v61 = vld [vmem:[%s2215_s24 + $0x148] sm:$0xff] }
  0x1d   : > { %832 = vmatpush.bf16.msra.mxu0 %v1881_v6  ;;  %1893 = vmatpush.bf16.msra.mxu1 %v1881_v6  ;;  %v1873_v62 = vld [vmem:[%s2215_s24 + $0x1c8] sm:$0xff] }
  0x1e   : > { %1894 = vmatpush.bf16.msra.mxu2 %v1881_v6  ;;  %1895 = vmatpush.bf16.msra.mxu3 %v1881_v6 }
  0x21   : > { %833 = vmatpush.bf16.msra.mxu0 %v1880_v7  ;;  %1896 = vmatpush.bf16.msra.mxu1 %v1880_v7 }
  0x22   : > { %1897 = vmatpush.bf16.msra.mxu2 %v1880_v7  ;;  %1898 = vmatpush.bf16.msra.mxu3 %v1880_v7 }
  0x24   : > { %1748 = vmatmul.msk.bf16.vlgmr.msra.gmra.mxu0 %vm629_vm1, %v1816_v8  ;;  %1764 = vmatmul.msk.bf16.vlgmr.msra.gmra.mxu1 %vm629_vm1, %v1832_v9 }
  0x25   : > { %1780 = vmatmul.msk.bf16.vlgmr.msra.gmra.mxu2 %vm629_vm1, %v1848_v10  ;;  %1796 = vmatmul.msk.bf16.vlgmr.msra.gmra.mxu3 %vm629_vm1, %v1864_v11 }
  0x34   : > { %1749 = vmatmul.msk.bf16.gmra.mxu0 %vm629_vm1, %v1817_v12  ;;  %1765 = vmatmul.msk.bf16.gmra.mxu1 %vm629_vm1, %v1833_v13  ;;  %v1826_v12 = vld [vmem:[%s2215_s24 + $0x50] sm:$0xff] }
  0x35   : > { %1781 = vmatmul.msk.bf16.gmra.mxu2 %vm629_vm1, %v1849_v14  ;;  %1797 = vmatmul.msk.bf16.gmra.mxu3 %vm629_vm1, %v1865_v15  ;;  %v1842_v13 = vld [vmem:[%s2215_s24 + $0xd0] sm:$0xff] }
  0x44   : > { %1750 = vmatmul.msk.bf16.gmra.mxu0 %vm629_vm1, %v1818_v16  ;;  %1766 = vmatmul.msk.bf16.gmra.mxu1 %vm629_vm1, %v1834_v17  ;;  %v1858_v17 = vld [vmem:[%s2215_s24 + $0x150] sm:$0xff] }
  0x45   : > { %1782 = vmatmul.msk.bf16.gmra.mxu2 %vm629_vm1, %v1850_v18  ;;  %1798 = vmatmul.msk.bf16.gmra.mxu3 %vm629_vm1, %v1866_v19  ;;  %v1874_v18 = vld [vmem:[%s2215_s24 + $0x1d0] sm:$0xff] }
  0x54   : > { %1751 = vmatmul.msk.bf16.gmra.mxu0 %vm629_vm1, %v1819_v20  ;;  %1767 = vmatmul.msk.bf16.gmra.mxu1 %vm629_vm1, %v1835_v21 }
  0x55   : > { %1783 = vmatmul.msk.bf16.gmra.mxu2 %vm629_vm1, %v1851_v22  ;;  %1799 = vmatmul.msk.bf16.gmra.mxu3 %vm629_vm1, %v1867_v23 }
  0x64   : > { %1752 = vmatmul.msk.bf16.gmra.mxu0 %vm629_vm1, %v1820_v24  ;;  %1768 = vmatmul.msk.bf16.gmra.mxu1 %vm629_vm1, %v1836_v25 }
  0x65   : > { %1784 = vmatmul.msk.bf16.gmra.mxu2 %vm629_vm1, %v1852_v26  ;;  %1800 = vmatmul.msk.bf16.gmra.mxu3 %vm629_vm1, %v1868_v27 }
  0x74   : > { %1753 = vmatmul.msk.bf16.gmra.mxu0 %vm629_vm1, %v1821_v28  ;;  %1769 = vmatmul.msk.bf16.gmra.mxu1 %vm629_vm1, %v1837_v29 }
  0x75   : > { %1785 = vmatmul.msk.bf16.gmra.mxu2 %vm629_vm1, %v1853_v30  ;;  %1801 = vmatmul.msk.bf16.gmra.mxu3 %vm629_vm1, %v1869_v31 }
  0x84   : > { %1754 = vmatmul.msk.bf16.gmra.mxu0 %vm629_vm1, %v1822_v32  ;;  %1770 = vmatmul.msk.bf16.gmra.mxu1 %vm629_vm1, %v1838_v33  ;;  %v1827_v32 = vld [vmem:[%s2215_s24 + $0x58] sm:$0xff] }
  0x85   : > { %1786 = vmatmul.msk.bf16.gmra.mxu2 %vm629_vm1, %v1854_v34  ;;  %1802 = vmatmul.msk.bf16.gmra.mxu3 %vm629_vm1, %v1870_v35  ;;  %v1843_v33 = vld [vmem:[%s2215_s24 + $0xd8] sm:$0xff] }
  0x94   : > { %1755 = vmatmul.msk.bf16.gmra.mxu0 %vm629_vm1, %v1823_v36  ;;  %1771 = vmatmul.msk.bf16.gmra.mxu1 %vm629_vm1, %v1839_v37  ;;  %v1859_v37 = vld [vmem:[%s2215_s24 + $0x158] sm:$0xff] }
  0x95   : > { %1787 = vmatmul.msk.bf16.gmra.mxu2 %vm629_vm1, %v1855_v38  ;;  %1803 = vmatmul.msk.bf16.gmra.mxu3 %vm629_vm1, %v1871_v39  ;;  %v1875_v38 = vld [vmem:[%s2215_s24 + $0x1d8] sm:$0xff] }
  0xa1   : > { %v835_v42 = vpop.f32.mrf.mxu0  ;;  %v915_v43 = vpop.f32.mrf.mxu1 }
  0xa2   : > { %1907 = vtanh.f32 %v835_v42 }
  0xa3   : > { %1909 = vtanh.f32 %v915_v43 }
  0xa4   : > { %1756 = vmatmul.msk.bf16.gmra.mxu0 %vm629_vm1, %v1824_v40  ;;  %1772 = vmatmul.msk.bf16.gmra.mxu1 %vm629_vm1, %v1840_v41 }
  0xa5   : > { %1788 = vmatmul.msk.bf16.gmra.mxu2 %vm629_vm1, %v1856_v44  ;;  %1804 = vmatmul.msk.bf16.gmra.mxu3 %vm629_vm1, %v1872_v45 }
  0xa8   : > { %v1908_v46 = vpop.eup %1907  ;;  %v995_v47 = vpop.f32.mrf.mxu2 }
  0xa9   : > { %v1075_v48 = vpop.f32.mrf.mxu3  ;;  %v1910_v49 = vpop.eup %1909  ;;  %1284 = vst.msk [vmem:[%s2293_s28] sm:$0xff] %vm1283_vm2, %v1908_v46  ;;  %1911 = vtanh.f32 %v995_v47 }
  0xaa   : > { %v837_v50 = vpop.f32.mrf.mxu0  ;;  %v917_v51 = vpop.f32.mrf.mxu1  ;;  %1316 = vst.msk [vmem:[%s2293_s28 + $0x100] sm:$0xff] %vm1283_vm2, %v1910_v49  ;;  %1913 = vtanh.f32 %v1075_v48 }
  0xab   : > { %1915 = vtanh.f32 %v837_v50 }
  0xac   : > { %1917 = vtanh.f32 %v917_v51 }
  0xaf   : > { %v1912_v52 = vpop.eup %1911 }
  0xb0   : > { %v1914_v53 = vpop.eup %1913  ;;  %1348 = vst.msk [vmem:[%s2293_s28 + $0x200] sm:$0xff] %vm1283_vm2, %v1912_v52  ;;  %v997_v54 = vpop.f32.mrf.mxu2  ;;  %v1828_v52 = vld [vmem:[%s2215_s24 + $0x60] sm:$0xff] }
  0xb1   : > { %v1077_v55 = vpop.f32.mrf.mxu3  ;;  %v1916_v58 = vpop.eup %1915  ;;  %1380 = vst.msk [vmem:[%s2293_s28 + $0x300] sm:$0xff] %vm1283_vm2, %v1914_v53  ;;  %1919 = vtanh.f32 %v997_v54  ;;  %v1844_v53 = vld [vmem:[%s2215_s24 + $0xe0] sm:$0xff] }
  0xb2   : > { %v840_v59 = vpop.f32.mrf.mxu0  ;;  %v920_v60 = vpop.f32.mrf.mxu1  ;;  %1285 = vst.msk [vmem:[%s2293_s28 + $0x8] sm:$0xff] %vm1283_vm2, %v1916_v58  ;;  %1921 = vtanh.f32 %v1077_v55  ;;  %v1876_v58 = vld [vmem:[%s2215_s24 + $0x1e0] sm:$0xff] }
  0xb3   : > { %v1918_v63 = vpop.eup %1917  ;;  %1923 = vtanh.f32 %v840_v59 }
  0xb4   : > { %1317 = vst.msk [vmem:[%s2293_s28 + $0x108] sm:$0xff] %vm1283_vm2, %v1918_v63  ;;  %1925 = vtanh.f32 %v920_v60  ;;  %1757 = vmatmul.msk.bf16.gmra.mxu0 %vm629_vm1, %v1825_v56  ;;  %1773 = vmatmul.msk.bf16.gmra.mxu1 %vm629_vm1, %v1841_v57  ;;  %v1860_v57 = vld [vmem:[%s2215_s24 + $0x160] sm:$0xff] }
  0xb5   : > { %1789 = vmatmul.msk.bf16.gmra.mxu2 %vm629_vm1, %v1857_v61  ;;  %1805 = vmatmul.msk.bf16.gmra.mxu3 %vm629_vm1, %v1873_v62 }
  0xb7   : > { %v1920_v0 = vpop.eup %1919 }
  0xb8   : > { %v1922_v1 = vpop.eup %1921  ;;  %1349 = vst.msk [vmem:[%s2293_s28 + $0x208] sm:$0xff] %vm1283_vm2, %v1920_v0  ;;  %v1000_v2 = vpop.f32.mrf.mxu2 }
  0xb9   : > { %v1080_v3 = vpop.f32.mrf.mxu3  ;;  %v1924_v4 = vpop.eup %1923  ;;  %1381 = vst.msk [vmem:[%s2293_s28 + $0x308] sm:$0xff] %vm1283_vm2, %v1922_v1  ;;  %1927 = vtanh.f32 %v1000_v2 }
  0xba   : > { %v842_v5 = vpop.f32.mrf.mxu0  ;;  %v922_v6 = vpop.f32.mrf.mxu1  ;;  %1286 = vst.msk [vmem:[%s2293_s28 + $0x10] sm:$0xff] %vm1283_vm2, %v1924_v4  ;;  %1929 = vtanh.f32 %v1080_v3 }
  0xbb   : > { %v1926_v7 = vpop.eup %1925  ;;  %1931 = vtanh.f32 %v842_v5 }
  0xbc   : > { %1318 = vst.msk [vmem:[%s2293_s28 + $0x110] sm:$0xff] %vm1283_vm2, %v1926_v7  ;;  %1933 = vtanh.f32 %v922_v6 }
  0xbf   : > { %v1928_v8 = vpop.eup %1927 }
  0xc0   : > { %v1930_v9 = vpop.eup %1929  ;;  %1350 = vst.msk [vmem:[%s2293_s28 + $0x210] sm:$0xff] %vm1283_vm2, %v1928_v8  ;;  %v1002_v10 = vpop.f32.mrf.mxu2  ;;  %v1829_v8 = vld [vmem:[%s2215_s24 + $0x68] sm:$0xff] }
  0xc1   : > { %v1082_v11 = vpop.f32.mrf.mxu3  ;;  %v1932_v14 = vpop.eup %1931  ;;  %1382 = vst.msk [vmem:[%s2293_s28 + $0x310] sm:$0xff] %vm1283_vm2, %v1930_v9  ;;  %1935 = vtanh.f32 %v1002_v10  ;;  %v1845_v9 = vld [vmem:[%s2215_s24 + $0xe8] sm:$0xff] }
  0xc2   : > { %v845_v15 = vpop.f32.mrf.mxu0  ;;  %v925_v16 = vpop.f32.mrf.mxu1  ;;  %1287 = vst.msk [vmem:[%s2293_s28 + $0x18] sm:$0xff] %vm1283_vm2, %v1932_v14  ;;  %1937 = vtanh.f32 %v1082_v11  ;;  %v1877_v14 = vld [vmem:[%s2215_s24 + $0x1e8] sm:$0xff] }
  0xc3   : > { %v1934_v19 = vpop.eup %1933  ;;  %1939 = vtanh.f32 %v845_v15 }
  0xc4   : > { %1319 = vst.msk [vmem:[%s2293_s28 + $0x118] sm:$0xff] %vm1283_vm2, %v1934_v19  ;;  %1941 = vtanh.f32 %v925_v16  ;;  %1758 = vmatmul.msk.bf16.gmra.mxu0 %vm629_vm1, %v1826_v12  ;;  %1774 = vmatmul.msk.bf16.gmra.mxu1 %vm629_vm1, %v1842_v13  ;;  %v1861_v13 = vld [vmem:[%s2215_s24 + $0x168] sm:$0xff] }
  0xc5   : > { %1790 = vmatmul.msk.bf16.gmra.mxu2 %vm629_vm1, %v1858_v17  ;;  %1806 = vmatmul.msk.bf16.gmra.mxu3 %vm629_vm1, %v1874_v18 }
  0xc7   : > { %v1936_v20 = vpop.eup %1935 }
  0xc8   : > { %v1938_v21 = vpop.eup %1937  ;;  %1351 = vst.msk [vmem:[%s2293_s28 + $0x218] sm:$0xff] %vm1283_vm2, %v1936_v20  ;;  %v1005_v22 = vpop.f32.mrf.mxu2 }
  0xc9   : > { %v1085_v23 = vpop.f32.mrf.mxu3  ;;  %v1940_v24 = vpop.eup %1939  ;;  %1383 = vst.msk [vmem:[%s2293_s28 + $0x318] sm:$0xff] %vm1283_vm2, %v1938_v21  ;;  %1943 = vtanh.f32 %v1005_v22 }
  0xca   : > { %v847_v25 = vpop.f32.mrf.mxu0  ;;  %v927_v26 = vpop.f32.mrf.mxu1  ;;  %1288 = vst.msk [vmem:[%s2293_s28 + $0x20] sm:$0xff] %vm1283_vm2, %v1940_v24  ;;  %1945 = vtanh.f32 %v1085_v23 }
  0xcb   : > { %v1942_v27 = vpop.eup %1941  ;;  %1947 = vtanh.f32 %v847_v25 }
  0xcc   : > { %1320 = vst.msk [vmem:[%s2293_s28 + $0x120] sm:$0xff] %vm1283_vm2, %v1942_v27  ;;  %1949 = vtanh.f32 %v927_v26 }
  0xcf   : > { %v1944_v28 = vpop.eup %1943 }
  0xd0   : > { %v1946_v29 = vpop.eup %1945  ;;  %1352 = vst.msk [vmem:[%s2293_s28 + $0x220] sm:$0xff] %vm1283_vm2, %v1944_v28  ;;  %v1007_v30 = vpop.f32.mrf.mxu2  ;;  %v1830_v28 = vld [vmem:[%s2215_s24 + $0x70] sm:$0xff] }
  0xd1   : > { %v1087_v31 = vpop.f32.mrf.mxu3  ;;  %v1948_v34 = vpop.eup %1947  ;;  %1384 = vst.msk [vmem:[%s2293_s28 + $0x320] sm:$0xff] %vm1283_vm2, %v1946_v29  ;;  %1951 = vtanh.f32 %v1007_v30  ;;  %v1846_v29 = vld [vmem:[%s2215_s24 + $0xf0] sm:$0xff] }
  0xd2   : > { %v850_v35 = vpop.f32.mrf.mxu0  ;;  %v930_v36 = vpop.f32.mrf.mxu1  ;;  %1289 = vst.msk [vmem:[%s2293_s28 + $0x28] sm:$0xff] %vm1283_vm2, %v1948_v34  ;;  %1953 = vtanh.f32 %v1087_v31  ;;  %v1878_v34 = vld [vmem:[%s2215_s24 + $0x1f0] sm:$0xff] }
  0xd3   : > { %v1950_v39 = vpop.eup %1949  ;;  %1955 = vtanh.f32 %v850_v35 }
  0xd4   : > { %1321 = vst.msk [vmem:[%s2293_s28 + $0x128] sm:$0xff] %vm1283_vm2, %v1950_v39  ;;  %1957 = vtanh.f32 %v930_v36  ;;  %1759 = vmatmul.msk.bf16.gmra.mxu0 %vm629_vm1, %v1827_v32  ;;  %1775 = vmatmul.msk.bf16.gmra.mxu1 %vm629_vm1, %v1843_v33  ;;  %v1862_v33 = vld [vmem:[%s2215_s24 + $0x170] sm:$0xff] }
  0xd5   : > { %1791 = vmatmul.msk.bf16.gmra.mxu2 %vm629_vm1, %v1859_v37  ;;  %1807 = vmatmul.msk.bf16.gmra.mxu3 %vm629_vm1, %v1875_v38 }
  0xd7   : > { %v1952_v40 = vpop.eup %1951 }
  0xd8   : > { %v1954_v41 = vpop.eup %1953  ;;  %1353 = vst.msk [vmem:[%s2293_s28 + $0x228] sm:$0xff] %vm1283_vm2, %v1952_v40  ;;  %v1010_v42 = vpop.f32.mrf.mxu2 }
  0xd9   : > { %v1090_v43 = vpop.f32.mrf.mxu3  ;;  %v1956_v44 = vpop.eup %1955  ;;  %1385 = vst.msk [vmem:[%s2293_s28 + $0x328] sm:$0xff] %vm1283_vm2, %v1954_v41  ;;  %1959 = vtanh.f32 %v1010_v42 }
  0xda   : > { %v852_v45 = vpop.f32.mrf.mxu0  ;;  %v932_v46 = vpop.f32.mrf.mxu1  ;;  %1290 = vst.msk [vmem:[%s2293_s28 + $0x30] sm:$0xff] %vm1283_vm2, %v1956_v44  ;;  %1961 = vtanh.f32 %v1090_v43 }
  0xdb   : > { %v1958_v47 = vpop.eup %1957  ;;  %1963 = vtanh.f32 %v852_v45 }
  0xdc   : > { %1322 = vst.msk [vmem:[%s2293_s28 + $0x130] sm:$0xff] %vm1283_vm2, %v1958_v47  ;;  %1965 = vtanh.f32 %v932_v46 }
  0xdf   : > { %v1960_v48 = vpop.eup %1959 }
  0xe0   : > { %v1962_v49 = vpop.eup %1961  ;;  %1354 = vst.msk [vmem:[%s2293_s28 + $0x230] sm:$0xff] %vm1283_vm2, %v1960_v48  ;;  %v1012_v50 = vpop.f32.mrf.mxu2  ;;  %v1831_v48 = vld [vmem:[%s2215_s24 + $0x78] sm:$0xff] }
  0xe1   : > { %v1092_v51 = vpop.f32.mrf.mxu3  ;;  %v1964_v54 = vpop.eup %1963  ;;  %1386 = vst.msk [vmem:[%s2293_s28 + $0x330] sm:$0xff] %vm1283_vm2, %v1962_v49  ;;  %1967 = vtanh.f32 %v1012_v50  ;;  %v1847_v49 = vld [vmem:[%s2215_s24 + $0xf8] sm:$0xff] }
  0xe2   : > { %v855_v55 = vpop.f32.mrf.mxu0  ;;  %v935_v56 = vpop.f32.mrf.mxu1  ;;  %1291 = vst.msk [vmem:[%s2293_s28 + $0x38] sm:$0xff] %vm1283_vm2, %v1964_v54  ;;  %1969 = vtanh.f32 %v1092_v51  ;;  %v1879_v54 = vld [vmem:[%s2215_s24 + $0x1f8] sm:$0xff] }
  0xe3   : > { %v1966_v59 = vpop.eup %1965  ;;  %1971 = vtanh.f32 %v855_v55 }
  0xe4   : > { %1323 = vst.msk [vmem:[%s2293_s28 + $0x138] sm:$0xff] %vm1283_vm2, %v1966_v59  ;;  %1973 = vtanh.f32 %v935_v56  ;;  %1760 = vmatmul.msk.bf16.gmra.mxu0 %vm629_vm1, %v1828_v52  ;;  %1776 = vmatmul.msk.bf16.gmra.mxu1 %vm629_vm1, %v1844_v53  ;;  %v1863_v53 = vld [vmem:[%s2215_s24 + $0x178] sm:$0xff] }
  0xe5   : > { %1792 = vmatmul.msk.bf16.gmra.mxu2 %vm629_vm1, %v1860_v57  ;;  %1808 = vmatmul.msk.bf16.gmra.mxu3 %vm629_vm1, %v1876_v58 }
  0xe7   : > { %v1968_v60 = vpop.eup %1967 }
  0xe8   : > { %v1970_v61 = vpop.eup %1969  ;;  %1355 = vst.msk [vmem:[%s2293_s28 + $0x238] sm:$0xff] %vm1283_vm2, %v1968_v60  ;;  %v1015_v62 = vpop.f32.mrf.mxu2 }
  0xe9   : > { %v1095_v63 = vpop.f32.mrf.mxu3  ;;  %v1972_v0 = vpop.eup %1971  ;;  %1387 = vst.msk [vmem:[%s2293_s28 + $0x338] sm:$0xff] %vm1283_vm2, %v1970_v61  ;;  %1975 = vtanh.f32 %v1015_v62 }
  0xea   : > { %v857_v1 = vpop.f32.mrf.mxu0  ;;  %v937_v2 = vpop.f32.mrf.mxu1  ;;  %1292 = vst.msk [vmem:[%s2293_s28 + $0x40] sm:$0xff] %vm1283_vm2, %v1972_v0  ;;  %1977 = vtanh.f32 %v1095_v63 }
  0xeb   : > { %v1974_v3 = vpop.eup %1973  ;;  %1979 = vtanh.f32 %v857_v1 }
  0xec   : > { %1324 = vst.msk [vmem:[%s2293_s28 + $0x140] sm:$0xff] %vm1283_vm2, %v1974_v3  ;;  %1981 = vtanh.f32 %v937_v2 }
  0xef   : > { %v1976_v4 = vpop.eup %1975 }
  0xf0   : > { %v1978_v5 = vpop.eup %1977  ;;  %1356 = vst.msk [vmem:[%s2293_s28 + $0x240] sm:$0xff] %vm1283_vm2, %v1976_v4  ;;  %v1017_v6 = vpop.f32.mrf.mxu2 }
  0xf1   : > { %v1097_v7 = vpop.f32.mrf.mxu3  ;;  %v1980_v10 = vpop.eup %1979  ;;  %1388 = vst.msk [vmem:[%s2293_s28 + $0x340] sm:$0xff] %vm1283_vm2, %v1978_v5  ;;  %1983 = vtanh.f32 %v1017_v6 }
  0xf2   : > { %v860_v11 = vpop.f32.mrf.mxu0  ;;  %v940_v12 = vpop.f32.mrf.mxu1  ;;  %1293 = vst.msk [vmem:[%s2293_s28 + $0x48] sm:$0xff] %vm1283_vm2, %v1980_v10  ;;  %1985 = vtanh.f32 %v1097_v7 }
  0xf3   : > { %v1982_v15 = vpop.eup %1981  ;;  %1987 = vtanh.f32 %v860_v11 }
  0xf4   : > { %1325 = vst.msk [vmem:[%s2293_s28 + $0x148] sm:$0xff] %vm1283_vm2, %v1982_v15  ;;  %1989 = vtanh.f32 %v940_v12  ;;  %1761 = vmatmul.msk.bf16.gmra.mxu0 %vm629_vm1, %v1829_v8  ;;  %1777 = vmatmul.msk.bf16.gmra.mxu1 %vm629_vm1, %v1845_v9 }
  0xf5   : > { %1793 = vmatmul.msk.bf16.gmra.mxu2 %vm629_vm1, %v1861_v13  ;;  %1809 = vmatmul.msk.bf16.gmra.mxu3 %vm629_vm1, %v1877_v14 }
  0xf7   : > { %v1984_v16 = vpop.eup %1983 }
  0xf8   : > { %v1986_v17 = vpop.eup %1985  ;;  %1357 = vst.msk [vmem:[%s2293_s28 + $0x248] sm:$0xff] %vm1283_vm2, %v1984_v16  ;;  %v1020_v18 = vpop.f32.mrf.mxu2 }
  0xf9   : > { %v1100_v19 = vpop.f32.mrf.mxu3  ;;  %v1988_v20 = vpop.eup %1987  ;;  %1389 = vst.msk [vmem:[%s2293_s28 + $0x348] sm:$0xff] %vm1283_vm2, %v1986_v17  ;;  %1991 = vtanh.f32 %v1020_v18 }
  0xfa   : > { %v862_v21 = vpop.f32.mrf.mxu0  ;;  %v942_v22 = vpop.f32.mrf.mxu1  ;;  %1294 = vst.msk [vmem:[%s2293_s28 + $0x50] sm:$0xff] %vm1283_vm2, %v1988_v20  ;;  %1993 = vtanh.f32 %v1100_v19 }
  0xfb   : > { %v1990_v23 = vpop.eup %1989  ;;  %1995 = vtanh.f32 %v862_v21 }
  0xfc   : > { %1326 = vst.msk [vmem:[%s2293_s28 + $0x150] sm:$0xff] %vm1283_vm2, %v1990_v23  ;;  %1997 = vtanh.f32 %v942_v22 }
  0xff   : > { %v1992_v24 = vpop.eup %1991 }
 0x100   : > { %v1994_v25 = vpop.eup %1993  ;;  %1358 = vst.msk [vmem:[%s2293_s28 + $0x250] sm:$0xff] %vm1283_vm2, %v1992_v24  ;;  %v1022_v26 = vpop.f32.mrf.mxu2 }
 0x101   : > { %v1102_v27 = vpop.f32.mrf.mxu3  ;;  %v1996_v30 = vpop.eup %1995  ;;  %1390 = vst.msk [vmem:[%s2293_s28 + $0x350] sm:$0xff] %vm1283_vm2, %v1994_v25  ;;  %1999 = vtanh.f32 %v1022_v26 }
 0x102   : > { %v865_v31 = vpop.f32.mrf.mxu0  ;;  %v945_v32 = vpop.f32.mrf.mxu1  ;;  %1295 = vst.msk [vmem:[%s2293_s28 + $0x58] sm:$0xff] %vm1283_vm2, %v1996_v30  ;;  %2001 = vtanh.f32 %v1102_v27 }
 0x103   : > { %v1998_v35 = vpop.eup %1997  ;;  %2003 = vtanh.f32 %v865_v31 }
 0x104   : > { %1327 = vst.msk [vmem:[%s2293_s28 + $0x158] sm:$0xff] %vm1283_vm2, %v1998_v35  ;;  %2005 = vtanh.f32 %v945_v32  ;;  %1762 = vmatmul.msk.bf16.gmra.mxu0 %vm629_vm1, %v1830_v28  ;;  %1778 = vmatmul.msk.bf16.gmra.mxu1 %vm629_vm1, %v1846_v29 }
 0x105   : > { %1794 = vmatmul.msk.bf16.gmra.mxu2 %vm629_vm1, %v1862_v33  ;;  %1810 = vmatmul.msk.bf16.gmra.mxu3 %vm629_vm1, %v1878_v34 }
 0x107   : > { %v2000_v36 = vpop.eup %1999 }
 0x108   : > { %v2002_v37 = vpop.eup %2001  ;;  %1359 = vst.msk [vmem:[%s2293_s28 + $0x258] sm:$0xff] %vm1283_vm2, %v2000_v36  ;;  %v1025_v38 = vpop.f32.mrf.mxu2 }
 0x109   : > { %v1105_v39 = vpop.f32.mrf.mxu3  ;;  %v2004_v40 = vpop.eup %2003  ;;  %1391 = vst.msk [vmem:[%s2293_s28 + $0x358] sm:$0xff] %vm1283_vm2, %v2002_v37  ;;  %2007 = vtanh.f32 %v1025_v38 }
 0x10a   : > { %v867_v41 = vpop.f32.mrf.mxu0  ;;  %v947_v42 = vpop.f32.mrf.mxu1  ;;  %1296 = vst.msk [vmem:[%s2293_s28 + $0x60] sm:$0xff] %vm1283_vm2, %v2004_v40  ;;  %2009 = vtanh.f32 %v1105_v39 }
 0x10b   : > { %v2006_v43 = vpop.eup %2005  ;;  %2011 = vtanh.f32 %v867_v41 }
 0x10c   : > { %1328 = vst.msk [vmem:[%s2293_s28 + $0x160] sm:$0xff] %vm1283_vm2, %v2006_v43  ;;  %2013 = vtanh.f32 %v947_v42 }
 0x10f   : > { %v2008_v44 = vpop.eup %2007 }
 0x110   : > { %v2010_v45 = vpop.eup %2009  ;;  %1360 = vst.msk [vmem:[%s2293_s28 + $0x260] sm:$0xff] %vm1283_vm2, %v2008_v44  ;;  %v1027_v46 = vpop.f32.mrf.mxu2 }
 0x111   : > { %v1107_v47 = vpop.f32.mrf.mxu3  ;;  %v2012_v50 = vpop.eup %2011  ;;  %1392 = vst.msk [vmem:[%s2293_s28 + $0x360] sm:$0xff] %vm1283_vm2, %v2010_v45  ;;  %2015 = vtanh.f32 %v1027_v46 }
 0x112   : > { %v870_v51 = vpop.f32.mrf.mxu0  ;;  %v950_v52 = vpop.f32.mrf.mxu1  ;;  %1297 = vst.msk [vmem:[%s2293_s28 + $0x68] sm:$0xff] %vm1283_vm2, %v2012_v50  ;;  %2017 = vtanh.f32 %v1107_v47 }
 0x113   : > { %v2014_v55 = vpop.eup %2013  ;;  %2019 = vtanh.f32 %v870_v51 }
 0x114   : > { %1329 = vst.msk [vmem:[%s2293_s28 + $0x168] sm:$0xff] %vm1283_vm2, %v2014_v55  ;;  %2021 = vtanh.f32 %v950_v52  ;;  %1763 = vmatmul.msk.bf16.gmra.mxu0 %vm629_vm1, %v1831_v48  ;;  %1779 = vmatmul.msk.bf16.gmra.mxu1 %vm629_vm1, %v1847_v49 }
 0x115   : > { %1795 = vmatmul.msk.bf16.gmra.mxu2 %vm629_vm1, %v1863_v53  ;;  %1811 = vmatmul.msk.bf16.gmra.mxu3 %vm629_vm1, %v1879_v54 }
 0x117   : > { %v2016_v56 = vpop.eup %2015 }
 0x118   : > { %v2018_v57 = vpop.eup %2017  ;;  %1361 = vst.msk [vmem:[%s2293_s28 + $0x268] sm:$0xff] %vm1283_vm2, %v2016_v56  ;;  %v1030_v58 = vpop.f32.mrf.mxu2 }
 0x119   : > { %v1110_v59 = vpop.f32.mrf.mxu3  ;;  %v2020_v60 = vpop.eup %2019  ;;  %1393 = vst.msk [vmem:[%s2293_s28 + $0x368] sm:$0xff] %vm1283_vm2, %v2018_v57  ;;  %2023 = vtanh.f32 %v1030_v58 }
 0x11a   : > { %v872_v61 = vpop.f32.mrf.mxu0  ;;  %v952_v62 = vpop.f32.mrf.mxu1  ;;  %1298 = vst.msk [vmem:[%s2293_s28 + $0x70] sm:$0xff] %vm1283_vm2, %v2020_v60  ;;  %2025 = vtanh.f32 %v1110_v59 }
 0x11b   : > { %v2022_v63 = vpop.eup %2021  ;;  %2027 = vtanh.f32 %v872_v61 }
 0x11c   : > { %1330 = vst.msk [vmem:[%s2293_s28 + $0x170] sm:$0xff] %vm1283_vm2, %v2022_v63  ;;  %2029 = vtanh.f32 %v952_v62 }
 0x11f   : > { %v2024_v0 = vpop.eup %2023 }
 0x120   : > { %v2026_v1 = vpop.eup %2025  ;;  %1362 = vst.msk [vmem:[%s2293_s28 + $0x270] sm:$0xff] %vm1283_vm2, %v2024_v0  ;;  %v1032_v2 = vpop.f32.mrf.mxu2 }
 0x121   : > { %v1112_v3 = vpop.f32.mrf.mxu3  ;;  %v2028_v4 = vpop.eup %2027  ;;  %1394 = vst.msk [vmem:[%s2293_s28 + $0x370] sm:$0xff] %vm1283_vm2, %v2026_v1  ;;  %2031 = vtanh.f32 %v1032_v2 }
 0x122   : > { %v875_v5 = vpop.f32.mrf.mxu0  ;;  %v955_v6 = vpop.f32.mrf.mxu1  ;;  %1299 = vst.msk [vmem:[%s2293_s28 + $0x78] sm:$0xff] %vm1283_vm2, %v2028_v4  ;;  %2033 = vtanh.f32 %v1112_v3 }
 0x123   : > { %v2030_v7 = vpop.eup %2029  ;;  %2035 = vtanh.f32 %v875_v5 }
 0x124   : > { %1331 = vst.msk [vmem:[%s2293_s28 + $0x178] sm:$0xff] %vm1283_vm2, %v2030_v7  ;;  %2037 = vtanh.f32 %v955_v6 }
 0x127   : > { %v2032_v8 = vpop.eup %2031 }
 0x128   : > { %v2034_v9 = vpop.eup %2033  ;;  %1363 = vst.msk [vmem:[%s2293_s28 + $0x278] sm:$0xff] %vm1283_vm2, %v2032_v8  ;;  %v1035_v10 = vpop.f32.mrf.mxu2 }
 0x129   : > { %v1115_v11 = vpop.f32.mrf.mxu3  ;;  %v2036_v12 = vpop.eup %2035  ;;  %1395 = vst.msk [vmem:[%s2293_s28 + $0x378] sm:$0xff] %vm1283_vm2, %v2034_v9  ;;  %2039 = vtanh.f32 %v1035_v10 }
 0x12a   : > { %v877_v13 = vpop.f32.mrf.mxu0  ;;  %v957_v14 = vpop.f32.mrf.mxu1  ;;  %1300 = vst.msk [vmem:[%s2293_s28 + $0x80] sm:$0xff] %vm1283_vm2, %v2036_v12  ;;  %2041 = vtanh.f32 %v1115_v11 }
 0x12b   : > { %v2038_v15 = vpop.eup %2037  ;;  %2043 = vtanh.f32 %v877_v13 }
 0x12c   : > { %1332 = vst.msk [vmem:[%s2293_s28 + $0x180] sm:$0xff] %vm1283_vm2, %v2038_v15  ;;  %2045 = vtanh.f32 %v957_v14 }
 0x12f   : > { %v2040_v16 = vpop.eup %2039 }
 0x130   : > { %v2042_v17 = vpop.eup %2041  ;;  %1364 = vst.msk [vmem:[%s2293_s28 + $0x280] sm:$0xff] %vm1283_vm2, %v2040_v16  ;;  %v1037_v18 = vpop.f32.mrf.mxu2 }
 0x131   : > { %v1117_v19 = vpop.f32.mrf.mxu3  ;;  %v2044_v20 = vpop.eup %2043  ;;  %1396 = vst.msk [vmem:[%s2293_s28 + $0x380] sm:$0xff] %vm1283_vm2, %v2042_v17  ;;  %2047 = vtanh.f32 %v1037_v18 }
 0x132   : > { %v880_v21 = vpop.f32.mrf.mxu0  ;;  %v960_v22 = vpop.f32.mrf.mxu1  ;;  %1301 = vst.msk [vmem:[%s2293_s28 + $0x88] sm:$0xff] %vm1283_vm2, %v2044_v20  ;;  %2049 = vtanh.f32 %v1117_v19 }
 0x133   : > { %v2046_v23 = vpop.eup %2045  ;;  %2051 = vtanh.f32 %v880_v21 }
 0x134   : > { %1333 = vst.msk [vmem:[%s2293_s28 + $0x188] sm:$0xff] %vm1283_vm2, %v2046_v23  ;;  %2053 = vtanh.f32 %v960_v22 }
 0x137   : > { %v2048_v24 = vpop.eup %2047 }
 0x138   : > { %v2050_v25 = vpop.eup %2049  ;;  %1365 = vst.msk [vmem:[%s2293_s28 + $0x288] sm:$0xff] %vm1283_vm2, %v2048_v24  ;;  %v1040_v26 = vpop.f32.mrf.mxu2 }
 0x139   : > { %v1120_v27 = vpop.f32.mrf.mxu3  ;;  %v2052_v28 = vpop.eup %2051  ;;  %1397 = vst.msk [vmem:[%s2293_s28 + $0x388] sm:$0xff] %vm1283_vm2, %v2050_v25  ;;  %2055 = vtanh.f32 %v1040_v26 }
 0x13a   : > { %v882_v29 = vpop.f32.mrf.mxu0  ;;  %v962_v30 = vpop.f32.mrf.mxu1  ;;  %1302 = vst.msk [vmem:[%s2293_s28 + $0x90] sm:$0xff] %vm1283_vm2, %v2052_v28  ;;  %2057 = vtanh.f32 %v1120_v27 }
 0x13b   : > { %v2054_v31 = vpop.eup %2053  ;;  %2059 = vtanh.f32 %v882_v29 }
 0x13c   : > { %1334 = vst.msk [vmem:[%s2293_s28 + $0x190] sm:$0xff] %vm1283_vm2, %v2054_v31  ;;  %2061 = vtanh.f32 %v962_v30 }
 0x13f   : > { %v2056_v32 = vpop.eup %2055 }
 0x140   : > { %v2058_v33 = vpop.eup %2057  ;;  %1366 = vst.msk [vmem:[%s2293_s28 + $0x290] sm:$0xff] %vm1283_vm2, %v2056_v32  ;;  %v1042_v34 = vpop.f32.mrf.mxu2 }
 0x141   : > { %v1122_v35 = vpop.f32.mrf.mxu3  ;;  %v2060_v36 = vpop.eup %2059  ;;  %1398 = vst.msk [vmem:[%s2293_s28 + $0x390] sm:$0xff] %vm1283_vm2, %v2058_v33  ;;  %2063 = vtanh.f32 %v1042_v34 }
 0x142   : > { %v885_v37 = vpop.f32.mrf.mxu0  ;;  %v965_v38 = vpop.f32.mrf.mxu1  ;;  %1303 = vst.msk [vmem:[%s2293_s28 + $0x98] sm:$0xff] %vm1283_vm2, %v2060_v36  ;;  %2065 = vtanh.f32 %v1122_v35 }
 0x143   : > { %v2062_v39 = vpop.eup %2061  ;;  %2067 = vtanh.f32 %v885_v37 }
 0x144   : > { %1335 = vst.msk [vmem:[%s2293_s28 + $0x198] sm:$0xff] %vm1283_vm2, %v2062_v39  ;;  %2069 = vtanh.f32 %v965_v38 }
 0x147   : > { %v2064_v40 = vpop.eup %2063 }
 0x148   : > { %v2066_v41 = vpop.eup %2065  ;;  %1367 = vst.msk [vmem:[%s2293_s28 + $0x298] sm:$0xff] %vm1283_vm2, %v2064_v40  ;;  %v1045_v42 = vpop.f32.mrf.mxu2 }
 0x149   : > { %v1125_v43 = vpop.f32.mrf.mxu3  ;;  %v2068_v44 = vpop.eup %2067  ;;  %1399 = vst.msk [vmem:[%s2293_s28 + $0x398] sm:$0xff] %vm1283_vm2, %v2066_v41  ;;  %2071 = vtanh.f32 %v1045_v42 }
 0x14a   : > { %v887_v45 = vpop.f32.mrf.mxu0  ;;  %v967_v46 = vpop.f32.mrf.mxu1  ;;  %1304 = vst.msk [vmem:[%s2293_s28 + $0xa0] sm:$0xff] %vm1283_vm2, %v2068_v44  ;;  %2073 = vtanh.f32 %v1125_v43 }
 0x14b   : > { %v2070_v47 = vpop.eup %2069  ;;  %2075 = vtanh.f32 %v887_v45 }
 0x14c   : > { %1336 = vst.msk [vmem:[%s2293_s28 + $0x1a0] sm:$0xff] %vm1283_vm2, %v2070_v47  ;;  %2077 = vtanh.f32 %v967_v46 }
 0x14f   : > { %v2072_v48 = vpop.eup %2071 }
 0x150   : > { %v2074_v49 = vpop.eup %2073  ;;  %1368 = vst.msk [vmem:[%s2293_s28 + $0x2a0] sm:$0xff] %vm1283_vm2, %v2072_v48  ;;  %v1047_v50 = vpop.f32.mrf.mxu2 }
 0x151   : > { %v1127_v51 = vpop.f32.mrf.mxu3  ;;  %v2076_v52 = vpop.eup %2075  ;;  %1400 = vst.msk [vmem:[%s2293_s28 + $0x3a0] sm:$0xff] %vm1283_vm2, %v2074_v49  ;;  %2079 = vtanh.f32 %v1047_v50 }
 0x152   : > { %v890_v53 = vpop.f32.mrf.mxu0  ;;  %v970_v54 = vpop.f32.mrf.mxu1  ;;  %1305 = vst.msk [vmem:[%s2293_s28 + $0xa8] sm:$0xff] %vm1283_vm2, %v2076_v52  ;;  %2081 = vtanh.f32 %v1127_v51 }
 0x153   : > { %v2078_v55 = vpop.eup %2077  ;;  %2083 = vtanh.f32 %v890_v53 }
 0x154   : > { %1337 = vst.msk [vmem:[%s2293_s28 + $0x1a8] sm:$0xff] %vm1283_vm2, %v2078_v55  ;;  %2085 = vtanh.f32 %v970_v54 }
 0x157   : > { %v2080_v56 = vpop.eup %2079 }
 0x158   : > { %v2082_v57 = vpop.eup %2081  ;;  %1369 = vst.msk [vmem:[%s2293_s28 + $0x2a8] sm:$0xff] %vm1283_vm2, %v2080_v56  ;;  %v1050_v58 = vpop.f32.mrf.mxu2 }
 0x159   : > { %v1130_v59 = vpop.f32.mrf.mxu3  ;;  %v2084_v60 = vpop.eup %2083  ;;  %1401 = vst.msk [vmem:[%s2293_s28 + $0x3a8] sm:$0xff] %vm1283_vm2, %v2082_v57  ;;  %2087 = vtanh.f32 %v1050_v58 }
 0x15a   : > { %v892_v61 = vpop.f32.mrf.mxu0  ;;  %v972_v62 = vpop.f32.mrf.mxu1  ;;  %1306 = vst.msk [vmem:[%s2293_s28 + $0xb0] sm:$0xff] %vm1283_vm2, %v2084_v60  ;;  %2089 = vtanh.f32 %v1130_v59 }
 0x15b   : > { %v2086_v63 = vpop.eup %2085  ;;  %2091 = vtanh.f32 %v892_v61 }
 0x15c   : > { %1338 = vst.msk [vmem:[%s2293_s28 + $0x1b0] sm:$0xff] %vm1283_vm2, %v2086_v63  ;;  %2093 = vtanh.f32 %v972_v62 }
 0x15f   : > { %v2088_v0 = vpop.eup %2087 }
 0x160   : > { %v2090_v1 = vpop.eup %2089  ;;  %1370 = vst.msk [vmem:[%s2293_s28 + $0x2b0] sm:$0xff] %vm1283_vm2, %v2088_v0  ;;  %v1052_v2 = vpop.f32.mrf.mxu2 }
 0x161   : > { %v1132_v3 = vpop.f32.mrf.mxu3  ;;  %v2092_v4 = vpop.eup %2091  ;;  %1402 = vst.msk [vmem:[%s2293_s28 + $0x3b0] sm:$0xff] %vm1283_vm2, %v2090_v1  ;;  %2095 = vtanh.f32 %v1052_v2 }
 0x162   : > { %v895_v5 = vpop.f32.mrf.mxu0  ;;  %v975_v6 = vpop.f32.mrf.mxu1  ;;  %1307 = vst.msk [vmem:[%s2293_s28 + $0xb8] sm:$0xff] %vm1283_vm2, %v2092_v4  ;;  %2097 = vtanh.f32 %v1132_v3 }
 0x163   : > { %v2094_v7 = vpop.eup %2093  ;;  %2099 = vtanh.f32 %v895_v5 }
 0x164   : > { %1339 = vst.msk [vmem:[%s2293_s28 + $0x1b8] sm:$0xff] %vm1283_vm2, %v2094_v7  ;;  %2101 = vtanh.f32 %v975_v6 }
 0x167   : > { %v2096_v8 = vpop.eup %2095 }
 0x168   : > { %v2098_v9 = vpop.eup %2097  ;;  %1371 = vst.msk [vmem:[%s2293_s28 + $0x2b8] sm:$0xff] %vm1283_vm2, %v2096_v8  ;;  %v1055_v10 = vpop.f32.mrf.mxu2 }
 0x169   : > { %v1135_v11 = vpop.f32.mrf.mxu3  ;;  %v2100_v12 = vpop.eup %2099  ;;  %1403 = vst.msk [vmem:[%s2293_s28 + $0x3b8] sm:$0xff] %vm1283_vm2, %v2098_v9  ;;  %2103 = vtanh.f32 %v1055_v10 }
 0x16a   : > { %v897_v13 = vpop.f32.mrf.mxu0  ;;  %v977_v14 = vpop.f32.mrf.mxu1  ;;  %1308 = vst.msk [vmem:[%s2293_s28 + $0xc0] sm:$0xff] %vm1283_vm2, %v2100_v12  ;;  %2105 = vtanh.f32 %v1135_v11 }
 0x16b   : > { %v2102_v15 = vpop.eup %2101  ;;  %2107 = vtanh.f32 %v897_v13 }
 0x16c   : > { %1340 = vst.msk [vmem:[%s2293_s28 + $0x1c0] sm:$0xff] %vm1283_vm2, %v2102_v15  ;;  %2109 = vtanh.f32 %v977_v14 }
 0x16f   : > { %v2104_v16 = vpop.eup %2103 }
 0x170   : > { %v2106_v17 = vpop.eup %2105  ;;  %1372 = vst.msk [vmem:[%s2293_s28 + $0x2c0] sm:$0xff] %vm1283_vm2, %v2104_v16  ;;  %v1057_v18 = vpop.f32.mrf.mxu2 }
 0x171   : > { %v1137_v19 = vpop.f32.mrf.mxu3  ;;  %v2108_v20 = vpop.eup %2107  ;;  %1404 = vst.msk [vmem:[%s2293_s28 + $0x3c0] sm:$0xff] %vm1283_vm2, %v2106_v17  ;;  %2111 = vtanh.f32 %v1057_v18 }
 0x172   : > { %v900_v21 = vpop.f32.mrf.mxu0  ;;  %v980_v22 = vpop.f32.mrf.mxu1  ;;  %1309 = vst.msk [vmem:[%s2293_s28 + $0xc8] sm:$0xff] %vm1283_vm2, %v2108_v20  ;;  %2113 = vtanh.f32 %v1137_v19 }
 0x173   : > { %v2110_v23 = vpop.eup %2109  ;;  %2115 = vtanh.f32 %v900_v21 }
 0x174   : > { %1341 = vst.msk [vmem:[%s2293_s28 + $0x1c8] sm:$0xff] %vm1283_vm2, %v2110_v23  ;;  %2117 = vtanh.f32 %v980_v22 }
 0x177   : > { %v2112_v24 = vpop.eup %2111 }
 0x178   : > { %v2114_v25 = vpop.eup %2113  ;;  %1373 = vst.msk [vmem:[%s2293_s28 + $0x2c8] sm:$0xff] %vm1283_vm2, %v2112_v24  ;;  %v1060_v26 = vpop.f32.mrf.mxu2 }
 0x179   : > { %v1140_v27 = vpop.f32.mrf.mxu3  ;;  %v2116_v28 = vpop.eup %2115  ;;  %1405 = vst.msk [vmem:[%s2293_s28 + $0x3c8] sm:$0xff] %vm1283_vm2, %v2114_v25  ;;  %2119 = vtanh.f32 %v1060_v26 }
 0x17a   : > { %v902_v29 = vpop.f32.mrf.mxu0  ;;  %v982_v30 = vpop.f32.mrf.mxu1  ;;  %1310 = vst.msk [vmem:[%s2293_s28 + $0xd0] sm:$0xff] %vm1283_vm2, %v2116_v28  ;;  %2121 = vtanh.f32 %v1140_v27 }
 0x17b   : > { %v2118_v31 = vpop.eup %2117  ;;  %2123 = vtanh.f32 %v902_v29 }
 0x17c   : > { %1342 = vst.msk [vmem:[%s2293_s28 + $0x1d0] sm:$0xff] %vm1283_vm2, %v2118_v31  ;;  %2125 = vtanh.f32 %v982_v30 }
 0x17f   : > { %v2120_v32 = vpop.eup %2119 }
 0x180   : > { %v2122_v33 = vpop.eup %2121  ;;  %1374 = vst.msk [vmem:[%s2293_s28 + $0x2d0] sm:$0xff] %vm1283_vm2, %v2120_v32  ;;  %v1062_v34 = vpop.f32.mrf.mxu2 }
 0x181   : > { %v1142_v35 = vpop.f32.mrf.mxu3  ;;  %v2124_v36 = vpop.eup %2123  ;;  %1406 = vst.msk [vmem:[%s2293_s28 + $0x3d0] sm:$0xff] %vm1283_vm2, %v2122_v33  ;;  %2127 = vtanh.f32 %v1062_v34 }
 0x182   : > { %v905_v37 = vpop.f32.mrf.mxu0  ;;  %v985_v38 = vpop.f32.mrf.mxu1  ;;  %1311 = vst.msk [vmem:[%s2293_s28 + $0xd8] sm:$0xff] %vm1283_vm2, %v2124_v36  ;;  %2129 = vtanh.f32 %v1142_v35 }
 0x183   : > { %v2126_v39 = vpop.eup %2125  ;;  %2131 = vtanh.f32 %v905_v37 }
 0x184   : > { %1343 = vst.msk [vmem:[%s2293_s28 + $0x1d8] sm:$0xff] %vm1283_vm2, %v2126_v39  ;;  %2133 = vtanh.f32 %v985_v38 }
 0x187   : > { %v2128_v40 = vpop.eup %2127 }
 0x188   : > { %v2130_v41 = vpop.eup %2129  ;;  %1375 = vst.msk [vmem:[%s2293_s28 + $0x2d8] sm:$0xff] %vm1283_vm2, %v2128_v40  ;;  %v1065_v42 = vpop.f32.mrf.mxu2 }
 0x189   : > { %v1145_v43 = vpop.f32.mrf.mxu3  ;;  %v2132_v44 = vpop.eup %2131  ;;  %1407 = vst.msk [vmem:[%s2293_s28 + $0x3d8] sm:$0xff] %vm1283_vm2, %v2130_v41  ;;  %2135 = vtanh.f32 %v1065_v42 }
 0x18a   : > { %v907_v45 = vpop.f32.mrf.mxu0  ;;  %v987_v46 = vpop.f32.mrf.mxu1  ;;  %1312 = vst.msk [vmem:[%s2293_s28 + $0xe0] sm:$0xff] %vm1283_vm2, %v2132_v44  ;;  %2137 = vtanh.f32 %v1145_v43 }
 0x18b   : > { %v2134_v47 = vpop.eup %2133  ;;  %2139 = vtanh.f32 %v907_v45 }
 0x18c   : > { %1344 = vst.msk [vmem:[%s2293_s28 + $0x1e0] sm:$0xff] %vm1283_vm2, %v2134_v47  ;;  %2141 = vtanh.f32 %v987_v46 }
 0x18f   : > { %v2136_v48 = vpop.eup %2135 }
 0x190   : > { %v2138_v49 = vpop.eup %2137  ;;  %1376 = vst.msk [vmem:[%s2293_s28 + $0x2e0] sm:$0xff] %vm1283_vm2, %v2136_v48  ;;  %v1067_v50 = vpop.f32.mrf.mxu2 }
 0x191   : > { %v1147_v51 = vpop.f32.mrf.mxu3  ;;  %v2140_v52 = vpop.eup %2139  ;;  %1408 = vst.msk [vmem:[%s2293_s28 + $0x3e0] sm:$0xff] %vm1283_vm2, %v2138_v49  ;;  %2143 = vtanh.f32 %v1067_v50 }
 0x192   : > { %v910_v53 = vpop.f32.mrf.mxu0  ;;  %v990_v54 = vpop.f32.mrf.mxu1  ;;  %1313 = vst.msk [vmem:[%s2293_s28 + $0xe8] sm:$0xff] %vm1283_vm2, %v2140_v52  ;;  %2145 = vtanh.f32 %v1147_v51 }
 0x193   : > { %v2142_v55 = vpop.eup %2141  ;;  %2147 = vtanh.f32 %v910_v53 }
 0x194   : > { %1345 = vst.msk [vmem:[%s2293_s28 + $0x1e8] sm:$0xff] %vm1283_vm2, %v2142_v55  ;;  %2149 = vtanh.f32 %v990_v54 }
 0x197   : > { %v2144_v56 = vpop.eup %2143 }
 0x198   : > { %v2146_v57 = vpop.eup %2145  ;;  %1377 = vst.msk [vmem:[%s2293_s28 + $0x2e8] sm:$0xff] %vm1283_vm2, %v2144_v56  ;;  %v1070_v58 = vpop.f32.mrf.mxu2 }
 0x199   : > { %v1150_v59 = vpop.f32.mrf.mxu3  ;;  %v2148_v60 = vpop.eup %2147  ;;  %1409 = vst.msk [vmem:[%s2293_s28 + $0x3e8] sm:$0xff] %vm1283_vm2, %v2146_v57  ;;  %2151 = vtanh.f32 %v1070_v58 }
 0x19a   : > { %v912_v61 = vpop.f32.mrf.mxu0  ;;  %v992_v62 = vpop.f32.mrf.mxu1  ;;  %1314 = vst.msk [vmem:[%s2293_s28 + $0xf0] sm:$0xff] %vm1283_vm2, %v2148_v60  ;;  %2153 = vtanh.f32 %v1150_v59 }
 0x19b   : > { %v2150_v63 = vpop.eup %2149  ;;  %2155 = vtanh.f32 %v912_v61 }
 0x19c   : > { %1346 = vst.msk [vmem:[%s2293_s28 + $0x1f0] sm:$0xff] %vm1283_vm2, %v2150_v63  ;;  %2157 = vtanh.f32 %v992_v62 }
 0x19f   : > { %v2152_v0 = vpop.eup %2151 }
 0x1a0   : > { %v2154_v1 = vpop.eup %2153  ;;  %1378 = vst.msk [vmem:[%s2293_s28 + $0x2f0] sm:$0xff] %vm1283_vm2, %v2152_v0  ;;  %v1072_v2 = vpop.f32.mrf.mxu2 }
 0x1a1   : > { %v1152_v3 = vpop.f32.mrf.mxu3  ;;  %v2156_v4 = vpop.eup %2155  ;;  %1410 = vst.msk [vmem:[%s2293_s28 + $0x3f0] sm:$0xff] %vm1283_vm2, %v2154_v1  ;;  %2159 = vtanh.f32 %v1072_v2 }
 0x1a2   : > { %v2158_v5 = vpop.eup %2157  ;;  %1315 = vst.msk [vmem:[%s2293_s28 + $0xf8] sm:$0xff] %vm1283_vm2, %v2156_v4  ;;  %2161 = vtanh.f32 %v1152_v3 }
 0x1a3   : > { %1347 = vst.msk [vmem:[%s2293_s28 + $0x1f8] sm:$0xff] %vm1283_vm2, %v2158_v5 }
 0x1a7   : > { %v2160_v6 = vpop.eup %2159 }
 0x1a8   : > { %v2162_v7 = vpop.eup %2161  ;;  %1379 = vst.msk [vmem:[%s2293_s28 + $0x2f8] sm:$0xff] %vm1283_vm2, %v2160_v6 }
 0x1a9   : > { %1411 = vst.msk [vmem:[%s2293_s28 + $0x3f8] sm:$0xff] %vm1283_vm2, %v2162_v7 }
 0x1aa PF: > { %s12_s9 = sadd.s32 1, %s2169_s9  }
 0x1ab   : > { %p9_p4 = scmp.ge.s32.totalorder %s12_s9, 4  }
 0x1ad   :  { %11 = sbr.rel (!%p9_p4) target bundleno = 1 (0x1), region = 58 }

</bundles_post_ra>
